<compile_context>
chip_gen: v7x
topology: tpu7x:2x2x1
jax: 0.10.0
libtpu: 0.0.40
codegen_flags: <defaults>
</compile_context>

<pallas_src>
import functools

import jax
import jax.numpy as jnp
from jax.experimental import pallas as pl
from jax.experimental.pallas import tpu as pltpu


_LANE = 128
_STEM_K = 128          # stem im2col contracting dim padded 27 -> 128 (unmasked lanes)

_BLOCK_CFG = [
    # (in_ch, out_ch, expand_ratio, kernel, stride)  -- static MBConv config
    (16, 16, 1, 3, 1),
    (16, 24, 6, 3, 2),
    (24, 40, 6, 5, 2),
]
_STEM_CH = 16
_HEAD_CH = 128
_NUM_CLASSES = 4


def _cpad(c):
    """Round channel count up to a multiple of the 128-lane vreg width."""
    return ((c + _LANE - 1) // _LANE) * _LANE


def _round_up(x, m):
    return ((x + m - 1) // m) * m


def _same_pad(size, k, s):
    out = -(-size // s)
    total = max((out - 1) * s + k - size, 0)
    return (total // 2, total - total // 2)


# ----------------------------------------------------------------------------
# In-kernel math helpers (exp -> EUP, approx reciprocal -> EUP)
# ----------------------------------------------------------------------------

def _sigmoid(x):
    return pl.reciprocal(1.0 + jnp.exp(-x), approx=True)


def _swish(x):
    return x * _sigmoid(x)


# ----------------------------------------------------------------------------
# Pallas kernels
# ----------------------------------------------------------------------------

def _mm_kernel(x_ref, w_ref, b_ref, o_ref, *, act):
    """y = act(x @ w + b) -- stem / expand 1x1 convs (bf16 in, f32 acc)."""
    y = jnp.dot(x_ref[...], w_ref[...], preferred_element_type=jnp.float32)
    y = y + b_ref[...]                       # (1, N) broadcasts over rows
    if act == "swish":
        y = _swish(y)
    o_ref[...] = y.astype(o_ref.dtype)


def _dw_kernel(x_ref, w_ref, b_ref, o_ref, m_ref, *, k, s, hv, wv):
    """Depthwise conv on phase-decomposed input + folded BN + swish.

    x_ref: (s*s, Hh, Wh, TC) bf16 where phase (p, q) holds xp[:, p::s, q::s, :]
    Only the strided outputs are computed.  Taps are read directly from the
    ref (no whole-image value materialization); acc starts from the first tap.
    Second output: spatial mean per channel (the SE squeeze)."""
    def tap(di, dj):
        xt = x_ref[(di % s) * s + (dj % s),
                   di // s:di // s + hv,
                   dj // s:dj // s + wv, :]
        wrow = w_ref[di * k + dj:di * k + dj + 1, :]          # (1, TC) f32
        return xt.astype(jnp.float32) * wrow

    acc = tap(0, 0)
    for di in range(k):
        for dj in range(k):
            if di == 0 and dj == 0:
                continue
            acc = acc + tap(di, dj)
    y = _swish(acc + b_ref[...])                              # (hv, wv, TC) f32
    o_ref[0] = y.astype(o_ref.dtype)
    m_ref[0] = jnp.sum(jnp.sum(y, axis=0), axis=0, keepdims=True) * (1.0 / (hv * wv))


def _proj_kernel(x_ref, m_ref, w1_ref, b1_ref, w2_ref, b2_ref, wp_ref, bp_ref,
                 *rest, has_res):
    """Fused SE (reduce FC -> swish -> expand FC -> sigmoid) from the pooled
    squeeze, gate * x, project 1x1 (+ folded BN), optional residual add."""
    if has_res:
        r_ref, o_ref = rest
    else:
        (o_ref,) = rest
    h = jnp.dot(m_ref[0], w1_ref[...], preferred_element_type=jnp.float32) + b1_ref[...]
    h = _swish(h)                                             # (1, Cse)
    g = jnp.dot(h, w2_ref[...], preferred_element_type=jnp.float32) + b2_ref[...]
    g = _sigmoid(g)                                           # (1, Cexp)
    xg = x_ref[0] * g.astype(x_ref.dtype)                     # (thw, Cexp) bf16
    y = jnp.dot(xg, wp_ref[...], preferred_element_type=jnp.float32) + bp_ref[...]
    if has_res:
        y = y + r_ref[0].astype(jnp.float32)
    o_ref[0] = y.astype(o_ref.dtype)


def _head_pool_fc_kernel(x_ref, wh_ref, bh_ref, wf_ref, bf_ref, o_ref, *, inv_hw):
    """Fused head 1x1 conv + swish + global-average-pool + classifier FC."""
    h = jnp.dot(x_ref[0], wh_ref[...], preferred_element_type=jnp.float32)
    h = _swish(h + bh_ref[...])                               # (HW, Ch) f32
    pooled = jnp.sum(h, axis=0, keepdims=True) * inv_hw       # (1, Ch)
    y = jnp.dot(pooled, wf_ref[...], preferred_element_type=jnp.float32) + bf_ref[...]
    o_ref[0] = y.astype(o_ref.dtype)


# ----------------------------------------------------------------------------
# Pallas wrappers
# ----------------------------------------------------------------------------

def matmul_bias_act(x, w, b, act="none", tile_m=128):
    m, k = x.shape
    n = w.shape[1]
    tm = min(tile_m, _round_up(m, 8))
    grid_m = pl.cdiv(m, tm)
    return pl.pallas_call(
        functools.partial(_mm_kernel, act=act),
        out_shape=jax.ShapeDtypeStruct((m, n), jnp.bfloat16),
        grid=(grid_m,),
        in_specs=[pl.BlockSpec((tm, k), lambda i: (i, 0)),
                  pl.BlockSpec((k, n), lambda i: (0, 0)),
                  pl.BlockSpec((1, n), lambda i: (0, 0))],
        out_specs=pl.BlockSpec((tm, n), lambda i: (i, 0)),
        compiler_params=pltpu.CompilerParams(
            dimension_semantics=("parallel",)),
    )(x, w, b.reshape(1, n))


def conv1x1(x, w, b, act="none"):
    n, h, wd, c = x.shape
    y = matmul_bias_act(x.reshape(n * h * wd, c), w, b, act)
    return y.reshape(n, h, wd, -1)


def depthwise_conv_bn_swish(x, w2d, b, k, s):
    """Strided depthwise conv + folded BN + swish; also returns the per-batch
    per-channel spatial mean (SE squeeze) so SE never re-reads the activation."""
    n, h, wd, c = x.shape
    hv, wv = -(-h // s), -(-wd // s)                     # strided output size
    hh, wh = hv + (k - 1) // s, wv + (k - 1) // s        # per-phase padded size
    pt = _same_pad(h, k, s)[0]
    pw = _same_pad(wd, k, s)[0]
    xp = jnp.pad(x, ((0, 0), (pt, s * hh - h - pt), (pw, s * wh - wd - pw), (0, 0)))
    # space-to-batch: phases[b*(s*s) + p*s + q, i, j, c] = xp[b, s*i + p, s*j + q, c]
    phases = jnp.transpose(xp.reshape(n, hh, s, wh, s, c), (0, 2, 4, 1, 3, 5))
    phases = phases.reshape(n * s * s, hh, wh, c)

    tc = _LANE
    ct = c // tc
    y, ymean = pl.pallas_call(
        functools.partial(_dw_kernel, k=k, s=s, hv=hv, wv=wv),
        out_shape=(jax.ShapeDtypeStruct((n, hv, wv, c), jnp.bfloat16),
                   jax.ShapeDtypeStruct((n, 1, c), jnp.float32)),
        grid=(n, ct),
        in_specs=[pl.BlockSpec((s * s, hh, wh, tc), lambda i, j: (i, 0, 0, j)),
                  pl.BlockSpec((k * k, tc), lambda i, j: (0, j)),
                  pl.BlockSpec((1, tc), lambda i, j: (0, j))],
        out_specs=(pl.BlockSpec((1, hv, wv, tc), lambda i, j: (i, 0, 0, j)),
                   pl.BlockSpec((1, 1, tc), lambda i, j: (i, 0, j))),
        compiler_params=pltpu.CompilerParams(
            dimension_semantics=("parallel", "parallel")),
    )(phases, w2d, b.reshape(1, c))
    return y, ymean


def project_se_residual(x3, dwmean, p, res, out_hw):
    """Fused SE + gate + project 1x1 (+ residual), gridded over (batch, HW tile)."""
    n, hw, c = x3.shape
    w1, b1 = p["se_reduce"]["w"], p["se_reduce"]["b"]
    w2, b2 = p["se_expand"]["w"], p["se_expand"]["b"]
    wp, bp = p["project"]["w"], p["project"]["b"]
    cse = w1.shape[1]
    cout = wp.shape[1]
    thw = 128 if (hw % 128 == 0) else hw
    grid = (n, hw // thw)

    args = [x3, dwmean, w1, b1.reshape(1, cse), w2, b2.reshape(1, c),
            wp, bp.reshape(1, cout)]
    in_specs = [pl.BlockSpec((1, thw, c), lambda i, j: (i, j, 0)),
                pl.BlockSpec((1, 1, c), lambda i, j: (i, 0, 0)),
                pl.BlockSpec((c, cse), lambda i, j: (0, 0)),
                pl.BlockSpec((1, cse), lambda i, j: (0, 0)),
                pl.BlockSpec((cse, c), lambda i, j: (0, 0)),
                pl.BlockSpec((1, c), lambda i, j: (0, 0)),
                pl.BlockSpec((c, cout), lambda i, j: (0, 0)),
                pl.BlockSpec((1, cout), lambda i, j: (0, 0))]
    has_res = res is not None
    if has_res:
        args.append(res.reshape(n, hw, cout))
        in_specs.append(pl.BlockSpec((1, thw, cout), lambda i, j: (i, j, 0)))

    y = pl.pallas_call(
        functools.partial(_proj_kernel, has_res=has_res),
        out_shape=jax.ShapeDtypeStruct((n, hw, cout), jnp.bfloat16),
        grid=grid,
        in_specs=in_specs,
        out_specs=pl.BlockSpec((1, thw, cout), lambda i, j: (i, j, 0)),
        compiler_params=pltpu.CompilerParams(
            dimension_semantics=("parallel", "parallel")),
    )(*args)
    h, wd = out_hw
    return y.reshape(n, h, wd, cout)


def head_pool_fc(x3, wh, bh, wf, bf):
    """Fused head conv + swish + GAP + classifier FC: (N, HW, C) -> (N, ncls)."""
    n, hw, c = x3.shape
    ch = wh.shape[1]
    ncls = wf.shape[1]
    out = pl.pallas_call(
        functools.partial(_head_pool_fc_kernel, inv_hw=1.0 / hw),
        out_shape=jax.ShapeDtypeStruct((n, 1, ncls), jnp.float32),
        grid=(n,),
        in_specs=[pl.BlockSpec((1, hw, c), lambda i: (i, 0, 0)),
                  pl.BlockSpec((c, ch), lambda i: (0, 0)),
                  pl.BlockSpec((1, ch), lambda i: (0, 0)),
                  pl.BlockSpec((ch, ncls), lambda i: (0, 0)),
                  pl.BlockSpec((1, ncls), lambda i: (0, 0))],
        out_specs=pl.BlockSpec((1, 1, ncls), lambda i: (i, 0, 0)),
        compiler_params=pltpu.CompilerParams(
            dimension_semantics=("parallel",)),
    )(x3, wh, bh.reshape(1, ch), wf, bf.reshape(1, ncls))
    return out.reshape(n, ncls)


# ----------------------------------------------------------------------------
# Stem im2col glue (small at 32x32; see TODO at top for real resolutions)
# ----------------------------------------------------------------------------

def _im2col_same(x, kh, kw, stride):
    n, h, w, c = x.shape
    ph = _same_pad(h, kh, stride)
    pw = _same_pad(w, kw, stride)
    xp = jnp.pad(x, ((0, 0), ph, pw, (0, 0)))
    hp, wp = xp.shape[1], xp.shape[2]
    ho = (hp - kh) // stride + 1
    wo = (wp - kw) // stride + 1
    taps = []
    for i in range(kh):
        for j in range(kw):
            taps.append(xp[:, i:i + (ho - 1) * stride + 1:stride,
                              j:j + (wo - 1) * stride + 1:stride, :])
    patches = jnp.stack(taps, axis=3)              # (N, Ho, Wo, kh*kw, C)
    return patches.reshape(n, ho, wo, kh * kw * c), ho, wo


# ----------------------------------------------------------------------------
# Parameters (deterministic synthetic, BN folded, channels zero-padded to 128,
# matmul weights bf16 / biases & depthwise & SE weights f32)
# ----------------------------------------------------------------------------

def init_params(key):
    keys = iter(jax.random.split(key, 512))

    def nrm(shape, scale=0.1):
        return scale * jax.random.normal(next(keys), shape, dtype=jnp.float32)

    def bn_fold(c, eps=1e-3):
        gamma = 1.0 + 0.1 * jax.random.normal(next(keys), (c,), jnp.float32)
        beta = 0.1 * jax.random.normal(next(keys), (c,), jnp.float32)
        mean = 0.1 * jax.random.normal(next(keys), (c,), jnp.float32)
        var = 0.5 + jnp.abs(jax.random.normal(next(keys), (c,), jnp.float32))
        scale = gamma / jnp.sqrt(var + eps)
        shift = beta - mean * scale
        return scale, shift

    def pad_mat(w, rows, cols):
        return jnp.pad(w, ((0, rows - w.shape[0]), (0, cols - w.shape[1])))

    def pad_vec(v, c):
        return jnp.pad(v, (0, c - v.shape[0]))

    params = {}

    # Stem: 3x3 stride-2 conv (HWIO) + folded BN, flattened for im2col matmul.
    # Contracting dim padded 27 -> 128 so the patch loads are lane-unmasked.
    stem_p = _cpad(_STEM_CH)
    w = nrm((3, 3, 3, _STEM_CH))
    sc, sh = bn_fold(_STEM_CH)
    w = (w * sc).reshape(27, _STEM_CH)
    params["stem"] = {"w": pad_mat(w, _STEM_K, stem_p).astype(jnp.bfloat16),
                      "b": pad_vec(sh, stem_p)}

    blocks = []
    for (cin, cout, exp, k, s) in _BLOCK_CFG:
        cexp = cin * exp
        cin_p, cexp_p, cout_p = _cpad(cin), _cpad(cexp), _cpad(cout)
        blk = {}
        if exp != 1:
            w = nrm((cin, cexp)); sc, sh = bn_fold(cexp)
            blk["expand"] = {"w": pad_mat(w * sc, cin_p, cexp_p).astype(jnp.bfloat16),
                             "b": pad_vec(sh, cexp_p)}
        else:
            blk["expand"] = None
        w = nrm((k, k, cexp)); sc, sh = bn_fold(cexp)
        wdw = (w * sc[None, None, :]).reshape(k * k, cexp)
        blk["dw"] = {"w": pad_mat(wdw, k * k, cexp_p), "b": pad_vec(sh, cexp_p)}
        cse = max(1, int(cin * 0.25))
        blk["se_reduce"] = {"w": pad_mat(nrm((cexp, cse)), cexp_p, cse),
                            "b": nrm((cse,))}
        blk["se_expand"] = {"w": pad_mat(nrm((cse, cexp)), cse, cexp_p),
                            "b": pad_vec(nrm((cexp,)), cexp_p)}
        w = nrm((cexp, cout)); sc, sh = bn_fold(cout)
        blk["project"] = {"w": pad_mat(w * sc, cexp_p, cout_p).astype(jnp.bfloat16),
                          "b": pad_vec(sh, cout_p)}
        blocks.append(blk)
    params["blocks"] = blocks

    cin_head = _cpad(_BLOCK_CFG[-1][1])
    head_p = _cpad(_HEAD_CH)
    w = nrm((_BLOCK_CFG[-1][1], _HEAD_CH)); sc, sh = bn_fold(_HEAD_CH)
    params["head"] = {"w": pad_mat(w * sc, cin_head, head_p).astype(jnp.bfloat16),
                      "b": pad_vec(sh, head_p)}
    params["fc"] = {"w": nrm((head_p, _NUM_CLASSES)), "b": nrm((_NUM_CLASSES,))}
    return params


# ----------------------------------------------------------------------------
# Forward pass (inference semantics of Efficientb5.forward)
# ----------------------------------------------------------------------------

def _mbconv(x, cfg, p):
    cin, cout, exp, k, s = cfg                # static Python config
    inputs = x
    if exp != 1:
        x = conv1x1(x, p["expand"]["w"], p["expand"]["b"], act="swish")
    x, x_mean = depthwise_conv_bn_swish(x, p["dw"]["w"], p["dw"]["b"], k, s)
    n, h, wd, c = x.shape
    res = inputs if (s == 1 and cin == cout) else None   # drop_connect == id
    x = project_se_residual(x.reshape(n, h * wd, c), x_mean, p, res,
                            out_hw=(h, wd))
    return x


def efficientb5_forward(params, x_nchw):
    x = jnp.transpose(x_nchw, (0, 2, 3, 1)).astype(jnp.bfloat16)  # NCHW -> NHWC bf16
    n = x.shape[0]
    # Stem: 3x3 s2 conv (im2col glue + M-tiled Pallas matmul) + folded BN + swish
    cols, ho, wo = _im2col_same(x, 3, 3, 2)
    k_real = cols.shape[-1]
    cols = jnp.pad(cols, ((0, 0), (0, 0), (0, 0), (0, _STEM_K - k_real)))
    y = matmul_bias_act(cols.reshape(n * ho * wo, _STEM_K),
                        params["stem"]["w"], params["stem"]["b"], act="swish")
    x = y.reshape(n, ho, wo, -1)
    # MBConv stages (config static; weights traced)
    for cfg, blk in zip(_BLOCK_CFG, params["blocks"]):
        x = _mbconv(x, cfg, blk)
    # Fused head conv + swish + GAP + FC (dropout == identity in eval)
    nh, hh, wh, ch = x.shape
    logits = head_pool_fc(x.reshape(nh, hh * wh, ch),
                          params["head"]["w"], params["head"]["b"],
                          params["fc"]["w"], params["fc"]["b"])
    return logits


# ----------------------------------------------------------------------------

if __name__ == "__main__":
    root = jax.random.PRNGKey(0)
    pk, xk = jax.random.split(root)
    params = init_params(pk)
    x = jax.random.normal(xk, (2, 3, 32, 32), dtype=jnp.float32)  # NCHW input

    fwd = jax.jit(efficientb5_forward)
    out = jax.block_until_ready(fwd(params, x))

    assert out.shape == (2, _NUM_CLASSES), out.shape
    assert out.dtype == jnp.float32
    assert bool(jnp.all(jnp.isfinite(out)))
    print("KERNEL_OK")
</pallas_src>

<mosaic_0001>
module attributes {stable_mosaic.version = 11 : i64} {
  func.func @_mm_kernel(%arg0: i32, %arg1: memref<128x128xbf16, #tpu.memory_space<vmem>>, %arg2: memref<128x128xbf16, #tpu.memory_space<vmem>>, %arg3: memref<1x128xf32, #tpu.memory_space<vmem>>, %arg4: memref<128x128xbf16, #tpu.memory_space<vmem>>) attributes {dimension_semantics = [#tpu.dimension_semantics<parallel>], iteration_bounds = array<i64: 4>, scalar_prefetch = 0 : i64, scratch_operands = 0 : i64, tpu.core_type = #tpu.core_type<tc>, window_params = [{transform_indices = @transform_0, window_bounds = array<i64: 128, 128>}, {pipeline_mode = #tpu.pipeline_mode<synchronous>, transform_indices = @transform_1, window_bounds = array<i64: 128, 128>}, {pipeline_mode = #tpu.pipeline_mode<synchronous>, transform_indices = @transform_2, window_bounds = array<i64: 1, 128>}, {transform_indices = @transform_3, window_bounds = array<i64: 128, 128>}]} {
    %c0 = arith.constant 0 : index
    %c0_0 = arith.constant 0 : index
    %0 = vector.load %arg1[%c0, %c0_0] : memref<128x128xbf16, #tpu.memory_space<vmem>>, vector<128x128xbf16>
    %c0_1 = arith.constant 0 : index
    %c0_2 = arith.constant 0 : index
    %1 = vector.load %arg2[%c0_1, %c0_2] : memref<128x128xbf16, #tpu.memory_space<vmem>>, vector<128x128xbf16>
    %cst = arith.constant dense<0.000000e+00> : vector<128x128xf32>
    %2 = tpu.matmul %0, %1, %cst {dimension_numbers = #tpu.dot_dimension_numbers<[1], [0], [0], [1], [0, 0, 1, 1], [], []>} : vector<128x128xbf16>, vector<128x128xbf16>, vector<128x128xf32> -> vector<128x128xf32>
    %c0_3 = arith.constant 0 : index
    %c0_4 = arith.constant 0 : index
    %3 = vector.load %arg3[%c0_3, %c0_4] : memref<1x128xf32, #tpu.memory_space<vmem>>, vector<1x128xf32>
    %4 = vector.broadcast %3 : vector<1x128xf32> to vector<128x128xf32>
    %5 = arith.addf %2, %4 : vector<128x128xf32>
    %cst_5 = arith.constant 0.000000e+00 : f32
    %6 = vector.broadcast %cst_5 : f32 to vector<128x128xf32>
    %7 = arith.subf %6, %5 : vector<128x128xf32>
    %8 = math.exp %7 : vector<128x128xf32>
    %cst_6 = arith.constant 1.000000e+00 : f32
    %9 = vector.broadcast %cst_6 : f32 to vector<128x128xf32>
    %10 = arith.addf %9, %8 : vector<128x128xf32>
    %11 = tpu.reciprocal %10 {approx = true} : vector<128x128xf32> -> vector<128x128xf32>
    %12 = arith.mulf %5, %11 : vector<128x128xf32>
    %13 = arith.truncf %12 : vector<128x128xf32> to vector<128x128xbf16>
    %c0_7 = arith.constant 0 : index
    %c0_8 = arith.constant 0 : index
    %14 = vector.load %arg4[%c0_7, %c0_8] : memref<128x128xbf16, #tpu.memory_space<vmem>>, vector<128x128xbf16>
    tpu.vector_store %arg4[%c0_7, %c0_8], %13 {strides = array<i32>} : memref<128x128xbf16, #tpu.memory_space<vmem>>, vector<128x128xbf16>,
    return
  }
  func.func @transform_0(%arg0: i32) -> (i32, i32) {
    %c0_i32 = arith.constant 0 : i32
    %c0_i32_0 = arith.constant 0 : i32
    return %arg0, %c0_i32 : i32, i32
  }
  func.func @transform_1(%arg0: i32) -> (i32, i32) {
    %c0_i32 = arith.constant 0 : i32
    %c0_i32_0 = arith.constant 0 : i32
    %c0_i32_1 = arith.constant 0 : i32
    return %c0_i32, %c0_i32_0 : i32, i32
  }
  func.func @transform_2(%arg0: i32) -> (i32, i32) {
    %c0_i32 = arith.constant 0 : i32
    %c0_i32_0 = arith.constant 0 : i32
    %c0_i32_1 = arith.constant 0 : i32
    return %c0_i32, %c0_i32_0 : i32, i32
  }
  func.func @transform_3(%arg0: i32) -> (i32, i32) {
    %c0_i32 = arith.constant 0 : i32
    %c0_i32_0 = arith.constant 0 : i32
    return %arg0, %c0_i32 : i32, i32
  }
}

module attributes {stable_mosaic.version = 11 : i64} {
  func.func @_dw_kernel(%arg0: i32, %arg1: i32, %arg2: memref<1x18x18x128xbf16, #tpu.memory_space<vmem>>, %arg3: memref<9x128xf32, #tpu.memory_space<vmem>>, %arg4: memref<1x128xf32, #tpu.memory_space<vmem>>, %arg5: memref<1x16x16x128xbf16, #tpu.memory_space<vmem>>, %arg6: memref<1x1x128xf32, #tpu.memory_space<vmem>>) attributes {dimension_semantics = [#tpu.dimension_semantics<parallel>, #tpu.dimension_semantics<parallel>], iteration_bounds = array<i64: 2, 1>, scalar_prefetch = 0 : i64, scratch_operands = 0 : i64, tpu.core_type = #tpu.core_type<tc>, window_params = [{transform_indices = @transform_0, window_bounds = array<i64: 1, 18, 18, 128>}, {transform_indices = @transform_1, window_bounds = array<i64: 9, 128>}, {transform_indices = @transform_2, window_bounds = array<i64: 1, 128>}, {transform_indices = @transform_3, window_bounds = array<i64: 1, 16, 16, 128>}, {transform_indices = @transform_4, window_bounds = array<i64: 1, 1, 128>}]} {
    %c0 = arith.constant 0 : index
    %c0_0 = arith.constant 0 : index
    %c0_1 = arith.constant 0 : index
    %c0_2 = arith.constant 0 : index
    %0 = vector.load %arg2[%c0, %c0_0, %c0_1, %c0_2] : memref<1x18x18x128xbf16, #tpu.memory_space<vmem>>, vector<1x16x16x128xbf16>
    %1 = vector.shape_cast %0 : vector<1x16x16x128xbf16> to vector<16x16x128xbf16>
    %c0_3 = arith.constant 0 : index
    %c0_4 = arith.constant 0 : index
    %2 = vector.load %arg3[%c0_3, %c0_4] : memref<9x128xf32, #tpu.memory_space<vmem>>, vector<1x128xf32>
    %3 = arith.extf %1 : vector<16x16x128xbf16> to vector<16x16x128xf32>
    %4 = vector.shape_cast %2 : vector<1x128xf32> to vector<1x1x128xf32>
    %5 = vector.broadcast %4 : vector<1x1x128xf32> to vector<16x16x128xf32>
    %6 = arith.mulf %3, %5 : vector<16x16x128xf32>
    %c0_5 = arith.constant 0 : index
    %c0_6 = arith.constant 0 : index
    %c1 = arith.constant 1 : index
    %c0_7 = arith.constant 0 : index
    %7 = vector.load %arg2[%c0_5, %c0_6, %c1, %c0_7] : memref<1x18x18x128xbf16, #tpu.memory_space<vmem>>, vector<1x16x16x128xbf16>
    %8 = vector.shape_cast %7 : vector<1x16x16x128xbf16> to vector<16x16x128xbf16>
    %c1_8 = arith.constant 1 : index
    %c0_9 = arith.constant 0 : index
    %9 = vector.load %arg3[%c1_8, %c0_9] : memref<9x128xf32, #tpu.memory_space<vmem>>, vector<1x128xf32>
    %10 = arith.extf %8 : vector<16x16x128xbf16> to vector<16x16x128xf32>
    %11 = vector.shape_cast %9 : vector<1x128xf32> to vector<1x1x128xf32>
    %12 = vector.broadcast %11 : vector<1x1x128xf32> to vector<16x16x128xf32>
    %13 = arith.mulf %10, %12 : vector<16x16x128xf32>
    %14 = arith.addf %6, %13 : vector<16x16x128xf32>
    %c0_10 = arith.constant 0 : index
    %c0_11 = arith.constant 0 : index
    %c2 = arith.constant 2 : index
    %c0_12 = arith.constant 0 : index
    %15 = vector.load %arg2[%c0_10, %c0_11, %c2, %c0_12] : memref<1x18x18x128xbf16, #tpu.memory_space<vmem>>, vector<1x16x16x128xbf16>
    %16 = vector.shape_cast %15 : vector<1x16x16x128xbf16> to vector<16x16x128xbf16>
    %c2_13 = arith.constant 2 : index
    %c0_14 = arith.constant 0 : index
    %17 = vector.load %arg3[%c2_13, %c0_14] : memref<9x128xf32, #tpu.memory_space<vmem>>, vector<1x128xf32>
    %18 = arith.extf %16 : vector<16x16x128xbf16> to vector<16x16x128xf32>
    %19 = vector.shape_cast %17 : vector<1x128xf32> to vector<1x1x128xf32>
    %20 = vector.broadcast %19 : vector<1x1x128xf32> to vector<16x16x128xf32>
    %21 = arith.mulf %18, %20 : vector<16x16x128xf32>
    %22 = arith.addf %14, %21 : vector<16x16x128xf32>
    %c0_15 = arith.constant 0 : index
    %c1_16 = arith.constant 1 : index
    %c0_17 = arith.constant 0 : index
    %c0_18 = arith.constant 0 : index
    %23 = vector.load %arg2[%c0_15, %c1_16, %c0_17, %c0_18] : memref<1x18x18x128xbf16, #tpu.memory_space<vmem>>, vector<1x16x16x128xbf16>
    %24 = vector.shape_cast %23 : vector<1x16x16x128xbf16> to vector<16x16x128xbf16>
    %c3 = arith.constant 3 : index
    %c0_19 = arith.constant 0 : index
    %25 = vector.load %arg3[%c3, %c0_19] : memref<9x128xf32, #tpu.memory_space<vmem>>, vector<1x128xf32>
    %26 = arith.extf %24 : vector<16x16x128xbf16> to vector<16x16x128xf32>
    %27 = vector.shape_cast %25 : vector<1x128xf32> to vector<1x1x128xf32>
    %28 = vector.broadcast %27 : vector<1x1x128xf32> to vector<16x16x128xf32>
    %29 = arith.mulf %26, %28 : vector<16x16x128xf32>
    %30 = arith.addf %22, %29 : vector<16x16x128xf32>
    %c0_20 = arith.constant 0 : index
    %c1_21 = arith.constant 1 : index
    %c1_22 = arith.constant 1 : index
    %c0_23 = arith.constant 0 : index
    %31 = vector.load %arg2[%c0_20, %c1_21, %c1_22, %c0_23] : memref<1x18x18x128xbf16, #tpu.memory_space<vmem>>, vector<1x16x16x128xbf16>
    %32 = vector.shape_cast %31 : vector<1x16x16x128xbf16> to vector<16x16x128xbf16>
    %c4 = arith.constant 4 : index
    %c0_24 = arith.constant 0 : index
    %33 = vector.load %arg3[%c4, %c0_24] : memref<9x128xf32, #tpu.memory_space<vmem>>, vector<1x128xf32>
    %34 = arith.extf %32 : vector<16x16x128xbf16> to vector<16x16x128xf32>
    %35 = vector.shape_cast %33 : vector<1x128xf32> to vector<1x1x128xf32>
    %36 = vector.broadcast %35 : vector<1x1x128xf32> to vector<16x16x128xf32>
    %37 = arith.mulf %34, %36 : vector<16x16x128xf32>
    %38 = arith.addf %30, %37 : vector<16x16x128xf32>
    %c0_25 = arith.constant 0 : index
    %c1_26 = arith.constant 1 : index
    %c2_27 = arith.constant 2 : index
    %c0_28 = arith.constant 0 : index
    %39 = vector.load %arg2[%c0_25, %c1_26, %c2_27, %c0_28] : memref<1x18x18x128xbf16, #tpu.memory_space<vmem>>, vector<1x16x16x128xbf16>
    %40 = vector.shape_cast %39 : vector<1x16x16x128xbf16> to vector<16x16x128xbf16>
    %c5 = arith.constant 5 : index
    %c0_29 = arith.constant 0 : index
    %41 = vector.load %arg3[%c5, %c0_29] : memref<9x128xf32, #tpu.memory_space<vmem>>, vector<1x128xf32>
    %42 = arith.extf %40 : vector<16x16x128xbf16> to vector<16x16x128xf32>
    %43 = vector.shape_cast %41 : vector<1x128xf32> to vector<1x1x128xf32>
    %44 = vector.broadcast %43 : vector<1x1x128xf32> to vector<16x16x128xf32>
    %45 = arith.mulf %42, %44 : vector<16x16x128xf32>
    %46 = arith.addf %38, %45 : vector<16x16x128xf32>
    %c0_30 = arith.constant 0 : index
    %c2_31 = arith.constant 2 : index
    %c0_32 = arith.constant 0 : index
    %c0_33 = arith.constant 0 : index
    %47 = vector.load %arg2[%c0_30, %c2_31, %c0_32, %c0_33] : memref<1x18x18x128xbf16, #tpu.memory_space<vmem>>, vector<1x16x16x128xbf16>
    %48 = vector.shape_cast %47 : vector<1x16x16x128xbf16> to vector<16x16x128xbf16>
    %c6 = arith.constant 6 : index
    %c0_34 = arith.constant 0 : index
    %49 = vector.load %arg3[%c6, %c0_34] : memref<9x128xf32, #tpu.memory_space<vmem>>, vector<1x128xf32>
    %50 = arith.extf %48 : vector<16x16x128xbf16> to vector<16x16x128xf32>
    %51 = vector.shape_cast %49 : vector<1x128xf32> to vector<1x1x128xf32>
    %52 = vector.broadcast %51 : vector<1x1x128xf32> to vector<16x16x128xf32>
    %53 = arith.mulf %50, %52 : vector<16x16x128xf32>
    %54 = arith.addf %46, %53 : vector<16x16x128xf32>
    %c0_35 = arith.constant 0 : index
    %c2_36 = arith.constant 2 : index
    %c1_37 = arith.constant 1 : index
    %c0_38 = arith.constant 0 : index
    %55 = vector.load %arg2[%c0_35, %c2_36, %c1_37, %c0_38] : memref<1x18x18x128xbf16, #tpu.memory_space<vmem>>, vector<1x16x16x128xbf16>
    %56 = vector.shape_cast %55 : vector<1x16x16x128xbf16> to vector<16x16x128xbf16>
    %c7 = arith.constant 7 : index
    %c0_39 = arith.constant 0 : index
    %57 = vector.load %arg3[%c7, %c0_39] : memref<9x128xf32, #tpu.memory_space<vmem>>, vector<1x128xf32>
    %58 = arith.extf %56 : vector<16x16x128xbf16> to vector<16x16x128xf32>
    %59 = vector.shape_cast %57 : vector<1x128xf32> to vector<1x1x128xf32>
    %60 = vector.broadcast %59 : vector<1x1x128xf32> to vector<16x16x128xf32>
    %61 = arith.mulf %58, %60 : vector<16x16x128xf32>
    %62 = arith.addf %54, %61 : vector<16x16x128xf32>
    %c0_40 = arith.constant 0 : index
    %c2_41 = arith.constant 2 : index
    %c2_42 = arith.constant 2 : index
    %c0_43 = arith.constant 0 : index
    %63 = vector.load %arg2[%c0_40, %c2_41, %c2_42, %c0_43] : memref<1x18x18x128xbf16, #tpu.memory_space<vmem>>, vector<1x16x16x128xbf16>
    %64 = vector.shape_cast %63 : vector<1x16x16x128xbf16> to vector<16x16x128xbf16>
    %c8 = arith.constant 8 : index
    %c0_44 = arith.constant 0 : index
    %65 = vector.load %arg3[%c8, %c0_44] : memref<9x128xf32, #tpu.memory_space<vmem>>, vector<1x128xf32>
    %66 = arith.extf %64 : vector<16x16x128xbf16> to vector<16x16x128xf32>
    %67 = vector.shape_cast %65 : vector<1x128xf32> to vector<1x1x128xf32>
    %68 = vector.broadcast %67 : vector<1x1x128xf32> to vector<16x16x128xf32>
    %69 = arith.mulf %66, %68 : vector<16x16x128xf32>
    %70 = arith.addf %62, %69 : vector<16x16x128xf32>
    %c0_45 = arith.constant 0 : index
    %c0_46 = arith.constant 0 : index
    %71 = vector.load %arg4[%c0_45, %c0_46] : memref<1x128xf32, #tpu.memory_space<vmem>>, vector<1x128xf32>
    %72 = vector.shape_cast %71 : vector<1x128xf32> to vector<1x1x128xf32>
    %73 = vector.broadcast %72 : vector<1x1x128xf32> to vector<16x16x128xf32>
    %74 = arith.addf %70, %73 : vector<16x16x128xf32>
    %cst = arith.constant 0.000000e+00 : f32
    %75 = vector.broadcast %cst : f32 to vector<16x16x128xf32>
    %76 = arith.subf %75, %74 : vector<16x16x128xf32>
    %77 = math.exp %76 : vector<16x16x128xf32>
    %cst_47 = arith.constant 1.000000e+00 : f32
    %78 = vector.broadcast %cst_47 : f32 to vector<16x16x128xf32>
    %79 = arith.addf %78, %77 : vector<16x16x128xf32>
    %80 = tpu.reciprocal %79 {approx = true} : vector<16x16x128xf32> -> vector<16x16x128xf32>
    %81 = arith.mulf %74, %80 : vector<16x16x128xf32>
    %82 = arith.truncf %81 : vector<16x16x128xf32> to vector<16x16x128xbf16>
    %c0_48 = arith.constant 0 : index
    %c0_49 = arith.constant 0 : index
    %c0_50 = arith.constant 0 : index
    %c0_51 = arith.constant 0 : index
    %83 = vector.load %arg5[%c0_48, %c0_49, %c0_50, %c0_51] : memref<1x16x16x128xbf16, #tpu.memory_space<vmem>>, vector<1x16x16x128xbf16>
    %84 = vector.shape_cast %83 : vector<1x16x16x128xbf16> to vector<16x16x128xbf16>
    %85 = vector.shape_cast %82 : vector<16x16x128xbf16> to vector<1x16x16x128xbf16>
    tpu.vector_store %arg5[%c0_48, %c0_49, %c0_50, %c0_51], %85 {strides = array<i32>} : memref<1x16x16x128xbf16, #tpu.memory_space<vmem>>, vector<1x16x16x128xbf16>,
    %cst_52 = arith.constant dense<0.000000e+00> : vector<16x128xf32>
    %86 = vector.multi_reduction <add>, %81, %cst_52 [0] : vector<16x16x128xf32> to vector<16x128xf32>
    %cst_53 = arith.constant dense<0.000000e+00> : vector<128xf32>
    %87 = vector.multi_reduction <add>, %86, %cst_53 [0] : vector<16x128xf32> to vector<128xf32>
    %88 = vector.shape_cast %87 : vector<128xf32> to vector<1x128xf32>
    %cst_54 = arith.constant 3.906250e-03 : f32
    %89 = vector.broadcast %cst_54 : f32 to vector<1x128xf32>
    %90 = arith.mulf %88, %89 : vector<1x128xf32>
    %c0_55 = arith.constant 0 : index
    %c0_56 = arith.constant 0 : index
    %c0_57 = arith.constant 0 : index
    %91 = vector.load %arg6[%c0_55, %c0_56, %c0_57] : memref<1x1x128xf32, #tpu.memory_space<vmem>>, vector<1x1x128xf32>
    %92 = vector.shape_cast %91 : vector<1x1x128xf32> to vector<1x128xf32>
    %93 = vector.shape_cast %90 : vector<1x128xf32> to vector<1x1x128xf32>
    tpu.vector_store %arg6[%c0_55, %c0_56, %c0_57], %93 {strides = array<i32>} : memref<1x1x128xf32, #tpu.memory_space<vmem>>, vector<1x1x128xf32>,
    return
  }
  func.func @transform_0(%arg0: i32, %arg1: i32) -> (i32, i32, i32, i32) {
    %c0_i32 = arith.constant 0 : i32
    %c0_i32_0 = arith.constant 0 : i32
    %c0_i32_1 = arith.constant 0 : i32
    return %arg0, %c0_i32, %c0_i32_0, %arg1 : i32, i32, i32, i32
  }
  func.func @transform_1(%arg0: i32, %arg1: i32) -> (i32, i32) {
    %c0_i32 = arith.constant 0 : i32
    %c0_i32_0 = arith.constant 0 : i32
    return %c0_i32, %arg1 : i32, i32
  }
  func.func @transform_2(%arg0: i32, %arg1: i32) -> (i32, i32) {
    %c0_i32 = arith.constant 0 : i32
    %c0_i32_0 = arith.constant 0 : i32
    return %c0_i32, %arg1 : i32, i32
  }
  func.func @transform_3(%arg0: i32, %arg1: i32) -> (i32, i32, i32, i32) {
    %c0_i32 = arith.constant 0 : i32
    %c0_i32_0 = arith.constant 0 : i32
    %c0_i32_1 = arith.constant 0 : i32
    return %arg0, %c0_i32, %c0_i32_0, %arg1 : i32, i32, i32, i32
  }
  func.func @transform_4(%arg0: i32, %arg1: i32) -> (i32, i32, i32) {
    %c0_i32 = arith.constant 0 : i32
    %c0_i32_0 = arith.constant 0 : i32
    return %arg0, %c0_i32, %arg1 : i32, i32, i32
  }
}

module attributes {stable_mosaic.version = 11 : i64} {
  func.func @_proj_kernel(%arg0: i32, %arg1: i32, %arg2: memref<1x128x128xbf16, #tpu.memory_space<vmem>>, %arg3: memref<1x1x128xf32, #tpu.memory_space<vmem>>, %arg4: memref<128x4xf32, #tpu.memory_space<vmem>>, %arg5: memref<1x4xf32, #tpu.memory_space<vmem>>, %arg6: memref<4x128xf32, #tpu.memory_space<vmem>>, %arg7: memref<1x128xf32, #tpu.memory_space<vmem>>, %arg8: memref<128x128xbf16, #tpu.memory_space<vmem>>, %arg9: memref<1x128xf32, #tpu.memory_space<vmem>>, %arg10: memref<1x128x128xbf16, #tpu.memory_space<vmem>>, %arg11: memref<1x128x128xbf16, #tpu.memory_space<vmem>>) attributes {dimension_semantics = [#tpu.dimension_semantics<parallel>, #tpu.dimension_semantics<parallel>], iteration_bounds = array<i64: 2, 2>, scalar_prefetch = 0 : i64, scratch_operands = 0 : i64, tpu.core_type = #tpu.core_type<tc>, window_params = [{transform_indices = @transform_0, window_bounds = array<i64: 1, 128, 128>}, {transform_indices = @transform_1, window_bounds = array<i64: 1, 1, 128>}, {pipeline_mode = #tpu.pipeline_mode<synchronous>, transform_indices = @transform_2, window_bounds = array<i64: 128, 4>}, {pipeline_mode = #tpu.pipeline_mode<synchronous>, transform_indices = @transform_3, window_bounds = array<i64: 1, 4>}, {pipeline_mode = #tpu.pipeline_mode<synchronous>, transform_indices = @transform_4, window_bounds = array<i64: 4, 128>}, {pipeline_mode = #tpu.pipeline_mode<synchronous>, transform_indices = @transform_5, window_bounds = array<i64: 1, 128>}, {pipeline_mode = #tpu.pipeline_mode<synchronous>, transform_indices = @transform_6, window_bounds = array<i64: 128, 128>}, {pipeline_mode = #tpu.pipeline_mode<synchronous>, transform_indices = @transform_7, window_bounds = array<i64: 1, 128>}, {transform_indices = @transform_8, window_bounds = array<i64: 1, 128, 128>}, {transform_indices = @transform_9, window_bounds = array<i64: 1, 128, 128>}]} {
    %c0 = arith.constant 0 : index
    %c0_0 = arith.constant 0 : index
    %c0_1 = arith.constant 0 : index
    %0 = vector.load %arg3[%c0, %c0_0, %c0_1] : memref<1x1x128xf32, #tpu.memory_space<vmem>>, vector<1x1x128xf32>
    %1 = vector.shape_cast %0 : vector<1x1x128xf32> to vector<1x128xf32>
    %c0_2 = arith.constant 0 : index
    %c0_3 = arith.constant 0 : index
    %2 = vector.load %arg4[%c0_2, %c0_3] : memref<128x4xf32, #tpu.memory_space<vmem>>, vector<128x4xf32>
    %cst = arith.constant dense<0.000000e+00> : vector<1x4xf32>
    %3 = tpu.matmul %1, %2, %cst {dimension_numbers = #tpu.dot_dimension_numbers<[1], [0], [0], [1], [0, 0, 1, 1], [], []>} : vector<1x128xf32>, vector<128x4xf32>, vector<1x4xf32> -> vector<1x4xf32>
    %c0_4 = arith.constant 0 : index
    %c0_5 = arith.constant 0 : index
    %4 = vector.load %arg5[%c0_4, %c0_5] : memref<1x4xf32, #tpu.memory_space<vmem>>, vector<1x4xf32>
    %5 = arith.addf %3, %4 : vector<1x4xf32>
    %cst_6 = arith.constant 0.000000e+00 : f32
    %6 = vector.broadcast %cst_6 : f32 to vector<1x4xf32>
    %7 = arith.subf %6, %5 : vector<1x4xf32>
    %8 = math.exp %7 : vector<1x4xf32>
    %cst_7 = arith.constant 1.000000e+00 : f32
    %9 = vector.broadcast %cst_7 : f32 to vector<1x4xf32>
    %10 = arith.addf %9, %8 : vector<1x4xf32>
    %11 = tpu.reciprocal %10 {approx = true} : vector<1x4xf32> -> vector<1x4xf32>
    %12 = arith.mulf %5, %11 : vector<1x4xf32>
    %c0_8 = arith.constant 0 : index
    %c0_9 = arith.constant 0 : index
    %13 = vector.load %arg6[%c0_8, %c0_9] : memref<4x128xf32, #tpu.memory_space<vmem>>, vector<4x128xf32>
    %cst_10 = arith.constant dense<0.000000e+00> : vector<1x128xf32>
    %14 = tpu.matmul %12, %13, %cst_10 {dimension_numbers = #tpu.dot_dimension_numbers<[1], [0], [0], [1], [0, 0, 1, 1], [], []>} : vector<1x4xf32>, vector<4x128xf32>, vector<1x128xf32> -> vector<1x128xf32>
    %c0_11 = arith.constant 0 : index
    %c0_12 = arith.constant 0 : index
    %15 = vector.load %arg7[%c0_11, %c0_12] : memref<1x128xf32, #tpu.memory_space<vmem>>, vector<1x128xf32>
    %16 = arith.addf %14, %15 : vector<1x128xf32>
    %cst_13 = arith.constant 0.000000e+00 : f32
    %17 = vector.broadcast %cst_13 : f32 to vector<1x128xf32>
    %18 = arith.subf %17, %16 : vector<1x128xf32>
    %19 = math.exp %18 : vector<1x128xf32>
    %cst_14 = arith.constant 1.000000e+00 : f32
    %20 = vector.broadcast %cst_14 : f32 to vector<1x128xf32>
    %21 = arith.addf %20, %19 : vector<1x128xf32>
    %22 = tpu.reciprocal %21 {approx = true} : vector<1x128xf32> -> vector<1x128xf32>
    %c0_15 = arith.constant 0 : index
    %c0_16 = arith.constant 0 : index
    %c0_17 = arith.constant 0 : index
    %23 = vector.load %arg2[%c0_15, %c0_16, %c0_17] : memref<1x128x128xbf16, #tpu.memory_space<vmem>>, vector<1x128x128xbf16>
    %24 = vector.shape_cast %23 : vector<1x128x128xbf16> to vector<128x128xbf16>
    %25 = arith.truncf %22 : vector<1x128xf32> to vector<1x128xbf16>
    %26 = vector.broadcast %25 : vector<1x128xbf16> to vector<128x128xbf16>
    %27 = arith.mulf %24, %26 : vector<128x128xbf16>
    %c0_18 = arith.constant 0 : index
    %c0_19 = arith.constant 0 : index
    %28 = vector.load %arg8[%c0_18, %c0_19] : memref<128x128xbf16, #tpu.memory_space<vmem>>, vector<128x128xbf16>
    %cst_20 = arith.constant dense<0.000000e+00> : vector<128x128xf32>
    %29 = tpu.matmul %27, %28, %cst_20 {dimension_numbers = #tpu.dot_dimension_numbers<[1], [0], [0], [1], [0, 0, 1, 1], [], []>} : vector<128x128xbf16>, vector<128x128xbf16>, vector<128x128xf32> -> vector<128x128xf32>
    %c0_21 = arith.constant 0 : index
    %c0_22 = arith.constant 0 : index
    %30 = vector.load %arg9[%c0_21, %c0_22] : memref<1x128xf32, #tpu.memory_space<vmem>>, vector<1x128xf32>
    %31 = vector.broadcast %30 : vector<1x128xf32> to vector<128x128xf32>
    %32 = arith.addf %29, %31 : vector<128x128xf32>
    %c0_23 = arith.constant 0 : index
    %c0_24 = arith.constant 0 : index
    %c0_25 = arith.constant 0 : index
    %33 = vector.load %arg10[%c0_23, %c0_24, %c0_25] : memref<1x128x128xbf16, #tpu.memory_space<vmem>>, vector<1x128x128xbf16>
    %34 = vector.shape_cast %33 : vector<1x128x128xbf16> to vector<128x128xbf16>
    %35 = arith.extf %34 : vector<128x128xbf16> to vector<128x128xf32>
    %36 = arith.addf %32, %35 : vector<128x128xf32>
    %37 = arith.truncf %36 : vector<128x128xf32> to vector<128x128xbf16>
    %c0_26 = arith.constant 0 : index
    %c0_27 = arith.constant 0 : index
    %c0_28 = arith.constant 0 : index
    %38 = vector.load %arg11[%c0_26, %c0_27, %c0_28] : memref<1x128x128xbf16, #tpu.memory_space<vmem>>, vector<1x128x128xbf16>
    %39 = vector.shape_cast %38 : vector<1x128x128xbf16> to vector<128x128xbf16>
    %40 = vector.shape_cast %37 : vector<128x128xbf16> to vector<1x128x128xbf16>
    tpu.vector_store %arg11[%c0_26, %c0_27, %c0_28], %40 {strides = array<i32>} : memref<1x128x128xbf16, #tpu.memory_space<vmem>>, vector<1x128x128xbf16>,
    return
  }
  func.func @transform_0(%arg0: i32, %arg1: i32) -> (i32, i32, i32) {
    %c0_i32 = arith.constant 0 : i32
    %c0_i32_0 = arith.constant 0 : i32
    return %arg0, %arg1, %c0_i32 : i32, i32, i32
  }
  func.func @transform_1(%arg0: i32, %arg1: i32) -> (i32, i32, i32) {
    %c0_i32 = arith.constant 0 : i32
    %c0_i32_0 = arith.constant 0 : i32
    %c0_i32_1 = arith.constant 0 : i32
    return %arg0, %c0_i32, %c0_i32_0 : i32, i32, i32
  }
  func.func @transform_2(%arg0: i32, %arg1: i32) -> (i32, i32) {
    %c0_i32 = arith.constant 0 : i32
    %c0_i32_0 = arith.constant 0 : i32
    %c0_i32_1 = arith.constant 0 : i32
    return %c0_i32, %c0_i32_0 : i32, i32
  }
  func.func @transform_3(%arg0: i32, %arg1: i32) -> (i32, i32) {
    %c0_i32 = arith.constant 0 : i32
    %c0_i32_0 = arith.constant 0 : i32
    %c0_i32_1 = arith.constant 0 : i32
    return %c0_i32, %c0_i32_0 : i32, i32
  }
  func.func @transform_4(%arg0: i32, %arg1: i32) -> (i32, i32) {
    %c0_i32 = arith.constant 0 : i32
    %c0_i32_0 = arith.constant 0 : i32
    %c0_i32_1 = arith.constant 0 : i32
    return %c0_i32, %c0_i32_0 : i32, i32
  }
  func.func @transform_5(%arg0: i32, %arg1: i32) -> (i32, i32) {
    %c0_i32 = arith.constant 0 : i32
    %c0_i32_0 = arith.constant 0 : i32
    %c0_i32_1 = arith.constant 0 : i32
    return %c0_i32, %c0_i32_0 : i32, i32
  }
  func.func @transform_6(%arg0: i32, %arg1: i32) -> (i32, i32) {
    %c0_i32 = arith.constant 0 : i32
    %c0_i32_0 = arith.constant 0 : i32
    %c0_i32_1 = arith.constant 0 : i32
    return %c0_i32, %c0_i32_0 : i32, i32
  }
  func.func @transform_7(%arg0: i32, %arg1: i32) -> (i32, i32) {
    %c0_i32 = arith.constant 0 : i32
    %c0_i32_0 = arith.constant 0 : i32
    %c0_i32_1 = arith.constant 0 : i32
    return %c0_i32, %c0_i32_0 : i32, i32
  }
  func.func @transform_8(%arg0: i32, %arg1: i32) -> (i32, i32, i32) {
    %c0_i32 = arith.constant 0 : i32
    %c0_i32_0 = arith.constant 0 : i32
    return %arg0, %arg1, %c0_i32 : i32, i32, i32
  }
  func.func @transform_9(%arg0: i32, %arg1: i32) -> (i32, i32, i32) {
    %c0_i32 = arith.constant 0 : i32
    %c0_i32_0 = arith.constant 0 : i32
    return %arg0, %arg1, %c0_i32 : i32, i32, i32
  }
}

module attributes {stable_mosaic.version = 11 : i64} {
  func.func @_dw_kernel(%arg0: i32, %arg1: i32, %arg2: memref<4x9x9x128xbf16, #tpu.memory_space<vmem>>, %arg3: memref<9x128xf32, #tpu.memory_space<vmem>>, %arg4: memref<1x128xf32, #tpu.memory_space<vmem>>, %arg5: memref<1x8x8x128xbf16, #tpu.memory_space<vmem>>, %arg6: memref<1x1x128xf32, #tpu.memory_space<vmem>>) attributes {dimension_semantics = [#tpu.dimension_semantics<parallel>, #tpu.dimension_semantics<parallel>], iteration_bounds = array<i64: 2, 1>, scalar_prefetch = 0 : i64, scratch_operands = 0 : i64, tpu.core_type = #tpu.core_type<tc>, window_params = [{transform_indices = @transform_0, window_bounds = array<i64: 4, 9, 9, 128>}, {transform_indices = @transform_1, window_bounds = array<i64: 9, 128>}, {transform_indices = @transform_2, window_bounds = array<i64: 1, 128>}, {transform_indices = @transform_3, window_bounds = array<i64: 1, 8, 8, 128>}, {transform_indices = @transform_4, window_bounds = array<i64: 1, 1, 128>}]} {
    %c0 = arith.constant 0 : index
    %c0_0 = arith.constant 0 : index
    %c0_1 = arith.constant 0 : index
    %c0_2 = arith.constant 0 : index
    %0 = vector.load %arg2[%c0, %c0_0, %c0_1, %c0_2] : memref<4x9x9x128xbf16, #tpu.memory_space<vmem>>, vector<1x8x8x128xbf16>
    %1 = vector.shape_cast %0 : vector<1x8x8x128xbf16> to vector<8x8x128xbf16>
    %c0_3 = arith.constant 0 : index
    %c0_4 = arith.constant 0 : index
    %2 = vector.load %arg3[%c0_3, %c0_4] : memref<9x128xf32, #tpu.memory_space<vmem>>, vector<1x128xf32>
    %3 = arith.extf %1 : vector<8x8x128xbf16> to vector<8x8x128xf32>
    %4 = vector.shape_cast %2 : vector<1x128xf32> to vector<1x1x128xf32>
    %5 = vector.broadcast %4 : vector<1x1x128xf32> to vector<8x8x128xf32>
    %6 = arith.mulf %3, %5 : vector<8x8x128xf32>
    %c1 = arith.constant 1 : index
    %c0_5 = arith.constant 0 : index
    %c0_6 = arith.constant 0 : index
    %c0_7 = arith.constant 0 : index
    %7 = vector.load %arg2[%c1, %c0_5, %c0_6, %c0_7] : memref<4x9x9x128xbf16, #tpu.memory_space<vmem>>, vector<1x8x8x128xbf16>
    %8 = vector.shape_cast %7 : vector<1x8x8x128xbf16> to vector<8x8x128xbf16>
    %c1_8 = arith.constant 1 : index
    %c0_9 = arith.constant 0 : index
    %9 = vector.load %arg3[%c1_8, %c0_9] : memref<9x128xf32, #tpu.memory_space<vmem>>, vector<1x128xf32>
    %10 = arith.extf %8 : vector<8x8x128xbf16> to vector<8x8x128xf32>
    %11 = vector.shape_cast %9 : vector<1x128xf32> to vector<1x1x128xf32>
    %12 = vector.broadcast %11 : vector<1x1x128xf32> to vector<8x8x128xf32>
    %13 = arith.mulf %10, %12 : vector<8x8x128xf32>
    %14 = arith.addf %6, %13 : vector<8x8x128xf32>
    %c0_10 = arith.constant 0 : index
    %c0_11 = arith.constant 0 : index
    %c1_12 = arith.constant 1 : index
    %c0_13 = arith.constant 0 : index
    %15 = vector.load %arg2[%c0_10, %c0_11, %c1_12, %c0_13] : memref<4x9x9x128xbf16, #tpu.memory_space<vmem>>, vector<1x8x8x128xbf16>
    %16 = vector.shape_cast %15 : vector<1x8x8x128xbf16> to vector<8x8x128xbf16>
    %c2 = arith.constant 2 : index
    %c0_14 = arith.constant 0 : index
    %17 = vector.load %arg3[%c2, %c0_14] : memref<9x128xf32, #tpu.memory_space<vmem>>, vector<1x128xf32>
    %18 = arith.extf %16 : vector<8x8x128xbf16> to vector<8x8x128xf32>
    %19 = vector.shape_cast %17 : vector<1x128xf32> to vector<1x1x128xf32>
    %20 = vector.broadcast %19 : vector<1x1x128xf32> to vector<8x8x128xf32>
    %21 = arith.mulf %18, %20 : vector<8x8x128xf32>
    %22 = arith.addf %14, %21 : vector<8x8x128xf32>
    %c2_15 = arith.constant 2 : index
    %c0_16 = arith.constant 0 : index
    %c0_17 = arith.constant 0 : index
    %c0_18 = arith.constant 0 : index
    %23 = vector.load %arg2[%c2_15, %c0_16, %c0_17, %c0_18] : memref<4x9x9x128xbf16, #tpu.memory_space<vmem>>, vector<1x8x8x128xbf16>
    %24 = vector.shape_cast %23 : vector<1x8x8x128xbf16> to vector<8x8x128xbf16>
    %c3 = arith.constant 3 : index
    %c0_19 = arith.constant 0 : index
    %25 = vector.load %arg3[%c3, %c0_19] : memref<9x128xf32, #tpu.memory_space<vmem>>, vector<1x128xf32>
    %26 = arith.extf %24 : vector<8x8x128xbf16> to vector<8x8x128xf32>
    %27 = vector.shape_cast %25 : vector<1x128xf32> to vector<1x1x128xf32>
    %28 = vector.broadcast %27 : vector<1x1x128xf32> to vector<8x8x128xf32>
    %29 = arith.mulf %26, %28 : vector<8x8x128xf32>
    %30 = arith.addf %22, %29 : vector<8x8x128xf32>
    %c3_20 = arith.constant 3 : index
    %c0_21 = arith.constant 0 : index
    %c0_22 = arith.constant 0 : index
    %c0_23 = arith.constant 0 : index
    %31 = vector.load %arg2[%c3_20, %c0_21, %c0_22, %c0_23] : memref<4x9x9x128xbf16, #tpu.memory_space<vmem>>, vector<1x8x8x128xbf16>
    %32 = vector.shape_cast %31 : vector<1x8x8x128xbf16> to vector<8x8x128xbf16>
    %c4 = arith.constant 4 : index
    %c0_24 = arith.constant 0 : index
    %33 = vector.load %arg3[%c4, %c0_24] : memref<9x128xf32, #tpu.memory_space<vmem>>, vector<1x128xf32>
    %34 = arith.extf %32 : vector<8x8x128xbf16> to vector<8x8x128xf32>
    %35 = vector.shape_cast %33 : vector<1x128xf32> to vector<1x1x128xf32>
    %36 = vector.broadcast %35 : vector<1x1x128xf32> to vector<8x8x128xf32>
    %37 = arith.mulf %34, %36 : vector<8x8x128xf32>
    %38 = arith.addf %30, %37 : vector<8x8x128xf32>
    %c2_25 = arith.constant 2 : index
    %c0_26 = arith.constant 0 : index
    %c1_27 = arith.constant 1 : index
    %c0_28 = arith.constant 0 : index
    %39 = vector.load %arg2[%c2_25, %c0_26, %c1_27, %c0_28] : memref<4x9x9x128xbf16, #tpu.memory_space<vmem>>, vector<1x8x8x128xbf16>
    %40 = vector.shape_cast %39 : vector<1x8x8x128xbf16> to vector<8x8x128xbf16>
    %c5 = arith.constant 5 : index
    %c0_29 = arith.constant 0 : index
    %41 = vector.load %arg3[%c5, %c0_29] : memref<9x128xf32, #tpu.memory_space<vmem>>, vector<1x128xf32>
    %42 = arith.extf %40 : vector<8x8x128xbf16> to vector<8x8x128xf32>
    %43 = vector.shape_cast %41 : vector<1x128xf32> to vector<1x1x128xf32>
    %44 = vector.broadcast %43 : vector<1x1x128xf32> to vector<8x8x128xf32>
    %45 = arith.mulf %42, %44 : vector<8x8x128xf32>
    %46 = arith.addf %38, %45 : vector<8x8x128xf32>
    %c0_30 = arith.constant 0 : index
    %c1_31 = arith.constant 1 : index
    %c0_32 = arith.constant 0 : index
    %c0_33 = arith.constant 0 : index
    %47 = vector.load %arg2[%c0_30, %c1_31, %c0_32, %c0_33] : memref<4x9x9x128xbf16, #tpu.memory_space<vmem>>, vector<1x8x8x128xbf16>
    %48 = vector.shape_cast %47 : vector<1x8x8x128xbf16> to vector<8x8x128xbf16>
    %c6 = arith.constant 6 : index
    %c0_34 = arith.constant 0 : index
    %49 = vector.load %arg3[%c6, %c0_34] : memref<9x128xf32, #tpu.memory_space<vmem>>, vector<1x128xf32>
    %50 = arith.extf %48 : vector<8x8x128xbf16> to vector<8x8x128xf32>
    %51 = vector.shape_cast %49 : vector<1x128xf32> to vector<1x1x128xf32>
    %52 = vector.broadcast %51 : vector<1x1x128xf32> to vector<8x8x128xf32>
    %53 = arith.mulf %50, %52 : vector<8x8x128xf32>
    %54 = arith.addf %46, %53 : vector<8x8x128xf32>
    %c1_35 = arith.constant 1 : index
    %c1_36 = arith.constant 1 : index
    %c0_37 = arith.constant 0 : index
    %c0_38 = arith.constant 0 : index
    %55 = vector.load %arg2[%c1_35, %c1_36, %c0_37, %c0_38] : memref<4x9x9x128xbf16, #tpu.memory_space<vmem>>, vector<1x8x8x128xbf16>
    %56 = vector.shape_cast %55 : vector<1x8x8x128xbf16> to vector<8x8x128xbf16>
    %c7 = arith.constant 7 : index
    %c0_39 = arith.constant 0 : index
    %57 = vector.load %arg3[%c7, %c0_39] : memref<9x128xf32, #tpu.memory_space<vmem>>, vector<1x128xf32>
    %58 = arith.extf %56 : vector<8x8x128xbf16> to vector<8x8x128xf32>
    %59 = vector.shape_cast %57 : vector<1x128xf32> to vector<1x1x128xf32>
    %60 = vector.broadcast %59 : vector<1x1x128xf32> to vector<8x8x128xf32>
    %61 = arith.mulf %58, %60 : vector<8x8x128xf32>
    %62 = arith.addf %54, %61 : vector<8x8x128xf32>
    %c0_40 = arith.constant 0 : index
    %c1_41 = arith.constant 1 : index
    %c1_42 = arith.constant 1 : index
    %c0_43 = arith.constant 0 : index
    %63 = vector.load %arg2[%c0_40, %c1_41, %c1_42, %c0_43] : memref<4x9x9x128xbf16, #tpu.memory_space<vmem>>, vector<1x8x8x128xbf16>
    %64 = vector.shape_cast %63 : vector<1x8x8x128xbf16> to vector<8x8x128xbf16>
    %c8 = arith.constant 8 : index
    %c0_44 = arith.constant 0 : index
    %65 = vector.load %arg3[%c8, %c0_44] : memref<9x128xf32, #tpu.memory_space<vmem>>, vector<1x128xf32>
    %66 = arith.extf %64 : vector<8x8x128xbf16> to vector<8x8x128xf32>
    %67 = vector.shape_cast %65 : vector<1x128xf32> to vector<1x1x128xf32>
    %68 = vector.broadcast %67 : vector<1x1x128xf32> to vector<8x8x128xf32>
    %69 = arith.mulf %66, %68 : vector<8x8x128xf32>
    %70 = arith.addf %62, %69 : vector<8x8x128xf32>
    %c0_45 = arith.constant 0 : index
    %c0_46 = arith.constant 0 : index
    %71 = vector.load %arg4[%c0_45, %c0_46] : memref<1x128xf32, #tpu.memory_space<vmem>>, vector<1x128xf32>
    %72 = vector.shape_cast %71 : vector<1x128xf32> to vector<1x1x128xf32>
    %73 = vector.broadcast %72 : vector<1x1x128xf32> to vector<8x8x128xf32>
    %74 = arith.addf %70, %73 : vector<8x8x128xf32>
    %cst = arith.constant 0.000000e+00 : f32
    %75 = vector.broadcast %cst : f32 to vector<8x8x128xf32>
    %76 = arith.subf %75, %74 : vector<8x8x128xf32>
    %77 = math.exp %76 : vector<8x8x128xf32>
    %cst_47 = arith.constant 1.000000e+00 : f32
    %78 = vector.broadcast %cst_47 : f32 to vector<8x8x128xf32>
    %79 = arith.addf %78, %77 : vector<8x8x128xf32>
    %80 = tpu.reciprocal %79 {approx = true} : vector<8x8x128xf32> -> vector<8x8x128xf32>
    %81 = arith.mulf %74, %80 : vector<8x8x128xf32>
    %82 = arith.truncf %81 : vector<8x8x128xf32> to vector<8x8x128xbf16>
    %c0_48 = arith.constant 0 : index
    %c0_49 = arith.constant 0 : index
    %c0_50 = arith.constant 0 : index
    %c0_51 = arith.constant 0 : index
    %83 = vector.load %arg5[%c0_48, %c0_49, %c0_50, %c0_51] : memref<1x8x8x128xbf16, #tpu.memory_space<vmem>>, vector<1x8x8x128xbf16>
    %84 = vector.shape_cast %83 : vector<1x8x8x128xbf16> to vector<8x8x128xbf16>
    %85 = vector.shape_cast %82 : vector<8x8x128xbf16> to vector<1x8x8x128xbf16>
    tpu.vector_store %arg5[%c0_48, %c0_49, %c0_50, %c0_51], %85 {strides = array<i32>} : memref<1x8x8x128xbf16, #tpu.memory_space<vmem>>, vector<1x8x8x128xbf16>,
    %cst_52 = arith.constant dense<0.000000e+00> : vector<8x128xf32>
    %86 = vector.multi_reduction <add>, %81, %cst_52 [0] : vector<8x8x128xf32> to vector<8x128xf32>
    %cst_53 = arith.constant dense<0.000000e+00> : vector<128xf32>
    %87 = vector.multi_reduction <add>, %86, %cst_53 [0] : vector<8x128xf32> to vector<128xf32>
    %88 = vector.shape_cast %87 : vector<128xf32> to vector<1x128xf32>
    %cst_54 = arith.constant 1.562500e-02 : f32
    %89 = vector.broadcast %cst_54 : f32 to vector<1x128xf32>
    %90 = arith.mulf %88, %89 : vector<1x128xf32>
    %c0_55 = arith.constant 0 : index
    %c0_56 = arith.constant 0 : index
    %c0_57 = arith.constant 0 : index
    %91 = vector.load %arg6[%c0_55, %c0_56, %c0_57] : memref<1x1x128xf32, #tpu.memory_space<vmem>>, vector<1x1x128xf32>
    %92 = vector.shape_cast %91 : vector<1x1x128xf32> to vector<1x128xf32>
    %93 = vector.shape_cast %90 : vector<1x128xf32> to vector<1x1x128xf32>
    tpu.vector_store %arg6[%c0_55, %c0_56, %c0_57], %93 {strides = array<i32>} : memref<1x1x128xf32, #tpu.memory_space<vmem>>, vector<1x1x128xf32>,
    return
  }
  func.func @transform_0(%arg0: i32, %arg1: i32) -> (i32, i32, i32, i32) {
    %c0_i32 = arith.constant 0 : i32
    %c0_i32_0 = arith.constant 0 : i32
    %c0_i32_1 = arith.constant 0 : i32
    return %arg0, %c0_i32, %c0_i32_0, %arg1 : i32, i32, i32, i32
  }
  func.func @transform_1(%arg0: i32, %arg1: i32) -> (i32, i32) {
    %c0_i32 = arith.constant 0 : i32
    %c0_i32_0 = arith.constant 0 : i32
    return %c0_i32, %arg1 : i32, i32
  }
  func.func @transform_2(%arg0: i32, %arg1: i32) -> (i32, i32) {
    %c0_i32 = arith.constant 0 : i32
    %c0_i32_0 = arith.constant 0 : i32
    return %c0_i32, %arg1 : i32, i32
  }
  func.func @transform_3(%arg0: i32, %arg1: i32) -> (i32, i32, i32, i32) {
    %c0_i32 = arith.constant 0 : i32
    %c0_i32_0 = arith.constant 0 : i32
    %c0_i32_1 = arith.constant 0 : i32
    return %arg0, %c0_i32, %c0_i32_0, %arg1 : i32, i32, i32, i32
  }
  func.func @transform_4(%arg0: i32, %arg1: i32) -> (i32, i32, i32) {
    %c0_i32 = arith.constant 0 : i32
    %c0_i32_0 = arith.constant 0 : i32
    return %arg0, %c0_i32, %arg1 : i32, i32, i32
  }
}

module attributes {stable_mosaic.version = 11 : i64} {
  func.func @_mm_kernel(%arg0: i32, %arg1: memref<128x128xbf16, #tpu.memory_space<vmem>>, %arg2: memref<128x256xbf16, #tpu.memory_space<vmem>>, %arg3: memref<1x256xf32, #tpu.memory_space<vmem>>, %arg4: memref<128x256xbf16, #tpu.memory_space<vmem>>) attributes {dimension_semantics = [#tpu.dimension_semantics<parallel>], iteration_bounds = array<i64: 1>, scalar_prefetch = 0 : i64, scratch_operands = 0 : i64, tpu.core_type = #tpu.core_type<tc>, window_params = [{transform_indices = @transform_0, window_bounds = array<i64: 128, 128>}, {pipeline_mode = #tpu.pipeline_mode<synchronous>, transform_indices = @transform_1, window_bounds = array<i64: 128, 256>}, {pipeline_mode = #tpu.pipeline_mode<synchronous>, transform_indices = @transform_2, window_bounds = array<i64: 1, 256>}, {transform_indices = @transform_3, window_bounds = array<i64: 128, 256>}]} {
    %c0 = arith.constant 0 : index
    %c0_0 = arith.constant 0 : index
    %0 = vector.load %arg1[%c0, %c0_0] : memref<128x128xbf16, #tpu.memory_space<vmem>>, vector<128x128xbf16>
    %c0_1 = arith.constant 0 : index
    %c0_2 = arith.constant 0 : index
    %1 = vector.load %arg2[%c0_1, %c0_2] : memref<128x256xbf16, #tpu.memory_space<vmem>>, vector<128x256xbf16>
    %cst = arith.constant dense<0.000000e+00> : vector<128x256xf32>
    %2 = tpu.matmul %0, %1, %cst {dimension_numbers = #tpu.dot_dimension_numbers<[1], [0], [0], [1], [0, 0, 1, 1], [], []>} : vector<128x128xbf16>, vector<128x256xbf16>, vector<128x256xf32> -> vector<128x256xf32>
    %c0_3 = arith.constant 0 : index
    %c0_4 = arith.constant 0 : index
    %3 = vector.load %arg3[%c0_3, %c0_4] : memref<1x256xf32, #tpu.memory_space<vmem>>, vector<1x256xf32>
    %4 = vector.broadcast %3 : vector<1x256xf32> to vector<128x256xf32>
    %5 = arith.addf %2, %4 : vector<128x256xf32>
    %cst_5 = arith.constant 0.000000e+00 : f32
    %6 = vector.broadcast %cst_5 : f32 to vector<128x256xf32>
    %7 = arith.subf %6, %5 : vector<128x256xf32>
    %8 = math.exp %7 : vector<128x256xf32>
    %cst_6 = arith.constant 1.000000e+00 : f32
    %9 = vector.broadcast %cst_6 : f32 to vector<128x256xf32>
    %10 = arith.addf %9, %8 : vector<128x256xf32>
    %11 = tpu.reciprocal %10 {approx = true} : vector<128x256xf32> -> vector<128x256xf32>
    %12 = arith.mulf %5, %11 : vector<128x256xf32>
    %13 = arith.truncf %12 : vector<128x256xf32> to vector<128x256xbf16>
    %c0_7 = arith.constant 0 : index
    %c0_8 = arith.constant 0 : index
    %14 = vector.load %arg4[%c0_7, %c0_8] : memref<128x256xbf16, #tpu.memory_space<vmem>>, vector<128x256xbf16>
    tpu.vector_store %arg4[%c0_7, %c0_8], %13 {strides = array<i32>} : memref<128x256xbf16, #tpu.memory_space<vmem>>, vector<128x256xbf16>,
    return
  }
  func.func @transform_0(%arg0: i32) -> (i32, i32) {
    %c0_i32 = arith.constant 0 : i32
    %c0_i32_0 = arith.constant 0 : i32
    return %arg0, %c0_i32 : i32, i32
  }
  func.func @transform_1(%arg0: i32) -> (i32, i32) {
    %c0_i32 = arith.constant 0 : i32
    %c0_i32_0 = arith.constant 0 : i32
    %c0_i32_1 = arith.constant 0 : i32
    return %c0_i32, %c0_i32_0 : i32, i32
  }
  func.func @transform_2(%arg0: i32) -> (i32, i32) {
    %c0_i32 = arith.constant 0 : i32
    %c0_i32_0 = arith.constant 0 : i32
    %c0_i32_1 = arith.constant 0 : i32
    return %c0_i32, %c0_i32_0 : i32, i32
  }
  func.func @transform_3(%arg0: i32) -> (i32, i32) {
    %c0_i32 = arith.constant 0 : i32
    %c0_i32_0 = arith.constant 0 : i32
    return %arg0, %c0_i32 : i32, i32
  }
}

module attributes {stable_mosaic.version = 11 : i64} {
  func.func @_proj_kernel(%arg0: i32, %arg1: i32, %arg2: memref<1x64x128xbf16, #tpu.memory_space<vmem>>, %arg3: memref<1x1x128xf32, #tpu.memory_space<vmem>>, %arg4: memref<128x4xf32, #tpu.memory_space<vmem>>, %arg5: memref<1x4xf32, #tpu.memory_space<vmem>>, %arg6: memref<4x128xf32, #tpu.memory_space<vmem>>, %arg7: memref<1x128xf32, #tpu.memory_space<vmem>>, %arg8: memref<128x128xbf16, #tpu.memory_space<vmem>>, %arg9: memref<1x128xf32, #tpu.memory_space<vmem>>, %arg10: memref<1x64x128xbf16, #tpu.memory_space<vmem>>) attributes {dimension_semantics = [#tpu.dimension_semantics<parallel>, #tpu.dimension_semantics<parallel>], iteration_bounds = array<i64: 2, 1>, scalar_prefetch = 0 : i64, scratch_operands = 0 : i64, tpu.core_type = #tpu.core_type<tc>, window_params = [{transform_indices = @transform_0, window_bounds = array<i64: 1, 64, 128>}, {transform_indices = @transform_1, window_bounds = array<i64: 1, 1, 128>}, {pipeline_mode = #tpu.pipeline_mode<synchronous>, transform_indices = @transform_2, window_bounds = array<i64: 128, 4>}, {pipeline_mode = #tpu.pipeline_mode<synchronous>, transform_indices = @transform_3, window_bounds = array<i64: 1, 4>}, {pipeline_mode = #tpu.pipeline_mode<synchronous>, transform_indices = @transform_4, window_bounds = array<i64: 4, 128>}, {pipeline_mode = #tpu.pipeline_mode<synchronous>, transform_indices = @transform_5, window_bounds = array<i64: 1, 128>}, {pipeline_mode = #tpu.pipeline_mode<synchronous>, transform_indices = @transform_6, window_bounds = array<i64: 128, 128>}, {pipeline_mode = #tpu.pipeline_mode<synchronous>, transform_indices = @transform_7, window_bounds = array<i64: 1, 128>}, {transform_indices = @transform_8, window_bounds = array<i64: 1, 64, 128>}]} {
    %c0 = arith.constant 0 : index
    %c0_0 = arith.constant 0 : index
    %c0_1 = arith.constant 0 : index
    %0 = vector.load %arg3[%c0, %c0_0, %c0_1] : memref<1x1x128xf32, #tpu.memory_space<vmem>>, vector<1x1x128xf32>
    %1 = vector.shape_cast %0 : vector<1x1x128xf32> to vector<1x128xf32>
    %c0_2 = arith.constant 0 : index
    %c0_3 = arith.constant 0 : index
    %2 = vector.load %arg4[%c0_2, %c0_3] : memref<128x4xf32, #tpu.memory_space<vmem>>, vector<128x4xf32>
    %cst = arith.constant dense<0.000000e+00> : vector<1x4xf32>
    %3 = tpu.matmul %1, %2, %cst {dimension_numbers = #tpu.dot_dimension_numbers<[1], [0], [0], [1], [0, 0, 1, 1], [], []>} : vector<1x128xf32>, vector<128x4xf32>, vector<1x4xf32> -> vector<1x4xf32>
    %c0_4 = arith.constant 0 : index
    %c0_5 = arith.constant 0 : index
    %4 = vector.load %arg5[%c0_4, %c0_5] : memref<1x4xf32, #tpu.memory_space<vmem>>, vector<1x4xf32>
    %5 = arith.addf %3, %4 : vector<1x4xf32>
    %cst_6 = arith.constant 0.000000e+00 : f32
    %6 = vector.broadcast %cst_6 : f32 to vector<1x4xf32>
    %7 = arith.subf %6, %5 : vector<1x4xf32>
    %8 = math.exp %7 : vector<1x4xf32>
    %cst_7 = arith.constant 1.000000e+00 : f32
    %9 = vector.broadcast %cst_7 : f32 to vector<1x4xf32>
    %10 = arith.addf %9, %8 : vector<1x4xf32>
    %11 = tpu.reciprocal %10 {approx = true} : vector<1x4xf32> -> vector<1x4xf32>
    %12 = arith.mulf %5, %11 : vector<1x4xf32>
    %c0_8 = arith.constant 0 : index
    %c0_9 = arith.constant 0 : index
    %13 = vector.load %arg6[%c0_8, %c0_9] : memref<4x128xf32, #tpu.memory_space<vmem>>, vector<4x128xf32>
    %cst_10 = arith.constant dense<0.000000e+00> : vector<1x128xf32>
    %14 = tpu.matmul %12, %13, %cst_10 {dimension_numbers = #tpu.dot_dimension_numbers<[1], [0], [0], [1], [0, 0, 1, 1], [], []>} : vector<1x4xf32>, vector<4x128xf32>, vector<1x128xf32> -> vector<1x128xf32>
    %c0_11 = arith.constant 0 : index
    %c0_12 = arith.constant 0 : index
    %15 = vector.load %arg7[%c0_11, %c0_12] : memref<1x128xf32, #tpu.memory_space<vmem>>, vector<1x128xf32>
    %16 = arith.addf %14, %15 : vector<1x128xf32>
    %cst_13 = arith.constant 0.000000e+00 : f32
    %17 = vector.broadcast %cst_13 : f32 to vector<1x128xf32>
    %18 = arith.subf %17, %16 : vector<1x128xf32>
    %19 = math.exp %18 : vector<1x128xf32>
    %cst_14 = arith.constant 1.000000e+00 : f32
    %20 = vector.broadcast %cst_14 : f32 to vector<1x128xf32>
    %21 = arith.addf %20, %19 : vector<1x128xf32>
    %22 = tpu.reciprocal %21 {approx = true} : vector<1x128xf32> -> vector<1x128xf32>
    %c0_15 = arith.constant 0 : index
    %c0_16 = arith.constant 0 : index
    %c0_17 = arith.constant 0 : index
    %23 = vector.load %arg2[%c0_15, %c0_16, %c0_17] : memref<1x64x128xbf16, #tpu.memory_space<vmem>>, vector<1x64x128xbf16>
    %24 = vector.shape_cast %23 : vector<1x64x128xbf16> to vector<64x128xbf16>
    %25 = arith.truncf %22 : vector<1x128xf32> to vector<1x128xbf16>
    %26 = vector.broadcast %25 : vector<1x128xbf16> to vector<64x128xbf16>
    %27 = arith.mulf %24, %26 : vector<64x128xbf16>
    %c0_18 = arith.constant 0 : index
    %c0_19 = arith.constant 0 : index
    %28 = vector.load %arg8[%c0_18, %c0_19] : memref<128x128xbf16, #tpu.memory_space<vmem>>, vector<128x128xbf16>
    %cst_20 = arith.constant dense<0.000000e+00> : vector<64x128xf32>
    %29 = tpu.matmul %27, %28, %cst_20 {dimension_numbers = #tpu.dot_dimension_numbers<[1], [0], [0], [1], [0, 0, 1, 1], [], []>} : vector<64x128xbf16>, vector<128x128xbf16>, vector<64x128xf32> -> vector<64x128xf32>
    %c0_21 = arith.constant 0 : index
    %c0_22 = arith.constant 0 : index
    %30 = vector.load %arg9[%c0_21, %c0_22] : memref<1x128xf32, #tpu.memory_space<vmem>>, vector<1x128xf32>
    %31 = vector.broadcast %30 : vector<1x128xf32> to vector<64x128xf32>
    %32 = arith.addf %29, %31 : vector<64x128xf32>
    %33 = arith.truncf %32 : vector<64x128xf32> to vector<64x128xbf16>
    %c0_23 = arith.constant 0 : index
    %c0_24 = arith.constant 0 : index
    %c0_25 = arith.constant 0 : index
    %34 = vector.load %arg10[%c0_23, %c0_24, %c0_25] : memref<1x64x128xbf16, #tpu.memory_space<vmem>>, vector<1x64x128xbf16>
    %35 = vector.shape_cast %34 : vector<1x64x128xbf16> to vector<64x128xbf16>
    %36 = vector.shape_cast %33 : vector<64x128xbf16> to vector<1x64x128xbf16>
    tpu.vector_store %arg10[%c0_23, %c0_24, %c0_25], %36 {strides = array<i32>} : memref<1x64x128xbf16, #tpu.memory_space<vmem>>, vector<1x64x128xbf16>,
    return
  }
  func.func @transform_0(%arg0: i32, %arg1: i32) -> (i32, i32, i32) {
    %c0_i32 = arith.constant 0 : i32
    %c0_i32_0 = arith.constant 0 : i32
    return %arg0, %arg1, %c0_i32 : i32, i32, i32
  }
  func.func @transform_1(%arg0: i32, %arg1: i32) -> (i32, i32, i32) {
    %c0_i32 = arith.constant 0 : i32
    %c0_i32_0 = arith.constant 0 : i32
    %c0_i32_1 = arith.constant 0 : i32
    return %arg0, %c0_i32, %c0_i32_0 : i32, i32, i32
  }
  func.func @transform_2(%arg0: i32, %arg1: i32) -> (i32, i32) {
    %c0_i32 = arith.constant 0 : i32
    %c0_i32_0 = arith.constant 0 : i32
    %c0_i32_1 = arith.constant 0 : i32
    return %c0_i32, %c0_i32_0 : i32, i32
  }
  func.func @transform_3(%arg0: i32, %arg1: i32) -> (i32, i32) {
    %c0_i32 = arith.constant 0 : i32
    %c0_i32_0 = arith.constant 0 : i32
    %c0_i32_1 = arith.constant 0 : i32
    return %c0_i32, %c0_i32_0 : i32, i32
  }
  func.func @transform_4(%arg0: i32, %arg1: i32) -> (i32, i32) {
    %c0_i32 = arith.constant 0 : i32
    %c0_i32_0 = arith.constant 0 : i32
    %c0_i32_1 = arith.constant 0 : i32
    return %c0_i32, %c0_i32_0 : i32, i32
  }
  func.func @transform_5(%arg0: i32, %arg1: i32) -> (i32, i32) {
    %c0_i32 = arith.constant 0 : i32
    %c0_i32_0 = arith.constant 0 : i32
    %c0_i32_1 = arith.constant 0 : i32
    return %c0_i32, %c0_i32_0 : i32, i32
  }
  func.func @transform_6(%arg0: i32, %arg1: i32) -> (i32, i32) {
    %c0_i32 = arith.constant 0 : i32
    %c0_i32_0 = arith.constant 0 : i32
    %c0_i32_1 = arith.constant 0 : i32
    return %c0_i32, %c0_i32_0 : i32, i32
  }
  func.func @transform_7(%arg0: i32, %arg1: i32) -> (i32, i32) {
    %c0_i32 = arith.constant 0 : i32
    %c0_i32_0 = arith.constant 0 : i32
    %c0_i32_1 = arith.constant 0 : i32
    return %c0_i32, %c0_i32_0 : i32, i32
  }
  func.func @transform_8(%arg0: i32, %arg1: i32) -> (i32, i32, i32) {
    %c0_i32 = arith.constant 0 : i32
    %c0_i32_0 = arith.constant 0 : i32
    return %arg0, %arg1, %c0_i32 : i32, i32, i32
  }
}

module attributes {stable_mosaic.version = 11 : i64} {
  func.func @_dw_kernel(%arg0: i32, %arg1: i32, %arg2: memref<4x6x6x128xbf16, #tpu.memory_space<vmem>>, %arg3: memref<25x128xf32, #tpu.memory_space<vmem>>, %arg4: memref<1x128xf32, #tpu.memory_space<vmem>>, %arg5: memref<1x4x4x128xbf16, #tpu.memory_space<vmem>>, %arg6: memref<1x1x128xf32, #tpu.memory_space<vmem>>) attributes {dimension_semantics = [#tpu.dimension_semantics<parallel>, #tpu.dimension_semantics<parallel>], iteration_bounds = array<i64: 2, 2>, scalar_prefetch = 0 : i64, scratch_operands = 0 : i64, tpu.core_type = #tpu.core_type<tc>, window_params = [{transform_indices = @transform_0, window_bounds = array<i64: 4, 6, 6, 128>}, {transform_indices = @transform_1, window_bounds = array<i64: 25, 128>}, {transform_indices = @transform_2, window_bounds = array<i64: 1, 128>}, {transform_indices = @transform_3, window_bounds = array<i64: 1, 4, 4, 128>}, {transform_indices = @transform_4, window_bounds = array<i64: 1, 1, 128>}]} {
    %c0 = arith.constant 0 : index
    %c0_0 = arith.constant 0 : index
    %c0_1 = arith.constant 0 : index
    %c0_2 = arith.constant 0 : index
    %0 = vector.load %arg2[%c0, %c0_0, %c0_1, %c0_2] : memref<4x6x6x128xbf16, #tpu.memory_space<vmem>>, vector<1x4x4x128xbf16>
    %1 = vector.shape_cast %0 : vector<1x4x4x128xbf16> to vector<4x4x128xbf16>
    %c0_3 = arith.constant 0 : index
    %c0_4 = arith.constant 0 : index
    %2 = vector.load %arg3[%c0_3, %c0_4] : memref<25x128xf32, #tpu.memory_space<vmem>>, vector<1x128xf32>
    %3 = arith.extf %1 : vector<4x4x128xbf16> to vector<4x4x128xf32>
    %4 = vector.shape_cast %2 : vector<1x128xf32> to vector<1x1x128xf32>
    %5 = vector.broadcast %4 : vector<1x1x128xf32> to vector<4x4x128xf32>
    %6 = arith.mulf %3, %5 : vector<4x4x128xf32>
    %c1 = arith.constant 1 : index
    %c0_5 = arith.constant 0 : index
    %c0_6 = arith.constant 0 : index
    %c0_7 = arith.constant 0 : index
    %7 = vector.load %arg2[%c1, %c0_5, %c0_6, %c0_7] : memref<4x6x6x128xbf16, #tpu.memory_space<vmem>>, vector<1x4x4x128xbf16>
    %8 = vector.shape_cast %7 : vector<1x4x4x128xbf16> to vector<4x4x128xbf16>
    %c1_8 = arith.constant 1 : index
    %c0_9 = arith.constant 0 : index
    %9 = vector.load %arg3[%c1_8, %c0_9] : memref<25x128xf32, #tpu.memory_space<vmem>>, vector<1x128xf32>
    %10 = arith.extf %8 : vector<4x4x128xbf16> to vector<4x4x128xf32>
    %11 = vector.shape_cast %9 : vector<1x128xf32> to vector<1x1x128xf32>
    %12 = vector.broadcast %11 : vector<1x1x128xf32> to vector<4x4x128xf32>
    %13 = arith.mulf %10, %12 : vector<4x4x128xf32>
    %14 = arith.addf %6, %13 : vector<4x4x128xf32>
    %c0_10 = arith.constant 0 : index
    %c0_11 = arith.constant 0 : index
    %c1_12 = arith.constant 1 : index
    %c0_13 = arith.constant 0 : index
    %15 = vector.load %arg2[%c0_10, %c0_11, %c1_12, %c0_13] : memref<4x6x6x128xbf16, #tpu.memory_space<vmem>>, vector<1x4x4x128xbf16>
    %16 = vector.shape_cast %15 : vector<1x4x4x128xbf16> to vector<4x4x128xbf16>
    %c2 = arith.constant 2 : index
    %c0_14 = arith.constant 0 : index
    %17 = vector.load %arg3[%c2, %c0_14] : memref<25x128xf32, #tpu.memory_space<vmem>>, vector<1x128xf32>
    %18 = arith.extf %16 : vector<4x4x128xbf16> to vector<4x4x128xf32>
    %19 = vector.shape_cast %17 : vector<1x128xf32> to vector<1x1x128xf32>
    %20 = vector.broadcast %19 : vector<1x1x128xf32> to vector<4x4x128xf32>
    %21 = arith.mulf %18, %20 : vector<4x4x128xf32>
    %22 = arith.addf %14, %21 : vector<4x4x128xf32>
    %c1_15 = arith.constant 1 : index
    %c0_16 = arith.constant 0 : index
    %c1_17 = arith.constant 1 : index
    %c0_18 = arith.constant 0 : index
    %23 = vector.load %arg2[%c1_15, %c0_16, %c1_17, %c0_18] : memref<4x6x6x128xbf16, #tpu.memory_space<vmem>>, vector<1x4x4x128xbf16>
    %24 = vector.shape_cast %23 : vector<1x4x4x128xbf16> to vector<4x4x128xbf16>
    %c3 = arith.constant 3 : index
    %c0_19 = arith.constant 0 : index
    %25 = vector.load %arg3[%c3, %c0_19] : memref<25x128xf32, #tpu.memory_space<vmem>>, vector<1x128xf32>
    %26 = arith.extf %24 : vector<4x4x128xbf16> to vector<4x4x128xf32>
    %27 = vector.shape_cast %25 : vector<1x128xf32> to vector<1x1x128xf32>
    %28 = vector.broadcast %27 : vector<1x1x128xf32> to vector<4x4x128xf32>
    %29 = arith.mulf %26, %28 : vector<4x4x128xf32>
    %30 = arith.addf %22, %29 : vector<4x4x128xf32>
    %c0_20 = arith.constant 0 : index
    %c0_21 = arith.constant 0 : index
    %c2_22 = arith.constant 2 : index
    %c0_23 = arith.constant 0 : index
    %31 = vector.load %arg2[%c0_20, %c0_21, %c2_22, %c0_23] : memref<4x6x6x128xbf16, #tpu.memory_space<vmem>>, vector<1x4x4x128xbf16>
    %32 = vector.shape_cast %31 : vector<1x4x4x128xbf16> to vector<4x4x128xbf16>
    %c4 = arith.constant 4 : index
    %c0_24 = arith.constant 0 : index
    %33 = vector.load %arg3[%c4, %c0_24] : memref<25x128xf32, #tpu.memory_space<vmem>>, vector<1x128xf32>
    %34 = arith.extf %32 : vector<4x4x128xbf16> to vector<4x4x128xf32>
    %35 = vector.shape_cast %33 : vector<1x128xf32> to vector<1x1x128xf32>
    %36 = vector.broadcast %35 : vector<1x1x128xf32> to vector<4x4x128xf32>
    %37 = arith.mulf %34, %36 : vector<4x4x128xf32>
    %38 = arith.addf %30, %37 : vector<4x4x128xf32>
    %c2_25 = arith.constant 2 : index
    %c0_26 = arith.constant 0 : index
    %c0_27 = arith.constant 0 : index
    %c0_28 = arith.constant 0 : index
    %39 = vector.load %arg2[%c2_25, %c0_26, %c0_27, %c0_28] : memref<4x6x6x128xbf16, #tpu.memory_space<vmem>>, vector<1x4x4x128xbf16>
    %40 = vector.shape_cast %39 : vector<1x4x4x128xbf16> to vector<4x4x128xbf16>
    %c5 = arith.constant 5 : index
    %c0_29 = arith.constant 0 : index
    %41 = vector.load %arg3[%c5, %c0_29] : memref<25x128xf32, #tpu.memory_space<vmem>>, vector<1x128xf32>
    %42 = arith.extf %40 : vector<4x4x128xbf16> to vector<4x4x128xf32>
    %43 = vector.shape_cast %41 : vector<1x128xf32> to vector<1x1x128xf32>
    %44 = vector.broadcast %43 : vector<1x1x128xf32> to vector<4x4x128xf32>
    %45 = arith.mulf %42, %44 : vector<4x4x128xf32>
    %46 = arith.addf %38, %45 : vector<4x4x128xf32>
    %c3_30 = arith.constant 3 : index
    %c0_31 = arith.constant 0 : index
    %c0_32 = arith.constant 0 : index
    %c0_33 = arith.constant 0 : index
    %47 = vector.load %arg2[%c3_30, %c0_31, %c0_32, %c0_33] : memref<4x6x6x128xbf16, #tpu.memory_space<vmem>>, vector<1x4x4x128xbf16>
    %48 = vector.shape_cast %47 : vector<1x4x4x128xbf16> to vector<4x4x128xbf16>
    %c6 = arith.constant 6 : index
    %c0_34 = arith.constant 0 : index
    %49 = vector.load %arg3[%c6, %c0_34] : memref<25x128xf32, #tpu.memory_space<vmem>>, vector<1x128xf32>
    %50 = arith.extf %48 : vector<4x4x128xbf16> to vector<4x4x128xf32>
    %51 = vector.shape_cast %49 : vector<1x128xf32> to vector<1x1x128xf32>
    %52 = vector.broadcast %51 : vector<1x1x128xf32> to vector<4x4x128xf32>
    %53 = arith.mulf %50, %52 : vector<4x4x128xf32>
    %54 = arith.addf %46, %53 : vector<4x4x128xf32>
    %c2_35 = arith.constant 2 : index
    %c0_36 = arith.constant 0 : index
    %c1_37 = arith.constant 1 : index
    %c0_38 = arith.constant 0 : index
    %55 = vector.load %arg2[%c2_35, %c0_36, %c1_37, %c0_38] : memref<4x6x6x128xbf16, #tpu.memory_space<vmem>>, vector<1x4x4x128xbf16>
    %56 = vector.shape_cast %55 : vector<1x4x4x128xbf16> to vector<4x4x128xbf16>
    %c7 = arith.constant 7 : index
    %c0_39 = arith.constant 0 : index
    %57 = vector.load %arg3[%c7, %c0_39] : memref<25x128xf32, #tpu.memory_space<vmem>>, vector<1x128xf32>
    %58 = arith.extf %56 : vector<4x4x128xbf16> to vector<4x4x128xf32>
    %59 = vector.shape_cast %57 : vector<1x128xf32> to vector<1x1x128xf32>
    %60 = vector.broadcast %59 : vector<1x1x128xf32> to vector<4x4x128xf32>
    %61 = arith.mulf %58, %60 : vector<4x4x128xf32>
    %62 = arith.addf %54, %61 : vector<4x4x128xf32>
    %c3_40 = arith.constant 3 : index
    %c0_41 = arith.constant 0 : index
    %c1_42 = arith.constant 1 : index
    %c0_43 = arith.constant 0 : index
    %63 = vector.load %arg2[%c3_40, %c0_41, %c1_42, %c0_43] : memref<4x6x6x128xbf16, #tpu.memory_space<vmem>>, vector<1x4x4x128xbf16>
    %64 = vector.shape_cast %63 : vector<1x4x4x128xbf16> to vector<4x4x128xbf16>
    %c8 = arith.constant 8 : index
    %c0_44 = arith.constant 0 : index
    %65 = vector.load %arg3[%c8, %c0_44] : memref<25x128xf32, #tpu.memory_space<vmem>>, vector<1x128xf32>
    %66 = arith.extf %64 : vector<4x4x128xbf16> to vector<4x4x128xf32>
    %67 = vector.shape_cast %65 : vector<1x128xf32> to vector<1x1x128xf32>
    %68 = vector.broadcast %67 : vector<1x1x128xf32> to vector<4x4x128xf32>
    %69 = arith.mulf %66, %68 : vector<4x4x128xf32>
    %70 = arith.addf %62, %69 : vector<4x4x128xf32>
    %c2_45 = arith.constant 2 : index
    %c0_46 = arith.constant 0 : index
    %c2_47 = arith.constant 2 : index
    %c0_48 = arith.constant 0 : index
    %71 = vector.load %arg2[%c2_45, %c0_46, %c2_47, %c0_48] : memref<4x6x6x128xbf16, #tpu.memory_space<vmem>>, vector<1x4x4x128xbf16>
    %72 = vector.shape_cast %71 : vector<1x4x4x128xbf16> to vector<4x4x128xbf16>
    %c9 = arith.constant 9 : index
    %c0_49 = arith.constant 0 : index
    %73 = vector.load %arg3[%c9, %c0_49] : memref<25x128xf32, #tpu.memory_space<vmem>>, vector<1x128xf32>
    %74 = arith.extf %72 : vector<4x4x128xbf16> to vector<4x4x128xf32>
    %75 = vector.shape_cast %73 : vector<1x128xf32> to vector<1x1x128xf32>
    %76 = vector.broadcast %75 : vector<1x1x128xf32> to vector<4x4x128xf32>
    %77 = arith.mulf %74, %76 : vector<4x4x128xf32>
    %78 = arith.addf %70, %77 : vector<4x4x128xf32>
    %c0_50 = arith.constant 0 : index
    %c1_51 = arith.constant 1 : index
    %c0_52 = arith.constant 0 : index
    %c0_53 = arith.constant 0 : index
    %79 = vector.load %arg2[%c0_50, %c1_51, %c0_52, %c0_53] : memref<4x6x6x128xbf16, #tpu.memory_space<vmem>>, vector<1x4x4x128xbf16>
    %80 = vector.shape_cast %79 : vector<1x4x4x128xbf16> to vector<4x4x128xbf16>
    %c10 = arith.constant 10 : index
    %c0_54 = arith.constant 0 : index
    %81 = vector.load %arg3[%c10, %c0_54] : memref<25x128xf32, #tpu.memory_space<vmem>>, vector<1x128xf32>
    %82 = arith.extf %80 : vector<4x4x128xbf16> to vector<4x4x128xf32>
    %83 = vector.shape_cast %81 : vector<1x128xf32> to vector<1x1x128xf32>
    %84 = vector.broadcast %83 : vector<1x1x128xf32> to vector<4x4x128xf32>
    %85 = arith.mulf %82, %84 : vector<4x4x128xf32>
    %86 = arith.addf %78, %85 : vector<4x4x128xf32>
    %c1_55 = arith.constant 1 : index
    %c1_56 = arith.constant 1 : index
    %c0_57 = arith.constant 0 : index
    %c0_58 = arith.constant 0 : index
    %87 = vector.load %arg2[%c1_55, %c1_56, %c0_57, %c0_58] : memref<4x6x6x128xbf16, #tpu.memory_space<vmem>>, vector<1x4x4x128xbf16>
    %88 = vector.shape_cast %87 : vector<1x4x4x128xbf16> to vector<4x4x128xbf16>
    %c11 = arith.constant 11 : index
    %c0_59 = arith.constant 0 : index
    %89 = vector.load %arg3[%c11, %c0_59] : memref<25x128xf32, #tpu.memory_space<vmem>>, vector<1x128xf32>
    %90 = arith.extf %88 : vector<4x4x128xbf16> to vector<4x4x128xf32>
    %91 = vector.shape_cast %89 : vector<1x128xf32> to vector<1x1x128xf32>
    %92 = vector.broadcast %91 : vector<1x1x128xf32> to vector<4x4x128xf32>
    %93 = arith.mulf %90, %92 : vector<4x4x128xf32>
    %94 = arith.addf %86, %93 : vector<4x4x128xf32>
    %c0_60 = arith.constant 0 : index
    %c1_61 = arith.constant 1 : index
    %c1_62 = arith.constant 1 : index
    %c0_63 = arith.constant 0 : index
    %95 = vector.load %arg2[%c0_60, %c1_61, %c1_62, %c0_63] : memref<4x6x6x128xbf16, #tpu.memory_space<vmem>>, vector<1x4x4x128xbf16>
    %96 = vector.shape_cast %95 : vector<1x4x4x128xbf16> to vector<4x4x128xbf16>
    %c12 = arith.constant 12 : index
    %c0_64 = arith.constant 0 : index
    %97 = vector.load %arg3[%c12, %c0_64] : memref<25x128xf32, #tpu.memory_space<vmem>>, vector<1x128xf32>
    %98 = arith.extf %96 : vector<4x4x128xbf16> to vector<4x4x128xf32>
    %99 = vector.shape_cast %97 : vector<1x128xf32> to vector<1x1x128xf32>
    %100 = vector.broadcast %99 : vector<1x1x128xf32> to vector<4x4x128xf32>
    %101 = arith.mulf %98, %100 : vector<4x4x128xf32>
    %102 = arith.addf %94, %101 : vector<4x4x128xf32>
    %c1_65 = arith.constant 1 : index
    %c1_66 = arith.constant 1 : index
    %c1_67 = arith.constant 1 : index
    %c0_68 = arith.constant 0 : index
    %103 = vector.load %arg2[%c1_65, %c1_66, %c1_67, %c0_68] : memref<4x6x6x128xbf16, #tpu.memory_space<vmem>>, vector<1x4x4x128xbf16>
    %104 = vector.shape_cast %103 : vector<1x4x4x128xbf16> to vector<4x4x128xbf16>
    %c13 = arith.constant 13 : index
    %c0_69 = arith.constant 0 : index
    %105 = vector.load %arg3[%c13, %c0_69] : memref<25x128xf32, #tpu.memory_space<vmem>>, vector<1x128xf32>
    %106 = arith.extf %104 : vector<4x4x128xbf16> to vector<4x4x128xf32>
    %107 = vector.shape_cast %105 : vector<1x128xf32> to vector<1x1x128xf32>
    %108 = vector.broadcast %107 : vector<1x1x128xf32> to vector<4x4x128xf32>
    %109 = arith.mulf %106, %108 : vector<4x4x128xf32>
    %110 = arith.addf %102, %109 : vector<4x4x128xf32>
    %c0_70 = arith.constant 0 : index
    %c1_71 = arith.constant 1 : index
    %c2_72 = arith.constant 2 : index
    %c0_73 = arith.constant 0 : index
    %111 = vector.load %arg2[%c0_70, %c1_71, %c2_72, %c0_73] : memref<4x6x6x128xbf16, #tpu.memory_space<vmem>>, vector<1x4x4x128xbf16>
    %112 = vector.shape_cast %111 : vector<1x4x4x128xbf16> to vector<4x4x128xbf16>
    %c14 = arith.constant 14 : index
    %c0_74 = arith.constant 0 : index
    %113 = vector.load %arg3[%c14, %c0_74] : memref<25x128xf32, #tpu.memory_space<vmem>>, vector<1x128xf32>
    %114 = arith.extf %112 : vector<4x4x128xbf16> to vector<4x4x128xf32>
    %115 = vector.shape_cast %113 : vector<1x128xf32> to vector<1x1x128xf32>
    %116 = vector.broadcast %115 : vector<1x1x128xf32> to vector<4x4x128xf32>
    %117 = arith.mulf %114, %116 : vector<4x4x128xf32>
    %118 = arith.addf %110, %117 : vector<4x4x128xf32>
    %c2_75 = arith.constant 2 : index
    %c1_76 = arith.constant 1 : index
    %c0_77 = arith.constant 0 : index
    %c0_78 = arith.constant 0 : index
    %119 = vector.load %arg2[%c2_75, %c1_76, %c0_77, %c0_78] : memref<4x6x6x128xbf16, #tpu.memory_space<vmem>>, vector<1x4x4x128xbf16>
    %120 = vector.shape_cast %119 : vector<1x4x4x128xbf16> to vector<4x4x128xbf16>
    %c15 = arith.constant 15 : index
    %c0_79 = arith.constant 0 : index
    %121 = vector.load %arg3[%c15, %c0_79] : memref<25x128xf32, #tpu.memory_space<vmem>>, vector<1x128xf32>
    %122 = arith.extf %120 : vector<4x4x128xbf16> to vector<4x4x128xf32>
    %123 = vector.shape_cast %121 : vector<1x128xf32> to vector<1x1x128xf32>
    %124 = vector.broadcast %123 : vector<1x1x128xf32> to vector<4x4x128xf32>
    %125 = arith.mulf %122, %124 : vector<4x4x128xf32>
    %126 = arith.addf %118, %125 : vector<4x4x128xf32>
    %c3_80 = arith.constant 3 : index
    %c1_81 = arith.constant 1 : index
    %c0_82 = arith.constant 0 : index
    %c0_83 = arith.constant 0 : index
    %127 = vector.load %arg2[%c3_80, %c1_81, %c0_82, %c0_83] : memref<4x6x6x128xbf16, #tpu.memory_space<vmem>>, vector<1x4x4x128xbf16>
    %128 = vector.shape_cast %127 : vector<1x4x4x128xbf16> to vector<4x4x128xbf16>
    %c16 = arith.constant 16 : index
    %c0_84 = arith.constant 0 : index
    %129 = vector.load %arg3[%c16, %c0_84] : memref<25x128xf32, #tpu.memory_space<vmem>>, vector<1x128xf32>
    %130 = arith.extf %128 : vector<4x4x128xbf16> to vector<4x4x128xf32>
    %131 = vector.shape_cast %129 : vector<1x128xf32> to vector<1x1x128xf32>
    %132 = vector.broadcast %131 : vector<1x1x128xf32> to vector<4x4x128xf32>
    %133 = arith.mulf %130, %132 : vector<4x4x128xf32>
    %134 = arith.addf %126, %133 : vector<4x4x128xf32>
    %c2_85 = arith.constant 2 : index
    %c1_86 = arith.constant 1 : index
    %c1_87 = arith.constant 1 : index
    %c0_88 = arith.constant 0 : index
    %135 = vector.load %arg2[%c2_85, %c1_86, %c1_87, %c0_88] : memref<4x6x6x128xbf16, #tpu.memory_space<vmem>>, vector<1x4x4x128xbf16>
    %136 = vector.shape_cast %135 : vector<1x4x4x128xbf16> to vector<4x4x128xbf16>
    %c17 = arith.constant 17 : index
    %c0_89 = arith.constant 0 : index
    %137 = vector.load %arg3[%c17, %c0_89] : memref<25x128xf32, #tpu.memory_space<vmem>>, vector<1x128xf32>
    %138 = arith.extf %136 : vector<4x4x128xbf16> to vector<4x4x128xf32>
    %139 = vector.shape_cast %137 : vector<1x128xf32> to vector<1x1x128xf32>
    %140 = vector.broadcast %139 : vector<1x1x128xf32> to vector<4x4x128xf32>
    %141 = arith.mulf %138, %140 : vector<4x4x128xf32>
    %142 = arith.addf %134, %141 : vector<4x4x128xf32>
    %c3_90 = arith.constant 3 : index
    %c1_91 = arith.constant 1 : index
    %c1_92 = arith.constant 1 : index
    %c0_93 = arith.constant 0 : index
    %143 = vector.load %arg2[%c3_90, %c1_91, %c1_92, %c0_93] : memref<4x6x6x128xbf16, #tpu.memory_space<vmem>>, vector<1x4x4x128xbf16>
    %144 = vector.shape_cast %143 : vector<1x4x4x128xbf16> to vector<4x4x128xbf16>
    %c18 = arith.constant 18 : index
    %c0_94 = arith.constant 0 : index
    %145 = vector.load %arg3[%c18, %c0_94] : memref<25x128xf32, #tpu.memory_space<vmem>>, vector<1x128xf32>
    %146 = arith.extf %144 : vector<4x4x128xbf16> to vector<4x4x128xf32>
    %147 = vector.shape_cast %145 : vector<1x128xf32> to vector<1x1x128xf32>
    %148 = vector.broadcast %147 : vector<1x1x128xf32> to vector<4x4x128xf32>
    %149 = arith.mulf %146, %148 : vector<4x4x128xf32>
    %150 = arith.addf %142, %149 : vector<4x4x128xf32>
    %c2_95 = arith.constant 2 : index
    %c1_96 = arith.constant 1 : index
    %c2_97 = arith.constant 2 : index
    %c0_98 = arith.constant 0 : index
    %151 = vector.load %arg2[%c2_95, %c1_96, %c2_97, %c0_98] : memref<4x6x6x128xbf16, #tpu.memory_space<vmem>>, vector<1x4x4x128xbf16>
    %152 = vector.shape_cast %151 : vector<1x4x4x128xbf16> to vector<4x4x128xbf16>
    %c19 = arith.constant 19 : index
    %c0_99 = arith.constant 0 : index
    %153 = vector.load %arg3[%c19, %c0_99] : memref<25x128xf32, #tpu.memory_space<vmem>>, vector<1x128xf32>
    %154 = arith.extf %152 : vector<4x4x128xbf16> to vector<4x4x128xf32>
    %155 = vector.shape_cast %153 : vector<1x128xf32> to vector<1x1x128xf32>
    %156 = vector.broadcast %155 : vector<1x1x128xf32> to vector<4x4x128xf32>
    %157 = arith.mulf %154, %156 : vector<4x4x128xf32>
    %158 = arith.addf %150, %157 : vector<4x4x128xf32>
    %c0_100 = arith.constant 0 : index
    %c2_101 = arith.constant 2 : index
    %c0_102 = arith.constant 0 : index
    %c0_103 = arith.constant 0 : index
    %159 = vector.load %arg2[%c0_100, %c2_101, %c0_102, %c0_103] : memref<4x6x6x128xbf16, #tpu.memory_space<vmem>>, vector<1x4x4x128xbf16>
    %160 = vector.shape_cast %159 : vector<1x4x4x128xbf16> to vector<4x4x128xbf16>
    %c20 = arith.constant 20 : index
    %c0_104 = arith.constant 0 : index
    %161 = vector.load %arg3[%c20, %c0_104] : memref<25x128xf32, #tpu.memory_space<vmem>>, vector<1x128xf32>
    %162 = arith.extf %160 : vector<4x4x128xbf16> to vector<4x4x128xf32>
    %163 = vector.shape_cast %161 : vector<1x128xf32> to vector<1x1x128xf32>
    %164 = vector.broadcast %163 : vector<1x1x128xf32> to vector<4x4x128xf32>
    %165 = arith.mulf %162, %164 : vector<4x4x128xf32>
    %166 = arith.addf %158, %165 : vector<4x4x128xf32>
    %c1_105 = arith.constant 1 : index
    %c2_106 = arith.constant 2 : index
    %c0_107 = arith.constant 0 : index
    %c0_108 = arith.constant 0 : index
    %167 = vector.load %arg2[%c1_105, %c2_106, %c0_107, %c0_108] : memref<4x6x6x128xbf16, #tpu.memory_space<vmem>>, vector<1x4x4x128xbf16>
    %168 = vector.shape_cast %167 : vector<1x4x4x128xbf16> to vector<4x4x128xbf16>
    %c21 = arith.constant 21 : index
    %c0_109 = arith.constant 0 : index
    %169 = vector.load %arg3[%c21, %c0_109] : memref<25x128xf32, #tpu.memory_space<vmem>>, vector<1x128xf32>
    %170 = arith.extf %168 : vector<4x4x128xbf16> to vector<4x4x128xf32>
    %171 = vector.shape_cast %169 : vector<1x128xf32> to vector<1x1x128xf32>
    %172 = vector.broadcast %171 : vector<1x1x128xf32> to vector<4x4x128xf32>
    %173 = arith.mulf %170, %172 : vector<4x4x128xf32>
    %174 = arith.addf %166, %173 : vector<4x4x128xf32>
    %c0_110 = arith.constant 0 : index
    %c2_111 = arith.constant 2 : index
    %c1_112 = arith.constant 1 : index
    %c0_113 = arith.constant 0 : index
    %175 = vector.load %arg2[%c0_110, %c2_111, %c1_112, %c0_113] : memref<4x6x6x128xbf16, #tpu.memory_space<vmem>>, vector<1x4x4x128xbf16>
    %176 = vector.shape_cast %175 : vector<1x4x4x128xbf16> to vector<4x4x128xbf16>
    %c22 = arith.constant 22 : index
    %c0_114 = arith.constant 0 : index
    %177 = vector.load %arg3[%c22, %c0_114] : memref<25x128xf32, #tpu.memory_space<vmem>>, vector<1x128xf32>
    %178 = arith.extf %176 : vector<4x4x128xbf16> to vector<4x4x128xf32>
    %179 = vector.shape_cast %177 : vector<1x128xf32> to vector<1x1x128xf32>
    %180 = vector.broadcast %179 : vector<1x1x128xf32> to vector<4x4x128xf32>
    %181 = arith.mulf %178, %180 : vector<4x4x128xf32>
    %182 = arith.addf %174, %181 : vector<4x4x128xf32>
    %c1_115 = arith.constant 1 : index
    %c2_116 = arith.constant 2 : index
    %c1_117 = arith.constant 1 : index
    %c0_118 = arith.constant 0 : index
    %183 = vector.load %arg2[%c1_115, %c2_116, %c1_117, %c0_118] : memref<4x6x6x128xbf16, #tpu.memory_space<vmem>>, vector<1x4x4x128xbf16>
    %184 = vector.shape_cast %183 : vector<1x4x4x128xbf16> to vector<4x4x128xbf16>
    %c23 = arith.constant 23 : index
    %c0_119 = arith.constant 0 : index
    %185 = vector.load %arg3[%c23, %c0_119] : memref<25x128xf32, #tpu.memory_space<vmem>>, vector<1x128xf32>
    %186 = arith.extf %184 : vector<4x4x128xbf16> to vector<4x4x128xf32>
    %187 = vector.shape_cast %185 : vector<1x128xf32> to vector<1x1x128xf32>
    %188 = vector.broadcast %187 : vector<1x1x128xf32> to vector<4x4x128xf32>
    %189 = arith.mulf %186, %188 : vector<4x4x128xf32>
    %190 = arith.addf %182, %189 : vector<4x4x128xf32>
    %c0_120 = arith.constant 0 : index
    %c2_121 = arith.constant 2 : index
    %c2_122 = arith.constant 2 : index
    %c0_123 = arith.constant 0 : index
    %191 = vector.load %arg2[%c0_120, %c2_121, %c2_122, %c0_123] : memref<4x6x6x128xbf16, #tpu.memory_space<vmem>>, vector<1x4x4x128xbf16>
    %192 = vector.shape_cast %191 : vector<1x4x4x128xbf16> to vector<4x4x128xbf16>
    %c24 = arith.constant 24 : index
    %c0_124 = arith.constant 0 : index
    %193 = vector.load %arg3[%c24, %c0_124] : memref<25x128xf32, #tpu.memory_space<vmem>>, vector<1x128xf32>
    %194 = arith.extf %192 : vector<4x4x128xbf16> to vector<4x4x128xf32>
    %195 = vector.shape_cast %193 : vector<1x128xf32> to vector<1x1x128xf32>
    %196 = vector.broadcast %195 : vector<1x1x128xf32> to vector<4x4x128xf32>
    %197 = arith.mulf %194, %196 : vector<4x4x128xf32>
    %198 = arith.addf %190, %197 : vector<4x4x128xf32>
    %c0_125 = arith.constant 0 : index
    %c0_126 = arith.constant 0 : index
    %199 = vector.load %arg4[%c0_125, %c0_126] : memref<1x128xf32, #tpu.memory_space<vmem>>, vector<1x128xf32>
    %200 = vector.shape_cast %199 : vector<1x128xf32> to vector<1x1x128xf32>
    %201 = vector.broadcast %200 : vector<1x1x128xf32> to vector<4x4x128xf32>
    %202 = arith.addf %198, %201 : vector<4x4x128xf32>
    %cst = arith.constant 0.000000e+00 : f32
    %203 = vector.broadcast %cst : f32 to vector<4x4x128xf32>
    %204 = arith.subf %203, %202 : vector<4x4x128xf32>
    %205 = math.exp %204 : vector<4x4x128xf32>
    %cst_127 = arith.constant 1.000000e+00 : f32
    %206 = vector.broadcast %cst_127 : f32 to vector<4x4x128xf32>
    %207 = arith.addf %206, %205 : vector<4x4x128xf32>
    %208 = tpu.reciprocal %207 {approx = true} : vector<4x4x128xf32> -> vector<4x4x128xf32>
    %209 = arith.mulf %202, %208 : vector<4x4x128xf32>
    %210 = arith.truncf %209 : vector<4x4x128xf32> to vector<4x4x128xbf16>
    %c0_128 = arith.constant 0 : index
    %c0_129 = arith.constant 0 : index
    %c0_130 = arith.constant 0 : index
    %c0_131 = arith.constant 0 : index
    %211 = vector.load %arg5[%c0_128, %c0_129, %c0_130, %c0_131] : memref<1x4x4x128xbf16, #tpu.memory_space<vmem>>, vector<1x4x4x128xbf16>
    %212 = vector.shape_cast %211 : vector<1x4x4x128xbf16> to vector<4x4x128xbf16>
    %213 = vector.shape_cast %210 : vector<4x4x128xbf16> to vector<1x4x4x128xbf16>
    tpu.vector_store %arg5[%c0_128, %c0_129, %c0_130, %c0_131], %213 {strides = array<i32>} : memref<1x4x4x128xbf16, #tpu.memory_space<vmem>>, vector<1x4x4x128xbf16>,
    %cst_132 = arith.constant dense<0.000000e+00> : vector<4x128xf32>
    %214 = vector.multi_reduction <add>, %209, %cst_132 [0] : vector<4x4x128xf32> to vector<4x128xf32>
    %cst_133 = arith.constant dense<0.000000e+00> : vector<128xf32>
    %215 = vector.multi_reduction <add>, %214, %cst_133 [0] : vector<4x128xf32> to vector<128xf32>
    %216 = vector.shape_cast %215 : vector<128xf32> to vector<1x128xf32>
    %cst_134 = arith.constant 6.250000e-02 : f32
    %217 = vector.broadcast %cst_134 : f32 to vector<1x128xf32>
    %218 = arith.mulf %216, %217 : vector<1x128xf32>
    %c0_135 = arith.constant 0 : index
    %c0_136 = arith.constant 0 : index
    %c0_137 = arith.constant 0 : index
    %219 = vector.load %arg6[%c0_135, %c0_136, %c0_137] : memref<1x1x128xf32, #tpu.memory_space<vmem>>, vector<1x1x128xf32>
    %220 = vector.shape_cast %219 : vector<1x1x128xf32> to vector<1x128xf32>
    %221 = vector.shape_cast %218 : vector<1x128xf32> to vector<1x1x128xf32>
    tpu.vector_store %arg6[%c0_135, %c0_136, %c0_137], %221 {strides = array<i32>} : memref<1x1x128xf32, #tpu.memory_space<vmem>>, vector<1x1x128xf32>,
    return
  }
  func.func @transform_0(%arg0: i32, %arg1: i32) -> (i32, i32, i32, i32) {
    %c0_i32 = arith.constant 0 : i32
    %c0_i32_0 = arith.constant 0 : i32
    %c0_i32_1 = arith.constant 0 : i32
    return %arg0, %c0_i32, %c0_i32_0, %arg1 : i32, i32, i32, i32
  }
  func.func @transform_1(%arg0: i32, %arg1: i32) -> (i32, i32) {
    %c0_i32 = arith.constant 0 : i32
    %c0_i32_0 = arith.constant 0 : i32
    return %c0_i32, %arg1 : i32, i32
  }
  func.func @transform_2(%arg0: i32, %arg1: i32) -> (i32, i32) {
    %c0_i32 = arith.constant 0 : i32
    %c0_i32_0 = arith.constant 0 : i32
    return %c0_i32, %arg1 : i32, i32
  }
  func.func @transform_3(%arg0: i32, %arg1: i32) -> (i32, i32, i32, i32) {
    %c0_i32 = arith.constant 0 : i32
    %c0_i32_0 = arith.constant 0 : i32
    %c0_i32_1 = arith.constant 0 : i32
    return %arg0, %c0_i32, %c0_i32_0, %arg1 : i32, i32, i32, i32
  }
  func.func @transform_4(%arg0: i32, %arg1: i32) -> (i32, i32, i32) {
    %c0_i32 = arith.constant 0 : i32
    %c0_i32_0 = arith.constant 0 : i32
    return %arg0, %c0_i32, %arg1 : i32, i32, i32
  }
}

module attributes {stable_mosaic.version = 11 : i64} {
  func.func @_proj_kernel(%arg0: i32, %arg1: i32, %arg2: memref<1x16x256xbf16, #tpu.memory_space<vmem>>, %arg3: memref<1x1x256xf32, #tpu.memory_space<vmem>>, %arg4: memref<256x6xf32, #tpu.memory_space<vmem>>, %arg5: memref<1x6xf32, #tpu.memory_space<vmem>>, %arg6: memref<6x256xf32, #tpu.memory_space<vmem>>, %arg7: memref<1x256xf32, #tpu.memory_space<vmem>>, %arg8: memref<256x128xbf16, #tpu.memory_space<vmem>>, %arg9: memref<1x128xf32, #tpu.memory_space<vmem>>, %arg10: memref<1x16x128xbf16, #tpu.memory_space<vmem>>) attributes {dimension_semantics = [#tpu.dimension_semantics<parallel>, #tpu.dimension_semantics<parallel>], iteration_bounds = array<i64: 2, 1>, scalar_prefetch = 0 : i64, scratch_operands = 0 : i64, tpu.core_type = #tpu.core_type<tc>, window_params = [{transform_indices = @transform_0, window_bounds = array<i64: 1, 16, 256>}, {transform_indices = @transform_1, window_bounds = array<i64: 1, 1, 256>}, {pipeline_mode = #tpu.pipeline_mode<synchronous>, transform_indices = @transform_2, window_bounds = array<i64: 256, 6>}, {pipeline_mode = #tpu.pipeline_mode<synchronous>, transform_indices = @transform_3, window_bounds = array<i64: 1, 6>}, {pipeline_mode = #tpu.pipeline_mode<synchronous>, transform_indices = @transform_4, window_bounds = array<i64: 6, 256>}, {pipeline_mode = #tpu.pipeline_mode<synchronous>, transform_indices = @transform_5, window_bounds = array<i64: 1, 256>}, {pipeline_mode = #tpu.pipeline_mode<synchronous>, transform_indices = @transform_6, window_bounds = array<i64: 256, 128>}, {pipeline_mode = #tpu.pipeline_mode<synchronous>, transform_indices = @transform_7, window_bounds = array<i64: 1, 128>}, {transform_indices = @transform_8, window_bounds = array<i64: 1, 16, 128>}]} {
    %c0 = arith.constant 0 : index
    %c0_0 = arith.constant 0 : index
    %c0_1 = arith.constant 0 : index
    %0 = vector.load %arg3[%c0, %c0_0, %c0_1] : memref<1x1x256xf32, #tpu.memory_space<vmem>>, vector<1x1x256xf32>
    %1 = vector.shape_cast %0 : vector<1x1x256xf32> to vector<1x256xf32>
    %c0_2 = arith.constant 0 : index
    %c0_3 = arith.constant 0 : index
    %2 = vector.load %arg4[%c0_2, %c0_3] : memref<256x6xf32, #tpu.memory_space<vmem>>, vector<256x6xf32>
    %cst = arith.constant dense<0.000000e+00> : vector<1x6xf32>
    %3 = tpu.matmul %1, %2, %cst {dimension_numbers = #tpu.dot_dimension_numbers<[1], [0], [0], [1], [0, 0, 1, 1], [], []>} : vector<1x256xf32>, vector<256x6xf32>, vector<1x6xf32> -> vector<1x6xf32>
    %c0_4 = arith.constant 0 : index
    %c0_5 = arith.constant 0 : index
    %4 = vector.load %arg5[%c0_4, %c0_5] : memref<1x6xf32, #tpu.memory_space<vmem>>, vector<1x6xf32>
    %5 = arith.addf %3, %4 : vector<1x6xf32>
    %cst_6 = arith.constant 0.000000e+00 : f32
    %6 = vector.broadcast %cst_6 : f32 to vector<1x6xf32>
    %7 = arith.subf %6, %5 : vector<1x6xf32>
    %8 = math.exp %7 : vector<1x6xf32>
    %cst_7 = arith.constant 1.000000e+00 : f32
    %9 = vector.broadcast %cst_7 : f32 to vector<1x6xf32>
    %10 = arith.addf %9, %8 : vector<1x6xf32>
    %11 = tpu.reciprocal %10 {approx = true} : vector<1x6xf32> -> vector<1x6xf32>
    %12 = arith.mulf %5, %11 : vector<1x6xf32>
    %c0_8 = arith.constant 0 : index
    %c0_9 = arith.constant 0 : index
    %13 = vector.load %arg6[%c0_8, %c0_9] : memref<6x256xf32, #tpu.memory_space<vmem>>, vector<6x256xf32>
    %cst_10 = arith.constant dense<0.000000e+00> : vector<1x256xf32>
    %14 = tpu.matmul %12, %13, %cst_10 {dimension_numbers = #tpu.dot_dimension_numbers<[1], [0], [0], [1], [0, 0, 1, 1], [], []>} : vector<1x6xf32>, vector<6x256xf32>, vector<1x256xf32> -> vector<1x256xf32>
    %c0_11 = arith.constant 0 : index
    %c0_12 = arith.constant 0 : index
    %15 = vector.load %arg7[%c0_11, %c0_12] : memref<1x256xf32, #tpu.memory_space<vmem>>, vector<1x256xf32>
    %16 = arith.addf %14, %15 : vector<1x256xf32>
    %cst_13 = arith.constant 0.000000e+00 : f32
    %17 = vector.broadcast %cst_13 : f32 to vector<1x256xf32>
    %18 = arith.subf %17, %16 : vector<1x256xf32>
    %19 = math.exp %18 : vector<1x256xf32>
    %cst_14 = arith.constant 1.000000e+00 : f32
    %20 = vector.broadcast %cst_14 : f32 to vector<1x256xf32>
    %21 = arith.addf %20, %19 : vector<1x256xf32>
    %22 = tpu.reciprocal %21 {approx = true} : vector<1x256xf32> -> vector<1x256xf32>
    %c0_15 = arith.constant 0 : index
    %c0_16 = arith.constant 0 : index
    %c0_17 = arith.constant 0 : index
    %23 = vector.load %arg2[%c0_15, %c0_16, %c0_17] : memref<1x16x256xbf16, #tpu.memory_space<vmem>>, vector<1x16x256xbf16>
    %24 = vector.shape_cast %23 : vector<1x16x256xbf16> to vector<16x256xbf16>
    %25 = arith.truncf %22 : vector<1x256xf32> to vector<1x256xbf16>
    %26 = vector.broadcast %25 : vector<1x256xbf16> to vector<16x256xbf16>
    %27 = arith.mulf %24, %26 : vector<16x256xbf16>
    %c0_18 = arith.constant 0 : index
    %c0_19 = arith.constant 0 : index
    %28 = vector.load %arg8[%c0_18, %c0_19] : memref<256x128xbf16, #tpu.memory_space<vmem>>, vector<256x128xbf16>
    %cst_20 = arith.constant dense<0.000000e+00> : vector<16x128xf32>
    %29 = tpu.matmul %27, %28, %cst_20 {dimension_numbers = #tpu.dot_dimension_numbers<[1], [0], [0], [1], [0, 0, 1, 1], [], []>} : vector<16x256xbf16>, vector<256x128xbf16>, vector<16x128xf32> -> vector<16x128xf32>
    %c0_21 = arith.constant 0 : index
    %c0_22 = arith.constant 0 : index
    %30 = vector.load %arg9[%c0_21, %c0_22] : memref<1x128xf32, #tpu.memory_space<vmem>>, vector<1x128xf32>
    %31 = vector.broadcast %30 : vector<1x128xf32> to vector<16x128xf32>
    %32 = arith.addf %29, %31 : vector<16x128xf32>
    %33 = arith.truncf %32 : vector<16x128xf32> to vector<16x128xbf16>
    %c0_23 = arith.constant 0 : index
    %c0_24 = arith.constant 0 : index
    %c0_25 = arith.constant 0 : index
    %34 = vector.load %arg10[%c0_23, %c0_24, %c0_25] : memref<1x16x128xbf16, #tpu.memory_space<vmem>>, vector<1x16x128xbf16>
    %35 = vector.shape_cast %34 : vector<1x16x128xbf16> to vector<16x128xbf16>
    %36 = vector.shape_cast %33 : vector<16x128xbf16> to vector<1x16x128xbf16>
    tpu.vector_store %arg10[%c0_23, %c0_24, %c0_25], %36 {strides = array<i32>} : memref<1x16x128xbf16, #tpu.memory_space<vmem>>, vector<1x16x128xbf16>,
    return
  }
  func.func @transform_0(%arg0: i32, %arg1: i32) -> (i32, i32, i32) {
    %c0_i32 = arith.constant 0 : i32
    %c0_i32_0 = arith.constant 0 : i32
    return %arg0, %arg1, %c0_i32 : i32, i32, i32
  }
  func.func @transform_1(%arg0: i32, %arg1: i32) -> (i32, i32, i32) {
    %c0_i32 = arith.constant 0 : i32
    %c0_i32_0 = arith.constant 0 : i32
    %c0_i32_1 = arith.constant 0 : i32
    return %arg0, %c0_i32, %c0_i32_0 : i32, i32, i32
  }
  func.func @transform_2(%arg0: i32, %arg1: i32) -> (i32, i32) {
    %c0_i32 = arith.constant 0 : i32
    %c0_i32_0 = arith.constant 0 : i32
    %c0_i32_1 = arith.constant 0 : i32
    return %c0_i32, %c0_i32_0 : i32, i32
  }
  func.func @transform_3(%arg0: i32, %arg1: i32) -> (i32, i32) {
    %c0_i32 = arith.constant 0 : i32
    %c0_i32_0 = arith.constant 0 : i32
    %c0_i32_1 = arith.constant 0 : i32
    return %c0_i32, %c0_i32_0 : i32, i32
  }
  func.func @transform_4(%arg0: i32, %arg1: i32) -> (i32, i32) {
    %c0_i32 = arith.constant 0 : i32
    %c0_i32_0 = arith.constant 0 : i32
    %c0_i32_1 = arith.constant 0 : i32
    return %c0_i32, %c0_i32_0 : i32, i32
  }
  func.func @transform_5(%arg0: i32, %arg1: i32) -> (i32, i32) {
    %c0_i32 = arith.constant 0 : i32
    %c0_i32_0 = arith.constant 0 : i32
    %c0_i32_1 = arith.constant 0 : i32
    return %c0_i32, %c0_i32_0 : i32, i32
  }
  func.func @transform_6(%arg0: i32, %arg1: i32) -> (i32, i32) {
    %c0_i32 = arith.constant 0 : i32
    %c0_i32_0 = arith.constant 0 : i32
    %c0_i32_1 = arith.constant 0 : i32
    return %c0_i32, %c0_i32_0 : i32, i32
  }
  func.func @transform_7(%arg0: i32, %arg1: i32) -> (i32, i32) {
    %c0_i32 = arith.constant 0 : i32
    %c0_i32_0 = arith.constant 0 : i32
    %c0_i32_1 = arith.constant 0 : i32
    return %c0_i32, %c0_i32_0 : i32, i32
  }
  func.func @transform_8(%arg0: i32, %arg1: i32) -> (i32, i32, i32) {
    %c0_i32 = arith.constant 0 : i32
    %c0_i32_0 = arith.constant 0 : i32
    return %arg0, %arg1, %c0_i32 : i32, i32, i32
  }
}

module attributes {stable_mosaic.version = 11 : i64} {
  func.func @_head_pool_fc_kernel(%arg0: i32, %arg1: memref<1x16x128xbf16, #tpu.memory_space<vmem>>, %arg2: memref<128x128xbf16, #tpu.memory_space<vmem>>, %arg3: memref<1x128xf32, #tpu.memory_space<vmem>>, %arg4: memref<128x4xf32, #tpu.memory_space<vmem>>, %arg5: memref<1x4xf32, #tpu.memory_space<vmem>>, %arg6: memref<1x1x4xf32, #tpu.memory_space<vmem>>) attributes {dimension_semantics = [#tpu.dimension_semantics<parallel>], iteration_bounds = array<i64: 2>, scalar_prefetch = 0 : i64, scratch_operands = 0 : i64, tpu.core_type = #tpu.core_type<tc>, window_params = [{transform_indices = @transform_0, window_bounds = array<i64: 1, 16, 128>}, {pipeline_mode = #tpu.pipeline_mode<synchronous>, transform_indices = @transform_1, window_bounds = array<i64: 128, 128>}, {pipeline_mode = #tpu.pipeline_mode<synchronous>, transform_indices = @transform_2, window_bounds = array<i64: 1, 128>}, {pipeline_mode = #tpu.pipeline_mode<synchronous>, transform_indices = @transform_3, window_bounds = array<i64: 128, 4>}, {pipeline_mode = #tpu.pipeline_mode<synchronous>, transform_indices = @transform_4, window_bounds = array<i64: 1, 4>}, {transform_indices = @transform_5, window_bounds = array<i64: 1, 1, 4>}]} {
    %c0 = arith.constant 0 : index
    %c0_0 = arith.constant 0 : index
    %c0_1 = arith.constant 0 : index
    %0 = vector.load %arg1[%c0, %c0_0, %c0_1] : memref<1x16x128xbf16, #tpu.memory_space<vmem>>, vector<1x16x128xbf16>
    %1 = vector.shape_cast %0 : vector<1x16x128xbf16> to vector<16x128xbf16>
    %c0_2 = arith.constant 0 : index
    %c0_3 = arith.constant 0 : index
    %2 = vector.load %arg2[%c0_2, %c0_3] : memref<128x128xbf16, #tpu.memory_space<vmem>>, vector<128x128xbf16>
    %cst = arith.constant dense<0.000000e+00> : vector<16x128xf32>
    %3 = tpu.matmul %1, %2, %cst {dimension_numbers = #tpu.dot_dimension_numbers<[1], [0], [0], [1], [0, 0, 1, 1], [], []>} : vector<16x128xbf16>, vector<128x128xbf16>, vector<16x128xf32> -> vector<16x128xf32>
    %c0_4 = arith.constant 0 : index
    %c0_5 = arith.constant 0 : index
    %4 = vector.load %arg3[%c0_4, %c0_5] : memref<1x128xf32, #tpu.memory_space<vmem>>, vector<1x128xf32>
    %5 = vector.broadcast %4 : vector<1x128xf32> to vector<16x128xf32>
    %6 = arith.addf %3, %5 : vector<16x128xf32>
    %cst_6 = arith.constant 0.000000e+00 : f32
    %7 = vector.broadcast %cst_6 : f32 to vector<16x128xf32>
    %8 = arith.subf %7, %6 : vector<16x128xf32>
    %9 = math.exp %8 : vector<16x128xf32>
    %cst_7 = arith.constant 1.000000e+00 : f32
    %10 = vector.broadcast %cst_7 : f32 to vector<16x128xf32>
    %11 = arith.addf %10, %9 : vector<16x128xf32>
    %12 = tpu.reciprocal %11 {approx = true} : vector<16x128xf32> -> vector<16x128xf32>
    %13 = arith.mulf %6, %12 : vector<16x128xf32>
    %cst_8 = arith.constant dense<0.000000e+00> : vector<128xf32>
    %14 = vector.multi_reduction <add>, %13, %cst_8 [0] : vector<16x128xf32> to vector<128xf32>
    %15 = vector.shape_cast %14 : vector<128xf32> to vector<1x128xf32>
    %cst_9 = arith.constant 6.250000e-02 : f32
    %16 = vector.broadcast %cst_9 : f32 to vector<1x128xf32>
    %17 = arith.mulf %15, %16 : vector<1x128xf32>
    %c0_10 = arith.constant 0 : index
    %c0_11 = arith.constant 0 : index
    %18 = vector.load %arg4[%c0_10, %c0_11] : memref<128x4xf32, #tpu.memory_space<vmem>>, vector<128x4xf32>
    %cst_12 = arith.constant dense<0.000000e+00> : vector<1x4xf32>
    %19 = tpu.matmul %17, %18, %cst_12 {dimension_numbers = #tpu.dot_dimension_numbers<[1], [0], [0], [1], [0, 0, 1, 1], [], []>} : vector<1x128xf32>, vector<128x4xf32>, vector<1x4xf32> -> vector<1x4xf32>
    %c0_13 = arith.constant 0 : index
    %c0_14 = arith.constant 0 : index
    %20 = vector.load %arg5[%c0_13, %c0_14] : memref<1x4xf32, #tpu.memory_space<vmem>>, vector<1x4xf32>
    %21 = arith.addf %19, %20 : vector<1x4xf32>
    %c0_15 = arith.constant 0 : index
    %c0_16 = arith.constant 0 : index
    %c0_17 = arith.constant 0 : index
    %22 = vector.load %arg6[%c0_15, %c0_16, %c0_17] : memref<1x1x4xf32, #tpu.memory_space<vmem>>, vector<1x1x4xf32>
    %23 = vector.shape_cast %22 : vector<1x1x4xf32> to vector<1x4xf32>
    %24 = vector.shape_cast %21 : vector<1x4xf32> to vector<1x1x4xf32>
    tpu.vector_store %arg6[%c0_15, %c0_16, %c0_17], %24 {strides = array<i32>} : memref<1x1x4xf32, #tpu.memory_space<vmem>>, vector<1x1x4xf32>,
    return
  }
  func.func @transform_0(%arg0: i32) -> (i32, i32, i32) {
    %c0_i32 = arith.constant 0 : i32
    %c0_i32_0 = arith.constant 0 : i32
    %c0_i32_1 = arith.constant 0 : i32
    return %arg0, %c0_i32, %c0_i32_0 : i32, i32, i32
  }
  func.func @transform_1(%arg0: i32) -> (i32, i32) {
    %c0_i32 = arith.constant 0 : i32
    %c0_i32_0 = arith.constant 0 : i32
    %c0_i32_1 = arith.constant 0 : i32
    return %c0_i32, %c0_i32_0 : i32, i32
  }
  func.func @transform_2(%arg0: i32) -> (i32, i32) {
    %c0_i32 = arith.constant 0 : i32
    %c0_i32_0 = arith.constant 0 : i32
    %c0_i32_1 = arith.constant 0 : i32
    return %c0_i32, %c0_i32_0 : i32, i32
  }
  func.func @transform_3(%arg0: i32) -> (i32, i32) {
    %c0_i32 = arith.constant 0 : i32
    %c0_i32_0 = arith.constant 0 : i32
    %c0_i32_1 = arith.constant 0 : i32
    return %c0_i32, %c0_i32_0 : i32, i32
  }
  func.func @transform_4(%arg0: i32) -> (i32, i32) {
    %c0_i32 = arith.constant 0 : i32
    %c0_i32_0 = arith.constant 0 : i32
    %c0_i32_1 = arith.constant 0 : i32
    return %c0_i32, %c0_i32_0 : i32, i32
  }
  func.func @transform_5(%arg0: i32) -> (i32, i32, i32) {
    %c0_i32 = arith.constant 0 : i32
    %c0_i32_0 = arith.constant 0 : i32
    %c0_i32_1 = arith.constant 0 : i32
    return %arg0, %c0_i32, %c0_i32_0 : i32, i32, i32
  }
}

</mosaic_0001>

<bundles_post_ra>
// kernel: efficientb5_forward.10
= control target key start
LH: loop header
LB: loop body
LE: loop exit
PB: predicated region body
PF: predicated region fallthrough
CT: control target
= control target key end

     0   :  { %s926_s12 = smov 0   ;;  %s1079_s0 = inlined_call_operand.vmem [shape: bf16[512,128], index: 0, kind: input, shape index: {}]   ;;  %s1080_s1 = inlined_call_operand.vmem [shape: bf16[128,128], index: 1, kind: input, shape index: {}]   ;;  %s1081_s2 = inlined_call_operand.vmem [shape: f32[1,128], index: 2, kind: input, shape index: {}]   ;;  %s1082_s3 = inlined_call_operand.vmem [shape: bf16[512,128], index: 3, kind: output, shape index: {}]  }
   0x1 LB: > { %s639_s13 = sadd.s32 4294967295, %s904_s12   ;;  %p643_p0 = scmp.ge.s32.totalorder %s904_s12, 1  ;;  %s904_s12 = sphi %s926_s12, %s13_s12  }
   0x2   : > { %p138_p1 = scmp.lt.s32.totalorder %s904_s12, 5 }
   0x4   : > { %p139_p2 = pnand %p643_p0, %p138_p1 }
   0x5   : > { %v818_v0 = vld [vmem:[%s1080_s1] sm:$0xff] (!%p139_p2)   ;;  %s644_s16 = sshll.u32 (!%p139_p2), %s639_s13, 4  ;;  %v819_v1 = vld [vmem:[%s1080_s1 + $0x8] sm:$0xff] (!%p139_p2)   ;;  %v820_v2 = vld [vmem:[%s1080_s1 + $0x10] sm:$0xff] (!%p139_p2)  }
   0x6   : > { %142 = sbr.rel (%p139_p2) target bundleno = 312 (0x138), region = 32  ;;  %p163_p3 = scmp.lt.s32.totalorder (!%p139_p2), %s644_s16, 63  ;;  %762 = vmatprep.subr.bf16.mxu0 (!%p139_p2), %v818_v0  ;;  %794 = vmatprep.subr.bf16.mxu1 (!%p139_p2), %v818_v0  ;;  %v821_v3 = vld [vmem:[%s1080_s1 + $0x18] sm:$0xff] (!%p139_p2)   ;;  %v822_v6 = vld [vmem:[%s1080_s1 + $0x20] sm:$0xff] (!%p139_p2)   ;;  %v823_v7 = vld [vmem:[%s1080_s1 + $0x28] sm:$0xff] (!%p139_p2)  }
   0x7   : > { %763 = vmatpush3.bf16.msra.mxu0 (!%p139_p2), %v818_v0  ;;  %802 = vmatpush3.bf16.msra.mxu1 (!%p139_p2), %v818_v0  ;;  %v824_v8 = vld [vmem:[%s1080_s1 + $0x30] sm:$0xff] (!%p139_p2)   ;;  %v825_v9 = vld [vmem:[%s1080_s1 + $0x38] sm:$0xff] (!%p139_p2)   ;;  %v979_v16 = vld [vmem:[%s1081_s2] ss:$0 sm:$0xff] (!%p139_p2) }
   0x8   : > { %764 = vmatprep.subr.bf16.mxu0 (!%p139_p2), %v819_v1  ;;  %795 = vmatprep.subr.bf16.mxu1 (!%p139_p2), %v819_v1 }
   0xb   : > { %765 = vmatpush3.bf16.msra.mxu0 (!%p139_p2), %v819_v1  ;;  %803 = vmatpush3.bf16.msra.mxu1 (!%p139_p2), %v819_v1 }
   0xc   : > { %766 = vmatprep.subr.bf16.mxu0 (!%p139_p2), %v820_v2  ;;  %796 = vmatprep.subr.bf16.mxu1 (!%p139_p2), %v820_v2 }
   0xd   : > { %s1084_s16 = smov (!%p163_p3, %s644_s16), 63 }
   0xe   : > { %s645_s21 = sshll.u32 %s1084_s16, 2 }
   0xf   : > { %s951_s24 = scalar_lea.vmem %s1079_s0, %s645_s21  ;;  %767 = vmatpush3.bf16.msra.mxu0 %v820_v2  ;;  %804 = vmatpush3.bf16.msra.mxu1 %v820_v2  ;;  %s1053_s13 = scalar_lea.vmem %s1082_s3, %s645_s21 }
  0x10   : > { %v826_v4 = vld [vmem:[%s951_s24] sm:$0xff]   ;;  %768 = vmatprep.subr.bf16.mxu0 %v821_v3  ;;  %797 = vmatprep.subr.bf16.mxu1 %v821_v3  ;;  %v828_v10 = vld [vmem:[%s951_s24 + $0x8] sm:$0xff]   ;;  %v830_v12 = vld [vmem:[%s951_s24 + $0x10] sm:$0xff]  }
  0x11   : > { %v827_v5 = vld [vmem:[%s951_s24 + $0x20] sm:$0xff]   ;;  %778 = vmatprep.mubr.bf16.mxu0 %v826_v4  ;;  %v829_v11 = vld [vmem:[%s951_s24 + $0x28] sm:$0xff]   ;;  %v831_v13 = vld [vmem:[%s951_s24 + $0x30] sm:$0xff]  }
  0x12   : > { %786 = vmatprep.mubr.bf16.mxu1 %v827_v5  ;;  %v832_v14 = vld [vmem:[%s951_s24 + $0x18] sm:$0xff]  }
  0x13   : > { %769 = vmatpush3.bf16.msra.mxu0 %v821_v3  ;;  %805 = vmatpush3.bf16.msra.mxu1 %v821_v3  ;;  %v833_v15 = vld [vmem:[%s951_s24 + $0x38] sm:$0xff]  }
  0x14   : > { %770 = vmatprep.subr.bf16.mxu0 %v822_v6  ;;  %798 = vmatprep.subr.bf16.mxu1 %v822_v6 }
  0x17   : > { %771 = vmatpush3.bf16.msra.mxu0 %v822_v6  ;;  %806 = vmatpush3.bf16.msra.mxu1 %v822_v6 }
  0x18   : > { %772 = vmatprep.subr.bf16.mxu0 %v823_v7  ;;  %799 = vmatprep.subr.bf16.mxu1 %v823_v7 }
  0x1b   : > { %773 = vmatpush3.bf16.msra.mxu0 %v823_v7  ;;  %807 = vmatpush3.bf16.msra.mxu1 %v823_v7 }
  0x1c   : > { %774 = vmatprep.subr.bf16.mxu0 %v824_v8  ;;  %800 = vmatprep.subr.bf16.mxu1 %v824_v8 }
  0x1f   : > { %775 = vmatpush3.bf16.msra.mxu0 %v824_v8  ;;  %808 = vmatpush3.bf16.msra.mxu1 %v824_v8 }
  0x20   : > { %776 = vmatprep.subr.bf16.mxu0 %v825_v9  ;;  %801 = vmatprep.subr.bf16.mxu1 %v825_v9 }
  0x23   : > { %777 = vmatpush3.bf16.msra.mxu0 %v825_v9  ;;  %809 = vmatpush3.bf16.msra.mxu1 %v825_v9 }
  0x26   : > { %779 = vmatmul.mubr.bf16.vlgmr.msra.gmra.mrb[0].mxu0 %v828_v10  ;;  %787 = vmatmul.mubr.bf16.vlgmr.msra.gmra.mrb[0].mxu1 %v829_v11 }
  0x27   : > { %782 = vmatprep.mubr.bf16.mxu0 %v830_v12  ;;  %790 = vmatprep.mubr.bf16.mxu1 %v831_v13 }
  0x2e   : > { %783 = vmatmul.mubr.bf16.gmra.mrb[4].mxu0 %v832_v14  ;;  %791 = vmatmul.mubr.bf16.gmra.mrb[4].mxu1 %v833_v15 }
  0xf9   : > { %v780_v17 = vpop.f32.mrb[0].mxu0  ;;  %v788_v18 = vpop.f32.mrb[0].mxu1 }
  0xfa   : > { %v982_v19 = vadd.f32 %v780_v17, %v979_v16  ;;  %v985_v20 = vadd.f32 %v788_v18, %v979_v16  ;;  %v344_v21 = vpop.f32.mrb[1].mxu0  ;;  %v376_v22 = vpop.f32.mrb[1].mxu1 }
  0xfb   : > { %v988_v23 = vadd.f32 %v979_v16, %v344_v21  ;;  %v991_v24 = vadd.f32 %v979_v16, %v376_v22  ;;  %v781_v25 = vpop.f32.mrb[2].mxu0  ;;  %v789_v26 = vpop.f32.mrb[2].mxu1 }
  0xfc   : > { %v409_v27 = vsub.f32 0.0, %v982_v19  ;;  %v417_v28 = vsub.f32 0.0, %v985_v20  ;;  %v996_v29 = vadd.f32 %v781_v25, %v979_v16  ;;  %v999_v30 = vadd.f32 %v789_v26, %v979_v16  ;;  %v347_v31 = vpop.f32.mrb[3].mxu0  ;;  %v379_v32 = vpop.f32.mrb[3].mxu1 }
  0xfd   : > { %v407_v33 = vsub.f32 0.0, %v988_v23  ;;  %v415_v34 = vsub.f32 0.0, %v991_v24  ;;  %v1004_v35 = vadd.f32 %v979_v16, %v347_v31  ;;  %v1007_v36 = vadd.f32 %v979_v16, %v379_v32 }
  0xfe   : > { %v427_v37 = vmul.f32 1.442695, %v409_v27  ;;  %v443_v38 = vmul.f32 1.442695, %v417_v28  ;;  %v410_v39 = vsub.f32 0.0, %v996_v29  ;;  %v418_v40 = vsub.f32 0.0, %v999_v30 }
  0xff   : > { %v423_v41 = vmul.f32 1.442695, %v407_v33  ;;  %v439_v42 = vmul.f32 1.442695, %v415_v34  ;;  %v408_v43 = vsub.f32 0.0, %v1004_v35  ;;  %v416_v44 = vsub.f32 0.0, %v1007_v36 }
 0x100   : > { %834 = vpow2.f32 %v427_v37  ;;  %v429_v45 = vmul.f32 1.442695, %v410_v39  ;;  %v445_v46 = vmul.f32 1.442695, %v418_v40 }
 0x101   : > { %836 = vpow2.f32 %v443_v38  ;;  %v784_v47 = vpop.f32.mrb[4].mxu0  ;;  %v792_v48 = vpop.f32.mrb[4].mxu1  ;;  %v425_v49 = vmul.f32 1.442695, %v408_v43  ;;  %v441_v54 = vmul.f32 1.442695, %v416_v44 }
 0x102   : > { %838 = vpow2.f32 %v423_v41  ;;  %v1014_v50 = vadd.f32 %v784_v47, %v979_v16  ;;  %v1017_v51 = vadd.f32 %v792_v48, %v979_v16  ;;  %v360_v52 = vpop.f32.mrb[5].mxu0  ;;  %v392_v53 = vpop.f32.mrb[5].mxu1 }
 0x103   : > { %840 = vpow2.f32 %v439_v42  ;;  %v1020_v55 = vadd.f32 %v979_v16, %v360_v52  ;;  %v785_v56 = vpop.f32.mrb[6].mxu0  ;;  %v793_v57 = vpop.f32.mrb[6].mxu1  ;;  %v1030_v5 = vadd.f32 %v979_v16, %v392_v53 }
 0x104   : > { %842 = vpow2.f32 %v429_v45  ;;  %v413_v58 = vsub.f32 0.0, %v1014_v50  ;;  %v421_v59 = vsub.f32 0.0, %v1017_v51  ;;  %v1025_v60 = vadd.f32 %v785_v56, %v979_v16  ;;  %v363_v61 = vpop.f32.mrb[7].mxu0  ;;  %v395_v62 = vpop.f32.mrb[7].mxu1 }
 0x105   : > { %844 = vpow2.f32 %v445_v46  ;;  %v411_v63 = vsub.f32 0.0, %v1020_v55  ;;  %v419_v13 = vsub.f32 0.0, %v1030_v5  ;;  %v1034_v17 = vadd.f32 %v793_v57, %v979_v16 }
 0x106   : > { %846 = vpow2.f32 %v425_v49  ;;  %v435_v0 = vmul.f32 1.442695, %v413_v58  ;;  %v451_v1 = vmul.f32 1.442695, %v421_v59  ;;  %v414_v2 = vsub.f32 0.0, %v1025_v60 }
 0x107   : > { %848 = vpow2.f32 %v441_v54  ;;  %v431_v3 = vmul.f32 1.442695, %v411_v63  ;;  %v1037_v22 = vadd.f32 %v979_v16, %v363_v61  ;;  %v1040_v27 = vadd.f32 %v979_v16, %v395_v62 }
 0x108   : > { %850 = vpow2.f32 %v435_v0  ;;  %v437_v4 = vmul.f32 1.442695, %v414_v2  ;;  %v447_v32 = vmul.f32 1.442695, %v419_v13  ;;  %v422_v37 = vsub.f32 0.0, %v1034_v17 }
 0x109   : > { %852 = vpow2.f32 %v451_v1  ;;  %v412_v39 = vsub.f32 0.0, %v1037_v22  ;;  %v420_v41 = vsub.f32 0.0, %v1040_v27 }
 0x10a   : > { %v835_v6 = vpop.eup %834  ;;  %854 = vpow2.f32 %v431_v3  ;;  %v453_v43 = vmul.f32 1.442695, %v422_v37 }
 0x10b   : > { %v837_v7 = vpop.eup %836  ;;  %v457_v8 = vadd.f32 1.0, %v835_v6  ;;  %856 = vpow2.f32 %v437_v4  ;;  %v433_v46 = vmul.f32 1.442695, %v412_v39  ;;  %v449_v48 = vmul.f32 1.442695, %v420_v41 }
 0x10c   : > { %v839_v9 = vpop.eup %838  ;;  %v465_v10 = vadd.f32 1.0, %v837_v7 }
 0x10d   : > { %v841_v11 = vpop.eup %840  ;;  %858 = vrcp.f32 %v457_v8  ;;  %v455_v12 = vadd.f32 1.0, %v839_v9 }
 0x10e   : > { %v843_v14 = vpop.eup %842  ;;  %860 = vrcp.f32 %v465_v10  ;;  %v463_v15 = vadd.f32 1.0, %v841_v11 }
 0x10f   : > { %v845_v18 = vpop.eup %844  ;;  %862 = vrcp.f32 %v455_v12  ;;  %v458_v21 = vadd.f32 1.0, %v843_v14 }
 0x110   : > { %v847_v25 = vpop.eup %846  ;;  %864 = vrcp.f32 %v463_v15  ;;  %v466_v26 = vadd.f32 1.0, %v845_v18 }
 0x111   : > { %v849_v28 = vpop.eup %848  ;;  %866 = vrcp.f32 %v458_v21  ;;  %v456_v31 = vadd.f32 1.0, %v847_v25 }
 0x112   : > { %v851_v33 = vpop.eup %850  ;;  %868 = vrcp.f32 %v466_v26  ;;  %v464_v34 = vadd.f32 1.0, %v849_v28 }
 0x113   : > { %870 = vrcp.f32 %v456_v31  ;;  %v461_v38 = vadd.f32 1.0, %v851_v33  ;;  %v853_v40 = vpop.eup %852 }
 0x114   : > { %872 = vrcp.f32 %v464_v34  ;;  %v855_v42 = vpop.eup %854  ;;  %v469_v4 = vadd.f32 1.0, %v853_v40 }
 0x115   : > { %874 = vpow2.f32 %v447_v32  ;;  %v857_v16 = vpop.eup %856  ;;  %v459_v7 = vadd.f32 1.0, %v855_v42 }
 0x116   : > { %876 = vrcp.f32 %v461_v38  ;;  %v462_v45 = vadd.f32 1.0, %v857_v16 }
 0x117   : > { %v859_v44 = vpop.eup %858 }
 0x118   : > { %v861_v47 = vpop.eup %860  ;;  %878 = vrcp.f32 %v462_v45  ;;  %v489_v56 = vmul.f32 %v859_v44, %v982_v19 }
 0x119   : > { %v863_v49 = vpop.eup %862  ;;  %880 = vpow2.f32 %v453_v43  ;;  %v497_v59 = vmul.f32 %v861_v47, %v985_v20 }
 0x11a   : > { %v865_v52 = vpop.eup %864  ;;  %882 = vpow2.f32 %v433_v46  ;;  %v487_v19 = vmul.f32 %v863_v49, %v988_v23 }
 0x11b   : > { %v867_v53 = vpop.eup %866  ;;  %884 = vpow2.f32 %v449_v48  ;;  %v495_v20 = vmul.f32 %v865_v52, %v991_v24 }
 0x11c   : > { %v869_v54 = vpop.eup %868  ;;  %v490_v57 = vmul.f32 %v867_v53, %v996_v29  ;;  %886 = vrcp.f32 %v469_v4 }
 0x11d   : > { %v871_v58 = vpop.eup %870  ;;  %v498_v61 = vmul.f32 %v869_v54, %v999_v30  ;;  %888 = vrcp.f32 %v459_v7 }
 0x11e   : > { %v873_v62 = vpop.eup %872  ;;  %v707_v63 = vpack.c.bf16 %v490_v57, %v489_v56  ;;  %v488_v29 = vmul.f32 %v871_v58, %v1004_v35 }
 0x11f   : > { %v875_v0 = vpop.eup %874  ;;  %v727_v1 = vpack.c.bf16 %v498_v61, %v497_v59  ;;  %v496_v2 = vmul.f32 %v873_v62, %v1007_v36 }
 0x120   : > { %739 = vst [vmem:[%s1053_s13 + $0x8] sm:$0xff] %v707_v63   ;;  %v702_v3 = vpack.c.bf16 %v488_v29, %v487_v19  ;;  %v877_v6 = vpop.eup %876  ;;  %v467_v8 = vadd.f32 1.0, %v875_v0 }
 0x121   : > { %743 = vst [vmem:[%s1053_s13 + $0x28] sm:$0xff] %v727_v1   ;;  %v722_v30 = vpack.c.bf16 %v496_v2, %v495_v20  ;;  %v493_v35 = vmul.f32 %v877_v6, %v1014_v50 }
 0x122   : > { %703 = vst [vmem:[%s1053_s13] sm:$0xff] %v702_v3   ;;  %v879_v23 = vpop.eup %878  ;;  %890 = vrcp.f32 %v467_v8 }
 0x123   : > { %742 = vst [vmem:[%s1053_s13 + $0x20] sm:$0xff] %v722_v30   ;;  %v881_v9 = vpop.eup %880  ;;  %v494_v24 = vmul.f32 %v879_v23, %v1025_v60 }
 0x124   : > { %v883_v10 = vpop.eup %882  ;;  %v470_v36 = vadd.f32 1.0, %v881_v9 }
 0x125   : > { %v885_v11 = vpop.eup %884  ;;  %v717_v12 = vpack.c.bf16 %v494_v24, %v493_v35  ;;  %v460_v13 = vadd.f32 1.0, %v883_v10 }
 0x126   : > { %892 = vrcp.f32 %v470_v36  ;;  %v468_v14 = vadd.f32 1.0, %v885_v11  ;;  %v887_v15 = vpop.eup %886 }
 0x127   : > { %741 = vst [vmem:[%s1053_s13 + $0x18] sm:$0xff] %v717_v12   ;;  %894 = vrcp.f32 %v460_v13  ;;  %v889_v18 = vpop.eup %888  ;;  %v501_v25 = vmul.f32 %v887_v15, %v1017_v51 }
 0x128   : > { %896 = vrcp.f32 %v468_v14  ;;  %v491_v31 = vmul.f32 %v889_v18, %v1020_v55 }
 0x12c   : > { %v891_v50 = vpop.eup %890 }
 0x12d   : > { %v499_v33 = vmul.f32 %v891_v50, %v1030_v5 }
 0x130   : > { %v893_v21 = vpop.eup %892 }
 0x131   : > { %v895_v60 = vpop.eup %894  ;;  %v502_v26 = vmul.f32 %v893_v21, %v1034_v17 }
 0x132   : > { %v897_v28 = vpop.eup %896  ;;  %v492_v32 = vmul.f32 %v895_v60, %v1037_v22 }
 0x133   : > { %v737_v34 = vpack.c.bf16 %v502_v26, %v501_v25  ;;  %v500_v37 = vmul.f32 %v897_v28, %v1040_v27 }
 0x134   : > { %v712_v38 = vpack.c.bf16 %v492_v32, %v491_v31 }
 0x135   : > { %745 = vst [vmem:[%s1053_s13 + $0x38] sm:$0xff] %v737_v34   ;;  %v732_v39 = vpack.c.bf16 %v500_v37, %v499_v33 }
 0x136   : > { %740 = vst [vmem:[%s1053_s13 + $0x10] sm:$0xff] %v712_v38  }
 0x137   : > { %744 = vst [vmem:[%s1053_s13 + $0x30] sm:$0xff] %v732_v39  }
 0x138 PF: > { %s13_s12 = sadd.s32 1, %s904_s12  }
 0x139   : > { %p10_p4 = scmp.ge.s32.totalorder %s13_s12, 6  }
 0x13b   :  { %12 = sbr.rel (!%p10_p4) target bundleno = 1 (0x1), region = 62 }

// kernel: efficientb5_forward.12
= control target key start
LH: loop header
LB: loop body
LE: loop exit
PB: predicated region body
PF: predicated region fallthrough
CT: control target
= control target key end

     0   :  { %s1544_s30 = smov 0   ;;  %s1546_s10 = smov 0   ;;  %s1759_s0 = inlined_call_operand.vmem [shape: bf16[2,256,128], index: 0, kind: input, shape index: {}]   ;;  %s1760_s1 = inlined_call_operand.vmem [shape: f32[2,1,128], index: 1, kind: input, shape index: {}]   ;;  %s1761_s2 = inlined_call_operand.vmem [shape: f32[128,4], index: 2, kind: input, shape index: {}]   ;;  %s1762_s3 = inlined_call_operand.vmem [shape: f32[1,4], index: 3, kind: input, shape index: {}]   ;;  %s1763_s4 = inlined_call_operand.vmem [shape: f32[4,128], index: 4, kind: input, shape index: {}]   ;;  %s1764_s5 = inlined_call_operand.vmem [shape: f32[1,128], index: 5, kind: input, shape index: {}]   ;;  %s1765_s6 = inlined_call_operand.vmem [shape: bf16[128,128], index: 6, kind: input, shape index: {}]   ;;  %s1766_s7 = inlined_call_operand.vmem [shape: f32[1,128], index: 7, kind: input, shape index: {}]   ;;  %s1767_s8 = inlined_call_operand.vmem [shape: bf16[2,256,128], index: 8, kind: input, shape index: {}]   ;;  %s1768_s9 = inlined_call_operand.vmem [shape: bf16[2,256,128], index: 9, kind: output, shape index: {}]  }
   0x1   :  { %s1548_s11 = smov 0   ;;  %s1550_s12 = smov 0  }
   0x2   :  { %s1552_s13 = smov 0  }
   0x3 LB: > { %s28_s14 = sadd.s32 1, %s1481_s11  ;;  %s31_s15 = sadd.s32 1, %s1485_s12  ;;  %s1489_s13 = sphi %s1552_s13, %s19_s13   ;;  %s1485_s12 = sphi %s1550_s12, %s1772_s12   ;;  %s1481_s11 = sphi %s1548_s11, %s1771_s11   ;;  %s1477_s10 = sphi %s1546_s10, %s1770_s10   ;;  %s1473_s30 = sphi %s1544_s30, %s1769_s30  }
   0x4   : > { %p29_p0 = scmp.ge.s32.totalorder %s28_s14, 2  ;;  %p1111_p1 = scmp.ge.s32.totalorder %s1489_s13, 1 }
   0x5   : > { %p333_p2 = scmp.lt.s32.totalorder %s1489_s13, 5 }
   0x6   : > { %s1774_s14 = smov (%p29_p0, %s28_s14), 0  ;;  %s1776_s15 = smov (!%p29_p0, %s31_s15), %s1485_s12 }
   0x7   : > { %p334_p3 = pnand %p1111_p1, %p333_p2  ;;  %p33_p4 = scmp.ge.s32.totalorder %s1776_s15, 2 }
   0x8   : > { %v424_v0 = vld [vmem:[%s1761_s2] sm:$0xff] (!%p334_p3)  ;;  %v425_v1 = vld [vmem:[%s1761_s2 + $0x8] sm:$0xff] (!%p334_p3)  ;;  %v426_v2 = vld [vmem:[%s1761_s2 + $0x10] sm:$0xff] (!%p334_p3)  ;;  %v1491_v3 = vmov (!%p334_p3), 0.0|0.0   ;;  %vm1492_vm0 = vmmov (!%p334_p3), 0   ;;  %v1493_v6 = vmov (!%p334_p3), 0.0   ;;  %v622_v54 = vlaneseq (!%p334_p3) }
   0x9   : > { %s1778_s15 = smov (%p33_p4, %s1776_s15), 0  ;;  %337 = sbr.rel (%p334_p3) target bundleno = 788 (0x314), region = 56 }
   0xa   : > { %1368 = vmatprep.subr.bf16.mxu0 (!%p334_p3), %v1491_v3  ;;  %v1369_v4 = vpack.c.bf16 (!%p334_p3), %v425_v1, %v424_v0  ;;  %v427_v5 = vld [vmem:[%s1761_s2 + $0x18] sm:$0xff] (!%p334_p3)  ;;  %1328 = vmatprep.mubr.msk.f32.mxu0 (!%p334_p3), %vm1492_vm0, %v1493_v6  ;;  %v428_v8 = vld [vmem:[%s1761_s2 + $0x20] sm:$0xff] (!%p334_p3)  ;;  %v429_v9 = vld [vmem:[%s1761_s2 + $0x28] sm:$0xff] (!%p334_p3)  ;;  %p390_p5 = scmp.lt.s32.totalorder (!%p334_p3), %s1477_s10, 1  ;;  %vm523_vm1 = vcmask (!%p334_p3), 1043456   ;;  %vm519_vm2 = vcmask (!%p334_p3), 31744  }
   0xb   : > { %v1372_v7 = vpack.c.bf16 (!%p334_p3), %v427_v5, %v426_v2  ;;  %v430_v10 = vld [vmem:[%s1761_s2 + $0x30] sm:$0xff] (!%p334_p3)  ;;  %v1375_v11 = vpack.c.bf16 (!%p334_p3), %v429_v9, %v428_v8  ;;  %v431_v12 = vld [vmem:[%s1761_s2 + $0x38] sm:$0xff] (!%p334_p3)  ;;  %v432_v14 = vld [vmem:[%s1761_s2 + $0x40] sm:$0xff] (!%p334_p3)  ;;  %s1112_s17 = sshll.u32 (!%p334_p3), %s1473_s30, 4  ;;  %v623_v55 = vshrl.u32 (!%p334_p3), %v622_v54, 7 }
   0xc   : > { %1370 = vmatpush3.bf16.msra.mxu0 (!%p334_p3), %v1369_v4  ;;  %v1378_v13 = vpack.c.bf16 (!%p334_p3), %v431_v12, %v430_v10  ;;  %v433_v15 = vld [vmem:[%s1761_s2 + $0x48] sm:$0xff] (!%p334_p3)  ;;  %v434_v17 = vld [vmem:[%s1761_s2 + $0x50] sm:$0xff] (!%p334_p3)  ;;  %v435_v18 = vld [vmem:[%s1761_s2 + $0x58] sm:$0xff] (!%p334_p3)  ;;  %p392_p6 = scmp.lt.s32.totalorder (!%p334_p3), %s1112_s17, 31 }
   0xd   : > { %1371 = vmatprep.subr.bf16.mxu0 (!%p334_p3), %v1491_v3  ;;  %v1381_v16 = vpack.c.bf16 (!%p334_p3), %v433_v15, %v432_v14  ;;  %v1384_v19 = vpack.c.bf16 (!%p334_p3), %v435_v18, %v434_v17  ;;  %v436_v20 = vld [vmem:[%s1761_s2 + $0x60] sm:$0xff] (!%p334_p3)  ;;  %v437_v21 = vld [vmem:[%s1761_s2 + $0x68] sm:$0xff] (!%p334_p3)  ;;  %v438_v23 = vld [vmem:[%s1761_s2 + $0x70] sm:$0xff] (!%p334_p3)  ;;  %v624_v58 = vsub.s32 (!%p334_p3), 0, %v623_v55 }
   0xe   : > { %v1387_v22 = vpack.c.bf16 (!%p334_p3), %v437_v21, %v436_v20  ;;  %v439_v24 = vld [vmem:[%s1761_s2 + $0x78] sm:$0xff] (!%p334_p3)  ;;  %v517_v27 = vld [vmem:[%s1763_s4] sm:$0xf] (!%p334_p3)  ;;  %v1436_v39 = vld [vmem:[%s1765_s6 + $0x8] sm:$0xff] (!%p334_p3)  }
   0xf   : > { %v1390_v25 = vpack.c.bf16 (!%p334_p3), %v439_v24, %v438_v23  ;;  %v440_v28 = vld [vmem:[%s1762_s3] sm:$0x1] (!%p334_p3)  ;;  %v1437_v40 = vld [vmem:[%s1765_s6 + $0x10] sm:$0xff] (!%p334_p3)   ;;  %v1438_v41 = vld [vmem:[%s1765_s6 + $0x18] sm:$0xff] (!%p334_p3)  }
  0x10   : > { %1373 = vmatpush3.bf16.msra.mxu0 %v1372_v7  ;;  %s1780_s10 = smov (!%p390_p5, %s1477_s10), 1  ;;  %v1435_v38 = vld [vmem:[%s1765_s6] sm:$0xff]   ;;  %v1440_v43 = vld [vmem:[%s1765_s6 + $0x28] sm:$0xff]   ;;  %v1441_v44 = vld [vmem:[%s1765_s6 + $0x30] sm:$0xff]   ;;  %s1782_s17 = smov (!%p392_p6, %s1112_s17), 31 }
  0x11   : > { %1374 = vmatprep.subr.bf16.mxu0 %v1491_v3  ;;  %s401_s22 = scalar_lea.vmem %s1760_s1, %s1780_s10  ;;  %1336 = vmatprep.subr.bf16.mxu1 %v1435_v38  ;;  %v1439_v42 = vld [vmem:[%s1765_s6 + $0x20] sm:$0xff]   ;;  %v1442_v45 = vld [vmem:[%s1765_s6 + $0x38] sm:$0xff]   ;;  %s1113_s18 = sshll.u32 %s1780_s10, 5 }
  0x12   : > { %v423_v26 = vld [vmem:[%s401_s22] sm:$0x1]  ;;  %1337 = vmatpush3.bf16.msra.mxu1 %v1435_v38  ;;  %s395_s19 = sadd.s32 %s1113_s18, %s1782_s17 }
  0x13   : > { %1338 = vmatprep.subr.bf16.mxu1 %v1436_v39  ;;  %v518_v46 = vld [vmem:[%s1764_s5] sm:$0x1]  ;;  %s1671_s20 = sshll.u32 %s395_s19, 2 }
  0x14   : > { %1376 = vmatpush3.bf16.msra.mxu0 %v1375_v11  ;;  %s1677_s23 = scalar_lea.vmem %s1759_s0, %s1671_s20  ;;  %s1699_s24 = scalar_lea.vmem %s1767_s8, %s1671_s20 }
  0x15   : > { %1377 = vmatprep.subr.bf16.mxu0 %v1491_v3  ;;  %v602_v61 = vld [vmem:[%s1677_s23] sm:$0xf]  ;;  %v603_v62 = vld [vmem:[%s1677_s23 + $0x4] sm:$0xf]  ;;  %v604_v63 = vld [vmem:[%s1677_s23 + $0x8] sm:$0xf]  ;;  %s1718_s29 = scalar_lea.vmem %s1768_s9, %s1671_s20 }
  0x16   : > { %1339 = vmatpush3.bf16.msra.mxu1 %v1436_v39  ;;  %v605_v0 = vld [vmem:[%s1677_s23 + $0xc] sm:$0xf]  ;;  %v606_v1 = vld [vmem:[%s1677_s23 + $0x10] sm:$0xf]  ;;  %v608_v4 = vld [vmem:[%s1677_s23 + $0x18] sm:$0xf] }
  0x17   : > { %1340 = vmatprep.subr.bf16.mxu1 %v1437_v40  ;;  %v609_v5 = vld [vmem:[%s1677_s23 + $0x1c] sm:$0xf]  ;;  %v611_v7 = vld [vmem:[%s1677_s23 + $0x24] sm:$0xf]  ;;  %v612_v12 = vld [vmem:[%s1677_s23 + $0x28] sm:$0xf] }
  0x18   : > { %1379 = vmatpush3.bf16.msra.mxu0 %v1378_v13  ;;  %v613_v13 = vld [vmem:[%s1677_s23 + $0x2c] sm:$0xf]  ;;  %v614_v18 = vld [vmem:[%s1677_s23 + $0x30] sm:$0xf]  ;;  %v616_v20 = vld [vmem:[%s1677_s23 + $0x38] sm:$0xf] }
  0x19   : > { %1380 = vmatprep.subr.bf16.mxu0 %v1491_v3  ;;  %v1247_v38 = vld [vmem:[%s1699_s24 + $0x8] sm:$0xff]   ;;  %v1176_v39 = vld [vmem:[%s1699_s24] sm:$0xff]   ;;  %v1249_v55 = vld [vmem:[%s1699_s24 + $0x18] sm:$0xff]  }
  0x1a   : > { %1341 = vmatpush3.bf16.msra.mxu1 %v1437_v40  ;;  %v1706_v40 = vld [vmem:[%s1766_s7] ss:$0 sm:$0xff] }
  0x1b   : > { %1342 = vmatprep.subr.bf16.mxu1 %v1438_v41 }
  0x1c   : > { %1382 = vmatpush3.bf16.msra.mxu0 %v1381_v16 }
  0x1d   : > { %1383 = vmatprep.subr.bf16.mxu0 %v1491_v3 }
  0x1e   : > { %1343 = vmatpush3.bf16.msra.mxu1 %v1438_v41  ;;  %v1181_v41 = vunpack.c.l.bf16 %v1247_v38 }
  0x1f   : > { %1344 = vmatprep.subr.bf16.mxu1 %v1439_v42 }
  0x20   : > { %1385 = vmatpush3.bf16.msra.mxu0 %v1384_v19  ;;  %v615_v19 = vld [vmem:[%s1677_s23 + $0x34] sm:$0xf] }
  0x21   : > { %1386 = vmatprep.subr.bf16.mxu0 %v1491_v3 }
  0x22   : > { %1345 = vmatpush3.bf16.msra.mxu1 %v1439_v42 }
  0x23   : > { %1346 = vmatprep.subr.bf16.mxu1 %v1440_v43 }
  0x24   : > { %1388 = vmatpush3.bf16.msra.mxu0 %v1387_v22 }
  0x25   : > { %1389 = vmatprep.subr.bf16.mxu0 %v1491_v3  ;;  %v607_v3 = vld [vmem:[%s1677_s23 + $0x14] sm:$0xf] }
  0x26   : > { %1347 = vmatpush3.bf16.msra.mxu1 %v1440_v43  ;;  %v1177_v43 = vunpack.c.l.bf16 %v1176_v39 }
  0x27   : > { %1348 = vmatprep.subr.bf16.mxu1 %v1441_v44 }
  0x28   : > { %1391 = vmatpush3.bf16.msra.mxu0 %v1390_v25  ;;  %v617_v25 = vld [vmem:[%s1677_s23 + $0x3c] sm:$0xf] }
  0x29   : > { %1331 = vmatprep.subr.mxu0 %v1493_v6 }
  0x2a   : > { %1349 = vmatpush3.bf16.msra.mxu1 %v1441_v44 }
  0x2b   : > { %1329 = vmatmul.mubr.f32.vlgmr.msra.gmra.mrb[0].mxu0 %v423_v26  ;;  %1350 = vmatprep.subr.bf16.mxu1 %v1442_v45 }
  0x2c   : > { %1333 = vmatprep.mubr.msk.f32.mxu0 %vm1492_vm0, %v1493_v6  ;;  %1332 = vmatpush3.msk.msra.mxu0 %vm523_vm1, %v517_v27  ;;  %v610_v6 = vld [vmem:[%s1677_s23 + $0x20] sm:$0xf] }
  0x2e   : > { %1351 = vmatpush3.bf16.msra.mxu1 %v1442_v45 }
  0xfe   : > { %v507_v29 = vpop.f32.mrb[0].mxu0 }
  0xff   : > { %v508_v30 = vadd.f32 %v507_v29, %v440_v28  ;;  %v1330_v31 = vpop.f32.mrb[1].mxu0 }
 0x101   : > { %v511_v32 = vsub.f32 0.0, %v508_v30 }
 0x103   : > { %v512_v33 = vmul.f32 1.442695, %v511_v32 }
 0x105   : > { %1443 = vpow2.f32 %v512_v33 }
 0x10f   : > { %v1444_v34 = vpop.eup %1443 }
 0x110   : > { %v514_v35 = vadd.f32 1.0, %v1444_v34 }
 0x112   : > { %1445 = vrcp.f32 %v514_v35 }
 0x11c   : > { %v1446_v36 = vpop.eup %1445 }
 0x11d   : > { %v516_v37 = vmul.f32 %v1446_v36, %v508_v30 }
 0x11f   : > { %1334 = vmatmul.mubr.msk.f32.vlgmr.msra.gmra.mrb[2].mxu0 %vm519_vm2, %v516_v37 }
 0x1f2   : > { %v593_v47 = vpop.f32.mrb[2].mxu0 }
 0x1f3   : > { %v594_v48 = vadd.f32 %v593_v47, %v518_v46  ;;  %v1335_v49 = vpop.f32.mrb[3].mxu0  ;;  %v1182_v46 = vunpack.c.h.bf16 %v1247_v38 }
 0x1f4   : > { %v1178_v49 = vunpack.c.h.bf16 %v1176_v39 }
 0x1f5   : > { %v597_v50 = vsub.f32 0.0, %v594_v48 }
 0x1f7   : > { %v598_v51 = vmul.f32 1.442695, %v597_v50 }
 0x1f9   : > { %1447 = vpow2.f32 %v598_v51 }
 0x203   : > { %v1448_v52 = vpop.eup %1447 }
 0x204   : > { %v600_v53 = vadd.f32 1.0, %v1448_v52 }
 0x206   : > { %1449 = vrcp.f32 %v600_v53 }
 0x210   : > { %v1450_v56 = vpop.eup %1449 }
 0x211   : > { %v618_v57 = vpack.c.bf16 %v1450_v56, %v1450_v56 }
 0x213   : > { %v620_v59 = vpack.i.b16 %v618_v57, %v618_v57  ;;  %v1248_v57 = vld [vmem:[%s1699_s24 + $0x10] sm:$0xff]  }
 0x215   : > { %v625_v60 = vrot.slane %v620_v59, %v624_v58 }
 0x217   : > { %v1123_v2 = vcombine.low %v625_v60, %v625_v60  ;;  %v1189_v60 = vunpack.c.l.bf16 %v1249_v55 }
 0x219   : > { %v630_v8 = vmul.bf16 %v1123_v2, %v602_v61  ;;  %v631_v9 = vmul.bf16 %v1123_v2, %v603_v62  ;;  %v632_v10 = vmul.bf16 %v1123_v2, %v604_v63  ;;  %v633_v11 = vmul.bf16 %v1123_v2, %v605_v0 }
 0x21a   : > { %v634_v14 = vmul.bf16 %v1123_v2, %v606_v1  ;;  %v635_v15 = vmul.bf16 %v1123_v2, %v607_v3  ;;  %v636_v16 = vmul.bf16 %v1123_v2, %v608_v4  ;;  %v637_v17 = vmul.bf16 %v1123_v2, %v609_v5 }
 0x21b   : > { %v1125_v21 = vcombine.low %v630_v8, %v631_v9  ;;  %v1126_v22 = vcombine.low %v632_v10, %v633_v11  ;;  %v638_v23 = vmul.bf16 %v1123_v2, %v610_v6  ;;  %v639_v24 = vmul.bf16 %v1123_v2, %v611_v7  ;;  %v1251_v11 = vld [vmem:[%s1699_s24 + $0x28] sm:$0xff]  }
 0x21c   : > { %v1127_v26 = vcombine.low %v634_v14, %v635_v15  ;;  %v1128_v27 = vcombine.low %v636_v16, %v637_v17  ;;  %v640_v28 = vmul.bf16 %v1123_v2, %v612_v12  ;;  %v641_v29 = vmul.bf16 %v1123_v2, %v613_v13  ;;  %v1250_v13 = vld [vmem:[%s1699_s24 + $0x20] sm:$0xff]  }
 0x21d   : > { %1352 = vmatprep.mubr.bf16.mxu1 %v1125_v21  ;;  %v1129_v30 = vcombine.low %v638_v23, %v639_v24  ;;  %v642_v31 = vmul.bf16 %v1123_v2, %v614_v18  ;;  %v643_v32 = vmul.bf16 %v1123_v2, %v615_v19  ;;  %v644_v33 = vmul.bf16 %v1123_v2, %v616_v20 }
 0x21e   : > { %1353 = vmatmul.mubr.bf16.vlgmr.msra.gmra.mrb[0].mxu1 %v1126_v22  ;;  %v1130_v34 = vcombine.low %v640_v28, %v641_v29  ;;  %v645_v35 = vmul.bf16 %v1123_v2, %v617_v25  ;;  %v1185_v63 = vunpack.c.l.bf16 %v1248_v57  ;;  %v1190_v2 = vunpack.c.h.bf16 %v1249_v55 }
 0x21f   : > { %1356 = vmatprep.mubr.bf16.mxu1 %v1127_v26  ;;  %v1131_v36 = vcombine.low %v642_v31, %v643_v32  ;;  %v1186_v5 = vunpack.c.h.bf16 %v1248_v57  ;;  %v1197_v16 = vunpack.c.l.bf16 %v1251_v11  ;;  %v1193_v19 = vunpack.c.l.bf16 %v1250_v13  ;;  %v1253_v31 = vld [vmem:[%s1699_s24 + $0x38] sm:$0xff]  }
 0x220   : > { %v1132_v37 = vcombine.low %v644_v33, %v645_v35  ;;  %v1198_v22 = vunpack.c.h.bf16 %v1251_v11  ;;  %v1194_v25 = vunpack.c.h.bf16 %v1250_v13  ;;  %v1252_v33 = vld [vmem:[%s1699_s24 + $0x30] sm:$0xff]  }
 0x221   : > { %v1201_v39 = vunpack.c.l.bf16 %v1252_v33 }
 0x226   : > { %1357 = vmatmul.mubr.bf16.gmra.mrb[4].mxu1 %v1128_v27 }
 0x227   : > { %1360 = vmatprep.mubr.bf16.mxu1 %v1129_v30 }
 0x22e   : > { %1361 = vmatmul.mubr.bf16.gmra.mrb[8].mxu1 %v1130_v34 }
 0x22f   : > { %1364 = vmatprep.mubr.bf16.mxu1 %v1131_v36  ;;  %v1205_v36 = vunpack.c.l.bf16 %v1253_v31 }
 0x236   : > { %1365 = vmatmul.mubr.bf16.gmra.mrb[12].mxu1 %v1132_v37 }
 0x2f1   : > { %v1354_v42 = vpop.f32.mrb[0].mxu1 }
 0x2f2   : > { %v808_v44 = vadd.f32 %v1354_v42, %v1706_v40  ;;  %v799_v45 = vpop.f32.mrb[1].mxu1 }
 0x2f3   : > { %v800_v47 = vadd.f32 %v1706_v40, %v799_v45  ;;  %v1355_v48 = vpop.f32.mrb[2].mxu1 }
 0x2f4   : > { %v896_v50 = vadd.f32 %v1181_v41, %v808_v44  ;;  %v811_v51 = vadd.f32 %v1355_v48, %v1706_v40  ;;  %v802_v52 = vpop.f32.mrb[3].mxu1 }
 0x2f5   : > { %v894_v53 = vadd.f32 %v1177_v43, %v800_v47  ;;  %v803_v54 = vadd.f32 %v1706_v40, %v802_v52  ;;  %v1206_v43 = vunpack.c.h.bf16 %v1253_v31 }
 0x2f6   : > { %v897_v56 = vadd.f32 %v1182_v46, %v811_v51  ;;  %v1202_v46 = vunpack.c.h.bf16 %v1252_v33 }
 0x2f7   : > { %v895_v58 = vadd.f32 %v1178_v49, %v803_v54 }
 0x2f8   : > { %v1215_v59 = vpack.c.bf16 %v897_v56, %v896_v50 }
 0x2f9   : > { %v1210_v61 = vpack.c.bf16 %v895_v58, %v894_v53  ;;  %v1358_v62 = vpop.f32.mrb[4].mxu1 }
 0x2fa   : > { %1254 = vst [vmem:[%s1718_s29 + $0x8] sm:$0xff] %v1215_v59   ;;  %v824_v0 = vadd.f32 %v1358_v62, %v1706_v40  ;;  %v815_v1 = vpop.f32.mrb[5].mxu1 }
 0x2fb   : > { %1211 = vst [vmem:[%s1718_s29] sm:$0xff] %v1210_v61   ;;  %v816_v3 = vadd.f32 %v1706_v40, %v815_v1  ;;  %v1359_v4 = vpop.f32.mrb[6].mxu1 }
 0x2fc   : > { %v900_v6 = vadd.f32 %v1189_v60, %v824_v0  ;;  %v827_v7 = vadd.f32 %v1359_v4, %v1706_v40  ;;  %v818_v8 = vpop.f32.mrb[7].mxu1 }
 0x2fd   : > { %v898_v9 = vadd.f32 %v1185_v63, %v816_v3  ;;  %v819_v10 = vadd.f32 %v1706_v40, %v818_v8 }
 0x2fe   : > { %v901_v12 = vadd.f32 %v1190_v2, %v827_v7 }
 0x2ff   : > { %v899_v14 = vadd.f32 %v1186_v5, %v819_v10 }
 0x300   : > { %v1225_v15 = vpack.c.bf16 %v901_v12, %v900_v6 }
 0x301   : > { %v1220_v17 = vpack.c.bf16 %v899_v14, %v898_v9  ;;  %v1362_v18 = vpop.f32.mrb[8].mxu1 }
 0x302   : > { %1256 = vst [vmem:[%s1718_s29 + $0x18] sm:$0xff] %v1225_v15   ;;  %v840_v20 = vadd.f32 %v1362_v18, %v1706_v40  ;;  %v831_v21 = vpop.f32.mrb[9].mxu1 }
 0x303   : > { %1255 = vst [vmem:[%s1718_s29 + $0x10] sm:$0xff] %v1220_v17   ;;  %v832_v23 = vadd.f32 %v1706_v40, %v831_v21  ;;  %v1363_v24 = vpop.f32.mrb[10].mxu1 }
 0x304   : > { %v904_v26 = vadd.f32 %v1197_v16, %v840_v20  ;;  %v843_v27 = vadd.f32 %v1363_v24, %v1706_v40  ;;  %v834_v28 = vpop.f32.mrb[11].mxu1 }
 0x305   : > { %v902_v29 = vadd.f32 %v1193_v19, %v832_v23  ;;  %v835_v30 = vadd.f32 %v1706_v40, %v834_v28 }
 0x306   : > { %v905_v32 = vadd.f32 %v1198_v22, %v843_v27 }
 0x307   : > { %v903_v34 = vadd.f32 %v1194_v25, %v835_v30 }
 0x308   : > { %v1235_v35 = vpack.c.bf16 %v905_v32, %v904_v26 }
 0x309   : > { %v1230_v37 = vpack.c.bf16 %v903_v34, %v902_v29  ;;  %v1366_v38 = vpop.f32.mrb[12].mxu1 }
 0x30a   : > { %1258 = vst [vmem:[%s1718_s29 + $0x28] sm:$0xff] %v1235_v35   ;;  %v856_v41 = vadd.f32 %v1366_v38, %v1706_v40  ;;  %v847_v42 = vpop.f32.mrb[13].mxu1 }
 0x30b   : > { %1257 = vst [vmem:[%s1718_s29 + $0x20] sm:$0xff] %v1230_v37   ;;  %v848_v44 = vadd.f32 %v1706_v40, %v847_v42  ;;  %v1367_v45 = vpop.f32.mrb[14].mxu1 }
 0x30c   : > { %v908_v47 = vadd.f32 %v1205_v36, %v856_v41  ;;  %v859_v48 = vadd.f32 %v1367_v45, %v1706_v40  ;;  %v850_v49 = vpop.f32.mrb[15].mxu1 }
 0x30d   : > { %v906_v50 = vadd.f32 %v1201_v39, %v848_v44  ;;  %v851_v51 = vadd.f32 %v1706_v40, %v850_v49 }
 0x30e   : > { %v909_v52 = vadd.f32 %v1206_v43, %v859_v48 }
 0x30f   : > { %v907_v53 = vadd.f32 %v1202_v46, %v851_v51 }
 0x310   : > { %v1245_v54 = vpack.c.bf16 %v909_v52, %v908_v47 }
 0x311   : > { %v1240_v55 = vpack.c.bf16 %v907_v53, %v906_v50 }
 0x312   : > { %1260 = vst [vmem:[%s1718_s29 + $0x38] sm:$0xff] %v1245_v54  }
 0x313   : > { %1259 = vst [vmem:[%s1718_s29 + $0x30] sm:$0xff] %v1240_v55  }
 0x314 PF: > { %s19_s13 = sadd.s32 1, %s1489_s13   ;;  %s1769_s30 = smov %s1481_s11 }
 0x315   : > { %p16_p7 = scmp.ge.s32.totalorder %s19_s13, 6   ;;  %s1770_s10 = smov %s1485_s12 }
 0x316   : > { %s1771_s11 = smov %s1774_s14  ;;  %s1772_s12 = smov %s1778_s15 }
 0x317   :  { %18 = sbr.rel (!%p16_p7) target bundleno = 3 (0x3), region = 92 }

// kernel: efficientb5_forward.11
= control target key start
LH: loop header
LB: loop body
LE: loop exit
PB: predicated region body
PF: predicated region fallthrough
CT: control target
= control target key end

     0   :  { %s3517_s15 = smov 0   ;;  %s3519_s16 = smov 0   ;;  %s6951_s0 = inlined_call_operand.vmem [shape: bf16[2,18,18,128], index: 0, kind: input, shape index: {}]   ;;  %s6952_s1 = inlined_call_operand.vmem [shape: f32[9,128], index: 1, kind: input, shape index: {}]   ;;  %s6953_s2 = inlined_call_operand.vmem [shape: f32[1,128], index: 2, kind: input, shape index: {}]   ;;  %s6954_s3 = inlined_call_operand.vmem [shape: bf16[2,16,16,128], index: 3, kind: output, shape index: {0}]   ;;  %s6955_s4 = inlined_call_operand.vmem [shape: f32[2,1,128], index: 4, kind: output, shape index: {1}]  }
   0x1   :  { %s3521_s17 = smov 0  }
   0x2 LB: > { %s27_s18 = sadd.s32 1, %s3486_s16  ;;  %p2892_p0 = scmp.ge.s32.totalorder %s3490_s17, 1  ;;  %s3490_s17 = sphi %s3521_s17, %s15_s17   ;;  %s3486_s16 = sphi %s3519_s16, %s7912_s16   ;;  %s3482_s15 = sphi %s3517_s15, %s7911_s15  }
   0x3   : > { %p29_p1 = scmp.ge.s32.totalorder %s27_s18, 2  ;;  %p203_p2 = scmp.lt.s32.totalorder %s3490_s17, 3 }
   0x5   : > { %s7914_s18 = smov (%p29_p1, %s27_s18), 0  ;;  %p204_p3 = pnand %p2892_p0, %p203_p2 }
   0x7   : > { %207 = sbr.rel (%p204_p3) target bundleno = 515 (0x203), region = 32 }
   0xe   : > { %p248_p4 = scmp.lt.s32.totalorder %s3482_s15, 1  ;;  %v2896_v36 = vld [vmem:[%s6952_s1] ss:$0 sm:$0xff]  ;;  %vm511_vm0 = vcmask 1046528   ;;  %vm789_vm1 = vcmask 1045504  }
  0x10   : > { %s7916_s15 = smov (!%p248_p4, %s3482_s15), 1 }
  0x11   : > { %s3315_s19 = smul.u32 216, %s7916_s15  ;;  %s3068_s21 = sshll.u32 %s7916_s15, 7 }
  0x12   : > { %s6885_s24 = scalar_lea.vmem %s6954_s3, %s3068_s21  ;;  %s276_s27 = scalar_lea.vmem %s6955_s4, %s7916_s15 }
  0x13   : > { %s3541_s22 = scalar_lea.vmem %s6951_s0, %s3315_s19 }
  0x14   : > { %v3544_v0 = vld [vmem:[%s3541_s22] sm:$0xff]   ;;  %v3277_v1 = vld [vmem:[%s3541_s22 + $0x18] sm:$0xff]   ;;  %v3548_v2 = vld [vmem:[%s3541_s22 + $0xc] sm:$0xff]  }
  0x15   : > { %v3278_v3 = vld [vmem:[%s3541_s22 + $0x30] sm:$0xff]   ;;  %v3279_v4 = vld [vmem:[%s3541_s22 + $0x48] sm:$0xff]   ;;  %v3280_v5 = vld [vmem:[%s3541_s22 + $0x60] sm:$0xff]   ;;  %v6961_v6 = vunpack.c.l.bf16 %v3544_v0  ;;  %v3555_v7 = vunpack.c.h.bf16 %v3544_v0  ;;  %v3557_v8 = vunpack.c.l.bf16 %v3277_v1  ;;  %v3559_v9 = vunpack.c.h.bf16 %v3277_v1 }
  0x16   : > { %v3562_v10 = vld [vmem:[%s3541_s22 + $0x24] sm:$0xff]   ;;  %v3281_v11 = vld [vmem:[%s3541_s22 + $0x78] sm:$0xff]   ;;  %v3565_v12 = vunpack.c.l.bf16 %v3278_v3  ;;  %v3567_v13 = vunpack.c.h.bf16 %v3278_v3  ;;  %v3282_v14 = vld [vmem:[%s3541_s22 + $0x90] sm:$0xff]   ;;  %v6959_v16 = vunpack.c.l.bf16 %v3548_v2  ;;  %v3573_v17 = vunpack.c.h.bf16 %v3548_v2 }
  0x17   : > { %7113 = vst [vmem:[#allocation2_spill] sm:$0xff] %v3555_v7  ;;  %7114 = vst [vmem:[#allocation3_spill] sm:$0xff] %v3557_v8  ;;  %v3283_v15 = vld [vmem:[%s3541_s22 + $0xa8] sm:$0xff]   ;;  %v3576_v18 = vld [vmem:[%s3541_s22 + $0x3c] sm:$0xff]   ;;  %v3578_v19 = vunpack.c.l.bf16 %v3279_v4  ;;  %v3580_v20 = vunpack.c.h.bf16 %v3279_v4  ;;  %v3585_v22 = vunpack.c.l.bf16 %v3280_v5  ;;  %v3587_v23 = vunpack.c.h.bf16 %v3280_v5 }
  0x18   : > { %7115 = vst [vmem:[#allocation4_spill] sm:$0xff] %v3559_v9  ;;  %7116 = vst [vmem:[#allocation5_spill] sm:$0xff] %v3565_v12  ;;  %v3583_v21 = vld [vmem:[%s3541_s22 + $0x54] sm:$0xff]   ;;  %v3590_v24 = vld [vmem:[%s3541_s22 + $0x6c] sm:$0xff]   ;;  %v3592_v25 = vunpack.c.l.bf16 %v3281_v11  ;;  %v3594_v26 = vunpack.c.h.bf16 %v3281_v11  ;;  %v6958_v28 = vunpack.c.l.bf16 %v3562_v10  ;;  %v3601_v29 = vunpack.c.h.bf16 %v3562_v10 }
  0x19   : > { %7117 = vst [vmem:[#allocation6_spill] sm:$0xff] %v3567_v13  ;;  %7118 = vst [vmem:[#allocation7_spill] sm:$0xff] %v3573_v17  ;;  %v3597_v27 = vld [vmem:[%s3541_s22 + $0x84] sm:$0xff]   ;;  %v3603_v30 = vunpack.c.l.bf16 %v3282_v14  ;;  %v3605_v31 = vunpack.c.h.bf16 %v3282_v14  ;;  %v3608_v32 = vld [vmem:[%s3541_s22 + $0x9c] sm:$0xff]   ;;  %v3610_v33 = vunpack.c.l.bf16 %v3283_v15  ;;  %v3612_v34 = vunpack.c.h.bf16 %v3283_v15 }
  0x1a   : > { %7119 = vst [vmem:[#allocation8_spill] sm:$0xff] %v3578_v19  ;;  %7120 = vst [vmem:[#allocation9_spill] sm:$0xff] %v3580_v20  ;;  %v3615_v35 = vld [vmem:[%s3541_s22 + $0xb4] sm:$0xff]   ;;  %v6957_v37 = vunpack.c.l.bf16 %v3576_v18  ;;  %v3622_v38 = vunpack.c.h.bf16 %v3576_v18  ;;  %v6956_v39 = vunpack.c.l.bf16 %v3583_v21  ;;  %v3626_v40 = vunpack.c.h.bf16 %v3583_v21  ;;  %v3698_v3 = vld [vmem:[%s3541_s22 + $0x8] sm:$0x1] }
  0x1b   : > { %7121 = vst [vmem:[#allocation10_spill] sm:$0xff] %v3585_v22  ;;  %7122 = vst [vmem:[#allocation11_spill] sm:$0xff] %v3587_v23  ;;  %v6960_v41 = vunpack.c.l.bf16 %v3590_v24  ;;  %v3630_v42 = vunpack.c.h.bf16 %v3590_v24  ;;  %v6962_v43 = vunpack.c.l.bf16 %v3597_v27  ;;  %v3634_v44 = vunpack.c.h.bf16 %v3597_v27  ;;  %v3714_v15 = vld [vmem:[%s3541_s22 + $0x14] sm:$0x1]  ;;  %v3736_v47 = vld [vmem:[%s3541_s22 + $0x38] sm:$0x1] }
  0x1c   : > { %7123 = vst [vmem:[#allocation12_spill] sm:$0xff] %v3592_v25  ;;  %7124 = vst [vmem:[#allocation13_spill] sm:$0xff] %v3594_v26  ;;  %v3638_v46 = vunpack.c.h.bf16 %v3608_v32  ;;  %v3642_v48 = vunpack.c.h.bf16 %v3615_v35  ;;  %v3646_v49 = vmul.f32 %v6961_v6, %v2896_v36  ;;  %v3649_v50 = vmul.f32 %v3555_v7, %v2896_v36  ;;  %v3739_v45 = vld [vmem:[%s3541_s22 + $0x44] sm:$0x1] }
  0x1d   : > { %7125 = vst [vmem:[#allocation14_spill] sm:$0xff] %v3601_v29  ;;  %7126 = vst [vmem:[#allocation15_spill] sm:$0xff] %v3603_v30  ;;  %v3653_v51 = vmul.f32 %v2896_v36, %v6959_v16  ;;  %v3656_v52 = vmul.f32 %v2896_v36, %v3573_v17  ;;  %v3659_v53 = vmul.f32 %v3557_v8, %v2896_v36 }
  0x1e   : > { %7127 = vst [vmem:[#allocation16_spill] sm:$0xff] %v3605_v31  ;;  %7128 = vst [vmem:[#allocation17_spill] sm:$0xff] %v3610_v33  ;;  %v3662_v54 = vmul.f32 %v3559_v9, %v2896_v36  ;;  %v3666_v55 = vmul.f32 %v2896_v36, %v6958_v28  ;;  %v3669_v56 = vmul.f32 %v2896_v36, %v3601_v29 }
  0x1f   : > { %7129 = vst [vmem:[#allocation18_spill] sm:$0xff] %v3612_v34  ;;  %7130 = vst [vmem:[#allocation19_spill] sm:$0xff] %v3622_v38  ;;  %v3672_v57 = vmul.f32 %v3565_v12, %v2896_v36  ;;  %v3675_v58 = vmul.f32 %v3567_v13, %v2896_v36  ;;  %v3679_v59 = vmul.f32 %v2896_v36, %v6957_v37  ;;  %v3720_v37 = vld [vmem:[%s3541_s22 + $0x2c] sm:$0x1] }
  0x20   : > { %7131 = vst [vmem:[#allocation20_spill] sm:$0xff] %v3626_v40  ;;  %7132 = vst [vmem:[#allocation21_spill] sm:$0xff] %v3630_v42  ;;  %v3682_v60 = vmul.f32 %v2896_v36, %v3622_v38  ;;  %v3685_v61 = vmul.f32 %v3578_v19, %v2896_v36  ;;  %v3688_v62 = vmul.f32 %v3580_v20, %v2896_v36 }
  0x21   : > { %7133 = vst [vmem:[#allocation22_spill] sm:$0xff] %v3634_v44  ;;  %7134 = vst [vmem:[#allocation23_spill] sm:$0xff] %v3642_v48  ;;  %v3692_v63 = vmul.f32 %v2896_v36, %v6956_v39  ;;  %v3695_v1 = vmul.f32 %v2896_v36, %v3626_v40  ;;  %v3701_v4 = vmul.f32 %v3585_v22, %v2896_v36  ;;  %v3717_v39 = vld [vmem:[%s3541_s22 + $0x20] sm:$0x1] }
  0x22   : > { %7135 = vst [vmem:[#allocation24_spill] sm:$0xff] %v3659_v53  ;;  %7136 = vst [vmem:[#allocation25_spill] sm:$0xff] %v3662_v54  ;;  %v3704_v5 = vmul.f32 %v3587_v23, %v2896_v36  ;;  %v3708_v11 = vmul.f32 %v2896_v36, %v6960_v41  ;;  %v3711_v14 = vmul.f32 %v2896_v36, %v3630_v42 }
  0x23   : > { %7137 = vst [vmem:[#allocation26_spill] sm:$0xff] %v3666_v55  ;;  %7138 = vst [vmem:[#allocation27_spill] sm:$0xff] %v3669_v56  ;;  %v3723_v28 = vmul.f32 %v3592_v25, %v2896_v36  ;;  %v3726_v16 = vmul.f32 %v3594_v26, %v2896_v36  ;;  %v3730_v41 = vmul.f32 %v2896_v36, %v6962_v43 }
  0x24   : > { %7139 = vst [vmem:[#allocation28_spill] sm:$0xff] %v3672_v57  ;;  %7140 = vst [vmem:[#allocation29_spill] sm:$0xff] %v3675_v58  ;;  %v3733_v6 = vmul.f32 %v2896_v36, %v3634_v44  ;;  %v3748_v43 = vmul.f32 %v3605_v31, %v2896_v36  ;;  %v7179_v57 = vunpack.c.l.bf16 %v3544_v0  ;;  %v7182_v58 = vunpack.c.l.bf16 %v3714_v15 }
  0x25   : > { %7141 = vst [vmem:[#allocation30_spill] sm:$0xff] %v3679_v59  ;;  %7142 = vst [vmem:[#allocation31_spill] sm:$0xff] %v3682_v60  ;;  %v3792_v60 = vld [vmem:[%s3541_s22 + $0xb0] sm:$0x1] }
  0x26   : > { %7143 = vst [vmem:[#allocation32_spill] sm:$0xff] %v3685_v61  ;;  %7144 = vst [vmem:[#allocation33_spill] sm:$0xff] %v3688_v62  ;;  %v3786_v62 = vld [vmem:[%s3541_s22 + $0x98] sm:$0x1]  ;;  %v3789_v61 = vld [vmem:[%s3541_s22 + $0xa4] sm:$0x1] }
  0x27   : > { %7145 = vst [vmem:[#allocation34_spill] sm:$0xff] %v3692_v63  ;;  %7146 = vst [vmem:[#allocation35_spill] sm:$0xff] %v3695_v1  ;;  %v3767_v1 = vmul.f32 %v3610_v33, %v2896_v36 }
  0x28   : > { %7147 = vst [vmem:[#allocation36_spill] sm:$0xff] %v3698_v3  ;;  %7148 = vst [vmem:[#allocation37_spill] sm:$0xff] %v3701_v4  ;;  %v3764_v4 = vld [vmem:[%s3541_s22 + $0x74] sm:$0x1] }
  0x29   : > { %7149 = vst [vmem:[#allocation38_spill] sm:$0xff] %v3704_v5  ;;  %7150 = vst [vmem:[#allocation39_spill] sm:$0xff] %v3708_v11  ;;  %v3758_v11 = vld [vmem:[%s3541_s22 + $0x5c] sm:$0x1]  ;;  %v3761_v5 = vld [vmem:[%s3541_s22 + $0x68] sm:$0x1] }
  0x2a   : > { %7151 = vst [vmem:[#allocation40_spill] sm:$0xff] %v3711_v14  ;;  %7152 = vst [vmem:[#allocation41_spill] sm:$0xff] %v3714_v15  ;;  %v3742_v14 = vld [vmem:[%s3541_s22 + $0x50] sm:$0x1] }
  0x2b   : > { %7153 = vst [vmem:[#allocation42_spill] sm:$0xff] %v3717_v39  ;;  %7154 = vst [vmem:[#allocation43_spill] sm:$0xff] %v3720_v37 }
  0x2c   : > { %7155 = vst [vmem:[#allocation44_spill] sm:$0xff] %v3723_v28  ;;  %7156 = vst [vmem:[#allocation45_spill] sm:$0xff] %v3726_v16  ;;  %v3745_v16 = vmul.f32 %v3603_v30, %v2896_v36  ;;  %v3755_v28 = vmul.f32 %v2896_v36, %v3638_v46 }
  0x2d   : > { %7157 = vst [vmem:[#allocation46_spill] sm:$0xff] %v3730_v41  ;;  %7158 = vst [vmem:[#allocation47_spill] sm:$0xff] %v3733_v6  ;;  %v7164_v41 = vunpack.c.l.bf16 %v3608_v32 }
  0x2e   : > { %7159 = vst [vmem:[#allocation48_spill] sm:$0xff] %v3736_v47  ;;  %7160 = vst [vmem:[#allocation49_spill] sm:$0xff] %v3739_v45 }
  0x2f   : > { %7161 = vst [vmem:[#allocation50_spill] sm:$0xff] %v3742_v14  ;;  %7162 = vst [vmem:[#allocation51_spill] sm:$0xff] %v3745_v16  ;;  %v3752_v6 = vmul.f32 %v2896_v36, %v7164_v41  ;;  %v3770_v16 = vmul.f32 %v3612_v34, %v2896_v36  ;;  %v3777_v41 = vmul.f32 %v2896_v36, %v3642_v48 }
  0x30   : > { %7163 = vst [vmem:[#allocation52_spill] sm:$0xff] %v3748_v43  ;;  %7166 = vst [vmem:[#allocation54_spill] sm:$0xff] %v3755_v28  ;;  %v7172_v43 = vunpack.c.l.bf16 %v3615_v35  ;;  %v3780_v28 = vld [vmem:[%s3541_s22 + $0x80] sm:$0x1] }
  0x31   : > { %7165 = vst [vmem:[#allocation53_spill] sm:$0xff] %v3752_v6  ;;  %7167 = vst [vmem:[#allocation55_spill] sm:$0xff] %v3758_v11  ;;  %v3783_v6 = vld [vmem:[%s3541_s22 + $0x8c] sm:$0x1] }
  0x32   : > { %7168 = vst [vmem:[#allocation56_spill] sm:$0xff] %v3761_v5  ;;  %7169 = vst [vmem:[#allocation57_spill] sm:$0xff] %v3764_v4  ;;  %v3774_v63 = vmul.f32 %v2896_v36, %v7172_v43  ;;  %v7180_v43 = vunpack.c.l.bf16 %v3698_v3  ;;  %v7181_v36 = vunpack.c.l.bf16 %v3548_v2 }
  0x33   : > { %7170 = vst [vmem:[#allocation58_spill] sm:$0xff] %v3767_v1  ;;  %7171 = vst [vmem:[#allocation59_spill] sm:$0xff] %v3770_v16  ;;  %v3795_v1 = vld [vmem:[%s3541_s22 + $0xbc] sm:$0x1] }
  0x34   : > { %7173 = vst [vmem:[#allocation60_spill] sm:$0xff] %v3774_v63  ;;  %7174 = vst [vmem:[#allocation61_spill] sm:$0xff] %v3777_v41  ;;  %v3804_v41 = vld [vmem:[%s6952_s1 + $0x1] ss:$0 sm:$0xff] }
  0x35   : > { %7175 = vst [vmem:[#allocation62_spill] sm:$0xff] %v3780_v28  ;;  %7176 = vst [vmem:[#allocation63_spill] sm:$0xff] %v3783_v6  ;;  %v415_v56 = vmul.f32 %v7179_v57, %v3804_v41  ;;  %v416_v16 = vmul.f32 %v3555_v7, %v3804_v41  ;;  %v417_v63 = vmul.f32 %v3804_v41, %v7180_v43  ;;  %v7183_v43 = vunpack.c.l.bf16 %v3717_v39 }
  0x36   : > { %7177 = vst [vmem:[#allocation64_spill] sm:$0xff] %v3786_v62  ;;  %7178 = vst [vmem:[#allocation65_spill] sm:$0xff] %v3792_v60  ;;  %v418_v55 = vmul.f32 %v3804_v41, %v7181_v36  ;;  %v419_v59 = vmul.f32 %v3804_v41, %v3573_v17  ;;  %v420_v54 = vmul.f32 %v3804_v41, %v7182_v58  ;;  %v7184_v36 = vunpack.c.l.bf16 %v3562_v10 }
  0x37   : > { %v3836_v0 = vmul.f32 %v3557_v8, %v3804_v41  ;;  %v3840_v57 = vmul.f32 %v3559_v9, %v3804_v41  ;;  %v3845_v2 = vmul.f32 %v3804_v41, %v7183_v43  ;;  %v3854_v58 = vmul.f32 %v3804_v41, %v3601_v29 }
  0x38   : > { %v3850_v17 = vmul.f32 %v3804_v41, %v7184_v36  ;;  %v7185_v8 = vunpack.c.l.bf16 %v3720_v37  ;;  %v3863_v39 = vmul.f32 %v3565_v12, %v3804_v41  ;;  %v3867_v43 = vmul.f32 %v3567_v13, %v3804_v41 }
  0x39   : > { %v7186_v10 = vunpack.c.l.bf16 %v3736_v47  ;;  %v7187_v29 = vunpack.c.l.bf16 %v3576_v18  ;;  %v7188_v12 = vunpack.c.l.bf16 %v3739_v45  ;;  %v3890_v47 = vmul.f32 %v3578_v19, %v3804_v41 }
  0x3a   : > { %v3859_v15 = vmul.f32 %v3804_v41, %v7185_v8  ;;  %v3881_v8 = vmul.f32 %v3804_v41, %v3622_v38  ;;  %v3894_v18 = vmul.f32 %v3580_v20, %v3804_v41  ;;  %v7190_v38 = vunpack.c.l.bf16 %v3583_v21 }
  0x3b   : > { %v3872_v36 = vmul.f32 %v3804_v41, %v7186_v10  ;;  %v3877_v37 = vmul.f32 %v3804_v41, %v7187_v29  ;;  %v3886_v13 = vmul.f32 %v3804_v41, %v7188_v12  ;;  %v7189_v29 = vunpack.c.l.bf16 %v3742_v14 }
  0x3c   : > { %v3904_v45 = vmul.f32 %v3804_v41, %v7190_v38  ;;  %v3908_v12 = vmul.f32 %v3804_v41, %v3626_v40  ;;  %v7191_v19 = vunpack.c.l.bf16 %v3758_v11  ;;  %v3917_v14 = vmul.f32 %v3585_v22, %v3804_v41 }
  0x3d   : > { %v3899_v10 = vmul.f32 %v3804_v41, %v7189_v29  ;;  %v3921_v29 = vmul.f32 %v3587_v23, %v3804_v41  ;;  %v7192_v21 = vunpack.c.l.bf16 %v3761_v5  ;;  %v7193_v40 = vunpack.c.l.bf16 %v3590_v24 }
  0x3e   : > { %v3913_v9 = vmul.f32 %v3804_v41, %v7191_v19  ;;  %v3935_v19 = vmul.f32 %v3804_v41, %v3630_v42  ;;  %v7194_v22 = vunpack.c.l.bf16 %v3764_v4  ;;  %v3944_v5 = vmul.f32 %v3592_v25, %v3804_v41 }
  0x3f   : > { %v3926_v38 = vmul.f32 %v3804_v41, %v7192_v21  ;;  %v3931_v11 = vmul.f32 %v3804_v41, %v7193_v40  ;;  %v3948_v21 = vmul.f32 %v3594_v26, %v3804_v41  ;;  %v7195_v24 = vunpack.c.l.bf16 %v3780_v28 }
  0x40   : > { %v3940_v20 = vmul.f32 %v3804_v41, %v7194_v22  ;;  %v7196_v42 = vunpack.c.l.bf16 %v3597_v27  ;;  %v3962_v22 = vmul.f32 %v3804_v41, %v3634_v44  ;;  %v7197_v25 = vunpack.c.l.bf16 %v3783_v6 }
  0x41   : > { %v3953_v40 = vmul.f32 %v3804_v41, %v7195_v24  ;;  %v3971_v28 = vmul.f32 %v3603_v30, %v3804_v41  ;;  %v3975_v24 = vmul.f32 %v3605_v31, %v3804_v41  ;;  %v7198_v27 = vunpack.c.l.bf16 %v3786_v62 }
  0x42   : > { %v3958_v4 = vmul.f32 %v3804_v41, %v7196_v42  ;;  %v3967_v23 = vmul.f32 %v3804_v41, %v7197_v25  ;;  %v7199_v44 = vunpack.c.l.bf16 %v3608_v32  ;;  %v3989_v25 = vmul.f32 %v3804_v41, %v3638_v46 }
  0x43   : > { %v3980_v42 = vmul.f32 %v3804_v41, %v7198_v27  ;;  %v512_v30 = vrot.slane %v415_v56, 1  ;;  %v513_v26 = vrot.slane %v416_v16, 1  ;;  %v515_v3 = vrot.slane %v417_v63, 1 }
  0x44   : > { %v3985_v6 = vmul.f32 %v3804_v41, %v7199_v44  ;;  %v7200_v31 = vunpack.c.l.bf16 %v3789_v61  ;;  %v517_v62 = vrot.slane %v418_v55, 1  ;;  %v518_v27 = vrot.slane %v419_v59, 1 }
  0x45   : > { %v520_v53 = vrot.slane %v420_v54, 1  ;;  %v3998_v32 = vmul.f32 %v3610_v33, %v3804_v41  ;;  %v4002_v44 = vmul.f32 %v3612_v34, %v3804_v41  ;;  %v7201_v56 = vunpack.c.l.bf16 %v3792_v60 }
  0x46   : > { %v3994_v7 = vmul.f32 %v3804_v41, %v7200_v31  ;;  %v7202_v63 = vunpack.c.l.bf16 %v3615_v35  ;;  %v4016_v54 = vmul.f32 %v3804_v41, %v3642_v48  ;;  %v7203_v55 = vunpack.c.l.bf16 %v3795_v1 }
  0x47   : > { %v4007_v16 = vmul.f32 %v3804_v41, %v7201_v56  ;;  %v522_v33 = vrot.slane %v3836_v0, 1  ;;  %v523_v60 = vrot.slane %v3840_v57, 1  ;;  %v4026_v56 = vsel %vm511_vm0, %v512_v30, %v513_v26 }
  0x48   : > { %v4012_v31 = vmul.f32 %v3804_v41, %v7202_v63  ;;  %v4021_v59 = vmul.f32 %v3804_v41, %v7203_v55  ;;  %v4029_v35 = vsel %vm511_vm0, %v513_v26, %v515_v3  ;;  %v525_v63 = vrot.slane %v3845_v2, 1 }
  0x49   : > { %v527_v48 = vrot.slane %v3850_v17, 1  ;;  %v4034_v34 = vsel %vm511_vm0, %v517_v62, %v518_v27  ;;  %v4037_v41 = vsel %vm511_vm0, %v518_v27, %v520_v53  ;;  %v528_v0 = vrot.slane %v3854_v58, 1 }
  0x4a   : > { %v530_v57 = vrot.slane %v3859_v15, 1  ;;  %v532_v30 = vrot.slane %v3863_v39, 1  ;;  %v533_v55 = vrot.slane %v3867_v43, 1  ;;  %v535_v26 = vrot.slane %v3872_v36, 1 }
  0x4b   : > { %v537_v3 = vrot.slane %v3877_v37, 1  ;;  %v538_v17 = vrot.slane %v3881_v8, 1  ;;  %v540_v62 = vrot.slane %v3886_v13, 1  ;;  %v542_v2 = vrot.slane %v3890_v47, 1 }
  0x4c   : > { %v543_v53 = vrot.slane %v3894_v18, 1  ;;  %v545_v58 = vrot.slane %v3899_v10, 1  ;;  %v547_v15 = vrot.slane %v3904_v45, 1  ;;  %v548_v39 = vrot.slane %v3908_v12, 1 }
  0x4d   : > { %v550_v43 = vrot.slane %v3913_v9, 1  ;;  %v524_v36 = vsel %vm511_vm0, %v522_v33, %v523_v60  ;;  %v526_v37 = vsel %vm511_vm0, %v523_v60, %v525_v63  ;;  %v552_v8 = vrot.slane %v3917_v14, 1 }
  0x4e   : > { %v553_v13 = vrot.slane %v3921_v29, 1  ;;  %v529_v47 = vsel %vm511_vm0, %v527_v48, %v528_v0  ;;  %v531_v18 = vsel %vm511_vm0, %v528_v0, %v530_v57  ;;  %v534_v10 = vsel %vm511_vm0, %v532_v30, %v533_v55 }
  0x4f   : > { %v555_v45 = vrot.slane %v3926_v38, 1  ;;  %v536_v12 = vsel %vm511_vm0, %v533_v55, %v535_v26  ;;  %v539_v9 = vsel %vm511_vm0, %v537_v3, %v538_v17  ;;  %v541_v33 = vsel %vm511_vm0, %v538_v17, %v540_v62 }
  0x50   : > { %v544_v60 = vsel %vm511_vm0, %v542_v2, %v543_v53  ;;  %v546_v14 = vsel %vm511_vm0, %v543_v53, %v545_v58  ;;  %v549_v29 = vsel %vm511_vm0, %v547_v15, %v548_v39  ;;  %v551_v48 = vsel %vm511_vm0, %v548_v39, %v550_v43 }
  0x51   : > { %v557_v27 = vrot.slane %v3931_v11, 1  ;;  %v554_v63 = vsel %vm511_vm0, %v552_v8, %v553_v13  ;;  %v558_v38 = vrot.slane %v3935_v19, 1  ;;  %v560_v0 = vrot.slane %v3940_v20, 1 }
  0x52   : > { %v562_v57 = vrot.slane %v3944_v5, 1  ;;  %v556_v30 = vsel %vm511_vm0, %v553_v13, %v555_v45  ;;  %v563_v55 = vrot.slane %v3948_v21, 1  ;;  %v565_v26 = vrot.slane %v3953_v40, 1 }
  0x53   : > { %v567_v3 = vrot.slane %v3958_v4, 1  ;;  %v568_v17 = vrot.slane %v3962_v22, 1  ;;  %v570_v11 = vrot.slane %v3967_v23, 1  ;;  %v572_v62 = vrot.slane %v3971_v28, 1 }
  0x54   : > { %v573_v19 = vrot.slane %v3975_v24, 1  ;;  %v575_v20 = vrot.slane %v3980_v42, 1  ;;  %v577_v5 = vrot.slane %v3985_v6, 1  ;;  %v578_v2 = vrot.slane %v3989_v25, 1 }
  0x55   : > { %v580_v21 = vrot.slane %v3994_v7, 1  ;;  %v559_v40 = vsel %vm511_vm0, %v557_v27, %v558_v38  ;;  %v582_v4 = vrot.slane %v3998_v32, 1  ;;  %v583_v22 = vrot.slane %v4002_v44, 1  ;;  %v7204_v27 = vld [vmem:[#allocation24_spill] sm:$0xff] }
  0x56   : > { %v585_v23 = vrot.slane %v4007_v16, 1  ;;  %v561_v28 = vsel %vm511_vm0, %v558_v38, %v560_v0  ;;  %v587_v24 = vrot.slane %v4012_v31, 1  ;;  %v588_v42 = vrot.slane %v4016_v54, 1  ;;  %v7209_v0 = vld [vmem:[#allocation27_spill] sm:$0xff] }
  0x57   : > { %v590_v6 = vrot.slane %v4021_v59, 1  ;;  %v564_v25 = vsel %vm511_vm0, %v562_v57, %v563_v55  ;;  %v566_v7 = vsel %vm511_vm0, %v563_v55, %v565_v26  ;;  %v569_v53 = vsel %vm511_vm0, %v567_v3, %v568_v17  ;;  %v7219_v3 = vld [vmem:[#allocation32_spill] sm:$0xff] }
  0x58   : > { %v571_v32 = vsel %vm511_vm0, %v568_v17, %v570_v11  ;;  %v574_v44 = vsel %vm511_vm0, %v572_v62, %v573_v19  ;;  %v576_v16 = vsel %vm511_vm0, %v573_v19, %v575_v20  ;;  %v579_v58 = vsel %vm511_vm0, %v577_v5, %v578_v2  ;;  %v7221_v17 = vld [vmem:[#allocation33_spill] sm:$0xff]  ;;  %v7223_v11 = vld [vmem:[#allocation34_spill] sm:$0xff]  ;;  %v7225_v62 = vld [vmem:[#allocation35_spill] sm:$0xff] }
  0x59   : > { %v581_v31 = vsel %vm511_vm0, %v578_v2, %v580_v21  ;;  %v584_v54 = vsel %vm511_vm0, %v582_v4, %v583_v22  ;;  %v586_v59 = vsel %vm511_vm0, %v583_v22, %v585_v23  ;;  %v4105_v15 = vadd.f32 %v4026_v56, %v3646_v49  ;;  %v7205_v56 = vld [vmem:[#allocation25_spill] sm:$0xff]  ;;  %v7235_v22 = vld [vmem:[#allocation44_spill] sm:$0xff] }
  0x5a   : > { %v4109_v39 = vadd.f32 %v4029_v35, %v3649_v50  ;;  %v589_v43 = vsel %vm511_vm0, %v587_v24, %v588_v42  ;;  %v591_v8 = vsel %vm511_vm0, %v588_v42, %v590_v6  ;;  %v4115_v13 = vadd.f32 %v4034_v34, %v3653_v51  ;;  %v7207_v50 = vld [vmem:[#allocation26_spill] sm:$0xff]  ;;  %v7211_v34 = vld [vmem:[#allocation28_spill] sm:$0xff]  ;;  %v7227_v19 = vld [vmem:[#allocation37_spill] sm:$0xff] }
  0x5b   : > { %v4119_v45 = vadd.f32 %v4037_v41, %v3656_v52  ;;  %v4122_v49 = vadd.f32 %v524_v36, %v7204_v27  ;;  %v4125_v38 = vadd.f32 %v526_v37, %v7205_v56  ;;  %v4128_v35 = vadd.f32 %v529_v47, %v7207_v50  ;;  %v7213_v52 = vld [vmem:[#allocation29_spill] sm:$0xff]  ;;  %v7215_v36 = vld [vmem:[#allocation30_spill] sm:$0xff]  ;;  %v7217_v37 = vld [vmem:[#allocation31_spill] sm:$0xff] }
  0x5c   : > { %v4131_v57 = vadd.f32 %v531_v18, %v7209_v0  ;;  %v4134_v51 = vadd.f32 %v534_v10, %v7211_v34  ;;  %v4137_v41 = vadd.f32 %v536_v12, %v7213_v52  ;;  %v4140_v55 = vadd.f32 %v539_v9, %v7215_v36  ;;  %v656_v9 = vld [vmem:[%s3541_s22] sm:$0xe]  ;;  %v658_v4 = vld [vmem:[%s3541_s22 + $0x18] sm:$0xe]  ;;  %v661_v27 = vld [vmem:[%s3541_s22 + $0x3c] sm:$0xe] }
  0x5d   : > { %7206 = vst [vmem:[#allocation24_spill] sm:$0xff] %v4125_v38  ;;  %7208 = vst [vmem:[#allocation25_spill] sm:$0xff] %v4128_v35  ;;  %v4143_v26 = vadd.f32 %v541_v33, %v7217_v37  ;;  %v4146_v47 = vadd.f32 %v544_v60, %v7219_v3  ;;  %v4149_v18 = vadd.f32 %v546_v14, %v7221_v17  ;;  %v7229_v33 = vld [vmem:[#allocation38_spill] sm:$0xff]  ;;  %v7231_v60 = vld [vmem:[#allocation39_spill] sm:$0xff] }
  0x5e   : > { %7210 = vst [vmem:[#allocation26_spill] sm:$0xff] %v4131_v57  ;;  %7212 = vst [vmem:[#allocation27_spill] sm:$0xff] %v4134_v51  ;;  %v4152_v10 = vadd.f32 %v549_v29, %v7223_v11  ;;  %v4155_v12 = vadd.f32 %v551_v48, %v7225_v62  ;;  %v4159_v20 = vadd.f32 %v554_v63, %v7227_v19  ;;  %v7233_v14 = vld [vmem:[#allocation40_spill] sm:$0xff]  ;;  %v657_v29 = vld [vmem:[%s3541_s22 + $0xc] sm:$0xe] }
  0x5f   : > { %7214 = vst [vmem:[#allocation28_spill] sm:$0xff] %v4137_v41  ;;  %7216 = vst [vmem:[#allocation29_spill] sm:$0xff] %v4140_v55  ;;  %v4162_v5 = vadd.f32 %v556_v30, %v7229_v33  ;;  %v4165_v2 = vadd.f32 %v559_v40, %v7231_v60  ;;  %v4168_v21 = vadd.f32 %v561_v28, %v7233_v14  ;;  %v659_v48 = vld [vmem:[%s3541_s22 + $0x24] sm:$0xe]  ;;  %v7237_v63 = vld [vmem:[#allocation45_spill] sm:$0xff]  ;;  %v7298_v41 = vunpack.c.l.bf16 %v3789_v61 }
  0x60   : > { %7218 = vst [vmem:[#allocation30_spill] sm:$0xff] %v4143_v26  ;;  %7220 = vst [vmem:[#allocation31_spill] sm:$0xff] %v4146_v47  ;;  %v4174_v23 = vadd.f32 %v564_v25, %v7235_v22  ;;  %v4177_v24 = vadd.f32 %v566_v7, %v7237_v63  ;;  %v7239_v30 = vld [vmem:[#allocation46_spill] sm:$0xff]  ;;  %v7241_v40 = vld [vmem:[#allocation47_spill] sm:$0xff] }
  0x61   : > { %7222 = vst [vmem:[#allocation32_spill] sm:$0xff] %v4149_v18  ;;  %7224 = vst [vmem:[#allocation33_spill] sm:$0xff] %v4152_v10  ;;  %v4180_v42 = vadd.f32 %v569_v53, %v7239_v30  ;;  %v4183_v6 = vadd.f32 %v571_v32, %v7241_v40  ;;  %v660_v28 = vld [vmem:[%s3541_s22 + $0x30] sm:$0xe]  ;;  %v662_v56 = vld [vmem:[%s3541_s22 + $0x48] sm:$0xe]  ;;  %v673_v40 = vunpack.c.l.bf16 %v656_v9 }
  0x62   : > { %7226 = vst [vmem:[#allocation34_spill] sm:$0xff] %v4155_v12  ;;  %7228 = vst [vmem:[#allocation35_spill] sm:$0xff] %v4159_v20  ;;  %v7243_v50 = vld [vmem:[#allocation51_spill] sm:$0xff]  ;;  %v7245_v0 = vld [vmem:[#allocation52_spill] sm:$0xff] }
  0x63   : > { %7230 = vst [vmem:[#allocation37_spill] sm:$0xff] %v4162_v5  ;;  %7232 = vst [vmem:[#allocation38_spill] sm:$0xff] %v4165_v2  ;;  %v4189_v25 = vadd.f32 %v574_v44, %v7243_v50  ;;  %v4192_v7 = vadd.f32 %v576_v16, %v7245_v0  ;;  %v7247_v53 = vld [vmem:[#allocation53_spill] sm:$0xff]  ;;  %v7249_v52 = vld [vmem:[#allocation54_spill] sm:$0xff]  ;;  %v675_v50 = vunpack.c.l.bf16 %v658_v4  ;;  %v676_v0 = vunpack.c.l.bf16 %v659_v48 }
  0x64   : > { %7234 = vst [vmem:[#allocation39_spill] sm:$0xff] %v4168_v21  ;;  %7236 = vst [vmem:[#allocation40_spill] sm:$0xff] %v4174_v23  ;;  %v4195_v34 = vadd.f32 %v579_v58, %v7247_v53  ;;  %v4198_v32 = vadd.f32 %v581_v31, %v7249_v52  ;;  %v663_v36 = vld [vmem:[%s3541_s22 + $0x54] sm:$0xe]  ;;  %v664_v37 = vld [vmem:[%s3541_s22 + $0x60] sm:$0xe]  ;;  %v679_v53 = vunpack.c.l.bf16 %v662_v56 }
  0x65   : > { %7238 = vst [vmem:[#allocation44_spill] sm:$0xff] %v4177_v24  ;;  %7240 = vst [vmem:[#allocation45_spill] sm:$0xff] %v4180_v42  ;;  %v665_v3 = vld [vmem:[%s3541_s22 + $0x6c] sm:$0xe]  ;;  %v7251_v17 = vld [vmem:[#allocation58_spill] sm:$0xff]  ;;  %v680_v52 = vunpack.c.l.bf16 %v663_v36 }
  0x66   : > { %7242 = vst [vmem:[#allocation46_spill] sm:$0xff] %v4183_v6  ;;  %7244 = vst [vmem:[#allocation47_spill] sm:$0xff] %v4189_v25  ;;  %v4204_v11 = vadd.f32 %v584_v54, %v7251_v17  ;;  %v7253_v62 = vld [vmem:[#allocation59_spill] sm:$0xff]  ;;  %v7255_v44 = vld [vmem:[#allocation60_spill] sm:$0xff]  ;;  %v674_v54 = vunpack.c.l.bf16 %v657_v29  ;;  %v681_v17 = vunpack.c.l.bf16 %v664_v37 }
  0x67   : > { %7246 = vst [vmem:[#allocation51_spill] sm:$0xff] %v4192_v7  ;;  %7248 = vst [vmem:[#allocation52_spill] sm:$0xff] %v4195_v34  ;;  %v4207_v19 = vadd.f32 %v586_v59, %v7253_v62  ;;  %v4210_v33 = vadd.f32 %v589_v43, %v7255_v44  ;;  %v7257_v16 = vld [vmem:[#allocation61_spill] sm:$0xff]  ;;  %v667_v14 = vld [vmem:[%s3541_s22 + $0x84] sm:$0xe]  ;;  %v677_v43 = vunpack.c.l.bf16 %v660_v28  ;;  %v682_v62 = vunpack.c.l.bf16 %v665_v3 }
  0x68   : > { %7250 = vst [vmem:[#allocation53_spill] sm:$0xff] %v4198_v32  ;;  %7252 = vst [vmem:[#allocation54_spill] sm:$0xff] %v4204_v11  ;;  %v4213_v60 = vadd.f32 %v591_v8, %v7257_v16  ;;  %v666_v58 = vld [vmem:[%s3541_s22 + $0x78] sm:$0xe]  ;;  %v668_v22 = vld [vmem:[%s3541_s22 + $0x90] sm:$0xe]  ;;  %v678_v8 = vunpack.c.l.bf16 %v661_v27  ;;  %v684_v16 = vunpack.c.l.bf16 %v667_v14 }
  0x69   : > { %7254 = vst [vmem:[#allocation58_spill] sm:$0xff] %v4207_v19  ;;  %7256 = vst [vmem:[#allocation59_spill] sm:$0xff] %v4210_v33  ;;  %v669_v31 = vld [vmem:[%s3541_s22 + $0x9c] sm:$0xe]  ;;  %v4220_v63 = vld [vmem:[%s3541_s22 + $0xa8] sm:$0xe]  ;;  %v683_v44 = vunpack.c.l.bf16 %v666_v58 }
  0x6a   : > { %7258 = vst [vmem:[#allocation60_spill] sm:$0xff] %v4213_v60  ;;  %v4223_v30 = vld [vmem:[%s3541_s22 + $0xb4] sm:$0xe]  ;;  %v4228_v59 = vld [vmem:[%s6952_s1 + $0x2] ss:$0 sm:$0xff]  ;;  %v685_v60 = vunpack.c.l.bf16 %v668_v22  ;;  %v686_v33 = vunpack.c.l.bf16 %v669_v31  ;;  %v687_v9 = vunpack.c.l.bf16 %v4220_v63  ;;  %v7262_v36 = vld [vmem:[#allocation7_spill] sm:$0xff] }
  0x6b   : > { %v688_v29 = vunpack.c.l.bf16 %v4223_v30  ;;  %v693_v4 = vmul.f32 %v4228_v59, %v673_v40  ;;  %v7259_v48 = vld [vmem:[#allocation2_spill] sm:$0xff]  ;;  %v7260_v11 = vld [vmem:[#allocation36_spill] sm:$0xff]  ;;  %v696_v56 = vmul.f32 %v4228_v59, %v674_v54  ;;  %v697_v37 = vmul.f32 %v4228_v59, %v7262_v36  ;;  %v7263_v3 = vld [vmem:[#allocation41_spill] sm:$0xff] }
  0x6c   : > { %v694_v19 = vmul.f32 %v7259_v48, %v4228_v59  ;;  %v7261_v28 = vunpack.c.l.bf16 %v7260_v11  ;;  %v7264_v58 = vunpack.c.l.bf16 %v7263_v3  ;;  %v4245_v22 = vmul.f32 %v4228_v59, %v675_v50  ;;  %v7265_v31 = vld [vmem:[#allocation4_spill] sm:$0xff]  ;;  %v7266_v30 = vld [vmem:[#allocation42_spill] sm:$0xff]  ;;  %v7269_v36 = vld [vmem:[#allocation43_spill] sm:$0xff] }
  0x6d   : > { %v4249_v63 = vmul.f32 %v7265_v31, %v4228_v59  ;;  %v7267_v11 = vunpack.c.l.bf16 %v7266_v30  ;;  %v4257_v54 = vmul.f32 %v4228_v59, %v676_v0  ;;  %v7268_v48 = vld [vmem:[#allocation14_spill] sm:$0xff]  ;;  %v7270_v3 = vunpack.c.l.bf16 %v7269_v36  ;;  %v7274_v36 = vld [vmem:[#allocation19_spill] sm:$0xff]  ;;  %v7275_v34 = vld [vmem:[#allocation49_spill] sm:$0xff] }
  0x6e   : > { %v695_v27 = vmul.f32 %v4228_v59, %v7261_v28  ;;  %v698_v14 = vmul.f32 %v4228_v59, %v7264_v58  ;;  %v4261_v28 = vmul.f32 %v4228_v59, %v7268_v48  ;;  %v4269_v58 = vmul.f32 %v4228_v59, %v677_v43  ;;  %v7271_v30 = vld [vmem:[#allocation6_spill] sm:$0xff]  ;;  %v7280_v42 = vld [vmem:[#allocation20_spill] sm:$0xff]  ;;  %v7286_v2 = vld [vmem:[#allocation21_spill] sm:$0xff] }
  0x6f   : > { %v4254_v40 = vmul.f32 %v4228_v59, %v7267_v11  ;;  %v4266_v50 = vmul.f32 %v4228_v59, %v7270_v3  ;;  %v4273_v31 = vmul.f32 %v7271_v30, %v4228_v59  ;;  %v7272_v11 = vld [vmem:[#allocation48_spill] sm:$0xff]  ;;  %v4281_v48 = vmul.f32 %v4228_v59, %v678_v8  ;;  %v7278_v25 = vld [vmem:[#allocation50_spill] sm:$0xff] }
  0x70   : > { %v7273_v32 = vunpack.c.l.bf16 %v7272_v11  ;;  %v4285_v3 = vmul.f32 %v4228_v59, %v7274_v36  ;;  %v7276_v43 = vunpack.c.l.bf16 %v7275_v34  ;;  %v4293_v30 = vmul.f32 %v4228_v59, %v679_v53  ;;  %v7277_v11 = vld [vmem:[#allocation9_spill] sm:$0xff]  ;;  %v7292_v10 = vld [vmem:[#allocation22_spill] sm:$0xff] }
  0x71   : > { %v7279_v8 = vunpack.c.l.bf16 %v7278_v25  ;;  %v4305_v36 = vmul.f32 %v4228_v59, %v680_v52  ;;  %v4309_v34 = vmul.f32 %v4228_v59, %v7280_v42  ;;  %v7283_v25 = vld [vmem:[#allocation11_spill] sm:$0xff]  ;;  %v4329_v42 = vmul.f32 %v4228_v59, %v682_v62 }
  0x72   : > { %v4278_v0 = vmul.f32 %v4228_v59, %v7273_v32  ;;  %v4290_v7 = vmul.f32 %v4228_v59, %v7276_v43  ;;  %v4297_v32 = vmul.f32 %v7277_v11, %v4228_v59  ;;  %v7281_v43 = vld [vmem:[#allocation55_spill] sm:$0xff]  ;;  %v4317_v11 = vmul.f32 %v4228_v59, %v681_v17 }
  0x73   : > { %v4302_v6 = vmul.f32 %v4228_v59, %v7279_v8  ;;  %v7282_v24 = vunpack.c.l.bf16 %v7281_v43  ;;  %v4321_v23 = vmul.f32 %v7283_v25, %v4228_v59  ;;  %v7284_v8 = vld [vmem:[#allocation56_spill] sm:$0xff]  ;;  %v4333_v43 = vmul.f32 %v4228_v59, %v7286_v2 }
  0x74   : > { %v7285_v21 = vunpack.c.l.bf16 %v7284_v8  ;;  %v4341_v25 = vmul.f32 %v4228_v59, %v683_v44  ;;  %v7289_v8 = vld [vmem:[#allocation13_spill] sm:$0xff]  ;;  %v4353_v2 = vmul.f32 %v4228_v59, %v684_v16  ;;  %v791_v55 = vrot.slane %v694_v19, 2 }
  0x75   : > { %v4314_v53 = vmul.f32 %v4228_v59, %v7282_v24  ;;  %v7287_v24 = vld [vmem:[#allocation57_spill] sm:$0xff]  ;;  %v4345_v20 = vmul.f32 %v7289_v8, %v4228_v59  ;;  %v4365_v8 = vmul.f32 %v4228_v59, %v685_v60  ;;  %v793_v60 = vrot.slane %v695_v27, 2 }
  0x76   : > { %v4326_v52 = vmul.f32 %v4228_v59, %v7285_v21  ;;  %v7288_v5 = vunpack.c.l.bf16 %v7287_v24  ;;  %v7290_v21 = vld [vmem:[#allocation62_spill] sm:$0xff]  ;;  %v4357_v24 = vmul.f32 %v4228_v59, %v7292_v10  ;;  %v4377_v10 = vmul.f32 %v4228_v59, %v686_v33 }
  0x77   : > { %v7291_v12 = vunpack.c.l.bf16 %v7290_v21  ;;  %v7295_v21 = vld [vmem:[#allocation16_spill] sm:$0xff]  ;;  %v795_v51 = vrot.slane %v696_v56, 2  ;;  %v798_v57 = vrot.slane %v698_v14, 2  ;;  %v7299_v33 = vld [vmem:[#allocation18_spill] sm:$0xff]  ;;  %v4401_v61 = vmul.f32 %v4228_v59, %v688_v29 }
  0x78   : > { %v4338_v17 = vmul.f32 %v4228_v59, %v7288_v5  ;;  %v7293_v5 = vld [vmem:[#allocation63_spill] sm:$0xff]  ;;  %v4369_v47 = vmul.f32 %v7295_v21, %v4228_v59  ;;  %v4386_v21 = vmul.f32 %v4228_v59, %v7298_v41  ;;  %v4393_v35 = vmul.f32 %v7299_v33, %v4228_v59 }
  0x79   : > { %v4350_v62 = vmul.f32 %v4228_v59, %v7291_v12  ;;  %v7294_v18 = vunpack.c.l.bf16 %v7293_v5  ;;  %v7296_v12 = vld [vmem:[#allocation64_spill] sm:$0xff]  ;;  %v4381_v5 = vmul.f32 %v4228_v59, %v3638_v46  ;;  %v7300_v46 = vld [vmem:[#allocation65_spill] sm:$0xff]  ;;  %v7302_v41 = vld [vmem:[#allocation23_spill] sm:$0xff]  ;;  %v7303_v27 = vunpack.c.l.bf16 %v3795_v1 }
  0x7a   : > { %v7297_v26 = vunpack.c.l.bf16 %v7296_v12  ;;  %v796_v12 = vrot.slane %v697_v37, 2  ;;  %v7301_v38 = vunpack.c.l.bf16 %v7300_v46  ;;  %v800_v56 = vrot.slane %v4245_v22, 2 }
  0x7b   : > { %v4362_v44 = vmul.f32 %v4228_v59, %v7294_v18  ;;  %v790_v18 = vrot.slane %v693_v4, 2  ;;  %v4405_v4 = vmul.f32 %v4228_v59, %v7302_v41  ;;  %v801_v37 = vrot.slane %v4249_v63, 2 }
  0x7c   : > { %v4374_v16 = vmul.f32 %v4228_v59, %v7297_v26  ;;  %v4389_v26 = vmul.f32 %v4228_v59, %v687_v9  ;;  %v4398_v19 = vmul.f32 %v4228_v59, %v7301_v38  ;;  %v4410_v9 = vmul.f32 %v4228_v59, %v7303_v27 }
  0x7d   : > { %v4415_v14 = vsel %vm789_vm1, %v790_v18, %v791_v55  ;;  %v4418_v38 = vsel %vm789_vm1, %v791_v55, %v793_v60  ;;  %v803_v29 = vrot.slane %v4254_v40, 2  ;;  %v805_v46 = vrot.slane %v4257_v54, 2 }
  0x7e   : > { %v4423_v41 = vsel %vm789_vm1, %v795_v51, %v796_v12  ;;  %v4426_v1 = vsel %vm789_vm1, %v796_v12, %v798_v57  ;;  %v806_v59 = vrot.slane %v4261_v28, 2  ;;  %v808_v22 = vrot.slane %v4266_v50, 2 }
  0x7f   : > { %v810_v63 = vrot.slane %v4269_v58, 2  ;;  %v811_v18 = vrot.slane %v4273_v31, 2  ;;  %v813_v55 = vrot.slane %v4278_v0, 2  ;;  %v815_v40 = vrot.slane %v4281_v48, 2 }
  0x80   : > { %v816_v54 = vrot.slane %v4285_v3, 2  ;;  %v818_v51 = vrot.slane %v4290_v7, 2  ;;  %v820_v60 = vrot.slane %v4293_v30, 2  ;;  %v821_v57 = vrot.slane %v4297_v32, 2 }
  0x81   : > { %v823_v28 = vrot.slane %v4302_v6, 2  ;;  %v825_v50 = vrot.slane %v4305_v36, 2  ;;  %v826_v58 = vrot.slane %v4309_v34, 2  ;;  %v828_v31 = vrot.slane %v4314_v53, 2 }
  0x82   : > { %v802_v0 = vsel %vm789_vm1, %v800_v56, %v801_v37  ;;  %v804_v48 = vsel %vm789_vm1, %v801_v37, %v803_v29  ;;  %v830_v3 = vrot.slane %v4317_v11, 2  ;;  %v831_v7 = vrot.slane %v4321_v23, 2 }
  0x83   : > { %v807_v30 = vsel %vm789_vm1, %v805_v46, %v806_v59  ;;  %v809_v32 = vsel %vm789_vm1, %v806_v59, %v808_v22  ;;  %v812_v6 = vsel %vm789_vm1, %v810_v63, %v811_v18  ;;  %v833_v36 = vrot.slane %v4326_v52, 2 }
  0x84   : > { %v814_v34 = vsel %vm789_vm1, %v811_v18, %v813_v55  ;;  %v817_v53 = vsel %vm789_vm1, %v815_v40, %v816_v54  ;;  %v819_v12 = vsel %vm789_vm1, %v816_v54, %v818_v51  ;;  %v822_v27 = vsel %vm789_vm1, %v820_v60, %v821_v57 }
  0x85   : > { %v824_v11 = vsel %vm789_vm1, %v821_v57, %v823_v28  ;;  %v827_v23 = vsel %vm789_vm1, %v825_v50, %v826_v58  ;;  %v829_v56 = vsel %vm789_vm1, %v826_v58, %v828_v31  ;;  %v835_v37 = vrot.slane %v4329_v42, 2 }
  0x86   : > { %v832_v29 = vsel %vm789_vm1, %v830_v3, %v831_v7  ;;  %v836_v52 = vrot.slane %v4333_v43, 2  ;;  %v838_v46 = vrot.slane %v4338_v17, 2  ;;  %v840_v59 = vrot.slane %v4341_v25, 2 }
  0x87   : > { %v834_v22 = vsel %vm789_vm1, %v831_v7, %v833_v36  ;;  %v841_v63 = vrot.slane %v4345_v20, 2  ;;  %v843_v18 = vrot.slane %v4350_v62, 2  ;;  %v845_v55 = vrot.slane %v4353_v2, 2 }
  0x88   : > { %v846_v40 = vrot.slane %v4357_v24, 2  ;;  %v848_v42 = vrot.slane %v4362_v44, 2  ;;  %v850_v54 = vrot.slane %v4365_v8, 2  ;;  %v851_v43 = vrot.slane %v4369_v47, 2 }
  0x89   : > { %v853_v17 = vrot.slane %v4374_v16, 2  ;;  %v855_v25 = vrot.slane %v4377_v10, 2  ;;  %v856_v51 = vrot.slane %v4381_v5, 2  ;;  %v858_v20 = vrot.slane %v4386_v21, 2 }
  0x8a   : > { %v837_v62 = vsel %vm789_vm1, %v835_v37, %v836_v52  ;;  %v860_v2 = vrot.slane %v4389_v26, 2  ;;  %v861_v24 = vrot.slane %v4393_v35, 2  ;;  %v863_v44 = vrot.slane %v4398_v19, 2  ;;  %v7306_v37 = vld [vmem:[#allocation26_spill] sm:$0xff] }
  0x8b   : > { %v839_v8 = vsel %vm789_vm1, %v836_v52, %v838_v46  ;;  %v865_v47 = vrot.slane %v4401_v61, 2  ;;  %v866_v16 = vrot.slane %v4405_v4, 2  ;;  %v868_v10 = vrot.slane %v4410_v9, 2  ;;  %v7307_v46 = vld [vmem:[#allocation27_spill] sm:$0xff] }
  0x8c   : > { %v842_v5 = vsel %vm789_vm1, %v840_v59, %v841_v63  ;;  %v844_v21 = vsel %vm789_vm1, %v841_v63, %v843_v18  ;;  %v847_v60 = vsel %vm789_vm1, %v845_v55, %v846_v40  ;;  %v849_v26 = vsel %vm789_vm1, %v846_v40, %v848_v42  ;;  %v7312_v63 = vld [vmem:[#allocation32_spill] sm:$0xff]  ;;  %v7313_v18 = vld [vmem:[#allocation33_spill] sm:$0xff]  ;;  %v7314_v55 = vld [vmem:[#allocation34_spill] sm:$0xff] }
  0x8d   : > { %v852_v35 = vsel %vm789_vm1, %v850_v54, %v851_v43  ;;  %v854_v19 = vsel %vm789_vm1, %v851_v43, %v853_v17  ;;  %v857_v57 = vsel %vm789_vm1, %v855_v25, %v856_v51  ;;  %v859_v61 = vsel %vm789_vm1, %v856_v51, %v858_v20  ;;  %v7315_v40 = vld [vmem:[#allocation35_spill] sm:$0xff]  ;;  %v7316_v42 = vld [vmem:[#allocation37_spill] sm:$0xff]  ;;  %v7317_v54 = vld [vmem:[#allocation38_spill] sm:$0xff] }
  0x8e   : > { %v862_v4 = vsel %vm789_vm1, %v860_v2, %v861_v24  ;;  %v864_v9 = vsel %vm789_vm1, %v861_v24, %v863_v44  ;;  %v4494_v28 = vadd.f32 %v4415_v14, %v4105_v15  ;;  %v4498_v50 = vadd.f32 %v4418_v38, %v4109_v39  ;;  %v7304_v15 = vld [vmem:[#allocation24_spill] sm:$0xff]  ;;  %v7305_v39 = vld [vmem:[#allocation25_spill] sm:$0xff]  ;;  %v7318_v43 = vld [vmem:[#allocation39_spill] sm:$0xff] }
  0x8f   : > { %v867_v58 = vsel %vm789_vm1, %v865_v47, %v866_v16  ;;  %v869_v31 = vsel %vm789_vm1, %v866_v16, %v868_v10  ;;  %v4504_v3 = vadd.f32 %v4423_v41, %v4115_v13  ;;  %v4508_v7 = vadd.f32 %v4426_v1, %v4119_v45  ;;  %v7308_v13 = vld [vmem:[#allocation28_spill] sm:$0xff]  ;;  %v7309_v45 = vld [vmem:[#allocation29_spill] sm:$0xff]  ;;  %v7310_v1 = vld [vmem:[#allocation30_spill] sm:$0xff] }
  0x90   : > { %v4511_v36 = vadd.f32 %v802_v0, %v4122_v49  ;;  %v4514_v14 = vadd.f32 %v804_v48, %v7304_v15  ;;  %v4517_v38 = vadd.f32 %v807_v30, %v7305_v39  ;;  %v4520_v52 = vadd.f32 %v809_v32, %v7306_v37  ;;  %v7311_v48 = vld [vmem:[#allocation31_spill] sm:$0xff]  ;;  %v7320_v17 = vld [vmem:[#allocation40_spill] sm:$0xff]  ;;  %v7324_v51 = vld [vmem:[#allocation45_spill] sm:$0xff] }
  0x91   : > { %v4523_v59 = vadd.f32 %v812_v6, %v7307_v46  ;;  %v4526_v41 = vadd.f32 %v814_v34, %v7308_v13  ;;  %v4529_v49 = vadd.f32 %v817_v53, %v7309_v45  ;;  %v4532_v0 = vadd.f32 %v819_v12, %v7310_v1  ;;  %v7322_v25 = vld [vmem:[#allocation44_spill] sm:$0xff]  ;;  %v7326_v20 = vld [vmem:[#allocation46_spill] sm:$0xff]  ;;  %v7329_v24 = vld [vmem:[#allocation47_spill] sm:$0xff] }
  0x92   : > { %v4535_v30 = vadd.f32 %v822_v27, %v7311_v48  ;;  %v4538_v32 = vadd.f32 %v824_v11, %v7312_v63  ;;  %v4541_v6 = vadd.f32 %v827_v23, %v7313_v18  ;;  %v4544_v34 = vadd.f32 %v829_v56, %v7314_v55  ;;  %v3291_v2 = vld [vmem:[%s3541_s22 + $0xc0] sm:$0xff]   ;;  %v7333_v16 = vld [vmem:[#allocation52_spill] sm:$0xff]  ;;  %v7343_v46 = vld [vmem:[#allocation59_spill] sm:$0xff] }
  0x93   : > { %v4547_v53 = vadd.f32 %v832_v29, %v7315_v40  ;;  %v4550_v12 = vadd.f32 %v834_v22, %v7316_v42  ;;  %v4553_v27 = vadd.f32 %v837_v62, %v7317_v54  ;;  %v4556_v11 = vadd.f32 %v839_v8, %v7318_v43  ;;  %v4571_v62 = vld [vmem:[%s3541_s22 + $0xc] sm:$0xff]   ;;  %v7339_v15 = vld [vmem:[#allocation54_spill] sm:$0xff]  ;;  %v4605_v45 = vld [vmem:[%s3541_s22 + $0x54] sm:$0xff]  }
  0x94   : > { %v4559_v23 = vadd.f32 %v842_v5, %v7320_v17  ;;  %v4562_v56 = vadd.f32 %v844_v21, %v7322_v25  ;;  %v4565_v29 = vadd.f32 %v847_v60, %v7324_v51  ;;  %v4568_v22 = vadd.f32 %v849_v26, %v7326_v20  ;;  %7328 = vst [vmem:[#allocation42_spill] sm:$0xff] %v4571_v62  ;;  %v7331_v8 = vld [vmem:[#allocation51_spill] sm:$0xff]  ;;  %v7335_v5 = vld [vmem:[#allocation53_spill] sm:$0xff]  ;;  %v7341_v37 = vld [vmem:[#allocation58_spill] sm:$0xff] }
  0x95   : > { %7319 = vst [vmem:[#allocation61_spill] sm:$0xff] %v4556_v11  ;;  %v4575_v44 = vadd.f32 %v852_v35, %v7329_v24  ;;  %v4578_v47 = vadd.f32 %v854_v19, %v7331_v8  ;;  %v4581_v10 = vadd.f32 %v857_v57, %v7333_v16  ;;  %v4584_v21 = vadd.f32 %v859_v61, %v7335_v5  ;;  %v4587_v60 = vld [vmem:[%s3541_s22 + $0x24] sm:$0xff]   ;;  %v4590_v26 = vld [vmem:[%s3541_s22 + $0x3c] sm:$0xff]   ;;  %v7345_v13 = vld [vmem:[#allocation60_spill] sm:$0xff] }
  0x96   : > { %7321 = vst [vmem:[#allocation2_spill] sm:$0xff] %v4559_v23  ;;  %7323 = vst [vmem:[#allocation36_spill] sm:$0xff] %v4562_v56  ;;  %v4593_v39 = vadd.f32 %v862_v4, %v7339_v15  ;;  %v4596_v35 = vadd.f32 %v864_v9, %v7341_v37  ;;  %v4599_v19 = vadd.f32 %v867_v58, %v7343_v46  ;;  %v4608_v61 = vld [vmem:[%s3541_s22 + $0x6c] sm:$0xff]   ;;  %v4611_v1 = vld [vmem:[%s3541_s22 + $0x84] sm:$0xff]   ;;  %v4616_v63 = vunpack.c.l.bf16 %v3291_v2 }
  0x97   : > { %7325 = vst [vmem:[#allocation7_spill] sm:$0xff] %v4565_v29  ;;  %7327 = vst [vmem:[#allocation41_spill] sm:$0xff] %v4568_v22  ;;  %v4602_v57 = vadd.f32 %v869_v31, %v7345_v13  ;;  %v4614_v48 = vld [vmem:[%s3541_s22 + $0x9c] sm:$0xff]   ;;  %v4618_v4 = vunpack.c.h.bf16 %v3291_v2  ;;  %v7013_v9 = vunpack.c.l.bf16 %v4571_v62  ;;  %v4622_v58 = vunpack.c.h.bf16 %v4571_v62  ;;  %v4625_v18 = vld [vmem:[%s3541_s22 + $0xb4] sm:$0xff]  }
  0x98   : > { %7330 = vst [vmem:[#allocation14_spill] sm:$0xff] %v4575_v44  ;;  %7332 = vst [vmem:[#allocation43_spill] sm:$0xff] %v4578_v47  ;;  %v2931_v31 = vld [vmem:[%s6952_s1 + $0x3] ss:$0 sm:$0xff]  ;;  %v7017_v55 = vunpack.c.l.bf16 %v4587_v60  ;;  %v4632_v40 = vunpack.c.h.bf16 %v4587_v60  ;;  %v4636_v54 = vunpack.c.h.bf16 %v4590_v26  ;;  %v4640_v17 = vunpack.c.h.bf16 %v4605_v45  ;;  %v7358_v46 = vld [vmem:[#allocation3_spill] sm:$0xff] }
  0x99   : > { %7334 = vst [vmem:[#allocation48_spill] sm:$0xff] %v4581_v10  ;;  %7336 = vst [vmem:[#allocation19_spill] sm:$0xff] %v4584_v21  ;;  %v4644_v51 = vunpack.c.h.bf16 %v4608_v61  ;;  %v4648_v2 = vunpack.c.h.bf16 %v4611_v1  ;;  %v4652_v8 = vunpack.c.h.bf16 %v4614_v48  ;;  %v4656_v5 = vunpack.c.h.bf16 %v4625_v18  ;;  %v7359_v20 = vld [vmem:[#allocation4_spill] sm:$0xff]  ;;  %v7360_v42 = vld [vmem:[#allocation5_spill] sm:$0xff] }
  0x9a   : > { %7337 = vst [vmem:[#allocation49_spill] sm:$0xff] %v4587_v60  ;;  %7338 = vst [vmem:[#allocation50_spill] sm:$0xff] %v4590_v26  ;;  %v1004_v15 = vmul.f32 %v2931_v31, %v7013_v9  ;;  %v1005_v37 = vmul.f32 %v2931_v31, %v4622_v58  ;;  %v1006_v13 = vmul.f32 %v7358_v46, %v2931_v31  ;;  %v7361_v16 = vld [vmem:[#allocation6_spill] sm:$0xff]  ;;  %v7363_v62 = vld [vmem:[#allocation8_spill] sm:$0xff] }
  0x9b   : > { %7340 = vst [vmem:[#allocation20_spill] sm:$0xff] %v4593_v39  ;;  %7342 = vst [vmem:[#allocation55_spill] sm:$0xff] %v4596_v35  ;;  %v1007_v25 = vmul.f32 %v7359_v20, %v2931_v31  ;;  %v1008_v24 = vmul.f32 %v2931_v31, %v7017_v55  ;;  %v1009_v43 = vmul.f32 %v2931_v31, %v4632_v40  ;;  %v7362_v35 = vunpack.c.l.bf16 %v4590_v26  ;;  %v7364_v21 = vld [vmem:[#allocation9_spill] sm:$0xff]  ;;  %v7366_v60 = vld [vmem:[#allocation10_spill] sm:$0xff] }
  0x9c   : > { %7344 = vst [vmem:[#allocation56_spill] sm:$0xff] %v4599_v19  ;;  %7346 = vst [vmem:[#allocation21_spill] sm:$0xff] %v4602_v57  ;;  %v1010_v57 = vmul.f32 %v7360_v42, %v2931_v31  ;;  %v1011_v19 = vmul.f32 %v7361_v16, %v2931_v31  ;;  %v1013_v9 = vmul.f32 %v2931_v31, %v4636_v54  ;;  %v7365_v20 = vunpack.c.l.bf16 %v4605_v45  ;;  %v7367_v47 = vld [vmem:[#allocation11_spill] sm:$0xff]  ;;  %v7369_v26 = vld [vmem:[#allocation12_spill] sm:$0xff] }
  0x9d   : > { %7347 = vst [vmem:[#allocation57_spill] sm:$0xff] %v4605_v45  ;;  %7348 = vst [vmem:[#allocation62_spill] sm:$0xff] %v4608_v61  ;;  %v1012_v39 = vmul.f32 %v2931_v31, %v7362_v35  ;;  %v1015_v46 = vmul.f32 %v7364_v21, %v2931_v31  ;;  %v1017_v55 = vmul.f32 %v2931_v31, %v4640_v17  ;;  %v7368_v16 = vunpack.c.l.bf16 %v4608_v61  ;;  %v7370_v22 = vld [vmem:[#allocation13_spill] sm:$0xff]  ;;  %v7372_v45 = vld [vmem:[#allocation15_spill] sm:$0xff] }
  0x9e   : > { %7349 = vst [vmem:[#allocation22_spill] sm:$0xff] %v4616_v63  ;;  %7350 = vst [vmem:[#allocation63_spill] sm:$0xff] %v4618_v4  ;;  %v1016_v10 = vmul.f32 %v2931_v31, %v7365_v20  ;;  %v1019_v42 = vmul.f32 %v7367_v47, %v2931_v31  ;;  %v1021_v35 = vmul.f32 %v2931_v31, %v4644_v51  ;;  %v7371_v21 = vunpack.c.l.bf16 %v4611_v1  ;;  %v7373_v56 = vld [vmem:[#allocation16_spill] sm:$0xff]  ;;  %v7375_v61 = vld [vmem:[#allocation17_spill] sm:$0xff] }
  0x9f   : > { %7351 = vst [vmem:[#allocation64_spill] sm:$0xff] %v4622_v58  ;;  %7352 = vst [vmem:[#allocation65_spill] sm:$0xff] %v4632_v40  ;;  %v1014_v58 = vmul.f32 %v7363_v62, %v2931_v31  ;;  %v1018_v40 = vmul.f32 %v7366_v60, %v2931_v31  ;;  %v1020_v44 = vmul.f32 %v2931_v31, %v7368_v16  ;;  %v7374_v47 = vunpack.c.l.bf16 %v4614_v48 }
  0xa0   : > { %7353 = vst [vmem:[#allocation23_spill] sm:$0xff] %v4636_v54  ;;  %7354 = vst [vmem:[#allocation24_spill] sm:$0xff] %v4640_v17  ;;  %v1022_v54 = vmul.f32 %v7369_v26, %v2931_v31  ;;  %v1023_v62 = vmul.f32 %v7370_v22, %v2931_v31  ;;  %v1024_v29 = vmul.f32 %v2931_v31, %v7371_v21  ;;  %v7376_v22 = vunpack.c.l.bf16 %v4625_v18 }
  0xa1   : > { %7355 = vst [vmem:[#allocation25_spill] sm:$0xff] %v4644_v51  ;;  %7356 = vst [vmem:[#allocation26_spill] sm:$0xff] %v4648_v2  ;;  %v1025_v20 = vmul.f32 %v2931_v31, %v4648_v2  ;;  %v1026_v17 = vmul.f32 %v7372_v45, %v2931_v31  ;;  %v1027_v60 = vmul.f32 %v7373_v56, %v2931_v31 }
  0xa2   : > { %7357 = vst [vmem:[#allocation27_spill] sm:$0xff] %v4652_v8  ;;  %v1028_v23 = vmul.f32 %v2931_v31, %v7374_v47  ;;  %v1029_v16 = vmul.f32 %v2931_v31, %v4652_v8  ;;  %v1030_v51 = vmul.f32 %v7375_v61, %v2931_v31  ;;  %v1031_v26 = vmul.f32 %v7299_v33, %v2931_v31 }
  0xa3   : > { %v1032_v11 = vmul.f32 %v2931_v31, %v7376_v22  ;;  %v1033_v21 = vmul.f32 %v2931_v31, %v4656_v5  ;;  %v1034_v2 = vmul.f32 %v4616_v63, %v2931_v31  ;;  %v1035_v45 = vmul.f32 %v4618_v4, %v2931_v31 }
  0xa4   : > { %v4699_v56 = vadd.f32 %v1004_v15, %v4494_v28  ;;  %v4702_v47 = vadd.f32 %v1005_v37, %v4498_v50  ;;  %v4705_v8 = vadd.f32 %v1006_v13, %v4504_v3  ;;  %v4708_v33 = vadd.f32 %v1007_v25, %v4508_v7  ;;  %v4798_v25 = vld [vmem:[%s3541_s22 + $0x68] sm:$0x1] }
  0xa5   : > { %v4711_v22 = vadd.f32 %v1008_v24, %v4511_v36  ;;  %v4714_v63 = vadd.f32 %v1009_v43, %v4514_v14  ;;  %v4717_v28 = vadd.f32 %v1010_v57, %v4517_v38  ;;  %v4720_v50 = vadd.f32 %v1011_v19, %v4520_v52  ;;  %v4774_v57 = vld [vmem:[%s3541_s22 + $0x38] sm:$0x1]  ;;  %v4795_v43 = vld [vmem:[%s3541_s22 + $0x5c] sm:$0x1] }
  0xa6   : > { %v4723_v3 = vadd.f32 %v1012_v39, %v4523_v59  ;;  %v4726_v7 = vadd.f32 %v1013_v9, %v4526_v41  ;;  %v4729_v36 = vadd.f32 %v1014_v58, %v4529_v49  ;;  %v4732_v14 = vadd.f32 %v1015_v46, %v4532_v0  ;;  %7401 = vst [vmem:[#allocation59_spill] sm:$0xff] %v4774_v57  ;;  %v4777_v9 = vld [vmem:[%s3541_s22 + $0x44] sm:$0x1]  ;;  %v7420_v46 = vld [vmem:[#allocation55_spill] sm:$0xff] }
  0xa7   : > { %7377 = vst [vmem:[#allocation28_spill] sm:$0xff] %v4711_v22  ;;  %7378 = vst [vmem:[#allocation29_spill] sm:$0xff] %v4714_v63  ;;  %v4735_v38 = vadd.f32 %v1016_v10, %v4535_v30  ;;  %v4738_v52 = vadd.f32 %v1017_v55, %v4538_v32  ;;  %v4741_v59 = vadd.f32 %v1018_v40, %v4541_v6  ;;  %v4753_v30 = vld [vmem:[%s3541_s22 + $0x14] sm:$0x1]  ;;  %v4756_v10 = vld [vmem:[%s3541_s22 + $0x20] sm:$0x1] }
  0xa8   : > { %7379 = vst [vmem:[#allocation30_spill] sm:$0xff] %v4717_v28  ;;  %7380 = vst [vmem:[#allocation31_spill] sm:$0xff] %v4720_v50  ;;  %v4744_v41 = vadd.f32 %v1019_v42, %v4544_v34  ;;  %v4747_v49 = vadd.f32 %v1020_v44, %v4547_v53  ;;  %v4750_v0 = vadd.f32 %v1021_v35, %v4550_v12  ;;  %v7394_v6 = vld [vmem:[#allocation61_spill] sm:$0xff]  ;;  %v7396_v34 = vld [vmem:[#allocation2_spill] sm:$0xff] }
  0xa9   : > { %7381 = vst [vmem:[#allocation32_spill] sm:$0xff] %v4723_v3  ;;  %7382 = vst [vmem:[#allocation33_spill] sm:$0xff] %v4726_v7  ;;  %v4759_v32 = vadd.f32 %v1022_v54, %v4553_v27  ;;  %v4762_v39 = vadd.f32 %v1023_v62, %v7394_v6  ;;  %v4765_v19 = vadd.f32 %v1024_v29, %v7396_v34  ;;  %v7398_v53 = vld [vmem:[#allocation36_spill] sm:$0xff]  ;;  %v4771_v12 = vld [vmem:[%s3541_s22 + $0x2c] sm:$0x1] }
  0xaa   : > { %7383 = vst [vmem:[#allocation34_spill] sm:$0xff] %v4729_v36  ;;  %7384 = vst [vmem:[#allocation35_spill] sm:$0xff] %v4732_v14  ;;  %v4768_v44 = vadd.f32 %v1025_v20, %v7398_v53  ;;  %v7403_v27 = vld [vmem:[#allocation7_spill] sm:$0xff]  ;;  %v7405_v62 = vld [vmem:[#allocation41_spill] sm:$0xff]  ;;  %v4810_v13 = vadd.f32 %v1033_v21, %v7420_v46 }
  0xab   : > { %7385 = vst [vmem:[#allocation37_spill] sm:$0xff] %v4735_v38  ;;  %7386 = vst [vmem:[#allocation38_spill] sm:$0xff] %v4738_v52  ;;  %v4780_v58 = vadd.f32 %v1026_v17, %v7403_v27  ;;  %v4783_v31 = vadd.f32 %v1027_v60, %v7405_v62  ;;  %v7407_v29 = vld [vmem:[#allocation14_spill] sm:$0xff]  ;;  %v7409_v40 = vld [vmem:[#allocation43_spill] sm:$0xff]  ;;  %v7436_v62 = vunpack.c.l.bf16 %v4753_v30 }
  0xac   : > { %7387 = vst [vmem:[#allocation39_spill] sm:$0xff] %v4741_v59  ;;  %7388 = vst [vmem:[#allocation40_spill] sm:$0xff] %v4744_v41  ;;  %v4786_v55 = vadd.f32 %v1028_v23, %v7407_v29  ;;  %v4789_v42 = vadd.f32 %v1029_v16, %v7409_v40  ;;  %v4792_v54 = vld [vmem:[%s3541_s22 + $0x50] sm:$0x1]  ;;  %v7416_v60 = vld [vmem:[#allocation19_spill] sm:$0xff] }
  0xad   : > { %7389 = vst [vmem:[#allocation44_spill] sm:$0xff] %v4747_v49  ;;  %7390 = vst [vmem:[#allocation45_spill] sm:$0xff] %v4750_v0  ;;  %v7414_v17 = vld [vmem:[#allocation48_spill] sm:$0xff]  ;;  %v4804_v15 = vadd.f32 %v1031_v26, %v7416_v60  ;;  %v4816_v20 = vld [vmem:[%s3541_s22 + $0x80] sm:$0x1]  ;;  %v7439_v60 = vunpack.c.l.bf16 %v4756_v10 }
  0xae   : > { %7391 = vst [vmem:[#allocation46_spill] sm:$0xff] %v4753_v30  ;;  %7392 = vst [vmem:[#allocation47_spill] sm:$0xff] %v4756_v10  ;;  %v4801_v24 = vadd.f32 %v1030_v51, %v7414_v17  ;;  %v7418_v23 = vld [vmem:[#allocation20_spill] sm:$0xff]  ;;  %v4819_v16 = vld [vmem:[%s3541_s22 + $0x8c] sm:$0x1] }
  0xaf   : > { %7393 = vst [vmem:[#allocation51_spill] sm:$0xff] %v4759_v32  ;;  %7395 = vst [vmem:[#allocation52_spill] sm:$0xff] %v4762_v39  ;;  %v4807_v37 = vadd.f32 %v1032_v11, %v7418_v23  ;;  %v4813_v35 = vld [vmem:[%s3541_s22 + $0x74] sm:$0x1]  ;;  %v7427_v51 = vld [vmem:[#allocation21_spill] sm:$0xff] }
  0xb0   : > { %7397 = vst [vmem:[#allocation53_spill] sm:$0xff] %v4765_v19  ;;  %7399 = vst [vmem:[#allocation54_spill] sm:$0xff] %v4768_v44  ;;  %v7425_v6 = vld [vmem:[#allocation56_spill] sm:$0xff]  ;;  %v4825_v53 = vadd.f32 %v1035_v45, %v7427_v51  ;;  %v4828_v26 = vld [vmem:[%s3541_s22 + $0x98] sm:$0x1] }
  0xb1   : > { %7400 = vst [vmem:[#allocation58_spill] sm:$0xff] %v4771_v12  ;;  %7402 = vst [vmem:[#allocation60_spill] sm:$0xff] %v4777_v9  ;;  %v4822_v34 = vadd.f32 %v1034_v2, %v7425_v6  ;;  %v4831_v27 = vld [vmem:[%s3541_s22 + $0xa4] sm:$0x1]  ;;  %v4834_v11 = vld [vmem:[%s3541_s22 + $0xb0] sm:$0x1] }
  0xb2   : > { %7404 = vst [vmem:[#allocation17_spill] sm:$0xff] %v4780_v58  ;;  %7406 = vst [vmem:[#allocation61_spill] sm:$0xff] %v4783_v31  ;;  %v4839_v29 = vld [vmem:[%s3541_s22 + $0xbc] sm:$0x1]  ;;  %v4842_v40 = vld [vmem:[%s3541_s22 + $0xc8] sm:$0x1] }
  0xb3   : > { %7408 = vst [vmem:[#allocation2_spill] sm:$0xff] %v4786_v55  ;;  %7410 = vst [vmem:[#allocation36_spill] sm:$0xff] %v4789_v42  ;;  %v4847_v2 = vld [vmem:[%s6952_s1 + $0x4] ss:$0 sm:$0xff]  ;;  %v7438_v17 = vld [vmem:[#allocation4_spill] sm:$0xff] }
  0xb4   : > { %7411 = vst [vmem:[#allocation7_spill] sm:$0xff] %v4792_v54  ;;  %7412 = vst [vmem:[#allocation41_spill] sm:$0xff] %v4795_v43  ;;  %v1107_v21 = vmul.f32 %v4847_v2, %v7436_v62  ;;  %v1110_v23 = vmul.f32 %v4847_v2, %v7439_v60  ;;  %v7443_v62 = vunpack.c.l.bf16 %v4771_v12  ;;  %v7445_v10 = vld [vmem:[#allocation6_spill] sm:$0xff] }
  0xb5   : > { %7413 = vst [vmem:[#allocation14_spill] sm:$0xff] %v4798_v25  ;;  %7415 = vst [vmem:[#allocation43_spill] sm:$0xff] %v4801_v24  ;;  %v7442_v24 = vld [vmem:[#allocation65_spill] sm:$0xff]  ;;  %v4896_v60 = vmul.f32 %v7445_v10, %v4847_v2  ;;  %v7451_v10 = vld [vmem:[#allocation8_spill] sm:$0xff] }
  0xb6   : > { %7417 = vst [vmem:[#allocation48_spill] sm:$0xff] %v4804_v15  ;;  %7419 = vst [vmem:[#allocation19_spill] sm:$0xff] %v4807_v37  ;;  %v1109_v37 = vmul.f32 %v7438_v17, %v4847_v2  ;;  %v4888_v30 = vmul.f32 %v4847_v2, %v7443_v62  ;;  %v7449_v62 = vld [vmem:[#allocation23_spill] sm:$0xff]  ;;  %v1204_v3 = vrot.slane %v1107_v21, 1  ;;  %v7477_v28 = vld [vmem:[#allocation18_spill] sm:$0xff]  ;;  %v7480_v21 = vunpack.c.l.bf16 %v4839_v29 }
  0xb7   : > { %7421 = vst [vmem:[#allocation20_spill] sm:$0xff] %v4810_v13  ;;  %7422 = vst [vmem:[#allocation55_spill] sm:$0xff] %v4813_v35  ;;  %v7435_v13 = vld [vmem:[#allocation64_spill] sm:$0xff]  ;;  %v4910_v55 = vmul.f32 %v4847_v2, %v7449_v62  ;;  %v7454_v62 = vld [vmem:[#allocation57_spill] sm:$0xff]  ;;  %v5031_v63 = vmul.f32 %v7477_v28, %v4847_v2 }
  0xb8   : > { %7423 = vst [vmem:[#allocation66_spill] sm:$0xff] %v4816_v20  ;;  %7424 = vst [vmem:[#allocation67_spill] sm:$0xff] %v4819_v16  ;;  %v1106_v51 = vmul.f32 %v4847_v2, %v7435_v13  ;;  %v4883_v13 = vmul.f32 %v4847_v2, %v7442_v24  ;;  %v7447_v24 = vld [vmem:[#allocation50_spill] sm:$0xff]  ;;  %v7455_v44 = vunpack.c.l.bf16 %v7454_v62  ;;  %v1207_v50 = vrot.slane %v1109_v37, 1 }
  0xb9   : > { %7426 = vst [vmem:[#allocation56_spill] sm:$0xff] %v4822_v34  ;;  %7428 = vst [vmem:[#allocation21_spill] sm:$0xff] %v4825_v53  ;;  %v7433_v34 = vld [vmem:[#allocation42_spill] sm:$0xff]  ;;  %v7437_v53 = vld [vmem:[#allocation3_spill] sm:$0xff]  ;;  %v7448_v42 = vunpack.c.l.bf16 %v7447_v24  ;;  %v5046_v37 = vmul.f32 %v4847_v2, %v4656_v5 }
  0xba   : > { %7429 = vst [vmem:[#allocation68_spill] sm:$0xff] %v4828_v26  ;;  %7430 = vst [vmem:[#allocation69_spill] sm:$0xff] %v4831_v27  ;;  %v7434_v46 = vunpack.c.l.bf16 %v7433_v34  ;;  %v1108_v45 = vmul.f32 %v7437_v53, %v4847_v2  ;;  %v7440_v34 = vld [vmem:[#allocation49_spill] sm:$0xff]  ;;  %v1212_v22 = vrot.slane %v4883_v13, 1  ;;  %v5059_v13 = vmul.f32 %v4618_v4, %v4847_v2 }
  0xbb   : > { %7431 = vst [vmem:[#allocation70_spill] sm:$0xff] %v4839_v29  ;;  %7432 = vst [vmem:[#allocation71_spill] sm:$0xff] %v4842_v40  ;;  %v7441_v15 = vunpack.c.l.bf16 %v7440_v34  ;;  %v7444_v53 = vld [vmem:[#allocation5_spill] sm:$0xff]  ;;  %v7446_v34 = vunpack.c.l.bf16 %v4774_v57  ;;  %v4906_v12 = vmul.f32 %v4847_v2, %v7448_v42  ;;  %v4919_v57 = vmul.f32 %v7451_v10, %v4847_v2 }
  0xbc   : > { %v1105_v6 = vmul.f32 %v4847_v2, %v7434_v46  ;;  %v4892_v17 = vmul.f32 %v7444_v53, %v4847_v2  ;;  %v7450_v53 = vunpack.c.l.bf16 %v4777_v9  ;;  %v7453_v42 = vunpack.c.l.bf16 %v4792_v54 }
  0xbd   : > { %v1111_v46 = vmul.f32 %v4847_v2, %v7441_v15  ;;  %v4901_v15 = vmul.f32 %v4847_v2, %v7446_v34  ;;  %v7452_v34 = vld [vmem:[#allocation9_spill] sm:$0xff]  ;;  %v4933_v9 = vmul.f32 %v4847_v2, %v7455_v44  ;;  %v7457_v10 = vunpack.c.l.bf16 %v4795_v43 }
  0xbe   : > { %v4915_v31 = vmul.f32 %v4847_v2, %v7450_v53  ;;  %v4923_v58 = vmul.f32 %v7452_v34, %v4847_v2  ;;  %v4928_v24 = vmul.f32 %v4847_v2, %v7453_v42  ;;  %v7456_v53 = vld [vmem:[#allocation24_spill] sm:$0xff]  ;;  %v7458_v34 = vld [vmem:[#allocation10_spill] sm:$0xff]  ;;  %v7459_v42 = vld [vmem:[#allocation11_spill] sm:$0xff]  ;;  %v7460_v44 = vunpack.c.l.bf16 %v4798_v25 }
  0xbf   : > { %v4937_v19 = vmul.f32 %v4847_v2, %v7456_v53  ;;  %v4942_v39 = vmul.f32 %v4847_v2, %v7457_v10  ;;  %v4946_v54 = vmul.f32 %v7458_v34, %v4847_v2  ;;  %v4950_v32 = vmul.f32 %v7459_v42, %v4847_v2  ;;  %v7461_v53 = vld [vmem:[#allocation62_spill] sm:$0xff]  ;;  %v7463_v10 = vld [vmem:[#allocation25_spill] sm:$0xff]  ;;  %v7465_v42 = vld [vmem:[#allocation12_spill] sm:$0xff] }
  0xc0   : > { %v4955_v62 = vmul.f32 %v4847_v2, %v7460_v44  ;;  %v7462_v0 = vunpack.c.l.bf16 %v7461_v53  ;;  %v4964_v49 = vmul.f32 %v4847_v2, %v7463_v10  ;;  %v7464_v34 = vunpack.c.l.bf16 %v4813_v35  ;;  %v7466_v44 = vld [vmem:[#allocation13_spill] sm:$0xff] }
  0xc1   : > { %v4973_v25 = vmul.f32 %v7465_v42, %v4847_v2  ;;  %v4977_v59 = vmul.f32 %v7466_v44, %v4847_v2  ;;  %v7468_v10 = vunpack.c.l.bf16 %v4611_v1  ;;  %v7470_v42 = vunpack.c.l.bf16 %v4819_v16  ;;  %v7471_v44 = vld [vmem:[#allocation15_spill] sm:$0xff] }
  0xc2   : > { %v4960_v43 = vmul.f32 %v4847_v2, %v7462_v0  ;;  %v4969_v41 = vmul.f32 %v4847_v2, %v7464_v34  ;;  %v7467_v0 = vunpack.c.l.bf16 %v4816_v20  ;;  %v7469_v34 = vld [vmem:[#allocation26_spill] sm:$0xff]  ;;  %v5000_v20 = vmul.f32 %v7471_v44, %v4847_v2 }
  0xc3   : > { %v4987_v35 = vmul.f32 %v4847_v2, %v7468_v10  ;;  %v4991_v52 = vmul.f32 %v4847_v2, %v7469_v34  ;;  %v4996_v38 = vmul.f32 %v4847_v2, %v7470_v42  ;;  %v7473_v1 = vunpack.c.l.bf16 %v4828_v26  ;;  %v7475_v42 = vld [vmem:[#allocation27_spill] sm:$0xff] }
  0xc4   : > { %v4982_v53 = vmul.f32 %v4847_v2, %v7467_v0  ;;  %v7472_v0 = vld [vmem:[#allocation16_spill] sm:$0xff]  ;;  %v7474_v34 = vunpack.c.l.bf16 %v4614_v48  ;;  %v5018_v36 = vmul.f32 %v4847_v2, %v7475_v42  ;;  %v7476_v44 = vunpack.c.l.bf16 %v4831_v27 }
  0xc5   : > { %v5004_v14 = vmul.f32 %v7472_v0, %v4847_v2  ;;  %v5009_v10 = vmul.f32 %v4847_v2, %v7473_v1  ;;  %v5027_v26 = vmul.f32 %v7375_v61, %v4847_v2  ;;  %v1201_v1 = vrot.slane %v1105_v6, 1 }
  0xc6   : > { %v5014_v16 = vmul.f32 %v4847_v2, %v7474_v34  ;;  %v5023_v7 = vmul.f32 %v4847_v2, %v7476_v44  ;;  %v1202_v0 = vrot.slane %v1106_v51, 1  ;;  %v1206_v48 = vrot.slane %v1108_v45, 1 }
  0xc7   : > { %v1209_v34 = vrot.slane %v1110_v23, 1  ;;  %v7478_v42 = vunpack.c.l.bf16 %v4834_v11  ;;  %v1211_v44 = vrot.slane %v1111_v46, 1  ;;  %v7479_v61 = vunpack.c.l.bf16 %v4625_v18  ;;  %v7481_v23 = vld [vmem:[#allocation22_spill] sm:$0xff] }
  0xc8   : > { %v5051_v45 = vmul.f32 %v4847_v2, %v7480_v21  ;;  %v5055_v51 = vmul.f32 %v7481_v23, %v4847_v2  ;;  %v7482_v18 = vunpack.c.l.bf16 %v4842_v40  ;;  %v5071_v21 = vsel %vm511_vm0, %v1202_v0, %v1204_v3 }
  0xc9   : > { %v5036_v27 = vmul.f32 %v4847_v2, %v7478_v42  ;;  %v5042_v6 = vmul.f32 %v4847_v2, %v7479_v61  ;;  %v5067_v42 = vsel %vm511_vm0, %v1201_v1, %v1202_v0  ;;  %v1214_v61 = vrot.slane %v4888_v30, 1 }
  0xca   : > { %v5064_v46 = vmul.f32 %v4847_v2, %v7482_v18  ;;  %v5074_v23 = vsel %vm511_vm0, %v1206_v48, %v1207_v50  ;;  %v5077_v29 = vsel %vm511_vm0, %v1207_v50, %v1209_v34  ;;  %v1216_v4 = vrot.slane %v4892_v17, 1 }
  0xcb   : > { %v5081_v40 = vsel %vm511_vm0, %v1211_v44, %v1212_v22  ;;  %v1217_v2 = vrot.slane %v4896_v60, 1  ;;  %v1219_v1 = vrot.slane %v4901_v15, 1  ;;  %v1221_v30 = vrot.slane %v4906_v12, 1 }
  0xcc   : > { %v1222_v3 = vrot.slane %v4910_v55, 1  ;;  %v1224_v0 = vrot.slane %v4915_v31, 1  ;;  %v1226_v48 = vrot.slane %v4919_v57, 1  ;;  %v1227_v50 = vrot.slane %v4923_v58, 1 }
  0xcd   : > { %v1229_v34 = vrot.slane %v4928_v24, 1  ;;  %v1231_v17 = vrot.slane %v4933_v9, 1  ;;  %v1232_v44 = vrot.slane %v4937_v19, 1  ;;  %v1234_v60 = vrot.slane %v4942_v39, 1 }
  0xce   : > { %v1215_v15 = vsel %vm511_vm0, %v1212_v22, %v1214_v61  ;;  %v1236_v12 = vrot.slane %v4946_v54, 1  ;;  %v1237_v55 = vrot.slane %v4950_v32, 1  ;;  %v1239_v31 = vrot.slane %v4955_v62, 1 }
  0xcf   : > { %v1218_v57 = vsel %vm511_vm0, %v1216_v4, %v1217_v2  ;;  %v1241_v58 = vrot.slane %v4960_v43, 1  ;;  %v1242_v24 = vrot.slane %v4964_v49, 1  ;;  %v1244_v9 = vrot.slane %v4969_v41, 1 }
  0xd0   : > { %v1220_v19 = vsel %vm511_vm0, %v1217_v2, %v1219_v1  ;;  %v1223_v39 = vsel %vm511_vm0, %v1221_v30, %v1222_v3  ;;  %v1225_v22 = vsel %vm511_vm0, %v1222_v3, %v1224_v0  ;;  %v1228_v54 = vsel %vm511_vm0, %v1226_v48, %v1227_v50 }
  0xd1   : > { %v1230_v32 = vsel %vm511_vm0, %v1227_v50, %v1229_v34  ;;  %v1233_v62 = vsel %vm511_vm0, %v1231_v17, %v1232_v44  ;;  %v1235_v4 = vsel %vm511_vm0, %v1232_v44, %v1234_v60  ;;  %v1246_v43 = vrot.slane %v4973_v25, 1 }
  0xd2   : > { %v1238_v49 = vsel %vm511_vm0, %v1236_v12, %v1237_v55  ;;  %v1240_v41 = vsel %vm511_vm0, %v1237_v55, %v1239_v31  ;;  %v1247_v18 = vrot.slane %v4977_v59, 1  ;;  %v1249_v61 = vrot.slane %v4982_v53, 1 }
  0xd3   : > { %v1243_v2 = vsel %vm511_vm0, %v1241_v58, %v1242_v24  ;;  %v1245_v1 = vsel %vm511_vm0, %v1242_v24, %v1244_v9  ;;  %v1251_v30 = vrot.slane %v4987_v35, 1  ;;  %v1252_v3 = vrot.slane %v4991_v52, 1 }
  0xd4   : > { %v1254_v0 = vrot.slane %v4996_v38, 1  ;;  %v1256_v25 = vrot.slane %v5000_v20, 1  ;;  %v1257_v48 = vrot.slane %v5004_v14, 1  ;;  %v1259_v50 = vrot.slane %v5009_v10, 1 }
  0xd5   : > { %v1261_v59 = vrot.slane %v5014_v16, 1  ;;  %v1262_v53 = vrot.slane %v5018_v36, 1  ;;  %v1264_v34 = vrot.slane %v5023_v7, 1  ;;  %v1266_v17 = vrot.slane %v5027_v26, 1 }
  0xd6   : > { %v1267_v35 = vrot.slane %v5031_v63, 1  ;;  %v1269_v52 = vrot.slane %v5036_v27, 1  ;;  %v1271_v38 = vrot.slane %v5042_v6, 1  ;;  %v1272_v20 = vrot.slane %v5046_v37, 1 }
  0xd7   : > { %v1248_v14 = vsel %vm511_vm0, %v1246_v43, %v1247_v18  ;;  %v1250_v10 = vsel %vm511_vm0, %v1247_v18, %v1249_v61  ;;  %v1253_v16 = vsel %vm511_vm0, %v1251_v30, %v1252_v3  ;;  %v1274_v36 = vrot.slane %v5051_v45, 1  ;;  %v7485_v43 = vld [vmem:[#allocation30_spill] sm:$0xff]  ;;  %v7491_v61 = vld [vmem:[#allocation33_spill] sm:$0xff] }
  0xd8   : > { %v1255_v7 = vsel %vm511_vm0, %v1252_v3, %v1254_v0  ;;  %v1276_v26 = vrot.slane %v5055_v51, 1  ;;  %v1277_v63 = vrot.slane %v5059_v13, 1  ;;  %v1279_v27 = vrot.slane %v5064_v46, 1  ;;  %v7493_v3 = vld [vmem:[#allocation34_spill] sm:$0xff]  ;;  %v7495_v0 = vld [vmem:[#allocation35_spill] sm:$0xff] }
  0xd9   : > { %v1258_v6 = vsel %vm511_vm0, %v1256_v25, %v1257_v48  ;;  %v1260_v37 = vsel %vm511_vm0, %v1257_v48, %v1259_v50  ;;  %v1263_v44 = vsel %vm511_vm0, %v1261_v59, %v1262_v53  ;;  %v1265_v60 = vsel %vm511_vm0, %v1262_v53, %v1264_v34  ;;  %v7503_v59 = vld [vmem:[#allocation40_spill] sm:$0xff]  ;;  %v7507_v34 = vld [vmem:[#allocation45_spill] sm:$0xff] }
  0xda   : > { %v1268_v12 = vsel %vm511_vm0, %v1266_v17, %v1267_v35  ;;  %v1270_v45 = vsel %vm511_vm0, %v1267_v35, %v1269_v52  ;;  %v1273_v55 = vsel %vm511_vm0, %v1271_v38, %v1272_v20  ;;  %v5147_v51 = vadd.f32 %v5067_v42, %v4699_v56  ;;  %v7483_v42 = vld [vmem:[#allocation28_spill] sm:$0xff]  ;;  %v2950_v17 = vld [vmem:[%s3541_s22 + $0x18] sm:$0xe]  ;;  %v7509_v35 = vld [vmem:[#allocation51_spill] sm:$0xff] }
  0xdb   : > { %v1275_v13 = vsel %vm511_vm0, %v1272_v20, %v1274_v36  ;;  %v5152_v46 = vadd.f32 %v5071_v21, %v4702_v47  ;;  %v5156_v31 = vadd.f32 %v5074_v23, %v4705_v8  ;;  %v5160_v58 = vadd.f32 %v5077_v29, %v4708_v33  ;;  %v7484_v47 = vld [vmem:[#allocation29_spill] sm:$0xff]  ;;  %v7487_v23 = vld [vmem:[#allocation31_spill] sm:$0xff]  ;;  %v7489_v33 = vld [vmem:[#allocation32_spill] sm:$0xff] }
  0xdc   : > { %v1278_v24 = vsel %vm511_vm0, %v1276_v26, %v1277_v63  ;;  %v1280_v56 = vsel %vm511_vm0, %v1277_v63, %v1279_v27  ;;  %v5166_v9 = vadd.f32 %v5081_v40, %v7483_v42  ;;  %v5169_v21 = vadd.f32 %v1215_v15, %v7484_v47  ;;  %v7505_v53 = vld [vmem:[#allocation44_spill] sm:$0xff]  ;;  %v7513_v38 = vld [vmem:[#allocation53_spill] sm:$0xff]  ;;  %v7515_v20 = vld [vmem:[#allocation54_spill] sm:$0xff] }
  0xdd   : > { %v5172_v8 = vadd.f32 %v1218_v57, %v7485_v43  ;;  %v5175_v18 = vadd.f32 %v1220_v19, %v7487_v23  ;;  %v5178_v29 = vadd.f32 %v1223_v39, %v7489_v33  ;;  %v5181_v30 = vadd.f32 %v1225_v22, %v7491_v61  ;;  %v7497_v57 = vld [vmem:[#allocation37_spill] sm:$0xff]  ;;  %v7499_v19 = vld [vmem:[#allocation38_spill] sm:$0xff]  ;;  %v7501_v39 = vld [vmem:[#allocation39_spill] sm:$0xff] }
  0xde   : > { %v5184_v40 = vadd.f32 %v1228_v54, %v7493_v3  ;;  %v5187_v15 = vadd.f32 %v1230_v32, %v7495_v0  ;;  %v5190_v25 = vadd.f32 %v1233_v62, %v7497_v57  ;;  %v5193_v48 = vadd.f32 %v1235_v4, %v7499_v19  ;;  %v2949_v62 = vld [vmem:[%s3541_s22 + $0xc] sm:$0xe]  ;;  %v7511_v52 = vld [vmem:[#allocation52_spill] sm:$0xff]  ;;  %v2951_v36 = vld [vmem:[%s3541_s22 + $0x24] sm:$0xe] }
  0xdf   : > { %7486 = vst [vmem:[#allocation42_spill] sm:$0xff] %v5172_v8  ;;  %7488 = vst [vmem:[#allocation3_spill] sm:$0xff] %v5175_v18  ;;  %v5196_v50 = vadd.f32 %v1238_v49, %v7501_v39  ;;  %v5199_v22 = vadd.f32 %v1240_v41, %v7503_v59  ;;  %v5202_v54 = vadd.f32 %v1243_v2, %v7505_v53  ;;  %v2953_v26 = vld [vmem:[%s3541_s22 + $0x3c] sm:$0xe]  ;;  %v7523_v47 = vld [vmem:[#allocation36_spill] sm:$0xff] }
  0xe0   : > { %7490 = vst [vmem:[#allocation49_spill] sm:$0xff] %v5178_v29  ;;  %7492 = vst [vmem:[#allocation5_spill] sm:$0xff] %v5181_v30  ;;  %v5205_v32 = vadd.f32 %v1245_v1, %v7507_v34  ;;  %v5210_v4 = vadd.f32 %v1248_v14, %v7509_v35  ;;  %v5213_v49 = vadd.f32 %v1250_v10, %v7511_v52  ;;  %v2952_v1 = vld [vmem:[%s3541_s22 + $0x30] sm:$0xe]  ;;  %v7517_v63 = vld [vmem:[#allocation17_spill] sm:$0xff] }
  0xe1   : > { %7494 = vst [vmem:[#allocation50_spill] sm:$0xff] %v5184_v40  ;;  %7496 = vst [vmem:[#allocation8_spill] sm:$0xff] %v5187_v15  ;;  %v5216_v41 = vadd.f32 %v1253_v16, %v7513_v38  ;;  %v5219_v2 = vadd.f32 %v1255_v7, %v7515_v20  ;;  %v5225_v27 = vadd.f32 %v1258_v6, %v7517_v63  ;;  %v7519_v14 = vld [vmem:[#allocation61_spill] sm:$0xff]  ;;  %v7521_v10 = vld [vmem:[#allocation2_spill] sm:$0xff]  ;;  %v1363_v63 = vunpack.c.l.bf16 %v2950_v17 }
  0xe2   : > { %7498 = vst [vmem:[#allocation57_spill] sm:$0xff] %v5190_v25  ;;  %7500 = vst [vmem:[#allocation10_spill] sm:$0xff] %v5193_v48  ;;  %v5228_v42 = vadd.f32 %v1260_v37, %v7519_v14  ;;  %v5231_v16 = vadd.f32 %v1263_v44, %v7521_v10  ;;  %v5234_v7 = vadd.f32 %v1265_v60, %v7523_v47  ;;  %v2954_v43 = vld [vmem:[%s3541_s22 + $0x48] sm:$0xe]  ;;  %v2955_v23 = vld [vmem:[%s3541_s22 + $0x54] sm:$0xe]  ;;  %v1364_v10 = vunpack.c.l.bf16 %v2951_v36 }
  0xe3   : > { %7502 = vst [vmem:[#allocation62_spill] sm:$0xff] %v5196_v50  ;;  %7504 = vst [vmem:[#allocation12_spill] sm:$0xff] %v5199_v22  ;;  %v2956_v33 = vld [vmem:[%s3541_s22 + $0x60] sm:$0xe]  ;;  %v7525_v61 = vld [vmem:[#allocation43_spill] sm:$0xff]  ;;  %v1366_v47 = vunpack.c.l.bf16 %v2953_v26 }
  0xe4   : > { %7506 = vst [vmem:[#allocation15_spill] sm:$0xff] %v5202_v54  ;;  %7508 = vst [vmem:[#allocation18_spill] sm:$0xff] %v5205_v32  ;;  %v5240_v6 = vadd.f32 %v1268_v12, %v7525_v61  ;;  %v7527_v3 = vld [vmem:[#allocation48_spill] sm:$0xff]  ;;  %v7529_v37 = vld [vmem:[#allocation19_spill] sm:$0xff]  ;;  %v1367_v61 = vunpack.c.l.bf16 %v2954_v43 }
  0xe5   : > { %7510 = vst [vmem:[#allocation28_spill] sm:$0xff] %v5210_v4  ;;  %7512 = vst [vmem:[#allocation29_spill] sm:$0xff] %v5213_v49  ;;  %v5243_v0 = vadd.f32 %v1270_v45, %v7527_v3  ;;  %v5246_v57 = vadd.f32 %v1273_v55, %v7529_v37  ;;  %v7531_v44 = vld [vmem:[#allocation20_spill] sm:$0xff]  ;;  %v2957_v39 = vld [vmem:[%s3541_s22 + $0x6c] sm:$0xe]  ;;  %v1362_v45 = vunpack.c.l.bf16 %v2949_v62  ;;  %v1369_v3 = vunpack.c.l.bf16 %v2956_v33 }
  0xe6   : > { %7514 = vst [vmem:[#allocation30_spill] sm:$0xff] %v5216_v41  ;;  %7516 = vst [vmem:[#allocation31_spill] sm:$0xff] %v5219_v2  ;;  %v5249_v19 = vadd.f32 %v1275_v13, %v7531_v44  ;;  %v2958_v60 = vld [vmem:[%s3541_s22 + $0x78] sm:$0xe]  ;;  %v2959_v59 = vld [vmem:[%s3541_s22 + $0x84] sm:$0xe]  ;;  %v1370_v37 = vunpack.c.l.bf16 %v2957_v39 }
  0xe7   : > { %7518 = vst [vmem:[#allocation32_spill] sm:$0xff] %v5225_v27  ;;  %7520 = vst [vmem:[#allocation33_spill] sm:$0xff] %v5228_v42  ;;  %v7533_v53 = vld [vmem:[#allocation56_spill] sm:$0xff]  ;;  %v7535_v35 = vld [vmem:[#allocation21_spill] sm:$0xff]  ;;  %v1371_v44 = vunpack.c.l.bf16 %v2958_v60 }
  0xe8   : > { %7522 = vst [vmem:[#allocation34_spill] sm:$0xff] %v5231_v16  ;;  %7524 = vst [vmem:[#allocation35_spill] sm:$0xff] %v5234_v7  ;;  %v5255_v34 = vadd.f32 %v1278_v24, %v7533_v53  ;;  %v5258_v52 = vadd.f32 %v1280_v56, %v7535_v35  ;;  %v2960_v12 = vld [vmem:[%s3541_s22 + $0x90] sm:$0xe]  ;;  %v2961_v38 = vld [vmem:[%s3541_s22 + $0x9c] sm:$0xe]  ;;  %v1365_v24 = vunpack.c.l.bf16 %v2952_v1  ;;  %v1368_v56 = vunpack.c.l.bf16 %v2955_v23 }
  0xe9   : > { %7526 = vst [vmem:[#allocation37_spill] sm:$0xff] %v5240_v6  ;;  %7528 = vst [vmem:[#allocation38_spill] sm:$0xff] %v5243_v0  ;;  %v2962_v20 = vld [vmem:[%s3541_s22 + $0xa8] sm:$0xe]  ;;  %v5264_v14 = vld [vmem:[%s3541_s22 + $0xb4] sm:$0xe]  ;;  %v1372_v53 = vunpack.c.l.bf16 %v2959_v59  ;;  %v1373_v62 = vunpack.c.l.bf16 %v2960_v12  ;;  %v1374_v17 = vunpack.c.l.bf16 %v2961_v38 }
  0xea   : > { %7530 = vst [vmem:[#allocation39_spill] sm:$0xff] %v5246_v57  ;;  %7532 = vst [vmem:[#allocation40_spill] sm:$0xff] %v5249_v19  ;;  %v5267_v55 = vld [vmem:[%s3541_s22 + $0xc0] sm:$0xe]  ;;  %v5272_v13 = vld [vmem:[%s6952_s1 + $0x5] ss:$0 sm:$0xff]  ;;  %v1375_v35 = vunpack.c.l.bf16 %v2962_v20 }
  0xeb   : > { %7534 = vst [vmem:[#allocation44_spill] sm:$0xff] %v5255_v34  ;;  %7536 = vst [vmem:[#allocation45_spill] sm:$0xff] %v5258_v52  ;;  %v1376_v52 = vunpack.c.l.bf16 %v5264_v14  ;;  %v1377_v34 = vunpack.c.l.bf16 %v5267_v55  ;;  %v1382_v19 = vmul.f32 %v5272_v13, %v1362_v45  ;;  %v7537_v57 = vld [vmem:[#allocation64_spill] sm:$0xff]  ;;  %v7538_v1 = vld [vmem:[#allocation46_spill] sm:$0xff]  ;;  %v1385_v23 = vmul.f32 %v5272_v13, %v1363_v63 }
  0xec   : > { %v1383_v36 = vmul.f32 %v5272_v13, %v7537_v57  ;;  %v7539_v26 = vunpack.c.l.bf16 %v7538_v1  ;;  %v7540_v33 = vld [vmem:[#allocation4_spill] sm:$0xff]  ;;  %v7541_v60 = vld [vmem:[#allocation47_spill] sm:$0xff]  ;;  %v1388_v38 = vmul.f32 %v5272_v13, %v1364_v10  ;;  %v7543_v20 = vld [vmem:[#allocation65_spill] sm:$0xff]  ;;  %v5299_v63 = vmul.f32 %v5272_v13, %v1365_v24 }
  0xed   : > { %v1386_v39 = vmul.f32 %v7540_v33, %v5272_v13  ;;  %v7542_v59 = vunpack.c.l.bf16 %v7541_v60  ;;  %v5291_v45 = vmul.f32 %v5272_v13, %v7543_v20  ;;  %v7544_v57 = vld [vmem:[#allocation58_spill] sm:$0xff]  ;;  %v7547_v33 = vld [vmem:[#allocation59_spill] sm:$0xff]  ;;  %v7555_v16 = vld [vmem:[#allocation24_spill] sm:$0xff]  ;;  %v1478_v40 = vrot.slane %v1382_v19, 2 }
  0xee   : > { %v1384_v43 = vmul.f32 %v5272_v13, %v7539_v26  ;;  %v7545_v14 = vunpack.c.l.bf16 %v7544_v57  ;;  %v7546_v1 = vld [vmem:[#allocation6_spill] sm:$0xff]  ;;  %v7548_v60 = vunpack.c.l.bf16 %v7547_v33  ;;  %v7549_v20 = vld [vmem:[#allocation23_spill] sm:$0xff]  ;;  %v7552_v33 = vld [vmem:[#allocation9_spill] sm:$0xff]  ;;  %v5436_v19 = vmul.f32 %v5272_v13, %v4656_v5 }
  0xef   : > { %v1387_v12 = vmul.f32 %v5272_v13, %v7542_v59  ;;  %v5303_v26 = vmul.f32 %v7546_v1, %v5272_v13  ;;  %v5311_v59 = vmul.f32 %v5272_v13, %v1366_v47  ;;  %v5315_v57 = vmul.f32 %v5272_v13, %v7549_v20  ;;  %v7561_v41 = vld [vmem:[#allocation25_spill] sm:$0xff]  ;;  %v7567_v54 = vld [vmem:[#allocation26_spill] sm:$0xff]  ;;  %v7573_v25 = vld [vmem:[#allocation27_spill] sm:$0xff] }
  0xf0   : > { %v5296_v55 = vmul.f32 %v5272_v13, %v7545_v14  ;;  %v5308_v10 = vmul.f32 %v5272_v13, %v7548_v60  ;;  %v7550_v14 = vld [vmem:[#allocation60_spill] sm:$0xff]  ;;  %v5323_v1 = vmul.f32 %v5272_v13, %v1367_v61  ;;  %v5327_v6 = vmul.f32 %v7552_v33, %v5272_v13  ;;  %v7553_v60 = vld [vmem:[#allocation7_spill] sm:$0xff] }
  0xf1   : > { %v7551_v0 = vunpack.c.l.bf16 %v7550_v14  ;;  %v7554_v7 = vunpack.c.l.bf16 %v7553_v60  ;;  %v5335_v20 = vmul.f32 %v5272_v13, %v1368_v56  ;;  %v5339_v14 = vmul.f32 %v5272_v13, %v7555_v16  ;;  %v7558_v60 = vld [vmem:[#allocation11_spill] sm:$0xff] }
  0xf2   : > { %v5347_v33 = vmul.f32 %v5272_v13, %v1369_v3  ;;  %v5351_v27 = vmul.f32 %v7558_v60, %v5272_v13  ;;  %v5359_v16 = vmul.f32 %v5272_v13, %v1370_v37  ;;  %v5371_v60 = vmul.f32 %v5272_v13, %v1371_v44 }
  0xf3   : > { %v5320_v24 = vmul.f32 %v5272_v13, %v7551_v0  ;;  %v5332_v47 = vmul.f32 %v5272_v13, %v7554_v7  ;;  %v7556_v0 = vld [vmem:[#allocation41_spill] sm:$0xff]  ;;  %v7559_v7 = vld [vmem:[#allocation14_spill] sm:$0xff]  ;;  %v1481_v30 = vrot.slane %v1384_v43, 2  ;;  %v1484_v29 = vrot.slane %v1386_v39, 2 }
  0xf4   : > { %v7557_v42 = vunpack.c.l.bf16 %v7556_v0  ;;  %v7560_v2 = vunpack.c.l.bf16 %v7559_v7  ;;  %v5363_v0 = vmul.f32 %v5272_v13, %v7561_v41  ;;  %v7564_v7 = vld [vmem:[#allocation13_spill] sm:$0xff]  ;;  %v5383_v41 = vmul.f32 %v5272_v13, %v1372_v53 }
  0xf5   : > { %v5375_v4 = vmul.f32 %v7564_v7, %v5272_v13  ;;  %v5395_v7 = vmul.f32 %v5272_v13, %v1373_v62  ;;  %v1486_v18 = vrot.slane %v1387_v12, 2  ;;  %v1489_v8 = vrot.slane %v5291_v45, 2  ;;  %v7580_v12 = vld [vmem:[#allocation71_spill] sm:$0xff] }
  0xf6   : > { %v5344_v61 = vmul.f32 %v5272_v13, %v7557_v42  ;;  %v5356_v56 = vmul.f32 %v5272_v13, %v7560_v2  ;;  %v7562_v42 = vld [vmem:[#allocation55_spill] sm:$0xff]  ;;  %v7565_v2 = vld [vmem:[#allocation66_spill] sm:$0xff]  ;;  %v1491_v45 = vrot.slane %v5296_v55, 2  ;;  %v1498_v55 = vrot.slane %v5311_v59, 2 }
  0xf7   : > { %v7563_v49 = vunpack.c.l.bf16 %v7562_v42  ;;  %v7566_v32 = vunpack.c.l.bf16 %v7565_v2  ;;  %v5387_v42 = vmul.f32 %v5272_v13, %v7567_v54  ;;  %v7570_v2 = vld [vmem:[#allocation16_spill] sm:$0xff]  ;;  %v5407_v54 = vmul.f32 %v5272_v13, %v1374_v17 }
  0xf8   : > { %v5399_v50 = vmul.f32 %v7570_v2, %v5272_v13  ;;  %v5419_v2 = vmul.f32 %v5272_v13, %v1375_v35  ;;  %v5423_v17 = vmul.f32 %v7477_v28, %v5272_v13  ;;  %v5432_v35 = vmul.f32 %v5272_v13, %v1376_v52 }
  0xf9   : > { %v5368_v3 = vmul.f32 %v5272_v13, %v7563_v49  ;;  %v5380_v37 = vmul.f32 %v5272_v13, %v7566_v32  ;;  %v7568_v49 = vld [vmem:[#allocation67_spill] sm:$0xff]  ;;  %v7571_v32 = vld [vmem:[#allocation68_spill] sm:$0xff]  ;;  %v1513_v59 = vrot.slane %v5347_v33, 2 }
  0xfa   : > { %v7569_v22 = vunpack.c.l.bf16 %v7568_v49  ;;  %v7572_v48 = vunpack.c.l.bf16 %v7571_v32  ;;  %v5411_v49 = vmul.f32 %v5272_v13, %v7573_v25  ;;  %v1479_v32 = vrot.slane %v1383_v36, 2  ;;  %v7577_v36 = vld [vmem:[#allocation70_spill] sm:$0xff] }
  0xfb   : > { %v7576_v25 = vunpack.c.l.bf16 %v4834_v11  ;;  %v7578_v43 = vunpack.c.l.bf16 %v7577_v36  ;;  %v5444_v11 = vmul.f32 %v5272_v13, %v1377_v34  ;;  %v5466_v36 = vsel %vm789_vm1, %v1484_v29, %v1486_v18 }
  0xfc   : > { %v5392_v44 = vmul.f32 %v5272_v13, %v7569_v22  ;;  %v5404_v53 = vmul.f32 %v5272_v13, %v7572_v48  ;;  %v7574_v22 = vld [vmem:[#allocation69_spill] sm:$0xff]  ;;  %v1483_v48 = vrot.slane %v1385_v23, 2  ;;  %v7579_v23 = vld [vmem:[#allocation63_spill] sm:$0xff]  ;;  %v5456_v5 = vsel %vm789_vm1, %v1478_v40, %v1479_v32 }
  0xfd   : > { %v7575_v15 = vunpack.c.l.bf16 %v7574_v22  ;;  %v5428_v22 = vmul.f32 %v5272_v13, %v7576_v25  ;;  %v5441_v28 = vmul.f32 %v5272_v13, %v7578_v43  ;;  %v5448_v39 = vmul.f32 %v7579_v23, %v5272_v13 }
  0xfe   : > { %v5460_v25 = vsel %vm789_vm1, %v1479_v32, %v1481_v30  ;;  %v5463_v34 = vsel %vm789_vm1, %v1483_v48, %v1484_v29  ;;  %v1493_v43 = vrot.slane %v5299_v63, 2  ;;  %v1496_v40 = vrot.slane %v5308_v10, 2 }
  0xff   : > { %v5416_v62 = vmul.f32 %v5272_v13, %v7575_v15  ;;  %v1488_v15 = vrot.slane %v1388_v38, 2  ;;  %v7581_v38 = vunpack.c.l.bf16 %v7580_v12  ;;  %v1499_v30 = vrot.slane %v5315_v57, 2 }
 0x100   : > { %v1501_v32 = vrot.slane %v5320_v24, 2  ;;  %v1503_v48 = vrot.slane %v5323_v1, 2  ;;  %v1504_v18 = vrot.slane %v5327_v6, 2  ;;  %v1506_v29 = vrot.slane %v5332_v47, 2 }
 0x101   : > { %v5453_v52 = vmul.f32 %v5272_v13, %v7581_v38  ;;  %v5470_v12 = vsel %vm789_vm1, %v1488_v15, %v1489_v8  ;;  %v1494_v13 = vrot.slane %v5303_v26, 2  ;;  %v1508_v63 = vrot.slane %v5335_v20, 2 }
 0x102   : > { %v1509_v15 = vrot.slane %v5339_v14, 2  ;;  %v1511_v26 = vrot.slane %v5344_v61, 2  ;;  %v1492_v10 = vsel %vm789_vm1, %v1489_v8, %v1491_v45  ;;  %v1514_v57 = vrot.slane %v5351_v27, 2 }
 0x103   : > { %v1516_v24 = vrot.slane %v5356_v56, 2  ;;  %v1495_v1 = vsel %vm789_vm1, %v1493_v43, %v1494_v13  ;;  %v1518_v6 = vrot.slane %v5359_v16, 2  ;;  %v1519_v47 = vrot.slane %v5363_v0, 2 }
 0x104   : > { %v1521_v20 = vrot.slane %v5368_v3, 2  ;;  %v1497_v14 = vsel %vm789_vm1, %v1494_v13, %v1496_v40  ;;  %v1500_v61 = vsel %vm789_vm1, %v1498_v55, %v1499_v30  ;;  %v1502_v8 = vsel %vm789_vm1, %v1499_v30, %v1501_v32 }
 0x105   : > { %v1505_v33 = vsel %vm789_vm1, %v1503_v48, %v1504_v18  ;;  %v1507_v27 = vsel %vm789_vm1, %v1504_v18, %v1506_v29  ;;  %v1510_v56 = vsel %vm789_vm1, %v1508_v63, %v1509_v15  ;;  %v1512_v38 = vsel %vm789_vm1, %v1509_v15, %v1511_v26 }
 0x106   : > { %v1523_v16 = vrot.slane %v5371_v60, 2  ;;  %v1515_v0 = vsel %vm789_vm1, %v1513_v59, %v1514_v57  ;;  %v1517_v3 = vsel %vm789_vm1, %v1514_v57, %v1516_v24  ;;  %v1524_v45 = vrot.slane %v5375_v4, 2 }
 0x107   : > { %v1526_v43 = vrot.slane %v5380_v37, 2  ;;  %v1520_v13 = vsel %vm789_vm1, %v1518_v6, %v1519_v47  ;;  %v1522_v40 = vsel %vm789_vm1, %v1519_v47, %v1521_v20  ;;  %v1528_v55 = vrot.slane %v5383_v41, 2 }
 0x108   : > { %v1529_v30 = vrot.slane %v5387_v42, 2  ;;  %v1531_v32 = vrot.slane %v5392_v44, 2  ;;  %v1533_v60 = vrot.slane %v5395_v7, 2  ;;  %v1534_v48 = vrot.slane %v5399_v50, 2 }
 0x109   : > { %v1536_v18 = vrot.slane %v5404_v53, 2  ;;  %v1538_v4 = vrot.slane %v5407_v54, 2  ;;  %v1539_v37 = vrot.slane %v5411_v49, 2  ;;  %v1541_v29 = vrot.slane %v5416_v62, 2 }
 0x10a   : > { %v1543_v63 = vrot.slane %v5419_v2, 2  ;;  %v1544_v41 = vrot.slane %v5423_v17, 2  ;;  %v1546_v42 = vrot.slane %v5428_v22, 2  ;;  %v1548_v44 = vrot.slane %v5432_v35, 2 }
 0x10b   : > { %v1549_v7 = vrot.slane %v5436_v19, 2  ;;  %v1525_v50 = vsel %vm789_vm1, %v1523_v16, %v1524_v45  ;;  %v1527_v53 = vsel %vm789_vm1, %v1524_v45, %v1526_v43  ;;  %v1530_v54 = vsel %vm789_vm1, %v1528_v55, %v1529_v30  ;;  %v7585_v16 = vld [vmem:[#allocation5_spill] sm:$0xff]  ;;  %v7586_v43 = vld [vmem:[#allocation50_spill] sm:$0xff] }
 0x10c   : > { %v1551_v49 = vrot.slane %v5441_v28, 2  ;;  %v1532_v62 = vsel %vm789_vm1, %v1529_v30, %v1531_v32  ;;  %v1553_v2 = vrot.slane %v5444_v11, 2  ;;  %v1554_v17 = vrot.slane %v5448_v39, 2  ;;  %v7590_v30 = vld [vmem:[#allocation62_spill] sm:$0xff]  ;;  %v7591_v32 = vld [vmem:[#allocation12_spill] sm:$0xff] }
 0x10d   : > { %v1556_v22 = vrot.slane %v5453_v52, 2  ;;  %v1535_v35 = vsel %vm789_vm1, %v1533_v60, %v1534_v48  ;;  %v1537_v19 = vsel %vm789_vm1, %v1534_v48, %v1536_v18  ;;  %v1540_v15 = vsel %vm789_vm1, %v1538_v4, %v1539_v37  ;;  %v7592_v60 = vld [vmem:[#allocation15_spill] sm:$0xff]  ;;  %v7593_v48 = vld [vmem:[#allocation18_spill] sm:$0xff]  ;;  %v7594_v18 = vld [vmem:[#allocation28_spill] sm:$0xff] }
 0x10e   : > { %v1542_v26 = vsel %vm789_vm1, %v1539_v37, %v1541_v29  ;;  %v1545_v59 = vsel %vm789_vm1, %v1543_v63, %v1544_v41  ;;  %v1547_v28 = vsel %vm789_vm1, %v1544_v41, %v1546_v42  ;;  %v1550_v57 = vsel %vm789_vm1, %v1548_v44, %v1549_v7  ;;  %v7595_v4 = vld [vmem:[#allocation29_spill] sm:$0xff]  ;;  %v7597_v37 = vld [vmem:[#allocation30_spill] sm:$0xff]  ;;  %v7599_v29 = vld [vmem:[#allocation31_spill] sm:$0xff] }
 0x10f   : > { %v5536_v11 = vadd.f32 %v5456_v5, %v5147_v51  ;;  %v1552_v39 = vsel %vm789_vm1, %v1549_v7, %v1551_v49  ;;  %v5541_v52 = vadd.f32 %v5460_v25, %v5152_v46  ;;  %v5545_v24 = vadd.f32 %v5463_v34, %v5156_v31  ;;  %v7582_v46 = vld [vmem:[#allocation42_spill] sm:$0xff]  ;;  %v7583_v31 = vld [vmem:[#allocation3_spill] sm:$0xff]  ;;  %v5609_v63 = vld [vmem:[%s3541_s22 + $0x18] sm:$0xff]  }
 0x110   : > { %v5549_v6 = vadd.f32 %v5466_v36, %v5160_v58  ;;  %v1555_v47 = vsel %vm789_vm1, %v1553_v2, %v1554_v17  ;;  %v1557_v20 = vsel %vm789_vm1, %v1554_v17, %v1556_v22  ;;  %v5555_v51 = vadd.f32 %v5470_v12, %v5166_v9  ;;  %v7584_v58 = vld [vmem:[#allocation49_spill] sm:$0xff]  ;;  %v7587_v9 = vld [vmem:[#allocation8_spill] sm:$0xff]  ;;  %7601 = vst [vmem:[#allocation54_spill] sm:$0xff] %v5609_v63  ;;  %v7606_v44 = vld [vmem:[#allocation34_spill] sm:$0xff] }
 0x111   : > { %v5558_v5 = vadd.f32 %v1492_v10, %v5169_v21  ;;  %v5561_v25 = vadd.f32 %v1495_v1, %v7582_v46  ;;  %v5564_v34 = vadd.f32 %v1497_v14, %v7583_v31  ;;  %v5567_v36 = vadd.f32 %v1500_v61, %v7584_v58  ;;  %v7588_v21 = vld [vmem:[#allocation57_spill] sm:$0xff]  ;;  %v7589_v1 = vld [vmem:[#allocation10_spill] sm:$0xff]  ;;  %v5627_v49 = vld [vmem:[%s3541_s22 + $0x48] sm:$0xff]  }
 0x112   : > { %v5570_v45 = vadd.f32 %v1502_v8, %v7585_v16  ;;  %v5573_v55 = vadd.f32 %v1505_v33, %v7586_v43  ;;  %v5576_v12 = vadd.f32 %v1507_v27, %v7587_v9  ;;  %v5579_v10 = vadd.f32 %v1510_v56, %v7588_v21  ;;  %7611 = vst [vmem:[#allocation48_spill] sm:$0xff] %v5627_v49  ;;  %v7614_v17 = vld [vmem:[#allocation38_spill] sm:$0xff]  ;;  %v5645_v31 = vld [vmem:[%s3541_s22 + $0x78] sm:$0xff]   ;;  %v7622_v58 = vld [vmem:[#allocation44_spill] sm:$0xff] }
 0x113   : > { %v5582_v14 = vadd.f32 %v1512_v38, %v7589_v1  ;;  %v5585_v61 = vadd.f32 %v1515_v0, %v7590_v30  ;;  %v5588_v8 = vadd.f32 %v1517_v3, %v7591_v32  ;;  %v5591_v33 = vadd.f32 %v1520_v13, %v7592_v60  ;;  %v7602_v13 = vld [vmem:[#allocation32_spill] sm:$0xff]  ;;  %7621 = vst [vmem:[#allocation46_spill] sm:$0xff] %v5645_v31  ;;  %v5664_v21 = vld [vmem:[%s3541_s22 + $0x24] sm:$0xff]  }
 0x114   : > { %v5594_v27 = vadd.f32 %v1522_v40, %v7593_v48  ;;  %v5597_v56 = vadd.f32 %v1525_v50, %v7594_v18  ;;  %v5600_v38 = vadd.f32 %v1527_v53, %v7595_v4  ;;  %v5603_v0 = vadd.f32 %v1530_v54, %v7597_v37  ;;  %v7604_v40 = vld [vmem:[#allocation33_spill] sm:$0xff]  ;;  %v7608_v50 = vld [vmem:[#allocation35_spill] sm:$0xff]  ;;  %v5624_v54 = vld [vmem:[%s3541_s22 + $0x30] sm:$0xff]   ;;  %7628 = vst [vmem:[#allocation6_spill] sm:$0xff] %v5664_v21 }
 0x115   : > { %v5606_v3 = vadd.f32 %v1532_v62, %v7599_v29  ;;  %v5612_v41 = vadd.f32 %v1535_v35, %v7602_v13  ;;  %v5615_v42 = vadd.f32 %v1537_v19, %v7604_v40  ;;  %v5618_v7 = vadd.f32 %v1540_v15, %v7606_v44  ;;  %7610 = vst [vmem:[#allocation43_spill] sm:$0xff] %v5624_v54  ;;  %v7612_v62 = vld [vmem:[#allocation37_spill] sm:$0xff]  ;;  %v7616_v35 = vld [vmem:[#allocation39_spill] sm:$0xff]  ;;  %v7618_v15 = vld [vmem:[#allocation40_spill] sm:$0xff] }
 0x116   : > { %7596 = vst [vmem:[#allocation51_spill] sm:$0xff] %v5600_v38  ;;  %7598 = vst [vmem:[#allocation52_spill] sm:$0xff] %v5603_v0  ;;  %v5621_v53 = vadd.f32 %v1542_v26, %v7608_v50  ;;  %v5630_v2 = vadd.f32 %v1545_v59, %v7612_v62  ;;  %v5633_v22 = vadd.f32 %v1547_v28, %v7614_v17  ;;  %v5642_v26 = vld [vmem:[%s3541_s22 + $0x60] sm:$0xff]   ;;  %v7624_v59 = vld [vmem:[#allocation45_spill] sm:$0xff]  ;;  %v5675_v32 = vunpack.c.h.bf16 %v5627_v49 }
 0x117   : > { %7600 = vst [vmem:[#allocation53_spill] sm:$0xff] %v5606_v3  ;;  %7603 = vst [vmem:[#allocation17_spill] sm:$0xff] %v5612_v41  ;;  %v5636_v19 = vadd.f32 %v1550_v57, %v7616_v35  ;;  %v5639_v46 = vadd.f32 %v1552_v39, %v7618_v15  ;;  %v5648_v16 = vadd.f32 %v1555_v47, %v7622_v58  ;;  %v5655_v57 = vunpack.c.h.bf16 %v5609_v63  ;;  %v5658_v9 = vld [vmem:[%s3541_s22 + $0x90] sm:$0xff]   ;;  %v5661_v39 = vld [vmem:[%s3541_s22 + $0xa8] sm:$0xff]  }
 0x118   : > { %7605 = vst [vmem:[#allocation61_spill] sm:$0xff] %v5615_v42  ;;  %7607 = vst [vmem:[#allocation2_spill] sm:$0xff] %v5618_v7  ;;  %v5651_v43 = vadd.f32 %v1557_v20, %v7624_v59  ;;  %v5668_v47 = vunpack.c.h.bf16 %v5624_v54  ;;  %v5671_v20 = vld [vmem:[%s3541_s22 + $0x3c] sm:$0xff]   ;;  %v5678_v60 = vld [vmem:[%s3541_s22 + $0x54] sm:$0xff]   ;;  %v5682_v18 = vunpack.c.h.bf16 %v5642_v26  ;;  %v5689_v29 = vunpack.c.h.bf16 %v5645_v31 }
 0x119   : > { %7609 = vst [vmem:[#allocation36_spill] sm:$0xff] %v5621_v53  ;;  %7613 = vst [vmem:[#allocation19_spill] sm:$0xff] %v5630_v2  ;;  %v5685_v4 = vld [vmem:[%s3541_s22 + $0x6c] sm:$0xff]   ;;  %v5692_v13 = vld [vmem:[%s3541_s22 + $0x84] sm:$0xff]   ;;  %v5696_v44 = vunpack.c.h.bf16 %v5658_v9  ;;  %v5703_v17 = vunpack.c.h.bf16 %v5661_v39  ;;  %v5713_v59 = vunpack.c.h.bf16 %v5664_v21  ;;  %v5717_v37 = vunpack.c.h.bf16 %v5671_v20 }
 0x11a   : > { %7615 = vst [vmem:[#allocation20_spill] sm:$0xff] %v5633_v22  ;;  %7617 = vst [vmem:[#allocation56_spill] sm:$0xff] %v5636_v19  ;;  %v5699_v50 = vld [vmem:[%s3541_s22 + $0x9c] sm:$0xff]   ;;  %v5706_v35 = vld [vmem:[%s3541_s22 + $0xb4] sm:$0xff]   ;;  %v5724_v30 = vunpack.c.h.bf16 %v5678_v60  ;;  %v5728_v58 = vunpack.c.h.bf16 %v5685_v4  ;;  %v5732_v40 = vunpack.c.h.bf16 %v5692_v13  ;;  %v7648_v28 = vunpack.c.l.bf16 %v5609_v63 }
 0x11b   : > { %7619 = vst [vmem:[#allocation21_spill] sm:$0xff] %v5639_v46  ;;  %7620 = vst [vmem:[#allocation64_spill] sm:$0xff] %v5642_v26  ;;  %v5709_v15 = vld [vmem:[%s3541_s22 + $0xcc] sm:$0xff]   ;;  %v2998_v62 = vld [vmem:[%s6952_s1 + $0x6] ss:$0 sm:$0xff]  ;;  %v5740_v46 = vunpack.c.h.bf16 %v5706_v35  ;;  %v7650_v48 = vunpack.c.l.bf16 %v5624_v54  ;;  %v7651_v1 = vunpack.c.l.bf16 %v5671_v20  ;;  %v7652_v63 = vunpack.c.l.bf16 %v5627_v49 }
 0x11c   : > { %7623 = vst [vmem:[#allocation4_spill] sm:$0xff] %v5648_v16  ;;  %7625 = vst [vmem:[#allocation47_spill] sm:$0xff] %v5651_v43  ;;  %v5736_v16 = vunpack.c.h.bf16 %v5699_v50  ;;  %v5744_v19 = vunpack.c.h.bf16 %v5709_v15  ;;  %v1692_v22 = vmul.f32 %v7648_v28, %v2998_v62  ;;  %v1693_v2 = vmul.f32 %v5655_v57, %v2998_v62  ;;  %v7662_v38 = vld [vmem:[#allocation22_spill] sm:$0xff] }
 0x11d   : > { %7626 = vst [vmem:[#allocation65_spill] sm:$0xff] %v5655_v57  ;;  %7627 = vst [vmem:[#allocation58_spill] sm:$0xff] %v5658_v9  ;;  %v7649_v43 = vunpack.c.l.bf16 %v5664_v21  ;;  %v1695_v7 = vmul.f32 %v2998_v62, %v5713_v59  ;;  %v1696_v42 = vmul.f32 %v7650_v48, %v2998_v62  ;;  %v1697_v41 = vmul.f32 %v5668_v47, %v2998_v62 }
 0x11e   : > { %7629 = vst [vmem:[#allocation59_spill] sm:$0xff] %v5668_v47  ;;  %7630 = vst [vmem:[#allocation23_spill] sm:$0xff] %v5671_v20  ;;  %v1698_v3 = vmul.f32 %v2998_v62, %v7651_v1  ;;  %v1699_v0 = vmul.f32 %v2998_v62, %v5717_v37  ;;  %v1700_v28 = vmul.f32 %v7652_v63, %v2998_v62  ;;  %v7653_v21 = vunpack.c.l.bf16 %v5678_v60 }
 0x11f   : > { %7631 = vst [vmem:[#allocation60_spill] sm:$0xff] %v5675_v32  ;;  %7632 = vst [vmem:[#allocation9_spill] sm:$0xff] %v5678_v60  ;;  %v1694_v53 = vmul.f32 %v2998_v62, %v7649_v43  ;;  %v1701_v57 = vmul.f32 %v5675_v32, %v2998_v62  ;;  %v7654_v54 = vunpack.c.l.bf16 %v5642_v26  ;;  %v1705_v47 = vmul.f32 %v5682_v18, %v2998_v62 }
 0x120   : > { %7633 = vst [vmem:[#allocation7_spill] sm:$0xff] %v5682_v18  ;;  %7634 = vst [vmem:[#allocation24_spill] sm:$0xff] %v5685_v4  ;;  %v1702_v43 = vmul.f32 %v2998_v62, %v7653_v21  ;;  %v7655_v20 = vunpack.c.l.bf16 %v5685_v4  ;;  %v7656_v49 = vunpack.c.l.bf16 %v5645_v31  ;;  %v1709_v32 = vmul.f32 %v5689_v29, %v2998_v62 }
 0x121   : > { %7635 = vst [vmem:[#allocation41_spill] sm:$0xff] %v5689_v29  ;;  %7636 = vst [vmem:[#allocation11_spill] sm:$0xff] %v5692_v13  ;;  %v1704_v48 = vmul.f32 %v7654_v54, %v2998_v62  ;;  %v7657_v60 = vunpack.c.l.bf16 %v5692_v13  ;;  %v7658_v26 = vunpack.c.l.bf16 %v5658_v9  ;;  %v1713_v18 = vmul.f32 %v5696_v44, %v2998_v62 }
 0x122   : > { %7637 = vst [vmem:[#allocation14_spill] sm:$0xff] %v5696_v44  ;;  %7638 = vst [vmem:[#allocation25_spill] sm:$0xff] %v5699_v50  ;;  %v1706_v1 = vmul.f32 %v2998_v62, %v7655_v20  ;;  %v1708_v63 = vmul.f32 %v7656_v49, %v2998_v62  ;;  %v7659_v4 = vunpack.c.l.bf16 %v5699_v50  ;;  %v7660_v31 = vunpack.c.l.bf16 %v5661_v39 }
 0x123   : > { %7639 = vst [vmem:[#allocation55_spill] sm:$0xff] %v5703_v17  ;;  %7640 = vst [vmem:[#allocation13_spill] sm:$0xff] %v5713_v59  ;;  %v1703_v59 = vmul.f32 %v2998_v62, %v5724_v30  ;;  %v1710_v21 = vmul.f32 %v2998_v62, %v7657_v60  ;;  %v1712_v54 = vmul.f32 %v7658_v26, %v2998_v62  ;;  %v7661_v13 = vunpack.c.l.bf16 %v5706_v35 }
 0x124   : > { %7641 = vst [vmem:[#allocation66_spill] sm:$0xff] %v5717_v37  ;;  %7642 = vst [vmem:[#allocation26_spill] sm:$0xff] %v5724_v30  ;;  %v1707_v37 = vmul.f32 %v2998_v62, %v5728_v58  ;;  %v1711_v30 = vmul.f32 %v2998_v62, %v5732_v40  ;;  %v1714_v20 = vmul.f32 %v2998_v62, %v7659_v4  ;;  %v7663_v44 = vunpack.c.l.bf16 %v5709_v15 }
 0x125   : > { %7643 = vst [vmem:[#allocation67_spill] sm:$0xff] %v5728_v58  ;;  %7644 = vst [vmem:[#allocation16_spill] sm:$0xff] %v5732_v40  ;;  %v1715_v58 = vmul.f32 %v2998_v62, %v5736_v16  ;;  %v1716_v49 = vmul.f32 %v7660_v31, %v2998_v62  ;;  %v1717_v29 = vmul.f32 %v5703_v17, %v2998_v62 }
 0x126   : > { %7645 = vst [vmem:[#allocation68_spill] sm:$0xff] %v5736_v16  ;;  %7646 = vst [vmem:[#allocation27_spill] sm:$0xff] %v5740_v46  ;;  %v1718_v60 = vmul.f32 %v2998_v62, %v7661_v13  ;;  %v1719_v40 = vmul.f32 %v2998_v62, %v5740_v46  ;;  %v1720_v9 = vmul.f32 %v7662_v38, %v2998_v62 }
 0x127   : > { %7647 = vst [vmem:[#allocation69_spill] sm:$0xff] %v5744_v19  ;;  %v1721_v26 = vmul.f32 %v7579_v23, %v2998_v62  ;;  %v1722_v50 = vmul.f32 %v2998_v62, %v7663_v44  ;;  %v1723_v4 = vmul.f32 %v2998_v62, %v5744_v19  ;;  %v5794_v16 = vadd.f32 %v1692_v22, %v5536_v11 }
 0x128   : > { %v5797_v31 = vadd.f32 %v1693_v2, %v5541_v52  ;;  %v5800_v13 = vadd.f32 %v1694_v53, %v5545_v24  ;;  %v5803_v46 = vadd.f32 %v1695_v7, %v5549_v6  ;;  %v5806_v23 = vadd.f32 %v1696_v42, %v5555_v51  ;;  %v7691_v2 = vld [vmem:[#allocation61_spill] sm:$0xff] }
 0x129   : > { %v5809_v44 = vadd.f32 %v1697_v41, %v5558_v5  ;;  %v5812_v11 = vadd.f32 %v1698_v3, %v5561_v25  ;;  %v5815_v52 = vadd.f32 %v1699_v0, %v5564_v34  ;;  %v5818_v24 = vadd.f32 %v1700_v28, %v5567_v36  ;;  %v5863_v41 = vld [vmem:[%s3541_s22 + $0x44] sm:$0x1]  ;;  %v7702_v28 = vld [vmem:[#allocation20_spill] sm:$0xff] }
 0x12a   : > { %7664 = vst [vmem:[#allocation70_spill] sm:$0xff] %v5806_v23  ;;  %v5821_v6 = vadd.f32 %v1701_v57, %v5570_v45  ;;  %v5824_v51 = vadd.f32 %v1702_v43, %v5573_v55  ;;  %v5827_v5 = vadd.f32 %v1703_v59, %v5576_v12  ;;  %v5830_v25 = vadd.f32 %v1704_v48, %v5579_v10  ;;  %v5842_v55 = vld [vmem:[%s3541_s22 + $0x20] sm:$0x1]  ;;  %v5878_v57 = vld [vmem:[%s3541_s22 + $0x50] sm:$0x1]  ;;  %v7700_v59 = vld [vmem:[#allocation19_spill] sm:$0xff] }
 0x12b   : > { %7665 = vst [vmem:[#allocation71_spill] sm:$0xff] %v5809_v44  ;;  %7666 = vst [vmem:[#allocation42_spill] sm:$0xff] %v5812_v11  ;;  %v5833_v34 = vadd.f32 %v1705_v47, %v5582_v14  ;;  %v5836_v36 = vadd.f32 %v1706_v1, %v5585_v61  ;;  %v5839_v45 = vadd.f32 %v1707_v37, %v5588_v8  ;;  %v7680_v14 = vld [vmem:[#allocation51_spill] sm:$0xff]  ;;  %v5860_v8 = vld [vmem:[%s3541_s22 + $0x38] sm:$0x1] }
 0x12c   : > { %7667 = vst [vmem:[#allocation3_spill] sm:$0xff] %v5815_v52  ;;  %7668 = vst [vmem:[#allocation49_spill] sm:$0xff] %v5818_v24  ;;  %v5845_v12 = vadd.f32 %v1708_v63, %v5591_v33  ;;  %v5848_v10 = vadd.f32 %v1709_v32, %v5594_v27  ;;  %v5851_v0 = vadd.f32 %v1710_v21, %v5597_v56  ;;  %v5857_v61 = vld [vmem:[%s3541_s22 + $0x2c] sm:$0x1]  ;;  %v7685_v33 = vld [vmem:[#allocation52_spill] sm:$0xff] }
 0x12d   : > { %7669 = vst [vmem:[#allocation5_spill] sm:$0xff] %v5821_v6  ;;  %7670 = vst [vmem:[#allocation50_spill] sm:$0xff] %v5824_v51  ;;  %v5854_v3 = vadd.f32 %v1711_v30, %v7680_v14  ;;  %v5866_v42 = vadd.f32 %v1712_v54, %v7685_v33  ;;  %v7687_v27 = vld [vmem:[#allocation53_spill] sm:$0xff]  ;;  %v5875_v22 = vadd.f32 %v1715_v58, %v7691_v2  ;;  %v5884_v30 = vld [vmem:[%s3541_s22 + $0x68] sm:$0x1] }
 0x12e   : > { %7671 = vst [vmem:[#allocation8_spill] sm:$0xff] %v5827_v5  ;;  %7672 = vst [vmem:[#allocation57_spill] sm:$0xff] %v5830_v25  ;;  %v5869_v7 = vadd.f32 %v1713_v18, %v7687_v27  ;;  %v7689_v56 = vld [vmem:[#allocation17_spill] sm:$0xff]  ;;  %v7696_v32 = vld [vmem:[#allocation2_spill] sm:$0xff]  ;;  %v5893_v58 = vadd.f32 %v1718_v60, %v7700_v59  ;;  %v5896_v43 = vadd.f32 %v1719_v40, %v7702_v28 }
 0x12f   : > { %7673 = vst [vmem:[#allocation10_spill] sm:$0xff] %v5833_v34  ;;  %7674 = vst [vmem:[#allocation62_spill] sm:$0xff] %v5836_v36  ;;  %v5872_v53 = vadd.f32 %v1714_v20, %v7689_v56  ;;  %v5881_v47 = vld [vmem:[%s3541_s22 + $0x5c] sm:$0x1]  ;;  %v5887_v18 = vadd.f32 %v1716_v49, %v7696_v32  ;;  %v7698_v37 = vld [vmem:[#allocation36_spill] sm:$0xff] }
 0x130   : > { %7675 = vst [vmem:[#allocation12_spill] sm:$0xff] %v5839_v45  ;;  %7676 = vst [vmem:[#allocation15_spill] sm:$0xff] %v5842_v55  ;;  %v5890_v62 = vadd.f32 %v1717_v29, %v7698_v37  ;;  %v5899_v48 = vld [vmem:[%s3541_s22 + $0x74] sm:$0x1]  ;;  %v5902_v1 = vld [vmem:[%s3541_s22 + $0x80] sm:$0x1] }
 0x131   : > { %7677 = vst [vmem:[#allocation18_spill] sm:$0xff] %v5845_v12  ;;  %7678 = vst [vmem:[#allocation28_spill] sm:$0xff] %v5848_v10  ;;  %v5905_v63 = vld [vmem:[%s3541_s22 + $0x8c] sm:$0x1]  ;;  %v7707_v21 = vld [vmem:[#allocation56_spill] sm:$0xff] }
 0x132   : > { %7679 = vst [vmem:[#allocation29_spill] sm:$0xff] %v5851_v0  ;;  %7681 = vst [vmem:[#allocation30_spill] sm:$0xff] %v5854_v3  ;;  %v5908_v54 = vadd.f32 %v1720_v9, %v7707_v21  ;;  %v7709_v20 = vld [vmem:[#allocation21_spill] sm:$0xff]  ;;  %v7711_v29 = vld [vmem:[#allocation4_spill] sm:$0xff]  ;;  %v7726_v21 = vunpack.c.l.bf16 %v5857_v61 }
 0x133   : > { %7682 = vst [vmem:[#allocation31_spill] sm:$0xff] %v5857_v61  ;;  %7683 = vst [vmem:[#allocation32_spill] sm:$0xff] %v5860_v8  ;;  %v5911_v49 = vadd.f32 %v1721_v26, %v7709_v20  ;;  %v5914_v14 = vadd.f32 %v1722_v50, %v7711_v29  ;;  %v7713_v60 = vld [vmem:[#allocation47_spill] sm:$0xff]  ;;  %v5920_v40 = vld [vmem:[%s3541_s22 + $0x98] sm:$0x1]  ;;  %v7722_v50 = vunpack.c.l.bf16 %v5842_v55 }
 0x134   : > { %7684 = vst [vmem:[#allocation33_spill] sm:$0xff] %v5863_v41  ;;  %7686 = vst [vmem:[#allocation34_spill] sm:$0xff] %v5866_v42  ;;  %v5917_v33 = vadd.f32 %v1723_v4, %v7713_v60  ;;  %v5923_v27 = vld [vmem:[%s3541_s22 + $0xa4] sm:$0x1]  ;;  %v5926_v56 = vld [vmem:[%s3541_s22 + $0xb0] sm:$0x1] }
 0x135   : > { %7688 = vst [vmem:[#allocation35_spill] sm:$0xff] %v5869_v7  ;;  %7690 = vst [vmem:[#allocation37_spill] sm:$0xff] %v5872_v53  ;;  %v5929_v2 = vld [vmem:[%s3541_s22 + $0xbc] sm:$0x1]  ;;  %v5932_v32 = vld [vmem:[%s3541_s22 + $0xc8] sm:$0x1] }
 0x136   : > { %7692 = vst [vmem:[#allocation38_spill] sm:$0xff] %v5875_v22  ;;  %7693 = vst [vmem:[#allocation39_spill] sm:$0xff] %v5878_v57  ;;  %v5935_v9 = vld [vmem:[%s3541_s22 + $0xd4] sm:$0x1]  ;;  %v5944_v59 = vld [vmem:[%s6952_s1 + $0x7] ss:$0 sm:$0xff] }
 0x137   : > { %7694 = vst [vmem:[#allocation40_spill] sm:$0xff] %v5881_v47  ;;  %7695 = vst [vmem:[#allocation44_spill] sm:$0xff] %v5884_v30  ;;  %v7719_v20 = vld [vmem:[#allocation54_spill] sm:$0xff]  ;;  %v7721_v60 = vld [vmem:[#allocation65_spill] sm:$0xff]  ;;  %v1795_v37 = vmul.f32 %v5944_v59, %v7722_v50  ;;  %v7730_v50 = vunpack.c.l.bf16 %v5860_v8 }
 0x138   : > { %7697 = vst [vmem:[#allocation45_spill] sm:$0xff] %v5887_v18  ;;  %7699 = vst [vmem:[#allocation22_spill] sm:$0xff] %v5890_v62  ;;  %v7723_v4 = vld [vmem:[#allocation6_spill] sm:$0xff]  ;;  %v7729_v55 = vld [vmem:[#allocation59_spill] sm:$0xff] }
 0x139   : > { %7701 = vst [vmem:[#allocation51_spill] sm:$0xff] %v5893_v58  ;;  %7703 = vst [vmem:[#allocation52_spill] sm:$0xff] %v5896_v43  ;;  %v1798_v43 = vmul.f32 %v5944_v59, %v7726_v21  ;;  %v7733_v21 = vld [vmem:[#allocation66_spill] sm:$0xff]  ;;  %v1892_v52 = vrot.slane %v1795_v37, 1  ;;  %v7774_v37 = vunpack.c.l.bf16 %v5709_v15 }
 0x13a   : > { %7704 = vst [vmem:[#allocation53_spill] sm:$0xff] %v5899_v48  ;;  %7705 = vst [vmem:[#allocation17_spill] sm:$0xff] %v5902_v1  ;;  %v5995_v62 = vmul.f32 %v5944_v59, %v7733_v21  ;;  %v7739_v21 = vld [vmem:[#allocation9_spill] sm:$0xff] }
 0x13b   : > { %7706 = vst [vmem:[#allocation61_spill] sm:$0xff] %v5905_v63  ;;  %7708 = vst [vmem:[#allocation2_spill] sm:$0xff] %v5908_v54  ;;  %v7724_v54 = vunpack.c.l.bf16 %v7723_v4  ;;  %v7731_v4 = vld [vmem:[#allocation23_spill] sm:$0xff]  ;;  %v7740_v53 = vunpack.c.l.bf16 %v7739_v21  ;;  %v1897_v44 = vrot.slane %v1798_v43, 1  ;;  %v6162_v43 = vmul.f32 %v5944_v59, %v5744_v19 }
 0x13c   : > { %7710 = vst [vmem:[#allocation36_spill] sm:$0xff] %v5911_v49  ;;  %7712 = vst [vmem:[#allocation19_spill] sm:$0xff] %v5914_v14  ;;  %v7720_v14 = vunpack.c.l.bf16 %v7719_v20  ;;  %v1794_v49 = vmul.f32 %v7721_v60, %v5944_v59  ;;  %v5981_v60 = vmul.f32 %v7729_v55, %v5944_v59  ;;  %v7735_v55 = vld [vmem:[#allocation48_spill] sm:$0xff] }
 0x13d   : > { %7714 = vst [vmem:[#allocation20_spill] sm:$0xff] %v5917_v33  ;;  %7715 = vst [vmem:[#allocation56_spill] sm:$0xff] %v5920_v40  ;;  %v1796_v26 = vmul.f32 %v5944_v59, %v7724_v54  ;;  %v7725_v33 = vld [vmem:[#allocation13_spill] sm:$0xff]  ;;  %v5986_v54 = vmul.f32 %v5944_v59, %v7730_v50  ;;  %v7736_v8 = vunpack.c.l.bf16 %v7735_v55  ;;  %v7737_v50 = vld [vmem:[#allocation60_spill] sm:$0xff]  ;;  %v7742_v55 = vunpack.c.l.bf16 %v5881_v47 }
 0x13e   : > { %7716 = vst [vmem:[#allocation21_spill] sm:$0xff] %v5923_v27  ;;  %7717 = vst [vmem:[#allocation4_spill] sm:$0xff] %v5926_v56  ;;  %v1793_v29 = vmul.f32 %v7720_v14, %v5944_v59  ;;  %v1797_v28 = vmul.f32 %v5944_v59, %v7725_v33  ;;  %v7727_v14 = vld [vmem:[#allocation43_spill] sm:$0xff]  ;;  %v7732_v33 = vunpack.c.l.bf16 %v7731_v4  ;;  %v6009_v4 = vmul.f32 %v7737_v50, %v5944_v59  ;;  %v7743_v50 = vld [vmem:[#allocation64_spill] sm:$0xff] }
 0x13f   : > { %7718 = vst [vmem:[#allocation47_spill] sm:$0xff] %v5932_v32  ;;  %v7728_v20 = vunpack.c.l.bf16 %v7727_v14  ;;  %v7734_v14 = vunpack.c.l.bf16 %v5863_v41  ;;  %v6005_v18 = vmul.f32 %v7736_v8, %v5944_v59  ;;  %v6019_v41 = vmul.f32 %v5944_v59, %v7740_v53 }
 0x140   : > { %v5991_v61 = vmul.f32 %v5944_v59, %v7732_v33  ;;  %v7738_v33 = vunpack.c.l.bf16 %v5878_v57  ;;  %v6028_v8 = vmul.f32 %v5944_v59, %v7742_v55  ;;  %v7744_v57 = vunpack.c.l.bf16 %v7743_v50  ;;  %v7749_v55 = vld [vmem:[#allocation67_spill] sm:$0xff] }
 0x141   : > { %v5977_v58 = vmul.f32 %v7728_v20, %v5944_v59  ;;  %v6000_v20 = vmul.f32 %v5944_v59, %v7734_v14  ;;  %v7741_v14 = vld [vmem:[#allocation26_spill] sm:$0xff]  ;;  %v7746_v53 = vunpack.c.l.bf16 %v5884_v30  ;;  %v6051_v10 = vmul.f32 %v5944_v59, %v7749_v55  ;;  %v7755_v55 = vld [vmem:[#allocation11_spill] sm:$0xff] }
 0x142   : > { %v6014_v22 = vmul.f32 %v5944_v59, %v7738_v33  ;;  %v6023_v7 = vmul.f32 %v5944_v59, %v7741_v14  ;;  %v6033_v42 = vmul.f32 %v7744_v57, %v5944_v59  ;;  %v7745_v33 = vld [vmem:[#allocation7_spill] sm:$0xff]  ;;  %v7747_v14 = vld [vmem:[#allocation24_spill] sm:$0xff]  ;;  %v7750_v57 = vunpack.c.l.bf16 %v5899_v48 }
 0x143   : > { %v6037_v21 = vmul.f32 %v7745_v33, %v5944_v59  ;;  %v6042_v3 = vmul.f32 %v5944_v59, %v7746_v53  ;;  %v7748_v0 = vunpack.c.l.bf16 %v7747_v14  ;;  %v7751_v33 = vld [vmem:[#allocation46_spill] sm:$0xff]  ;;  %v7753_v53 = vld [vmem:[#allocation41_spill] sm:$0xff]  ;;  %v7756_v36 = vunpack.c.l.bf16 %v7755_v55 }
 0x144   : > { %v6056_v50 = vmul.f32 %v5944_v59, %v7750_v57  ;;  %v7752_v30 = vunpack.c.l.bf16 %v7751_v33  ;;  %v6065_v14 = vmul.f32 %v7753_v53, %v5944_v59  ;;  %v7757_v57 = vld [vmem:[#allocation16_spill] sm:$0xff]  ;;  %v7759_v53 = vld [vmem:[#allocation58_spill] sm:$0xff]  ;;  %v1904_v19 = vrot.slane %v5991_v61, 1 }
 0x145   : > { %v6047_v47 = vmul.f32 %v5944_v59, %v7748_v0  ;;  %v7754_v0 = vunpack.c.l.bf16 %v5902_v1  ;;  %v6075_v48 = vmul.f32 %v5944_v59, %v7756_v36  ;;  %v6079_v34 = vmul.f32 %v5944_v59, %v7757_v57  ;;  %v7763_v57 = vld [vmem:[#allocation25_spill] sm:$0xff] }
 0x146   : > { %v6061_v12 = vmul.f32 %v7752_v30, %v5944_v59  ;;  %v7758_v30 = vunpack.c.l.bf16 %v5905_v63  ;;  %v7760_v1 = vunpack.c.l.bf16 %v7759_v53  ;;  %v7762_v36 = vunpack.c.l.bf16 %v5920_v40 }
 0x147   : > { %v6070_v45 = vmul.f32 %v5944_v59, %v7754_v0  ;;  %v7761_v0 = vld [vmem:[#allocation14_spill] sm:$0xff]  ;;  %v7764_v51 = vunpack.c.l.bf16 %v7763_v57  ;;  %v7767_v40 = vunpack.c.l.bf16 %v5661_v39  ;;  %v6121_v57 = vmul.f32 %v5703_v17, %v5944_v59 }
 0x148   : > { %v6084_v33 = vmul.f32 %v5944_v59, %v7758_v30  ;;  %v6089_v25 = vmul.f32 %v7760_v1, %v5944_v59  ;;  %v6093_v55 = vmul.f32 %v7761_v0, %v5944_v59  ;;  %v6098_v5 = vmul.f32 %v5944_v59, %v7762_v36  ;;  %v7765_v30 = vld [vmem:[#allocation68_spill] sm:$0xff] }
 0x149   : > { %v6103_v63 = vmul.f32 %v5944_v59, %v7764_v51  ;;  %v6107_v6 = vmul.f32 %v5944_v59, %v7765_v30  ;;  %v7766_v1 = vunpack.c.l.bf16 %v5923_v27  ;;  %v6117_v0 = vmul.f32 %v7767_v40, %v5944_v59 }
 0x14a   : > { %v7768_v51 = vunpack.c.l.bf16 %v5926_v56  ;;  %v7769_v30 = vunpack.c.l.bf16 %v5706_v35  ;;  %v1889_v39 = vrot.slane %v1793_v29, 1  ;;  %v1890_v40 = vrot.slane %v1794_v49, 1 }
 0x14b   : > { %v6112_v53 = vmul.f32 %v5944_v59, %v7766_v1  ;;  %v7770_v1 = vld [vmem:[#allocation27_spill] sm:$0xff]  ;;  %v7771_v17 = vunpack.c.l.bf16 %v5929_v2  ;;  %v1894_v56 = vrot.slane %v1796_v26, 1  ;;  %v6144_v35 = vmul.f32 %v7662_v38, %v5944_v59 }
 0x14c   : > { %v6126_v36 = vmul.f32 %v5944_v59, %v7768_v51  ;;  %v6131_v27 = vmul.f32 %v5944_v59, %v7769_v30  ;;  %v6135_v24 = vmul.f32 %v5944_v59, %v7770_v1  ;;  %v1895_v51 = vrot.slane %v1797_v28, 1  ;;  %v7772_v30 = vld [vmem:[#allocation63_spill] sm:$0xff] }
 0x14d   : > { %v6140_v11 = vmul.f32 %v5944_v59, %v7771_v17  ;;  %v6148_v23 = vmul.f32 %v7772_v30, %v5944_v59  ;;  %v7773_v29 = vunpack.c.l.bf16 %v5932_v32  ;;  %v6158_v17 = vmul.f32 %v5944_v59, %v7774_v37 }
 0x14e   : > { %v7775_v38 = vunpack.c.l.bf16 %v5935_v9  ;;  %v1899_v28 = vrot.slane %v5977_v58, 1  ;;  %v1900_v32 = vrot.slane %v5981_v60, 1  ;;  %v6175_v15 = vsel %vm511_vm0, %v1890_v40, %v1892_v52 }
 0x14f   : > { %v6153_v49 = vmul.f32 %v5944_v59, %v7773_v29  ;;  %v6172_v29 = vsel %vm511_vm0, %v1889_v39, %v1890_v40  ;;  %v1902_v37 = vrot.slane %v5986_v54, 1  ;;  %v6180_v30 = vsel %vm511_vm0, %v1894_v56, %v1895_v51 }
 0x150   : > { %v6167_v26 = vmul.f32 %v5944_v59, %v7775_v38  ;;  %v6183_v59 = vsel %vm511_vm0, %v1895_v51, %v1897_v44  ;;  %v1905_v58 = vrot.slane %v5995_v62, 1  ;;  %v1907_v60 = vrot.slane %v6000_v20, 1 }
 0x151   : > { %v1909_v39 = vrot.slane %v6005_v18, 1  ;;  %v1910_v38 = vrot.slane %v6009_v4, 1  ;;  %v1912_v52 = vrot.slane %v6014_v22, 1  ;;  %v1914_v54 = vrot.slane %v6019_v41, 1 }
 0x152   : > { %v1915_v61 = vrot.slane %v6023_v7, 1  ;;  %v1917_v56 = vrot.slane %v6028_v8, 1  ;;  %v1919_v40 = vrot.slane %v6033_v42, 1  ;;  %v1920_v44 = vrot.slane %v6037_v21, 1 }
 0x153   : > { %v1922_v62 = vrot.slane %v6042_v3, 1  ;;  %v1924_v20 = vrot.slane %v6047_v47, 1  ;;  %v1925_v18 = vrot.slane %v6051_v10, 1  ;;  %v1927_v4 = vrot.slane %v6056_v50, 1 }
 0x154   : > { %v1901_v22 = vsel %vm511_vm0, %v1899_v28, %v1900_v32  ;;  %v1903_v41 = vsel %vm511_vm0, %v1900_v32, %v1902_v37  ;;  %v1929_v7 = vrot.slane %v6061_v12, 1  ;;  %v1930_v8 = vrot.slane %v6065_v14, 1 }
 0x155   : > { %v1906_v42 = vsel %vm511_vm0, %v1904_v19, %v1905_v58  ;;  %v1908_v21 = vsel %vm511_vm0, %v1905_v58, %v1907_v60  ;;  %v1911_v3 = vsel %vm511_vm0, %v1909_v39, %v1910_v38  ;;  %v1932_v47 = vrot.slane %v6070_v45, 1 }
 0x156   : > { %v1913_v10 = vsel %vm511_vm0, %v1910_v38, %v1912_v52  ;;  %v1916_v50 = vsel %vm511_vm0, %v1914_v54, %v1915_v61  ;;  %v1918_v51 = vsel %vm511_vm0, %v1915_v61, %v1917_v56  ;;  %v1921_v32 = vsel %vm511_vm0, %v1919_v40, %v1920_v44 }
 0x157   : > { %v1923_v12 = vsel %vm511_vm0, %v1920_v44, %v1922_v62  ;;  %v1926_v14 = vsel %vm511_vm0, %v1924_v20, %v1925_v18  ;;  %v1928_v19 = vsel %vm511_vm0, %v1925_v18, %v1927_v4  ;;  %v1934_v28 = vrot.slane %v6075_v48, 1 }
 0x158   : > { %v1931_v37 = vsel %vm511_vm0, %v1929_v7, %v1930_v8  ;;  %v1935_v45 = vrot.slane %v6079_v34, 1  ;;  %v1937_v58 = vrot.slane %v6084_v33, 1  ;;  %v1939_v60 = vrot.slane %v6089_v25, 1 }
 0x159   : > { %v1933_v39 = vsel %vm511_vm0, %v1930_v8, %v1932_v47  ;;  %v1940_v38 = vrot.slane %v6093_v55, 1  ;;  %v1942_v52 = vrot.slane %v6098_v5, 1  ;;  %v1944_v54 = vrot.slane %v6103_v63, 1 }
 0x15a   : > { %v1945_v61 = vrot.slane %v6107_v6, 1  ;;  %v1947_v48 = vrot.slane %v6112_v53, 1  ;;  %v1949_v56 = vrot.slane %v6117_v0, 1  ;;  %v1950_v34 = vrot.slane %v6121_v57, 1 }
 0x15b   : > { %v1952_v33 = vrot.slane %v6126_v36, 1  ;;  %v1954_v25 = vrot.slane %v6131_v27, 1  ;;  %v1955_v40 = vrot.slane %v6135_v24, 1  ;;  %v1957_v55 = vrot.slane %v6140_v11, 1 }
 0x15c   : > { %v1936_v5 = vsel %vm511_vm0, %v1934_v28, %v1935_v45  ;;  %v1959_v63 = vrot.slane %v6144_v35, 1  ;;  %v1960_v6 = vrot.slane %v6148_v23, 1  ;;  %v1962_v53 = vrot.slane %v6153_v49, 1  ;;  %v7776_v28 = vld [vmem:[#allocation70_spill] sm:$0xff] }
 0x15d   : > { %v1938_v0 = vsel %vm511_vm0, %v1935_v45, %v1937_v58  ;;  %v1964_v57 = vrot.slane %v6158_v17, 1  ;;  %v1965_v36 = vrot.slane %v6162_v43, 1  ;;  %v1967_v27 = vrot.slane %v6167_v26, 1  ;;  %v7781_v58 = vld [vmem:[#allocation3_spill] sm:$0xff] }
 0x15e   : > { %v1941_v24 = vsel %vm511_vm0, %v1939_v60, %v1940_v38  ;;  %v1943_v11 = vsel %vm511_vm0, %v1940_v38, %v1942_v52  ;;  %v1946_v44 = vsel %vm511_vm0, %v1944_v54, %v1945_v61  ;;  %v1948_v35 = vsel %vm511_vm0, %v1945_v61, %v1947_v48  ;;  %v7791_v54 = vld [vmem:[#allocation57_spill] sm:$0xff]  ;;  %v7793_v61 = vld [vmem:[#allocation10_spill] sm:$0xff] }
 0x15f   : > { %v1951_v23 = vsel %vm511_vm0, %v1949_v56, %v1950_v34  ;;  %v1953_v49 = vsel %vm511_vm0, %v1950_v34, %v1952_v33  ;;  %v1956_v62 = vsel %vm511_vm0, %v1954_v25, %v1955_v40  ;;  %v1958_v17 = vsel %vm511_vm0, %v1955_v40, %v1957_v55  ;;  %v7795_v48 = vld [vmem:[#allocation62_spill] sm:$0xff]  ;;  %v7797_v56 = vld [vmem:[#allocation12_spill] sm:$0xff] }
 0x160   : > { %v1961_v43 = vsel %vm511_vm0, %v1959_v63, %v1960_v6  ;;  %v1963_v26 = vsel %vm511_vm0, %v1960_v6, %v1962_v53  ;;  %v6251_v20 = vadd.f32 %v6172_v29, %v5794_v16  ;;  %v6255_v18 = vadd.f32 %v6175_v15, %v5797_v31  ;;  %v7777_v29 = vld [vmem:[#allocation71_spill] sm:$0xff]  ;;  %v7779_v31 = vld [vmem:[#allocation42_spill] sm:$0xff]  ;;  %v3018_v63 = vld [vmem:[%s3541_s22 + $0x30] sm:$0xe] }
 0x161   : > { %v1966_v4 = vsel %vm511_vm0, %v1964_v57, %v1965_v36  ;;  %v1968_v7 = vsel %vm511_vm0, %v1965_v36, %v1967_v27  ;;  %v6261_v8 = vadd.f32 %v6180_v30, %v5800_v13  ;;  %v6265_v47 = vadd.f32 %v6183_v59, %v5803_v46  ;;  %v7783_v13 = vld [vmem:[#allocation49_spill] sm:$0xff]  ;;  %v7799_v34 = vld [vmem:[#allocation18_spill] sm:$0xff] }
 0x162   : > { %v6268_v16 = vadd.f32 %v1901_v22, %v7776_v28  ;;  %v6271_v45 = vadd.f32 %v1903_v41, %v7777_v29  ;;  %v6274_v15 = vadd.f32 %v1906_v42, %v7779_v31  ;;  %v6277_v60 = vadd.f32 %v1908_v21, %v7781_v58  ;;  %v7785_v46 = vld [vmem:[#allocation5_spill] sm:$0xff]  ;;  %v7787_v22 = vld [vmem:[#allocation50_spill] sm:$0xff]  ;;  %v7789_v41 = vld [vmem:[#allocation8_spill] sm:$0xff] }
 0x163   : > { %v6280_v30 = vadd.f32 %v1911_v3, %v7783_v13  ;;  %v6283_v59 = vadd.f32 %v1913_v10, %v7785_v46  ;;  %v6286_v38 = vadd.f32 %v1916_v50, %v7787_v22  ;;  %v6289_v52 = vadd.f32 %v1918_v51, %v7789_v41  ;;  %v3016_v50 = vld [vmem:[%s3541_s22 + $0x18] sm:$0xe]  ;;  %v7801_v51 = vld [vmem:[#allocation28_spill] sm:$0xff]  ;;  %v7807_v6 = vld [vmem:[#allocation34_spill] sm:$0xff] }
 0x164   : > { %7778 = vst [vmem:[#allocation54_spill] sm:$0xff] %v6271_v45  ;;  %7780 = vst [vmem:[#allocation6_spill] sm:$0xff] %v6274_v15  ;;  %v6292_v42 = vadd.f32 %v1921_v32, %v7791_v54  ;;  %v6295_v21 = vadd.f32 %v1923_v12, %v7793_v61  ;;  %v6298_v3 = vadd.f32 %v1926_v14, %v7795_v48  ;;  %v7803_v32 = vld [vmem:[#allocation29_spill] sm:$0xff]  ;;  %v7805_v12 = vld [vmem:[#allocation30_spill] sm:$0xff] }
 0x165   : > { %7782 = vst [vmem:[#allocation43_spill] sm:$0xff] %v6277_v60  ;;  %7784 = vst [vmem:[#allocation23_spill] sm:$0xff] %v6280_v30  ;;  %v6301_v10 = vadd.f32 %v1928_v19, %v7797_v56  ;;  %v6305_v33 = vadd.f32 %v1931_v37, %v7799_v34  ;;  %v6308_v25 = vadd.f32 %v1933_v39, %v7801_v51  ;;  %v3017_v14 = vld [vmem:[%s3541_s22 + $0x24] sm:$0xe]  ;;  %v3019_v19 = vld [vmem:[%s3541_s22 + $0x3c] sm:$0xe] }
 0x166   : > { %7786 = vst [vmem:[#allocation48_spill] sm:$0xff] %v6283_v59  ;;  %7788 = vst [vmem:[#allocation9_spill] sm:$0xff] %v6286_v38  ;;  %v6311_v40 = vadd.f32 %v1936_v5, %v7803_v32  ;;  %v6314_v55 = vadd.f32 %v1938_v0, %v7805_v12  ;;  %v6320_v53 = vadd.f32 %v1941_v24, %v7807_v6  ;;  %v7809_v37 = vld [vmem:[#allocation35_spill] sm:$0xff]  ;;  %v7811_v39 = vld [vmem:[#allocation37_spill] sm:$0xff]  ;;  %v7870_v59 = vunpack.c.l.bf16 %v5929_v2 }
 0x167   : > { %7790 = vst [vmem:[#allocation64_spill] sm:$0xff] %v6289_v52  ;;  %7792 = vst [vmem:[#allocation24_spill] sm:$0xff] %v6292_v42  ;;  %v6323_v57 = vadd.f32 %v1943_v11, %v7809_v37  ;;  %v6326_v36 = vadd.f32 %v1946_v44, %v7811_v39  ;;  %v7813_v5 = vld [vmem:[#allocation38_spill] sm:$0xff]  ;;  %v3020_v0 = vld [vmem:[%s3541_s22 + $0x48] sm:$0xe] }
 0x168   : > { %7794 = vst [vmem:[#allocation46_spill] sm:$0xff] %v6295_v21  ;;  %7796 = vst [vmem:[#allocation11_spill] sm:$0xff] %v6298_v3  ;;  %v6329_v27 = vadd.f32 %v1948_v35, %v7813_v5  ;;  %v3021_v28 = vld [vmem:[%s3541_s22 + $0x54] sm:$0xe]  ;;  %v3022_v29 = vld [vmem:[%s3541_s22 + $0x60] sm:$0xe]  ;;  %v2050_v5 = vunpack.c.l.bf16 %v3016_v50 }
 0x169   : > { %7798 = vst [vmem:[#allocation58_spill] sm:$0xff] %v6301_v10  ;;  %7800 = vst [vmem:[#allocation25_spill] sm:$0xff] %v6305_v33  ;;  %v7815_v31 = vld [vmem:[#allocation45_spill] sm:$0xff]  ;;  %v7817_v58 = vld [vmem:[#allocation22_spill] sm:$0xff] }
 0x16a   : > { %7802 = vst [vmem:[#allocation27_spill] sm:$0xff] %v6308_v25  ;;  %7804 = vst [vmem:[#allocation70_spill] sm:$0xff] %v6311_v40  ;;  %v6335_v24 = vadd.f32 %v1951_v23, %v7815_v31  ;;  %v6338_v11 = vadd.f32 %v1953_v49, %v7817_v58  ;;  %v7819_v44 = vld [vmem:[#allocation51_spill] sm:$0xff]  ;;  %v7821_v46 = vld [vmem:[#allocation52_spill] sm:$0xff]  ;;  %v2052_v31 = vunpack.c.l.bf16 %v3018_v63  ;;  %v2053_v58 = vunpack.c.l.bf16 %v3019_v19 }
 0x16b   : > { %7806 = vst [vmem:[#allocation71_spill] sm:$0xff] %v6314_v55  ;;  %7808 = vst [vmem:[#allocation42_spill] sm:$0xff] %v6320_v53  ;;  %v6341_v13 = vadd.f32 %v1956_v62, %v7819_v44  ;;  %v6344_v35 = vadd.f32 %v1958_v17, %v7821_v46  ;;  %v3023_v22 = vld [vmem:[%s3541_s22 + $0x6c] sm:$0xe]  ;;  %v3024_v41 = vld [vmem:[%s3541_s22 + $0x78] sm:$0xe]  ;;  %v2056_v44 = vunpack.c.l.bf16 %v3022_v29 }
 0x16c   : > { %7810 = vst [vmem:[#allocation3_spill] sm:$0xff] %v6323_v57  ;;  %7812 = vst [vmem:[#allocation49_spill] sm:$0xff] %v6326_v36  ;;  %v3025_v54 = vld [vmem:[%s3541_s22 + $0x84] sm:$0xe]  ;;  %v7825_v56 = vld [vmem:[#allocation36_spill] sm:$0xff]  ;;  %v2057_v46 = vunpack.c.l.bf16 %v3023_v22 }
 0x16d   : > { %7814 = vst [vmem:[#allocation5_spill] sm:$0xff] %v6329_v27  ;;  %7816 = vst [vmem:[#allocation50_spill] sm:$0xff] %v6335_v24  ;;  %v7823_v61 = vld [vmem:[#allocation2_spill] sm:$0xff]  ;;  %v6353_v34 = vadd.f32 %v1963_v26, %v7825_v56  ;;  %v7827_v23 = vld [vmem:[#allocation19_spill] sm:$0xff]  ;;  %v2059_v56 = vunpack.c.l.bf16 %v3025_v54 }
 0x16e   : > { %7818 = vst [vmem:[#allocation8_spill] sm:$0xff] %v6338_v11  ;;  %7820 = vst [vmem:[#allocation57_spill] sm:$0xff] %v6341_v13  ;;  %v6350_v48 = vadd.f32 %v1961_v43, %v7823_v61  ;;  %v6356_v51 = vadd.f32 %v1966_v4, %v7827_v23  ;;  %v7829_v49 = vld [vmem:[#allocation20_spill] sm:$0xff]  ;;  %v3027_v12 = vld [vmem:[%s3541_s22 + $0x9c] sm:$0xe]  ;;  %v2051_v43 = vunpack.c.l.bf16 %v3017_v14  ;;  %v2054_v4 = vunpack.c.l.bf16 %v3020_v0 }
 0x16f   : > { %7822 = vst [vmem:[#allocation10_spill] sm:$0xff] %v6344_v35  ;;  %7826 = vst [vmem:[#allocation12_spill] sm:$0xff] %v6353_v34  ;;  %v6359_v32 = vadd.f32 %v1968_v7, %v7829_v49  ;;  %v3026_v62 = vld [vmem:[%s3541_s22 + $0x90] sm:$0xe]  ;;  %v3028_v6 = vld [vmem:[%s3541_s22 + $0xa8] sm:$0xe]  ;;  %v2055_v7 = vunpack.c.l.bf16 %v3021_v28  ;;  %v2058_v61 = vunpack.c.l.bf16 %v3024_v41  ;;  %v2061_v49 = vunpack.c.l.bf16 %v3027_v12 }
 0x170   : > { %7824 = vst [vmem:[#allocation62_spill] sm:$0xff] %v6350_v48  ;;  %7828 = vst [vmem:[#allocation18_spill] sm:$0xff] %v6356_v51  ;;  %v3029_v17 = vld [vmem:[%s3541_s22 + $0xb4] sm:$0xe]  ;;  %v6366_v37 = vld [vmem:[%s3541_s22 + $0xc0] sm:$0xe]  ;;  %v2060_v23 = vunpack.c.l.bf16 %v3026_v62 }
 0x171   : > { %7830 = vst [vmem:[#allocation28_spill] sm:$0xff] %v6359_v32  ;;  %v6369_v39 = vld [vmem:[%s3541_s22 + $0xcc] sm:$0xe]  ;;  %v6374_v26 = vld [vmem:[%s6952_s1 + $0x8] ss:$0 sm:$0xff]  ;;  %v2062_v32 = vunpack.c.l.bf16 %v3028_v6  ;;  %v2063_v51 = vunpack.c.l.bf16 %v3029_v17  ;;  %v2064_v50 = vunpack.c.l.bf16 %v6366_v37  ;;  %v7831_v19 = vld [vmem:[#allocation65_spill] sm:$0xff] }
 0x172   : > { %v2065_v14 = vunpack.c.l.bf16 %v6369_v39  ;;  %v2070_v63 = vmul.f32 %v6374_v26, %v2050_v5  ;;  %v2071_v34 = vmul.f32 %v7831_v19, %v6374_v26  ;;  %v7832_v48 = vld [vmem:[#allocation15_spill] sm:$0xff]  ;;  %v2073_v29 = vmul.f32 %v6374_v26, %v2051_v43  ;;  %v7834_v22 = vld [vmem:[#allocation13_spill] sm:$0xff]  ;;  %v7838_v39 = vld [vmem:[#allocation32_spill] sm:$0xff] }
 0x173   : > { %v7833_v0 = vunpack.c.l.bf16 %v7832_v48  ;;  %v2074_v41 = vmul.f32 %v6374_v26, %v7834_v22  ;;  %v7835_v54 = vld [vmem:[#allocation31_spill] sm:$0xff]  ;;  %v6391_v6 = vmul.f32 %v6374_v26, %v2052_v31  ;;  %v7839_v48 = vunpack.c.l.bf16 %v7838_v39  ;;  %v7840_v19 = vld [vmem:[#allocation66_spill] sm:$0xff]  ;;  %v7841_v22 = vld [vmem:[#allocation33_spill] sm:$0xff] }
 0x174   : > { %v7836_v62 = vunpack.c.l.bf16 %v7835_v54  ;;  %v7837_v17 = vld [vmem:[#allocation59_spill] sm:$0xff]  ;;  %v6403_v43 = vmul.f32 %v6374_v26, %v2053_v58  ;;  %v7842_v54 = vunpack.c.l.bf16 %v7841_v22  ;;  %v7846_v13 = vld [vmem:[#allocation26_spill] sm:$0xff]  ;;  %v7858_v40 = vld [vmem:[#allocation16_spill] sm:$0xff]  ;;  %v2167_v38 = vrot.slane %v2071_v34, 2 }
 0x175   : > { %v2072_v28 = vmul.f32 %v6374_v26, %v7833_v0  ;;  %v6395_v37 = vmul.f32 %v7837_v17, %v6374_v26  ;;  %v6400_v5 = vmul.f32 %v6374_v26, %v7839_v48  ;;  %v6407_v0 = vmul.f32 %v6374_v26, %v7840_v19  ;;  %v7843_v17 = vld [vmem:[#allocation60_spill] sm:$0xff]  ;;  %v7844_v48 = vld [vmem:[#allocation39_spill] sm:$0xff] }
 0x176   : > { %v2075_v12 = vmul.f32 %v6374_v26, %v7836_v62  ;;  %v6412_v31 = vmul.f32 %v6374_v26, %v7842_v54  ;;  %v6415_v62 = vmul.f32 %v6374_v26, %v2054_v4  ;;  %v6419_v39 = vmul.f32 %v7843_v17, %v6374_v26  ;;  %v7847_v54 = vld [vmem:[#allocation40_spill] sm:$0xff]  ;;  %v7852_v36 = vld [vmem:[#allocation67_spill] sm:$0xff] }
 0x177   : > { %v7845_v35 = vunpack.c.l.bf16 %v7844_v48  ;;  %v6427_v19 = vmul.f32 %v6374_v26, %v2055_v7  ;;  %v6431_v22 = vmul.f32 %v6374_v26, %v7846_v13  ;;  %v7848_v11 = vunpack.c.l.bf16 %v7847_v54  ;;  %v7849_v48 = vld [vmem:[#allocation7_spill] sm:$0xff]  ;;  %v7864_v3 = vld [vmem:[#allocation68_spill] sm:$0xff] }
 0x178   : > { %v6439_v17 = vmul.f32 %v6374_v26, %v2056_v44  ;;  %v6443_v24 = vmul.f32 %v7849_v48, %v6374_v26  ;;  %v6451_v13 = vmul.f32 %v6374_v26, %v2057_v46  ;;  %v6455_v54 = vmul.f32 %v6374_v26, %v7852_v36 }
 0x179   : > { %v6424_v58 = vmul.f32 %v6374_v26, %v7845_v35  ;;  %v6436_v4 = vmul.f32 %v6374_v26, %v7848_v11  ;;  %v7850_v35 = vld [vmem:[#allocation44_spill] sm:$0xff]  ;;  %v7853_v11 = vld [vmem:[#allocation53_spill] sm:$0xff]  ;;  %v6463_v48 = vmul.f32 %v6374_v26, %v2058_v61  ;;  %v6475_v36 = vmul.f32 %v6374_v26, %v2059_v56 }
 0x17a   : > { %v7851_v27 = vunpack.c.l.bf16 %v7850_v35  ;;  %v7854_v57 = vunpack.c.l.bf16 %v7853_v11  ;;  %v7855_v35 = vld [vmem:[#allocation41_spill] sm:$0xff]  ;;  %v6479_v11 = vmul.f32 %v6374_v26, %v7858_v40  ;;  %v6499_v40 = vmul.f32 %v6374_v26, %v2061_v49 }
 0x17b   : > { %v6467_v53 = vmul.f32 %v7855_v35, %v6374_v26  ;;  %v6487_v35 = vmul.f32 %v6374_v26, %v2060_v23  ;;  %v2171_v30 = vrot.slane %v2073_v29, 2  ;;  %v2174_v60 = vrot.slane %v2075_v12, 2 }
 0x17c   : > { %v6448_v7 = vmul.f32 %v6374_v26, %v7851_v27  ;;  %v6460_v44 = vmul.f32 %v6374_v26, %v7854_v57  ;;  %v7856_v27 = vld [vmem:[#allocation17_spill] sm:$0xff]  ;;  %v6547_v2 = vmul.f32 %v6374_v26, %v2065_v14  ;;  %v2176_v29 = vrot.slane %v6391_v6, 2 }
 0x17d   : > { %v7857_v55 = vunpack.c.l.bf16 %v7856_v27  ;;  %v7859_v57 = vld [vmem:[#allocation61_spill] sm:$0xff]  ;;  %v7861_v27 = vld [vmem:[#allocation14_spill] sm:$0xff]  ;;  %v2179_v14 = vrot.slane %v6400_v5, 2  ;;  %v2184_v6 = vrot.slane %v6412_v31, 2  ;;  %v2191_v5 = vrot.slane %v6427_v19, 2 }
 0x17e   : > { %v7860_v25 = vunpack.c.l.bf16 %v7859_v57  ;;  %v6491_v33 = vmul.f32 %v7861_v27, %v6374_v26  ;;  %v6503_v57 = vmul.f32 %v6374_v26, %v7864_v3  ;;  %v6511_v27 = vmul.f32 %v6374_v26, %v2062_v32 }
 0x17f   : > { %v6472_v46 = vmul.f32 %v6374_v26, %v7857_v55  ;;  %v7862_v55 = vld [vmem:[#allocation56_spill] sm:$0xff]  ;;  %v6523_v3 = vmul.f32 %v6374_v26, %v2063_v51  ;;  %v2169_v32 = vrot.slane %v2072_v28, 2  ;;  %v7871_v51 = vld [vmem:[#allocation63_spill] sm:$0xff]  ;;  %v7875_v28 = vunpack.c.l.bf16 %v5935_v9 }
 0x180   : > { %v6484_v61 = vmul.f32 %v6374_v26, %v7860_v25  ;;  %v7863_v10 = vunpack.c.l.bf16 %v7862_v55  ;;  %v7865_v25 = vld [vmem:[#allocation21_spill] sm:$0xff]  ;;  %v7867_v55 = vld [vmem:[#allocation55_spill] sm:$0xff]  ;;  %v6539_v15 = vmul.f32 %v7871_v51, %v6374_v26  ;;  %v2181_v51 = vrot.slane %v6403_v43, 2 }
 0x181   : > { %v7866_v21 = vunpack.c.l.bf16 %v7865_v25  ;;  %v6515_v42 = vmul.f32 %v7867_v55, %v6374_v26  ;;  %v6527_v25 = vmul.f32 %v6374_v26, %v7770_v1  ;;  %v6532_v55 = vmul.f32 %v6374_v26, %v7870_v59  ;;  %v7872_v1 = vld [vmem:[#allocation47_spill] sm:$0xff]  ;;  %v7874_v59 = vld [vmem:[#allocation69_spill] sm:$0xff] }
 0x182   : > { %v6496_v56 = vmul.f32 %v6374_v26, %v7863_v10  ;;  %v7868_v10 = vld [vmem:[#allocation4_spill] sm:$0xff]  ;;  %v7873_v45 = vunpack.c.l.bf16 %v7872_v1  ;;  %v2192_v43 = vrot.slane %v6431_v22, 2  ;;  %v2201_v31 = vrot.slane %v6451_v13, 2 }
 0x183   : > { %v6508_v23 = vmul.f32 %v6374_v26, %v7866_v21  ;;  %v7869_v52 = vunpack.c.l.bf16 %v7868_v10  ;;  %v2166_v21 = vrot.slane %v2070_v63, 2  ;;  %v2172_v10 = vrot.slane %v2074_v41, 2 }
 0x184   : > { %v6544_v34 = vmul.f32 %v6374_v26, %v7873_v45  ;;  %v6551_v63 = vmul.f32 %v6374_v26, %v7874_v59  ;;  %v2177_v41 = vrot.slane %v6395_v37, 2  ;;  %v6564_v45 = vsel %vm789_vm1, %v2167_v38, %v2169_v32 }
 0x185   : > { %v6520_v49 = vmul.f32 %v6374_v26, %v7869_v52  ;;  %v6535_v52 = vmul.f32 %v6374_v26, %v2064_v50  ;;  %v6556_v50 = vmul.f32 %v6374_v26, %v7875_v28  ;;  %v6561_v12 = vsel %vm789_vm1, %v2166_v21, %v2167_v38 }
 0x186   : > { %v6569_v1 = vsel %vm789_vm1, %v2171_v30, %v2172_v10  ;;  %v6572_v9 = vsel %vm789_vm1, %v2172_v10, %v2174_v60  ;;  %v2182_v26 = vrot.slane %v6407_v0, 2  ;;  %v2186_v37 = vrot.slane %v6415_v62, 2 }
 0x187   : > { %v2187_v21 = vrot.slane %v6419_v39, 2  ;;  %v2189_v38 = vrot.slane %v6424_v58, 2  ;;  %v2194_v30 = vrot.slane %v6436_v4, 2  ;;  %v2196_v32 = vrot.slane %v6439_v17, 2 }
 0x188   : > { %v2197_v60 = vrot.slane %v6443_v24, 2  ;;  %v2199_v0 = vrot.slane %v6448_v7, 2  ;;  %v2202_v62 = vrot.slane %v6455_v54, 2  ;;  %v2204_v39 = vrot.slane %v6460_v44, 2 }
 0x189   : > { %v2178_v58 = vsel %vm789_vm1, %v2176_v29, %v2177_v41  ;;  %v2180_v19 = vsel %vm789_vm1, %v2177_v41, %v2179_v14  ;;  %v2206_v22 = vrot.slane %v6463_v48, 2  ;;  %v2207_v4 = vrot.slane %v6467_v53, 2 }
 0x18a   : > { %v2183_v17 = vsel %vm789_vm1, %v2181_v51, %v2182_v26  ;;  %v2185_v24 = vsel %vm789_vm1, %v2182_v26, %v2184_v6  ;;  %v2188_v7 = vsel %vm789_vm1, %v2186_v37, %v2187_v21  ;;  %v2209_v13 = vrot.slane %v6472_v46, 2 }
 0x18b   : > { %v2190_v54 = vsel %vm789_vm1, %v2187_v21, %v2189_v38  ;;  %v2193_v44 = vsel %vm789_vm1, %v2191_v5, %v2192_v43  ;;  %v2195_v10 = vsel %vm789_vm1, %v2192_v43, %v2194_v30  ;;  %v2198_v59 = vsel %vm789_vm1, %v2196_v32, %v2197_v60 }
 0x18c   : > { %v2200_v48 = vsel %vm789_vm1, %v2197_v60, %v2199_v0  ;;  %v2203_v53 = vsel %vm789_vm1, %v2201_v31, %v2202_v62  ;;  %v2205_v28 = vsel %vm789_vm1, %v2202_v62, %v2204_v39  ;;  %v2211_v29 = vrot.slane %v6475_v36, 2 }
 0x18d   : > { %v2208_v41 = vsel %vm789_vm1, %v2206_v22, %v2207_v4  ;;  %v2212_v46 = vrot.slane %v6479_v11, 2  ;;  %v2214_v14 = vrot.slane %v6484_v61, 2  ;;  %v2216_v51 = vrot.slane %v6487_v35, 2 }
 0x18e   : > { %v2210_v26 = vsel %vm789_vm1, %v2207_v4, %v2209_v13  ;;  %v2217_v6 = vrot.slane %v6491_v33, 2  ;;  %v2219_v37 = vrot.slane %v6496_v56, 2  ;;  %v2221_v21 = vrot.slane %v6499_v40, 2  ;;  %v7876_v13 = vld [vmem:[#allocation54_spill] sm:$0xff] }
 0x18f   : > { %v2222_v38 = vrot.slane %v6503_v57, 2  ;;  %v2224_v36 = vrot.slane %v6508_v23, 2  ;;  %v2226_v5 = vrot.slane %v6511_v27, 2  ;;  %v2227_v11 = vrot.slane %v6515_v42, 2 }
 0x190   : > { %v2229_v61 = vrot.slane %v6520_v49, 2  ;;  %v2231_v35 = vrot.slane %v6523_v3, 2  ;;  %v2232_v43 = vrot.slane %v6527_v25, 2  ;;  %v2234_v33 = vrot.slane %v6532_v55, 2 }
 0x191   : > { %v2213_v56 = vsel %vm789_vm1, %v2211_v29, %v2212_v46  ;;  %v2236_v40 = vrot.slane %v6535_v52, 2  ;;  %v2237_v57 = vrot.slane %v6539_v15, 2  ;;  %v2239_v23 = vrot.slane %v6544_v34, 2 }
 0x192   : > { %v2215_v27 = vsel %vm789_vm1, %v2212_v46, %v2214_v14  ;;  %v2241_v42 = vrot.slane %v6547_v2, 2  ;;  %v2242_v49 = vrot.slane %v6551_v63, 2  ;;  %v2244_v3 = vrot.slane %v6556_v50, 2  ;;  %v7877_v46 = vld [vmem:[#allocation6_spill] sm:$0xff] }
 0x193   : > { %v2218_v25 = vsel %vm789_vm1, %v2216_v51, %v2217_v6  ;;  %v2220_v55 = vsel %vm789_vm1, %v2217_v6, %v2219_v37  ;;  %v2223_v30 = vsel %vm789_vm1, %v2221_v21, %v2222_v38  ;;  %v2225_v52 = vsel %vm789_vm1, %v2222_v38, %v2224_v36  ;;  %v7880_v6 = vld [vmem:[#allocation48_spill] sm:$0xff] }
 0x194   : > { %v2228_v15 = vsel %vm789_vm1, %v2226_v5, %v2227_v11  ;;  %v2230_v34 = vsel %vm789_vm1, %v2227_v11, %v2229_v61  ;;  %v2233_v32 = vsel %vm789_vm1, %v2231_v35, %v2232_v43  ;;  %v2235_v2 = vsel %vm789_vm1, %v2232_v43, %v2234_v33  ;;  %v7887_v5 = vld [vmem:[#allocation25_spill] sm:$0xff]  ;;  %v7892_v33 = vld [vmem:[#allocation3_spill] sm:$0xff] }
 0x195   : > { %v2238_v63 = vsel %vm789_vm1, %v2236_v40, %v2237_v57  ;;  %v2240_v50 = vsel %vm789_vm1, %v2237_v57, %v2239_v23  ;;  %v2278_v60 = vadd.f32 %v6561_v12, %v6251_v20  ;;  %v2279_v0 = vadd.f32 %v6564_v45, %v6255_v18  ;;  %v7878_v20 = vld [vmem:[#allocation43_spill] sm:$0xff]  ;;  %v6655_v18 = vld [vmem:[%s6953_s2] ss:$0 sm:$0xff]  ;;  %v7893_v57 = vld [vmem:[#allocation49_spill] sm:$0xff] }
 0x196   : > { %v2243_v31 = vsel %vm789_vm1, %v2241_v42, %v2242_v49  ;;  %v2245_v62 = vsel %vm789_vm1, %v2242_v49, %v2244_v3  ;;  %v2280_v39 = vadd.f32 %v6569_v1, %v6261_v8  ;;  %v2281_v22 = vadd.f32 %v6572_v9, %v6265_v47  ;;  %v7879_v45 = vld [vmem:[#allocation23_spill] sm:$0xff]  ;;  %v7881_v1 = vld [vmem:[#allocation9_spill] sm:$0xff]  ;;  %v7882_v47 = vld [vmem:[#allocation64_spill] sm:$0xff] }
 0x197   : > { %v2282_v4 = vadd.f32 %v2178_v58, %v6268_v16  ;;  %v2283_v29 = vadd.f32 %v2180_v19, %v7876_v13  ;;  %v2284_v14 = vadd.f32 %v2183_v17, %v7877_v46  ;;  %v2285_v12 = vadd.f32 %v2185_v24, %v7878_v20  ;;  %v7883_v16 = vld [vmem:[#allocation24_spill] sm:$0xff]  ;;  %v7884_v19 = vld [vmem:[#allocation46_spill] sm:$0xff]  ;;  %v7885_v17 = vld [vmem:[#allocation11_spill] sm:$0xff] }
 0x198   : > { %v2286_v51 = vadd.f32 %v2188_v7, %v7879_v45  ;;  %v2287_v8 = vadd.f32 %v2190_v54, %v7880_v6  ;;  %v2288_v37 = vadd.f32 %v2193_v44, %v7881_v1  ;;  %v2289_v9 = vadd.f32 %v2195_v10, %v7882_v47  ;;  %v7886_v24 = vld [vmem:[#allocation58_spill] sm:$0xff]  ;;  %v7888_v44 = vld [vmem:[#allocation27_spill] sm:$0xff] }
 0x199   : > { %v2290_v58 = vadd.f32 %v2198_v59, %v7883_v16  ;;  %v2291_v21 = vadd.f32 %v2200_v48, %v7884_v19  ;;  %v2292_v38 = vadd.f32 %v2203_v53, %v7885_v17  ;;  %v2293_v36 = vadd.f32 %v2205_v28, %v7886_v24  ;;  %v7889_v59 = vld [vmem:[#allocation70_spill] sm:$0xff]  ;;  %v7890_v48 = vld [vmem:[#allocation71_spill] sm:$0xff] }
 0x19a   : > { %v2294_v11 = vadd.f32 %v2208_v41, %v7887_v5  ;;  %v6667_v61 = vadd.f32 %v6655_v18, %v2278_v60  ;;  %v6670_v7 = vadd.f32 %v6655_v18, %v2279_v0  ;;  %v6673_v54 = vadd.f32 %v6655_v18, %v2280_v39  ;;  %v7891_v28 = vld [vmem:[#allocation42_spill] sm:$0xff] }
 0x19b   : > { %v2295_v10 = vadd.f32 %v2210_v26, %v7888_v44  ;;  %v2296_v35 = vadd.f32 %v2213_v56, %v7889_v59  ;;  %v2297_v43 = vadd.f32 %v2215_v27, %v7890_v48  ;;  %v6679_v53 = vadd.f32 %v6655_v18, %v2281_v22  ;;  %v7894_v26 = vld [vmem:[#allocation5_spill] sm:$0xff]  ;;  %v7895_v56 = vld [vmem:[#allocation50_spill] sm:$0xff] }
 0x19c   : > { %v6682_v41 = vadd.f32 %v2218_v25, %v7891_v28  ;;  %v6685_v40 = vadd.f32 %v2220_v55, %v7892_v33  ;;  %v6688_v23 = vadd.f32 %v2223_v30, %v7893_v57  ;;  %v6691_v42 = vadd.f32 %v6655_v18, %v2282_v4  ;;  %v7896_v55 = vld [vmem:[#allocation8_spill] sm:$0xff]  ;;  %v7899_v46 = vld [vmem:[#allocation62_spill] sm:$0xff] }
 0x19d   : > { %v6694_v49 = vadd.f32 %v2225_v52, %v7894_v26  ;;  %v6697_v27 = vadd.f32 %v2228_v15, %v7895_v56  ;;  %v6700_v3 = vadd.f32 %v6655_v18, %v2283_v29  ;;  %v6703_v25 = vadd.f32 %v6655_v18, %v2284_v14  ;;  %v7897_v52 = vld [vmem:[#allocation57_spill] sm:$0xff]  ;;  %v7898_v15 = vld [vmem:[#allocation10_spill] sm:$0xff]  ;;  %v7900_v14 = vld [vmem:[#allocation12_spill] sm:$0xff] }
 0x19e   : > { %v6706_v60 = vadd.f32 %v2230_v34, %v7896_v55  ;;  %v2349_v30 = vsub.f32 0.0, %v6667_v61  ;;  %v2350_v0 = vsub.f32 0.0, %v6670_v7  ;;  %v2351_v39 = vsub.f32 0.0, %v6673_v54  ;;  %v7901_v6 = vld [vmem:[#allocation18_spill] sm:$0xff] }
 0x19f   : > { %v6712_v22 = vadd.f32 %v2233_v32, %v7897_v52  ;;  %v6715_v4 = vadd.f32 %v2235_v2, %v7898_v15  ;;  %v6718_v13 = vadd.f32 %v6655_v18, %v2285_v12  ;;  %v2352_v29 = vsub.f32 0.0, %v6679_v53 }
 0x1a0   : > { %v6722_v34 = vadd.f32 %v2238_v63, %v7899_v46  ;;  %v6725_v20 = vadd.f32 %v2240_v50, %v7900_v14  ;;  %v6728_v45 = vadd.f32 %v6655_v18, %v2286_v51  ;;  %v2353_v32 = vsub.f32 0.0, %v6691_v42  ;;  %v7902_v51 = vld [vmem:[#allocation28_spill] sm:$0xff] }
 0x1a1   : > { %v6732_v1 = vadd.f32 %v2243_v31, %v7901_v6  ;;  %v6735_v2 = vadd.f32 %v6655_v18, %v2287_v8  ;;  %v2354_v12 = vsub.f32 0.0, %v6700_v3  ;;  %v2355_v47 = vsub.f32 0.0, %v6703_v25 }
 0x1a2   : > { %v6740_v63 = vadd.f32 %v6655_v18, %v2288_v37  ;;  %v2381_v50 = vmul.f32 1.442695, %v2349_v30  ;;  %v2383_v16 = vmul.f32 1.442695, %v2350_v0  ;;  %v2385_v19 = vmul.f32 1.442695, %v2351_v39 }
 0x1a3   : > { %v6743_v17 = vadd.f32 %v2245_v62, %v7902_v51  ;;  %v6746_v24 = vadd.f32 %v6655_v18, %v2289_v9  ;;  %v2356_v31 = vsub.f32 0.0, %v6718_v13  ;;  %v2387_v8 = vmul.f32 1.442695, %v2352_v29 }
 0x1a4   : > { %v6750_v5 = vadd.f32 %v6655_v18, %v2290_v58  ;;  %v2357_v44 = vsub.f32 0.0, %v6728_v45  ;;  %3340 = vpow2.f32 %v2381_v50  ;;  %v2389_v37 = vmul.f32 1.442695, %v2353_v32 }
 0x1a5   : > { %v6754_v59 = vadd.f32 %v6655_v18, %v2291_v21  ;;  %v2358_v48 = vsub.f32 0.0, %v6735_v2  ;;  %3342 = vpow2.f32 %v2383_v16  ;;  %v2391_v62 = vmul.f32 1.442695, %v2354_v12 }
 0x1a6   : > { %v6758_v9 = vadd.f32 %v6655_v18, %v2292_v38  ;;  %v2359_v28 = vsub.f32 0.0, %v6740_v63  ;;  %3344 = vpow2.f32 %v2385_v19  ;;  %v2393_v33 = vmul.f32 1.442695, %v2355_v47 }
 0x1a7   : > { %v6762_v58 = vadd.f32 %v6655_v18, %v2293_v36  ;;  %v2360_v57 = vsub.f32 0.0, %v6746_v24  ;;  %3346 = vpow2.f32 %v2387_v8  ;;  %v2395_v26 = vmul.f32 1.442695, %v2356_v31 }
 0x1a8   : > { %v6766_v21 = vadd.f32 %v6655_v18, %v2294_v11  ;;  %v2361_v56 = vsub.f32 0.0, %v6750_v5  ;;  %3348 = vpow2.f32 %v2389_v37  ;;  %v2397_v55 = vmul.f32 1.442695, %v2357_v44 }
 0x1a9   : > { %v6770_v38 = vadd.f32 %v6655_v18, %v2295_v10  ;;  %v2362_v30 = vsub.f32 0.0, %v6754_v59  ;;  %3350 = vpow2.f32 %v2391_v62  ;;  %v2399_v0 = vmul.f32 1.442695, %v2358_v48 }
 0x1aa   : > { %v6774_v36 = vadd.f32 %v6655_v18, %v2296_v35  ;;  %v2363_v39 = vsub.f32 0.0, %v6758_v9  ;;  %3352 = vpow2.f32 %v2393_v33  ;;  %v2401_v52 = vmul.f32 1.442695, %v2359_v28 }
 0x1ab   : > { %v6778_v11 = vadd.f32 %v6655_v18, %v2297_v43  ;;  %v2364_v15 = vsub.f32 0.0, %v6762_v58  ;;  %3354 = vpow2.f32 %v2395_v26  ;;  %v2403_v29 = vmul.f32 1.442695, %v2360_v57 }
 0x1ac   : > { %v6783_v10 = vadd.f32 %v6655_v18, %v6682_v41  ;;  %v2365_v46 = vsub.f32 0.0, %v6766_v21  ;;  %3356 = vpow2.f32 %v2397_v55  ;;  %v2405_v35 = vmul.f32 1.442695, %v2361_v56 }
 0x1ad   : > { %v6788_v14 = vadd.f32 %v6655_v18, %v6685_v40  ;;  %v2366_v32 = vsub.f32 0.0, %v6770_v38  ;;  %3358 = vpow2.f32 %v2399_v0  ;;  %v2407_v43 = vmul.f32 1.442695, %v2362_v30 }
 0x1ae   : > { %v6791_v6 = vpop.eup %3340  ;;  %v6795_v12 = vadd.f32 %v6655_v18, %v6688_v23  ;;  %v2367_v41 = vsub.f32 0.0, %v6774_v36  ;;  %3360 = vpow2.f32 %v2401_v52  ;;  %v2409_v47 = vmul.f32 1.442695, %v2363_v39 }
 0x1af   : > { %v6798_v50 = vpop.eup %3342  ;;  %v6802_v40 = vadd.f32 %v6655_v18, %v6694_v49  ;;  %v2368_v16 = vsub.f32 0.0, %v6778_v11  ;;  %3362 = vpow2.f32 %v2403_v29  ;;  %v2411_v19 = vmul.f32 1.442695, %v2364_v15 }
 0x1b0   : > { %v6805_v51 = vpop.eup %3344  ;;  %v6809_v23 = vadd.f32 %v6655_v18, %v6697_v27  ;;  %v2369_v31 = vsub.f32 0.0, %v6783_v10  ;;  %3364 = vpow2.f32 %v2405_v35  ;;  %v2413_v8 = vmul.f32 1.442695, %v2365_v46 }
 0x1b1   : > { %v6812_v44 = vpop.eup %3346  ;;  %v6816_v49 = vadd.f32 %v6655_v18, %v6706_v60  ;;  %v2370_v37 = vsub.f32 0.0, %v6788_v14  ;;  %3366 = vpow2.f32 %v2407_v43  ;;  %v2415_v48 = vmul.f32 1.442695, %v2366_v32 }
 0x1b2   : > { %v6819_v62 = vpop.eup %3348  ;;  %v6823_v27 = vadd.f32 %v6655_v18, %v6712_v22  ;;  %v2371_v28 = vsub.f32 0.0, %v6795_v12  ;;  %3368 = vpow2.f32 %v2409_v47  ;;  %v2417_v33 = vmul.f32 1.442695, %v2367_v41 }
 0x1b3   : > { %v6826_v57 = vpop.eup %3350  ;;  %v6830_v60 = vadd.f32 %v6655_v18, %v6715_v4  ;;  %v2372_v26 = vsub.f32 0.0, %v6802_v40  ;;  %3370 = vpow2.f32 %v2411_v19  ;;  %v2419_v56 = vmul.f32 1.442695, %v2368_v16 }
 0x1b4   : > { %v6833_v55 = vpop.eup %3352  ;;  %v6837_v22 = vadd.f32 %v6655_v18, %v6722_v34  ;;  %v2373_v30 = vsub.f32 0.0, %v6809_v23  ;;  %3372 = vpow2.f32 %v2413_v8  ;;  %v2421_v0 = vmul.f32 1.442695, %v2369_v31 }
 0x1b5   : > { %v6840_v39 = vpop.eup %3354  ;;  %v6844_v4 = vadd.f32 %v6655_v18, %v6725_v20  ;;  %v2374_v52 = vsub.f32 0.0, %v6816_v49  ;;  %3374 = vpow2.f32 %v2415_v48  ;;  %v2423_v15 = vmul.f32 1.442695, %v2370_v37 }
 0x1b6   : > { %7903 = vst [vmem:[#allocation29_spill] sm:$0xff] %v6837_v22  ;;  %v3357_v29 = vpop.eup %3356  ;;  %v6849_v46 = vadd.f32 %v6655_v18, %v6732_v1  ;;  %v2375_v34 = vsub.f32 0.0, %v6823_v27  ;;  %3376 = vpow2.f32 %v2417_v33  ;;  %v2425_v35 = vmul.f32 1.442695, %v2371_v28 }
 0x1b7   : > { %7904 = vst [vmem:[#allocation30_spill] sm:$0xff] %v6844_v4  ;;  %v3359_v32 = vpop.eup %3358  ;;  %v6854_v43 = vadd.f32 %v6655_v18, %v6743_v17  ;;  %v2376_v20 = vsub.f32 0.0, %v6830_v60  ;;  %3378 = vpow2.f32 %v2419_v56  ;;  %v2427_v41 = vmul.f32 1.442695, %v2372_v26 }
 0x1b8   : > { %7905 = vst [vmem:[#allocation34_spill] sm:$0xff] %v6849_v46  ;;  %v3361_v47 = vpop.eup %3360  ;;  %v2377_v16 = vsub.f32 0.0, %v6837_v22  ;;  %3380 = vpow2.f32 %v2421_v0  ;;  %v2429_v19 = vmul.f32 1.442695, %v2373_v30  ;;  %v2378_v31 = vsub.f32 0.0, %v6844_v4 }
 0x1b9   : > { %7906 = vst [vmem:[#allocation35_spill] sm:$0xff] %v6854_v43  ;;  %v3363_v1 = vpop.eup %3362  ;;  %3382 = vpow2.f32 %v2423_v15  ;;  %v2431_v8 = vmul.f32 1.442695, %v2374_v52  ;;  %v2379_v48 = vsub.f32 0.0, %v6849_v46  ;;  %v2433_v18 = vmul.f32 1.442695, %v2375_v34 }
 0x1ba   : > { %v3365_v37 = vpop.eup %3364  ;;  %3384 = vpow2.f32 %v2425_v35  ;;  %v2380_v28 = vsub.f32 0.0, %v6854_v43  ;;  %v2435_v33 = vmul.f32 1.442695, %v2376_v20  ;;  %v2437_v56 = vmul.f32 1.442695, %v2377_v16 }
 0x1bb   : > { %v3367_v17 = vpop.eup %3366  ;;  %3386 = vpow2.f32 %v2427_v41  ;;  %v2439_v30 = vmul.f32 1.442695, %v2378_v31  ;;  %v2441_v15 = vmul.f32 1.442695, %v2379_v48  ;;  %v2445_v34 = vadd.f32 1.0, %v6791_v6 }
 0x1bc   : > { %v3369_v26 = vpop.eup %3368  ;;  %3388 = vpow2.f32 %v2429_v19  ;;  %v2443_v4 = vmul.f32 1.442695, %v2380_v28  ;;  %v2446_v20 = vadd.f32 1.0, %v6798_v50  ;;  %v2447_v16 = vadd.f32 1.0, %v6805_v51 }
 0x1bd   : > { %v3371_v0 = vpop.eup %3370  ;;  %3390 = vpow2.f32 %v2431_v8  ;;  %v2448_v31 = vadd.f32 1.0, %v6812_v44  ;;  %v2449_v48 = vadd.f32 1.0, %v6819_v62  ;;  %v2450_v28 = vadd.f32 1.0, %v6826_v57 }
 0x1be   : > { %v3373_v22 = vpop.eup %3372  ;;  %3392 = vpow2.f32 %v2433_v18  ;;  %v2455_v57 = vadd.f32 1.0, %v3361_v47 }
 0x1bf   : > { %v3375_v52 = vpop.eup %3374  ;;  %3394 = vpow2.f32 %v2435_v33  ;;  %v2451_v33 = vadd.f32 1.0, %v6833_v55  ;;  %v2456_v55 = vadd.f32 1.0, %v3363_v1 }
 0x1c0   : > { %v3377_v46 = vpop.eup %3376  ;;  %3396 = vpow2.f32 %v2437_v56  ;;  %v2452_v56 = vadd.f32 1.0, %v6840_v39  ;;  %v2457_v39 = vadd.f32 1.0, %v3365_v37 }
 0x1c1   : > { %v3379_v35 = vpop.eup %3378  ;;  %3398 = vpow2.f32 %v2439_v30  ;;  %v2454_v30 = vadd.f32 1.0, %v3359_v32 }
 0x1c2   : > { %v3381_v41 = vpop.eup %3380  ;;  %3400 = vpow2.f32 %v2441_v15  ;;  %v2464_v43 = vadd.f32 1.0, %v3379_v35 }
 0x1c3   : > { %v3383_v19 = vpop.eup %3382  ;;  %3402 = vpow2.f32 %v2443_v4  ;;  %v2453_v4 = vadd.f32 1.0, %v3357_v29  ;;  %v2458_v29 = vadd.f32 1.0, %v3367_v17  ;;  %v2465_v37 = vadd.f32 1.0, %v3381_v41 }
 0x1c4   : > { %v3385_v8 = vpop.eup %3384  ;;  %3404 = vrcp.f32 %v2445_v34 }
 0x1c5   : > { %v3387_v18 = vpop.eup %3386  ;;  %3406 = vrcp.f32 %v2446_v20 }
 0x1c6   : > { %v3389_v6 = vpop.eup %3388  ;;  %3408 = vrcp.f32 %v2447_v16  ;;  %v2459_v16 = vadd.f32 1.0, %v3369_v26 }
 0x1c7   : > { %v3391_v50 = vpop.eup %3390  ;;  %3410 = vrcp.f32 %v2448_v31  ;;  %v2460_v31 = vadd.f32 1.0, %v3371_v0  ;;  %v2468_v0 = vadd.f32 1.0, %v3387_v18 }
 0x1c8   : > { %v3393_v51 = vpop.eup %3392  ;;  %3412 = vrcp.f32 %v2449_v48  ;;  %v2461_v48 = vadd.f32 1.0, %v3373_v22  ;;  %v2467_v22 = vadd.f32 1.0, %v3385_v8 }
 0x1c9   : > { %v6869_v44 = vpop.eup %3394  ;;  %3414 = vrcp.f32 %v2450_v28  ;;  %v2462_v28 = vadd.f32 1.0, %v3375_v52 }
 0x1ca   : > { %v6871_v62 = vpop.eup %3396  ;;  %3416 = vrcp.f32 %v2451_v33  ;;  %v2463_v33 = vadd.f32 1.0, %v3377_v46 }
 0x1cb   : > { %v6873_v15 = vpop.eup %3398  ;;  %3418 = vrcp.f32 %v2452_v56 }
 0x1cc   : > { %v6875_v34 = vpop.eup %3400  ;;  %3420 = vrcp.f32 %v2453_v4  ;;  %v2466_v4 = vadd.f32 1.0, %v3383_v19 }
 0x1cd   : > { %v6877_v20 = vpop.eup %3402  ;;  %3422 = vrcp.f32 %v2454_v30 }
 0x1ce   : > { %v3405_v32 = vpop.eup %3404  ;;  %3424 = vrcp.f32 %v2455_v57 }
 0x1cf   : > { %v3407_v47 = vpop.eup %3406  ;;  %3426 = vrcp.f32 %v2456_v55  ;;  %v2509_v1 = vmul.f32 %v3405_v32, %v6667_v61  ;;  %v2469_v61 = vadd.f32 1.0, %v3389_v6  ;;  %v2471_v6 = vadd.f32 1.0, %v3393_v51 }
 0x1d0   : > { %v3409_v56 = vpop.eup %3408  ;;  %3428 = vrcp.f32 %v2457_v39  ;;  %v2510_v17 = vmul.f32 %v3407_v47, %v6670_v7  ;;  %v2470_v7 = vadd.f32 1.0, %v3391_v50 }
 0x1d1   : > { %v3411_v26 = vpop.eup %3410  ;;  %3430 = vrcp.f32 %v2458_v29  ;;  %v2511_v46 = vmul.f32 %v3409_v56, %v6673_v54 }
 0x1d2   : > { %v3413_v52 = vpop.eup %3412  ;;  %3432 = vrcp.f32 %v2459_v16  ;;  %v2512_v35 = vmul.f32 %v3411_v26, %v6679_v53  ;;  %v3200_v41 = vpack.c.bf16 %v2510_v17, %v2509_v1 }
 0x1d3   : > { %v3415_v19 = vpop.eup %3414  ;;  %3434 = vrcp.f32 %v2460_v31  ;;  %v2513_v30 = vmul.f32 %v3413_v52, %v6691_v42  ;;  %v2701_v57 = vadd.f32 %v2511_v46, %v2509_v1 }
 0x1d4   : > { %v3417_v55 = vpop.eup %3416  ;;  %3436 = vrcp.f32 %v2461_v48  ;;  %v2514_v8 = vmul.f32 %v3415_v19, %v6700_v3  ;;  %3201 = vst [vmem:[%s6885_s24] sm:$0xff] %v3200_v41   ;;  %v3205_v18 = vpack.c.bf16 %v2512_v35, %v2511_v46  ;;  %v2716_v54 = vadd.f32 %v2512_v35, %v2510_v17 }
 0x1d5   : > { %v3419_v39 = vpop.eup %3418  ;;  %3438 = vrcp.f32 %v2462_v28  ;;  %v2515_v53 = vmul.f32 %v3417_v55, %v6703_v25  ;;  %v2702_v29 = vadd.f32 %v2701_v57, %v2513_v30  ;;  %v2472_v3 = vadd.f32 1.0, %v6869_v44 }
 0x1d6   : > { %v3421_v50 = vpop.eup %3420  ;;  %3440 = vrcp.f32 %v2463_v33  ;;  %v2516_v42 = vmul.f32 %v3419_v39, %v6718_v13  ;;  %3300 = vst [vmem:[%s6885_s24 + $0x8] sm:$0xff] %v3205_v18   ;;  %v3210_v16 = vpack.c.bf16 %v2514_v8, %v2513_v30  ;;  %v2717_v32 = vadd.f32 %v2716_v54, %v2514_v8 }
 0x1d7   : > { %v3423_v31 = vpop.eup %3422  ;;  %3442 = vrcp.f32 %v2464_v43  ;;  %v2517_v48 = vmul.f32 %v3421_v50, %v6728_v45  ;;  %v2703_v51 = vadd.f32 %v2702_v29, %v2515_v53  ;;  %v2473_v13 = vadd.f32 1.0, %v6871_v62 }
 0x1d8   : > { %v3425_v28 = vpop.eup %3424  ;;  %3444 = vrcp.f32 %v2465_v37  ;;  %v2518_v25 = vmul.f32 %v3423_v31, %v6735_v2  ;;  %3301 = vst [vmem:[%s6885_s24 + $0x10] sm:$0xff] %v3210_v16   ;;  %v3215_v47 = vpack.c.bf16 %v2516_v42, %v2515_v53  ;;  %v2718_v33 = vadd.f32 %v2717_v32, %v2516_v42 }
 0x1d9   : > { %v3427_v1 = vpop.eup %3426  ;;  %3446 = vrcp.f32 %v2466_v4  ;;  %v2519_v56 = vmul.f32 %v3425_v28, %v6740_v63  ;;  %v2704_v44 = vadd.f32 %v2703_v51, %v2517_v48  ;;  %v2474_v2 = vadd.f32 1.0, %v6873_v15 }
 0x1da   : > { %v3429_v43 = vpop.eup %3428  ;;  %3448 = vrcp.f32 %v2467_v22  ;;  %v2520_v45 = vmul.f32 %v3427_v1, %v6746_v24  ;;  %3302 = vst [vmem:[%s6885_s24 + $0x18] sm:$0xff] %v3215_v47   ;;  %v3220_v17 = vpack.c.bf16 %v2518_v25, %v2517_v48  ;;  %v2719_v37 = vadd.f32 %v2718_v33, %v2518_v25 }
 0x1db   : > { %v3431_v26 = vpop.eup %3430  ;;  %3450 = vrcp.f32 %v2468_v0  ;;  %v2521_v46 = vmul.f32 %v3429_v43, %v6750_v5  ;;  %v2705_v62 = vadd.f32 %v2704_v44, %v2519_v56  ;;  %v2475_v24 = vadd.f32 1.0, %v6875_v34 }
 0x1dc   : > { %v3433_v4 = vpop.eup %3432  ;;  %3452 = vrcp.f32 %v2469_v61  ;;  %v2522_v63 = vmul.f32 %v3431_v26, %v6754_v59  ;;  %3303 = vst [vmem:[%s6885_s24 + $0x20] sm:$0xff] %v3220_v17   ;;  %v3225_v52 = vpack.c.bf16 %v2520_v45, %v2519_v56  ;;  %v2720_v22 = vadd.f32 %v2719_v37, %v2520_v45  ;;  %v7907_v37 = vld [vmem:[#allocation29_spill] sm:$0xff] }
 0x1dd   : > { %v3435_v35 = vpop.eup %3434  ;;  %3454 = vrcp.f32 %v2470_v7  ;;  %v2523_v41 = vmul.f32 %v3433_v4, %v6758_v9  ;;  %v2706_v15 = vadd.f32 %v2705_v62, %v2521_v46  ;;  %v2476_v59 = vadd.f32 1.0, %v6877_v20 }
 0x1de   : > { %v3437_v0 = vpop.eup %3436  ;;  %3456 = vrcp.f32 %v2471_v6  ;;  %v2524_v5 = vmul.f32 %v3435_v35, %v6762_v58  ;;  %3304 = vst [vmem:[%s6885_s24 + $0x28] sm:$0xff] %v3225_v52   ;;  %v3230_v19 = vpack.c.bf16 %v2522_v63, %v2521_v46  ;;  %v2721_v61 = vadd.f32 %v2720_v22, %v2522_v63  ;;  %v7908_v46 = vld [vmem:[#allocation30_spill] sm:$0xff]  ;;  %v7910_v35 = vld [vmem:[#allocation35_spill] sm:$0xff] }
 0x1df   : > { %v3439_v30 = vpop.eup %3438  ;;  %3458 = vrcp.f32 %v2472_v3  ;;  %v2525_v57 = vmul.f32 %v3437_v0, %v6766_v21  ;;  %v2707_v34 = vadd.f32 %v2706_v15, %v2523_v41  ;;  %v7909_v52 = vld [vmem:[#allocation34_spill] sm:$0xff] }
 0x1e0   : > { %v3441_v7 = vpop.eup %3440  ;;  %3460 = vrcp.f32 %v2473_v13  ;;  %v2526_v9 = vmul.f32 %v3439_v30, %v6770_v38  ;;  %3305 = vst [vmem:[%s6885_s24 + $0x30] sm:$0xff] %v3230_v19   ;;  %v3235_v55 = vpack.c.bf16 %v2524_v5, %v2523_v41  ;;  %v2722_v8 = vadd.f32 %v2721_v61, %v2524_v5 }
 0x1e1   : > { %v3443_v18 = vpop.eup %3442  ;;  %3462 = vrcp.f32 %v2474_v2  ;;  %v2527_v58 = vmul.f32 %v3441_v7, %v6774_v36  ;;  %v2708_v54 = vadd.f32 %v2707_v34, %v2525_v57 }
 0x1e2   : > { %v3445_v39 = vpop.eup %3444  ;;  %3464 = vrcp.f32 %v2475_v24  ;;  %v2528_v20 = vmul.f32 %v3443_v18, %v6778_v11  ;;  %3306 = vst [vmem:[%s6885_s24 + $0x38] sm:$0xff] %v3235_v55   ;;  %v3240_v21 = vpack.c.bf16 %v2526_v9, %v2525_v57  ;;  %v2723_v6 = vadd.f32 %v2722_v8, %v2526_v9 }
 0x1e3   : > { %v3447_v53 = vpop.eup %3446  ;;  %3466 = vrcp.f32 %v2476_v59  ;;  %v2529_v38 = vmul.f32 %v3445_v39, %v6783_v10  ;;  %v2709_v29 = vadd.f32 %v2708_v54, %v2527_v58 }
 0x1e4   : > { %v3449_v50 = vpop.eup %3448  ;;  %v2530_v42 = vmul.f32 %v3447_v53, %v6788_v14  ;;  %3307 = vst [vmem:[%s6885_s24 + $0x40] sm:$0xff] %v3240_v21   ;;  %v3245_v36 = vpack.c.bf16 %v2528_v20, %v2527_v58  ;;  %v2724_v16 = vadd.f32 %v2723_v6, %v2528_v20 }
 0x1e5   : > { %v3451_v32 = vpop.eup %3450  ;;  %v2531_v31 = vmul.f32 %v3449_v50, %v6795_v12  ;;  %v2710_v11 = vadd.f32 %v2709_v29, %v2529_v38 }
 0x1e6   : > { %v3453_v3 = vpop.eup %3452  ;;  %v2532_v48 = vmul.f32 %v3451_v32, %v6802_v40  ;;  %3308 = vst [vmem:[%s6885_s24 + $0x48] sm:$0xff] %v3245_v36   ;;  %v3250_v51 = vpack.c.bf16 %v2530_v42, %v2529_v38  ;;  %v2725_v28 = vadd.f32 %v2724_v16, %v2530_v42 }
 0x1e7   : > { %v3455_v10 = vpop.eup %3454  ;;  %v2533_v25 = vmul.f32 %v3453_v3, %v6809_v23  ;;  %v2711_v47 = vadd.f32 %v2710_v11, %v2531_v31 }
 0x1e8   : > { %v3457_v14 = vpop.eup %3456  ;;  %v2534_v33 = vmul.f32 %v3455_v10, %v6816_v49  ;;  %3309 = vst [vmem:[%s6885_s24 + $0x50] sm:$0xff] %v3250_v51   ;;  %v3255_v1 = vpack.c.bf16 %v2532_v48, %v2531_v31  ;;  %v2726_v13 = vadd.f32 %v2725_v28, %v2532_v48 }
 0x1e9   : > { %v3459_v12 = vpop.eup %3458  ;;  %v2535_v56 = vmul.f32 %v3457_v14, %v6823_v27  ;;  %v2712_v44 = vadd.f32 %v2711_v47, %v2533_v25 }
 0x1ea   : > { %v3461_v40 = vpop.eup %3460  ;;  %v2536_v43 = vmul.f32 %v3459_v12, %v6830_v60  ;;  %3310 = vst [vmem:[%s6885_s24 + $0x58] sm:$0xff] %v3255_v1   ;;  %v3260_v45 = vpack.c.bf16 %v2534_v33, %v2533_v25  ;;  %v2727_v17 = vadd.f32 %v2726_v13, %v2534_v33 }
 0x1eb   : > { %v3463_v23 = vpop.eup %3462  ;;  %v2537_v26 = vmul.f32 %v3461_v40, %v7907_v37  ;;  %v2713_v49 = vadd.f32 %v2712_v44, %v2535_v56 }
 0x1ec   : > { %v3465_v2 = vpop.eup %3464  ;;  %v2538_v62 = vmul.f32 %v3463_v23, %v7908_v46  ;;  %3311 = vst [vmem:[%s6885_s24 + $0x60] sm:$0xff] %v3260_v45   ;;  %v3265_v4 = vpack.c.bf16 %v2536_v43, %v2535_v56  ;;  %v2728_v27 = vadd.f32 %v2727_v17, %v2536_v43 }
 0x1ed   : > { %v3467_v63 = vpop.eup %3466  ;;  %v2539_v22 = vmul.f32 %v3465_v2, %v7909_v52  ;;  %v2714_v60 = vadd.f32 %v2713_v49, %v2537_v26 }
 0x1ee   : > { %v2540_v24 = vmul.f32 %v3467_v63, %v7910_v35  ;;  %3312 = vst [vmem:[%s6885_s24 + $0x68] sm:$0xff] %v3265_v4   ;;  %v3270_v41 = vpack.c.bf16 %v2538_v62, %v2537_v26  ;;  %v2729_v15 = vadd.f32 %v2728_v27, %v2538_v62 }
 0x1ef   : > { %v2715_v0 = vadd.f32 %v2714_v60, %v2539_v22 }
 0x1f0   : > { %3313 = vst [vmem:[%s6885_s24 + $0x70] sm:$0xff] %v3270_v41   ;;  %v3275_v5 = vpack.c.bf16 %v2540_v24, %v2539_v22  ;;  %v2730_v19 = vadd.f32 %v2729_v15, %v2540_v24 }
 0x1f2   : > { %3314 = vst [vmem:[%s6885_s24 + $0x78] sm:$0xff] %v3275_v5   ;;  %v2731_v61 = vadd.f32 %v2730_v19, %v2715_v0 }
 0x1f4   : > { %v2732_v30 = vrot.slane %v2731_v61, 4 }
 0x1f6   : > { %v2733_v59 = vadd.f32 %v2732_v30, %v2731_v61 }
 0x1f8   : > { %v2734_v57 = vrot.slane %v2733_v59, 2 }
 0x1fa   : > { %v2735_v34 = vadd.f32 %v2734_v57, %v2733_v59 }
 0x1fc   : > { %v2736_v7 = vrot.slane %v2735_v34, 1 }
 0x1fe   : > { %v2737_v9 = vadd.f32 %v2736_v7, %v2735_v34 }
 0x200   : > { %v2738_v55 = vmul.f32 0.00390625, %v2737_v9 }
 0x202   : > { %2739 = vst [vmem:[%s276_s27] sm:$0x1] %v2738_v55 }
 0x203 PF: > { %s15_s17 = sadd.s32 1, %s3490_s17   ;;  %s7911_s15 = smov %s3486_s16 }
 0x204   : > { %p12_p5 = scmp.ge.s32.totalorder %s15_s17, 4   ;;  %s7912_s16 = smov %s7914_s18 }
 0x206   :  { %14 = sbr.rel (!%p12_p5) target bundleno = 2 (0x2), region = 82 }

// kernel: efficientb5_forward.16
= control target key start
LH: loop header
LB: loop body
LE: loop exit
PB: predicated region body
PF: predicated region fallthrough
CT: control target
= control target key end

     0   :  { %v841_v1 = vmov 0   ;;  %v49_v25 = vlaneseq  ;;  %s1175_s1 = inlined_call_operand.vmem [shape: bf16[128,256], index: 1, kind: input, shape index: {}]   ;;  %s1176_s0 = inlined_call_operand.vmem [shape: bf16[128,128], index: 0, kind: input, shape index: {}]   ;;  %s1177_s2 = inlined_call_operand.vmem [shape: f32[1,256], index: 2, kind: input, shape index: {}]   ;;  %s1178_s3 = inlined_call_operand.vmem [shape: bf16[128,256], index: 3, kind: output, shape index: {}]  }
   0x1   :  { %v681_v0 = vld [vmem:[%s1175_s1 + $0x4] ss:$8 sps:$4 sm:$0xff]   ;;  %219 = vmatprep.mubr.bf16.mxu0 %v841_v1  ;;  %259 = vmatprep.mubr.bf16.mxu1 %v841_v1  ;;  %v683_v2 = vld [vmem:[%s1175_s1] ss:$8 sps:$4 sm:$0xff]   ;;  %v684_v3 = vld [vmem:[%s1175_s1 + $0x14] ss:$8 sps:$4 sm:$0xff]  }
   0x2   :  { %187 = vmatprep.subr.bf16.mxu0 %v681_v0  ;;  %664 = vmatprep.subr.bf16.mxu1 %v681_v0  ;;  %v686_v4 = vld [vmem:[%s1175_s1 + $0x10] ss:$8 sps:$4 sm:$0xff]   ;;  %v687_v5 = vld [vmem:[%s1175_s1 + $0x24] ss:$8 sps:$4 sm:$0xff]   ;;  %v689_v6 = vld [vmem:[%s1175_s1 + $0x20] ss:$8 sps:$4 sm:$0xff]  }
   0x3   :  { %188 = vmatpush1.bf16.msra.mxu0 %v683_v2  ;;  %672 = vmatpush1.bf16.msra.mxu1 %v683_v2  ;;  %v690_v7 = vld [vmem:[%s1175_s1 + $0x34] ss:$8 sps:$4 sm:$0xff]   ;;  %v692_v8 = vld [vmem:[%s1175_s1 + $0x30] ss:$8 sps:$4 sm:$0xff]   ;;  %v693_v9 = vld [vmem:[%s1175_s1 + $0x44] ss:$8 sps:$4 sm:$0xff]  }
   0x4   :  { %189 = vmatprep.subr.bf16.mxu0 %v684_v3  ;;  %665 = vmatprep.subr.bf16.mxu1 %v684_v3  ;;  %v695_v10 = vld [vmem:[%s1175_s1 + $0x40] ss:$8 sps:$4 sm:$0xff]   ;;  %v696_v11 = vld [vmem:[%s1175_s1 + $0x54] ss:$8 sps:$4 sm:$0xff]   ;;  %v698_v12 = vld [vmem:[%s1175_s1 + $0x50] ss:$8 sps:$4 sm:$0xff]  }
   0x5   :  { %v699_v13 = vld [vmem:[%s1175_s1 + $0x64] ss:$8 sps:$4 sm:$0xff]   ;;  %v701_v14 = vld [vmem:[%s1175_s1 + $0x60] ss:$8 sps:$4 sm:$0xff]   ;;  %v702_v15 = vld [vmem:[%s1175_s1 + $0x74] ss:$8 sps:$4 sm:$0xff]  }
   0x6   :  { %v704_v16 = vld [vmem:[%s1175_s1 + $0x70] ss:$8 sps:$4 sm:$0xff]   ;;  %v705_v17 = vld [vmem:[%s1176_s0] sm:$0xff]   ;;  %v707_v19 = vld [vmem:[%s1176_s0 + $0x8] sm:$0xff]   ;;  %v50_v26 = vshrl.u32 %v49_v25, 7 }
   0x7   :  { %190 = vmatpush1.bf16.msra.mxu0 %v686_v4  ;;  %673 = vmatpush1.bf16.msra.mxu1 %v686_v4  ;;  %v706_v18 = vld [vmem:[%s1176_s0 + $0x20] sm:$0xff]   ;;  %v708_v20 = vld [vmem:[%s1176_s0 + $0x28] sm:$0xff]   ;;  %v709_v21 = vld [vmem:[%s1176_s0 + $0x10] sm:$0xff]  }
   0x8   :  { %191 = vmatprep.subr.bf16.mxu0 %v687_v5  ;;  %666 = vmatprep.subr.bf16.mxu1 %v687_v5  ;;  %v710_v22 = vld [vmem:[%s1176_s0 + $0x30] sm:$0xff]   ;;  %v711_v23 = vld [vmem:[%s1176_s0 + $0x18] sm:$0xff]   ;;  %v51_v27 = vsub.s32 0, %v50_v26  ;;  %v47_v28 = vld [vmem:[%s1177_s2] sm:$0x3]  ;;  %v55_v29 = vsub.s32 1, %v50_v26 }
   0x9   :  { %v712_v24 = vld [vmem:[%s1176_s0 + $0x38] sm:$0xff]  }
   0xa   :  { %v945_v30 = vrot.slane %v47_v28, %v51_v27  ;;  %v947_v31 = vrot.slane %v47_v28, %v55_v29 }
   0xb   :  { %192 = vmatpush1.bf16.msra.mxu0 %v689_v6  ;;  %674 = vmatpush1.bf16.msra.mxu1 %v689_v6 }
   0xc   :  { %193 = vmatprep.subr.bf16.mxu0 %v690_v7  ;;  %667 = vmatprep.subr.bf16.mxu1 %v690_v7 }
   0xf   :  { %194 = vmatpush1.bf16.msra.mxu0 %v692_v8  ;;  %675 = vmatpush1.bf16.msra.mxu1 %v692_v8 }
  0x10   :  { %195 = vmatprep.subr.bf16.mxu0 %v693_v9  ;;  %668 = vmatprep.subr.bf16.mxu1 %v693_v9 }
  0x13   :  { %196 = vmatpush1.bf16.msra.mxu0 %v695_v10  ;;  %676 = vmatpush1.bf16.msra.mxu1 %v695_v10 }
  0x14   :  { %197 = vmatprep.subr.bf16.mxu0 %v696_v11  ;;  %669 = vmatprep.subr.bf16.mxu1 %v696_v11 }
  0x17   :  { %198 = vmatpush1.bf16.msra.mxu0 %v698_v12  ;;  %677 = vmatpush1.bf16.msra.mxu1 %v698_v12 }
  0x18   :  { %199 = vmatprep.subr.bf16.mxu0 %v699_v13  ;;  %670 = vmatprep.subr.bf16.mxu1 %v699_v13 }
  0x1b   :  { %200 = vmatpush1.bf16.msra.mxu0 %v701_v14  ;;  %678 = vmatpush1.bf16.msra.mxu1 %v701_v14 }
  0x1c   :  { %201 = vmatprep.subr.bf16.mxu0 %v702_v15  ;;  %671 = vmatprep.subr.bf16.mxu1 %v702_v15 }
  0x1f   :  { %202 = vmatpush1.bf16.msra.mxu0 %v704_v16  ;;  %679 = vmatpush1.bf16.msra.mxu1 %v704_v16 }
  0x22   :  { %220 = vmatmul.mubr.bf16.vlgmr.msra.gmra.mrb[0].mxu0 %v705_v17  ;;  %260 = vmatmul.mubr.bf16.vlgmr.msra.gmra.mrb[0].mxu1 %v706_v18 }
  0x23   :  { %229 = vmatprep.mubr.bf16.mxu0 %v841_v1  ;;  %269 = vmatprep.mubr.bf16.mxu1 %v841_v1 }
  0x2a   :  { %230 = vmatmul.mubr.bf16.gmra.mrb[4].mxu0 %v707_v19  ;;  %270 = vmatmul.mubr.bf16.gmra.mrb[4].mxu1 %v708_v20 }
  0x2b   :  { %239 = vmatprep.mubr.bf16.mxu0 %v841_v1  ;;  %279 = vmatprep.mubr.bf16.mxu1 %v841_v1 }
  0x32   :  { %240 = vmatmul.mubr.bf16.gmra.mrb[8].mxu0 %v709_v21  ;;  %280 = vmatmul.mubr.bf16.gmra.mrb[8].mxu1 %v710_v22 }
  0x33   :  { %249 = vmatprep.mubr.bf16.mxu0 %v841_v1  ;;  %289 = vmatprep.mubr.bf16.mxu1 %v841_v1 }
  0x3a   :  { %250 = vmatmul.mubr.bf16.gmra.mrb[12].mxu0 %v711_v23  ;;  %290 = vmatmul.mubr.bf16.gmra.mrb[12].mxu1 %v712_v24 }
  0xf5   :  { %v221_v32 = vpop.f32.mrb[0].mxu0  ;;  %v261_v33 = vpop.f32.mrb[0].mxu1 }
  0xf6   :  { %v950_v34 = vadd.f32 %v221_v32, %v945_v30  ;;  %v953_v35 = vadd.f32 %v261_v33, %v945_v30  ;;  %v223_v36 = vpop.f32.mrb[1].mxu0  ;;  %v263_v37 = vpop.f32.mrb[1].mxu1 }
  0xf7   :  { %v956_v38 = vadd.f32 %v223_v36, %v947_v31  ;;  %v959_v39 = vadd.f32 %v263_v37, %v947_v31  ;;  %v225_v40 = vpop.f32.mrb[2].mxu0  ;;  %v265_v41 = vpop.f32.mrb[2].mxu1 }
  0xf8   :  { %v300_v42 = vsub.f32 0.0, %v950_v34  ;;  %v316_v43 = vsub.f32 0.0, %v953_v35  ;;  %v964_v44 = vadd.f32 %v225_v40, %v945_v30  ;;  %v967_v45 = vadd.f32 %v265_v41, %v945_v30  ;;  %v227_v46 = vpop.f32.mrb[3].mxu0  ;;  %v267_v47 = vpop.f32.mrb[3].mxu1 }
  0xf9   :  { %v301_v48 = vsub.f32 0.0, %v956_v38  ;;  %v317_v49 = vsub.f32 0.0, %v959_v39  ;;  %v972_v50 = vadd.f32 %v227_v46, %v947_v31  ;;  %v975_v51 = vadd.f32 %v267_v47, %v947_v31 }
  0xfa   :  { %v332_v52 = vmul.f32 1.442695, %v300_v42  ;;  %v364_v53 = vmul.f32 1.442695, %v316_v43  ;;  %v302_v54 = vsub.f32 0.0, %v964_v44  ;;  %v318_v55 = vsub.f32 0.0, %v967_v45 }
  0xfb   :  { %v334_v56 = vmul.f32 1.442695, %v301_v48  ;;  %v366_v57 = vmul.f32 1.442695, %v317_v49  ;;  %v303_v58 = vsub.f32 0.0, %v972_v50  ;;  %v319_v59 = vsub.f32 0.0, %v975_v51 }
  0xfc   :  { %713 = vpow2.f32 %v332_v52  ;;  %v336_v60 = vmul.f32 1.442695, %v302_v54  ;;  %v368_v61 = vmul.f32 1.442695, %v318_v55 }
  0xfd   :  { %715 = vpow2.f32 %v364_v53  ;;  %v231_v62 = vpop.f32.mrb[4].mxu0  ;;  %v271_v63 = vpop.f32.mrb[4].mxu1  ;;  %v338_v0 = vmul.f32 1.442695, %v303_v58  ;;  %v370_v5 = vmul.f32 1.442695, %v319_v59 }
  0xfe   :  { %717 = vpow2.f32 %v334_v56  ;;  %v982_v1 = vadd.f32 %v231_v62, %v945_v30  ;;  %v985_v2 = vadd.f32 %v271_v63, %v945_v30  ;;  %v233_v3 = vpop.f32.mrb[5].mxu0  ;;  %v273_v4 = vpop.f32.mrb[5].mxu1 }
  0xff   :  { %719 = vpow2.f32 %v366_v57  ;;  %v988_v6 = vadd.f32 %v233_v3, %v947_v31  ;;  %v991_v7 = vadd.f32 %v273_v4, %v947_v31  ;;  %v235_v8 = vpop.f32.mrb[6].mxu0  ;;  %v275_v9 = vpop.f32.mrb[6].mxu1 }
 0x100   :  { %721 = vpow2.f32 %v336_v60  ;;  %v304_v10 = vsub.f32 0.0, %v982_v1  ;;  %v320_v11 = vsub.f32 0.0, %v985_v2  ;;  %v996_v12 = vadd.f32 %v235_v8, %v945_v30  ;;  %v237_v13 = vpop.f32.mrb[7].mxu0  ;;  %v277_v14 = vpop.f32.mrb[7].mxu1 }
 0x101   :  { %723 = vpow2.f32 %v368_v61  ;;  %v305_v15 = vsub.f32 0.0, %v988_v6  ;;  %v321_v16 = vsub.f32 0.0, %v991_v7  ;;  %v1002_v26 = vadd.f32 %v275_v9, %v945_v30 }
 0x102   :  { %725 = vpow2.f32 %v338_v0  ;;  %v340_v17 = vmul.f32 1.442695, %v304_v10  ;;  %v372_v18 = vmul.f32 1.442695, %v320_v11  ;;  %v306_v19 = vsub.f32 0.0, %v996_v12 }
 0x103   :  { %727 = vpow2.f32 %v370_v5  ;;  %v342_v20 = vmul.f32 1.442695, %v305_v15  ;;  %v374_v21 = vmul.f32 1.442695, %v321_v16  ;;  %v1005_v33 = vadd.f32 %v237_v13, %v947_v31 }
 0x104   :  { %729 = vpow2.f32 %v340_v17  ;;  %v344_v22 = vmul.f32 1.442695, %v306_v19  ;;  %v1008_v42 = vadd.f32 %v277_v14, %v947_v31  ;;  %v322_v54 = vsub.f32 0.0, %v1002_v26 }
 0x105   :  { %731 = vpow2.f32 %v372_v18  ;;  %v241_v23 = vpop.f32.mrb[8].mxu0  ;;  %v281_v24 = vpop.f32.mrb[8].mxu1  ;;  %v307_v58 = vsub.f32 0.0, %v1005_v33 }
 0x106   :  { %v714_v25 = vpop.eup %713  ;;  %733 = vpow2.f32 %v342_v20  ;;  %v243_v27 = vpop.f32.mrb[9].mxu0  ;;  %v1011_v48 = vadd.f32 %v241_v23, %v945_v30  ;;  %v1015_v55 = vadd.f32 %v281_v24, %v945_v30  ;;  %v323_v61 = vsub.f32 0.0, %v1008_v42 }
 0x107   :  { %v283_v28 = vpop.f32.mrb[9].mxu1  ;;  %v716_v29 = vpop.eup %715  ;;  %v396_v32 = vadd.f32 1.0, %v714_v25  ;;  %735 = vpow2.f32 %v374_v21  ;;  %v1020_v62 = vadd.f32 %v243_v27, %v947_v31  ;;  %v376_v11 = vmul.f32 1.442695, %v322_v54 }
 0x108   :  { %v245_v36 = vpop.f32.mrb[10].mxu0  ;;  %v285_v37 = vpop.f32.mrb[10].mxu1  ;;  %v412_v41 = vadd.f32 1.0, %v716_v29  ;;  %737 = vpow2.f32 %v344_v22  ;;  %v308_v3 = vsub.f32 0.0, %v1011_v48  ;;  %v1024_v4 = vadd.f32 %v283_v28, %v947_v31 }
 0x109   :  { %v718_v40 = vpop.eup %717  ;;  %v247_v43 = vpop.f32.mrb[11].mxu0  ;;  %739 = vrcp.f32 %v396_v32  ;;  %v324_v13 = vsub.f32 0.0, %v1015_v55  ;;  %v346_v18 = vmul.f32 1.442695, %v307_v58  ;;  %v1032_v19 = vadd.f32 %v245_v36, %v945_v30 }
 0x10a   :  { %v720_v46 = vpop.eup %719  ;;  %v397_v47 = vadd.f32 1.0, %v718_v40  ;;  %v287_v49 = vpop.f32.mrb[11].mxu1  ;;  %741 = vrcp.f32 %v412_v41  ;;  %v378_v24 = vmul.f32 1.442695, %v323_v61  ;;  %v309_v25 = vsub.f32 0.0, %v1020_v62 }
 0x10b   :  { %v722_v52 = vpop.eup %721  ;;  %v413_v53 = vadd.f32 1.0, %v720_v46  ;;  %v348_v40 = vmul.f32 1.442695, %v308_v3  ;;  %v325_v36 = vsub.f32 0.0, %v1024_v4  ;;  %v1053_v61 = vadd.f32 %v287_v49, %v947_v31 }
 0x10c   :  { %v724_v56 = vpop.eup %723  ;;  %743 = vrcp.f32 %v397_v47  ;;  %v398_v57 = vadd.f32 1.0, %v722_v52  ;;  %v380_v47 = vmul.f32 1.442695, %v324_v13  ;;  %v1045_v52 = vadd.f32 %v285_v37, %v945_v30 }
 0x10d   :  { %v726_v59 = vpop.eup %725  ;;  %745 = vrcp.f32 %v413_v53  ;;  %v414_v60 = vadd.f32 1.0, %v724_v56  ;;  %v251_v5 = vpop.f32.mrb[12].mxu0  ;;  %v310_v56 = vsub.f32 0.0, %v1032_v19 }
 0x10e   :  { %v728_v63 = vpop.eup %727  ;;  %747 = vrcp.f32 %v398_v57  ;;  %v399_v0 = vadd.f32 1.0, %v726_v59  ;;  %v291_v8 = vpop.f32.mrb[12].mxu1  ;;  %v1049_v57 = vadd.f32 %v247_v43, %v947_v31  ;;  %v1057_v3 = vadd.f32 %v251_v5, %v945_v30 }
 0x10f   :  { %v730_v9 = vpop.eup %729  ;;  %749 = vrcp.f32 %v414_v60  ;;  %v415_v10 = vadd.f32 1.0, %v728_v63  ;;  %v1027_v14 = vpop.f32.mrb[13].mxu0  ;;  %v350_v60 = vmul.f32 1.442695, %v309_v25 }
 0x110   :  { %v1029_v15 = vpop.f32.mrb[13].mxu1  ;;  %v732_v16 = vpop.eup %731  ;;  %751 = vrcp.f32 %v399_v0  ;;  %v400_v17 = vadd.f32 1.0, %v730_v9  ;;  %v382_v0 = vmul.f32 1.442695, %v325_v36 }
 0x111   :  { %v1034_v20 = vpop.f32.mrb[14].mxu0  ;;  %v1036_v21 = vpop.f32.mrb[14].mxu1  ;;  %753 = vrcp.f32 %v415_v10  ;;  %v416_v23 = vadd.f32 1.0, %v732_v16  ;;  %v326_v10 = vsub.f32 0.0, %v1045_v52  ;;  %v352_v16 = vmul.f32 1.442695, %v310_v56 }
 0x112   :  { %v734_v22 = vpop.eup %733  ;;  %v1039_v27 = vpop.f32.mrb[15].mxu0  ;;  %755 = vrcp.f32 %v400_v17 }
 0x113   :  { %v1041_v28 = vpop.f32.mrb[15].mxu1  ;;  %v736_v29 = vpop.eup %735  ;;  %v401_v32 = vadd.f32 1.0, %v734_v22  ;;  %757 = vrcp.f32 %v416_v23 }
 0x114   :  { %v738_v41 = vpop.eup %737  ;;  %v417_v46 = vadd.f32 1.0, %v736_v29 }
 0x115   :  { %v740_v53 = vpop.eup %739  ;;  %759 = vrcp.f32 %v401_v32  ;;  %v402_v54 = vadd.f32 1.0, %v738_v41 }
 0x116   :  { %v742_v58 = vpop.eup %741  ;;  %v460_v59 = vmul.f32 %v740_v53, %v950_v34  ;;  %761 = vrcp.f32 %v417_v46  ;;  %v1062_v34 = vadd.f32 %v291_v8, %v945_v30  ;;  %v312_v8 = vsub.f32 0.0, %v1057_v3 }
 0x117   :  { %v744_v63 = vpop.eup %743  ;;  %v476_v37 = vmul.f32 %v742_v58, %v953_v35  ;;  %763 = vrcp.f32 %v402_v54  ;;  %v311_v35 = vsub.f32 0.0, %v1049_v57 }
 0x118   :  { %v746_v9 = vpop.eup %745  ;;  %v461_v43 = vmul.f32 %v744_v63, %v956_v38  ;;  %765 = vpow2.f32 %v376_v11  ;;  %v327_v38 = vsub.f32 0.0, %v1053_v61  ;;  %v356_v54 = vmul.f32 1.442695, %v312_v8 }
 0x119   :  { %v748_v13 = vpop.eup %747  ;;  %v477_v49 = vmul.f32 %v746_v9, %v959_v39  ;;  %767 = vpow2.f32 %v346_v18  ;;  %v384_v18 = vmul.f32 1.442695, %v326_v10  ;;  %v354_v32 = vmul.f32 1.442695, %v311_v35 }
 0x11a   :  { %v750_v17 = vpop.eup %749  ;;  %v648_v22 = vpack.c.bf16 %v461_v43, %v460_v59  ;;  %v462_v5 = vmul.f32 %v748_v13, %v964_v44  ;;  %769 = vpow2.f32 %v378_v24  ;;  %v328_v44 = vsub.f32 0.0, %v1062_v34 }
 0x11b   :  { %v752_v11 = vpop.eup %751  ;;  %v656_v23 = vpack.c.bf16 %v477_v49, %v476_v37  ;;  %v478_v25 = vmul.f32 %v750_v17, %v967_v45  ;;  %771 = vpow2.f32 %v348_v40  ;;  %v386_v46 = vmul.f32 1.442695, %v327_v38 }
 0x11c   :  { %v754_v29 = vpop.eup %753  ;;  %588 = vst [vmem:[%s1178_s3] sm:$0xff] %v648_v22  ;;  %v463_v39 = vmul.f32 %v752_v11, %v972_v50  ;;  %773 = vpow2.f32 %v380_v47  ;;  %v388_v58 = vmul.f32 1.442695, %v328_v44  ;;  %v1097_v49 = vadd.f32 %v1027_v14, %v947_v31 }
 0x11d   :  { %v756_v24 = vpop.eup %755  ;;  %596 = vst [vmem:[%s1178_s3 + $0x40] sm:$0xff] %v656_v23  ;;  %v479_v45 = vmul.f32 %v754_v29, %v975_v51  ;;  %775 = vpow2.f32 %v350_v60  ;;  %v1101_v17 = vadd.f32 %v1029_v15, %v947_v31  ;;  %v1105_v38 = vadd.f32 %v1034_v20, %v945_v30 }
 0x11e   :  { %v758_v40 = vpop.eup %757  ;;  %v649_v36 = vpack.c.bf16 %v463_v39, %v462_v5  ;;  %v464_v41 = vmul.f32 %v756_v24, %v982_v1  ;;  %777 = vpow2.f32 %v382_v0  ;;  %v1109_v14 = vadd.f32 %v1036_v21, %v945_v30 }
 0x11f   :  { %v760_v50 = vpop.eup %759  ;;  %v657_v47 = vpack.c.bf16 %v479_v45, %v478_v25  ;;  %v480_v53 = vmul.f32 %v758_v40, %v985_v2  ;;  %779 = vpow2.f32 %v352_v16  ;;  %v313_v15 = vsub.f32 0.0, %v1097_v49 }
 0x120   :  { %v762_v56 = vpop.eup %761  ;;  %589 = vst [vmem:[%s1178_s3 + $0x8] sm:$0xff] %v649_v36  ;;  %v465_v51 = vmul.f32 %v760_v50, %v988_v6  ;;  %781 = vpow2.f32 %v384_v18  ;;  %v1114_v29 = vadd.f32 %v1039_v27, %v947_v31  ;;  %v329_v18 = vsub.f32 0.0, %v1101_v17 }
 0x121   :  { %v764_v59 = vpop.eup %763  ;;  %597 = vst [vmem:[%s1178_s3 + $0x48] sm:$0xff] %v657_v47  ;;  %v481_v1 = vmul.f32 %v762_v56, %v991_v7  ;;  %783 = vpow2.f32 %v354_v32  ;;  %v1119_v44 = vadd.f32 %v1041_v28, %v947_v31  ;;  %v314_v24 = vsub.f32 0.0, %v1105_v38 }
 0x122   :  { %v766_v2 = vpop.eup %765  ;;  %v650_v60 = vpack.c.bf16 %v465_v51, %v464_v41  ;;  %785 = vpow2.f32 %v386_v46  ;;  %v330_v27 = vsub.f32 0.0, %v1109_v14  ;;  %v358_v36 = vmul.f32 1.442695, %v313_v15 }
 0x123   :  { %v768_v63 = vpop.eup %767  ;;  %v658_v37 = vpack.c.bf16 %v481_v1, %v480_v53  ;;  %v418_v0 = vadd.f32 1.0, %v766_v2  ;;  %787 = vpow2.f32 %v356_v54  ;;  %v315_v41 = vsub.f32 0.0, %v1114_v29 }
 0x124   :  { %v770_v9 = vpop.eup %769  ;;  %590 = vst [vmem:[%s1178_s3 + $0x10] sm:$0xff] %v650_v60  ;;  %v403_v6 = vadd.f32 1.0, %v768_v63  ;;  %789 = vpow2.f32 %v388_v58  ;;  %v466_v50 = vmul.f32 %v764_v59, %v996_v12  ;;  %v390_v31 = vmul.f32 1.442695, %v329_v18 }
 0x125   :  { %v772_v43 = vpop.eup %771  ;;  %598 = vst [vmem:[%s1178_s3 + $0x50] sm:$0xff] %v658_v37  ;;  %791 = vrcp.f32 %v418_v0  ;;  %v419_v7 = vadd.f32 1.0, %v770_v9  ;;  %v331_v28 = vsub.f32 0.0, %v1119_v44  ;;  %v360_v54 = vmul.f32 1.442695, %v314_v24 }
 0x126   :  { %v774_v10 = vpop.eup %773  ;;  %793 = vrcp.f32 %v403_v6  ;;  %v404_v13 = vadd.f32 1.0, %v772_v43  ;;  %v392_v58 = vmul.f32 1.442695, %v330_v27  ;;  %v362_v60 = vmul.f32 1.442695, %v315_v41 }
 0x127   :  { %v776_v16 = vpop.eup %775  ;;  %795 = vrcp.f32 %v419_v7  ;;  %v420_v35 = vadd.f32 1.0, %v774_v10  ;;  %v394_v59 = vmul.f32 1.442695, %v331_v28 }
 0x128   :  { %v778_v22 = vpop.eup %777  ;;  %797 = vrcp.f32 %v404_v13  ;;  %v405_v5 = vadd.f32 1.0, %v776_v16 }
 0x129   :  { %v780_v11 = vpop.eup %779  ;;  %799 = vrcp.f32 %v420_v35  ;;  %v421_v23 = vadd.f32 1.0, %v778_v22 }
 0x12a   :  { %v782_v25 = vpop.eup %781  ;;  %801 = vrcp.f32 %v405_v5  ;;  %v406_v8 = vadd.f32 1.0, %v780_v11 }
 0x12b   :  { %v784_v39 = vpop.eup %783  ;;  %803 = vrcp.f32 %v421_v23  ;;  %v422_v20 = vadd.f32 1.0, %v782_v25 }
 0x12c   :  { %v786_v30 = vpop.eup %785  ;;  %805 = vrcp.f32 %v406_v8  ;;  %v407_v21 = vadd.f32 1.0, %v784_v39 }
 0x12d   :  { %v788_v45 = vpop.eup %787  ;;  %807 = vrcp.f32 %v422_v20  ;;  %v423_v32 = vadd.f32 1.0, %v786_v30 }
 0x12e   :  { %v790_v40 = vpop.eup %789  ;;  %809 = vrcp.f32 %v407_v21  ;;  %v408_v10 = vadd.f32 1.0, %v788_v45 }
 0x12f   :  { %v792_v46 = vpop.eup %791  ;;  %811 = vrcp.f32 %v423_v32 }
 0x130   :  { %v794_v47 = vpop.eup %793  ;;  %v482_v53 = vmul.f32 %v792_v46, %v1002_v26  ;;  %813 = vpow2.f32 %v358_v36 }
 0x131   :  { %v796_v56 = vpop.eup %795  ;;  %v467_v51 = vmul.f32 %v794_v47, %v1005_v33  ;;  %815 = vpow2.f32 %v390_v31 }
 0x132   :  { %v798_v1 = vpop.eup %797  ;;  %v483_v2 = vmul.f32 %v796_v56, %v1008_v42  ;;  %817 = vpow2.f32 %v360_v54 }
 0x133   :  { %v800_v63 = vpop.eup %799  ;;  %v651_v37 = vpack.c.bf16 %v467_v51, %v466_v50  ;;  %v468_v12 = vmul.f32 %v798_v1, %v1011_v48  ;;  %819 = vpow2.f32 %v392_v58 }
 0x134   :  { %v802_v0 = vpop.eup %801  ;;  %v659_v9 = vpack.c.bf16 %v483_v2, %v482_v53  ;;  %v484_v26 = vmul.f32 %v800_v63, %v1015_v55  ;;  %821 = vpow2.f32 %v362_v60 }
 0x135   :  { %v804_v6 = vpop.eup %803  ;;  %591 = vst [vmem:[%s1178_s3 + $0x18] sm:$0xff] %v651_v37  ;;  %v469_v33 = vmul.f32 %v802_v0, %v1020_v62  ;;  %823 = vpow2.f32 %v394_v59  ;;  %v424_v62 = vadd.f32 1.0, %v790_v40 }
 0x136   :  { %v806_v42 = vpop.eup %805  ;;  %599 = vst [vmem:[%s1178_s3 + $0x58] sm:$0xff] %v659_v9  ;;  %v485_v48 = vmul.f32 %v804_v6, %v1024_v4  ;;  %825 = vrcp.f32 %v408_v10 }
 0x137   :  { %v808_v43 = vpop.eup %807  ;;  %v652_v7 = vpack.c.bf16 %v469_v33, %v468_v12  ;;  %v470_v55 = vmul.f32 %v806_v42, %v1032_v19  ;;  %827 = vrcp.f32 %v424_v62 }
 0x138   :  { %v810_v13 = vpop.eup %809  ;;  %v660_v16 = vpack.c.bf16 %v485_v48, %v484_v26  ;;  %v486_v35 = vmul.f32 %v808_v43, %v1045_v52 }
 0x139   :  { %v812_v22 = vpop.eup %811  ;;  %592 = vst [vmem:[%s1178_s3 + $0x20] sm:$0xff] %v652_v7  ;;  %v471_v5 = vmul.f32 %v810_v13, %v1049_v57 }
 0x13a   :  { %600 = vst [vmem:[%s1178_s3 + $0x60] sm:$0xff] %v660_v16  ;;  %v487_v4 = vmul.f32 %v812_v22, %v1053_v61  ;;  %v814_v11 = vpop.eup %813 }
 0x13b   :  { %v653_v19 = vpack.c.bf16 %v471_v5, %v470_v55  ;;  %v816_v52 = vpop.eup %815  ;;  %v409_v25 = vadd.f32 1.0, %v814_v11 }
 0x13c   :  { %v661_v23 = vpack.c.bf16 %v487_v4, %v486_v35  ;;  %v818_v8 = vpop.eup %817  ;;  %v425_v57 = vadd.f32 1.0, %v816_v52 }
 0x13d   :  { %593 = vst [vmem:[%s1178_s3 + $0x28] sm:$0xff] %v653_v19  ;;  %v820_v15 = vpop.eup %819  ;;  %829 = vrcp.f32 %v409_v25  ;;  %v410_v61 = vadd.f32 1.0, %v818_v8 }
 0x13e   :  { %601 = vst [vmem:[%s1178_s3 + $0x68] sm:$0xff] %v661_v23  ;;  %v822_v39 = vpop.eup %821  ;;  %831 = vrcp.f32 %v425_v57  ;;  %v426_v20 = vadd.f32 1.0, %v820_v15 }
 0x13f   :  { %v824_v18 = vpop.eup %823  ;;  %833 = vrcp.f32 %v410_v61  ;;  %v411_v30 = vadd.f32 1.0, %v822_v39 }
 0x140   :  { %835 = vrcp.f32 %v426_v20  ;;  %v427_v21 = vadd.f32 1.0, %v824_v18  ;;  %v826_v24 = vpop.eup %825 }
 0x141   :  { %837 = vrcp.f32 %v411_v30  ;;  %v828_v45 = vpop.eup %827  ;;  %v472_v32 = vmul.f32 %v826_v24, %v1057_v3 }
 0x142   :  { %839 = vrcp.f32 %v427_v21  ;;  %v488_v40 = vmul.f32 %v828_v45, %v1062_v34 }
 0x147   :  { %v830_v27 = vpop.eup %829 }
 0x148   :  { %v832_v36 = vpop.eup %831  ;;  %v473_v41 = vmul.f32 %v830_v27, %v1097_v49 }
 0x149   :  { %v834_v46 = vpop.eup %833  ;;  %v489_v50 = vmul.f32 %v832_v36, %v1101_v17 }
 0x14a   :  { %v836_v31 = vpop.eup %835  ;;  %v654_v28 = vpack.c.bf16 %v473_v41, %v472_v32  ;;  %v474_v47 = vmul.f32 %v834_v46, %v1105_v38 }
 0x14b   :  { %v838_v53 = vpop.eup %837  ;;  %v662_v54 = vpack.c.bf16 %v489_v50, %v488_v40  ;;  %v490_v56 = vmul.f32 %v836_v31, %v1109_v14 }
 0x14c   :  { %v840_v51 = vpop.eup %839  ;;  %594 = vst [vmem:[%s1178_s3 + $0x30] sm:$0xff] %v654_v28  ;;  %v475_v3 = vmul.f32 %v838_v53, %v1114_v29 }
 0x14d   :  { %602 = vst [vmem:[%s1178_s3 + $0x70] sm:$0xff] %v662_v54  ;;  %v491_v34 = vmul.f32 %v840_v51, %v1119_v44 }
 0x14e   :  { %v655_v49 = vpack.c.bf16 %v475_v3, %v474_v47 }
 0x14f   :  { %v663_v17 = vpack.c.bf16 %v491_v34, %v490_v56 }
 0x150   :  { %595 = vst [vmem:[%s1178_s3 + $0x38] sm:$0xff] %v655_v49 }
 0x151   :  { %603 = vst [vmem:[%s1178_s3 + $0x78] sm:$0xff] %v663_v17 }

// kernel: efficientb5_forward.15
= control target key start
LH: loop header
LB: loop body
LE: loop exit
PB: predicated region body
PF: predicated region fallthrough
CT: control target
= control target key end

     0   :  { %s1165_s27 = smov 0   ;;  %s1167_s28 = smov 0   ;;  %s1299_s0 = inlined_call_operand.vmem [shape: bf16[2,64,128], index: 0, kind: input, shape index: {}]   ;;  %s1300_s1 = inlined_call_operand.vmem [shape: f32[2,1,128], index: 1, kind: input, shape index: {}]   ;;  %s1301_s2 = inlined_call_operand.vmem [shape: f32[128,4], index: 2, kind: input, shape index: {}]   ;;  %s1302_s3 = inlined_call_operand.vmem [shape: f32[1,4], index: 3, kind: input, shape index: {}]   ;;  %s1303_s4 = inlined_call_operand.vmem [shape: f32[4,128], index: 4, kind: input, shape index: {}]   ;;  %s1304_s5 = inlined_call_operand.vmem [shape: f32[1,128], index: 5, kind: input, shape index: {}]   ;;  %s1305_s6 = inlined_call_operand.vmem [shape: bf16[128,128], index: 6, kind: input, shape index: {}]   ;;  %s1306_s7 = inlined_call_operand.vmem [shape: f32[1,128], index: 7, kind: input, shape index: {}]   ;;  %s1307_s8 = inlined_call_operand.vmem [shape: bf16[2,64,128], index: 8, kind: output, shape index: {}]  }
   0x1   :  { %s1169_s29 = smov 0  }
   0x2 LB: > { %s30_s30 = sadd.s32 1, %s1111_s28  ;;  %p867_p0 = scmp.ge.s32.totalorder %s1115_s29, 1  ;;  %s1115_s29 = sphi %s1169_s29, %s18_s29   ;;  %s1111_s28 = sphi %s1167_s28, %s1309_s28   ;;  %s1107_s27 = sphi %s1165_s27, %s1308_s27  }
   0x3   : > { %p32_p1 = scmp.ge.s32.totalorder %s30_s30, 2  ;;  %p291_p2 = scmp.lt.s32.totalorder %s1115_s29, 3 }
   0x5   : > { %s1311_s30 = smov (%p32_p1, %s30_s30), 0  ;;  %p292_p3 = pnand %p867_p0, %p291_p2 }
   0x6   : > { %v361_v0 = vld [vmem:[%s1301_s2] sm:$0xff] (!%p292_p3)  ;;  %v362_v1 = vld [vmem:[%s1301_s2 + $0x8] sm:$0xff] (!%p292_p3)  ;;  %v363_v2 = vld [vmem:[%s1301_s2 + $0x10] sm:$0xff] (!%p292_p3)  ;;  %v1117_v3 = vmov (!%p292_p3), 0.0|0.0   ;;  %vm1118_vm0 = vmmov (!%p292_p3), 0   ;;  %v1119_v6 = vmov (!%p292_p3), 0.0   ;;  %v551_v54 = vlaneseq (!%p292_p3) }
   0x7   : > { %295 = sbr.rel (%p292_p3) target bundleno = 767 (0x2ff), region = 52  ;;  %1026 = vmatprep.subr.bf16.mxu0 (!%p292_p3), %v1117_v3  ;;  %v1027_v4 = vpack.c.bf16 (!%p292_p3), %v362_v1, %v361_v0  ;;  %v364_v5 = vld [vmem:[%s1301_s2 + $0x18] sm:$0xff] (!%p292_p3)  ;;  %994 = vmatprep.mubr.msk.f32.mxu0 (!%p292_p3), %vm1118_vm0, %v1119_v6  ;;  %v365_v8 = vld [vmem:[%s1301_s2 + $0x20] sm:$0xff] (!%p292_p3)  ;;  %v366_v9 = vld [vmem:[%s1301_s2 + $0x28] sm:$0xff] (!%p292_p3)  ;;  %p337_p4 = scmp.lt.s32.totalorder (!%p292_p3), %s1107_s27, 1  ;;  %vm460_vm1 = vcmask (!%p292_p3), 1043456  }
   0x8   : > { %v1030_v7 = vpack.c.bf16 (!%p292_p3), %v364_v5, %v363_v2  ;;  %v367_v10 = vld [vmem:[%s1301_s2 + $0x30] sm:$0xff] (!%p292_p3)  ;;  %v368_v11 = vld [vmem:[%s1301_s2 + $0x38] sm:$0xff] (!%p292_p3)  ;;  %v1033_v12 = vpack.c.bf16 (!%p292_p3), %v366_v9, %v365_v8  ;;  %v369_v14 = vld [vmem:[%s1301_s2 + $0x40] sm:$0xff] (!%p292_p3)  ;;  %vm456_vm2 = vcmask (!%p292_p3), 31744   ;;  %v552_v55 = vshrl.u32 (!%p292_p3), %v551_v54, 7 }
   0x9   : > { %1028 = vmatpush3.bf16.msra.mxu0 (!%p292_p3), %v1027_v4  ;;  %v1036_v13 = vpack.c.bf16 (!%p292_p3), %v368_v11, %v367_v10  ;;  %v370_v15 = vld [vmem:[%s1301_s2 + $0x48] sm:$0xff] (!%p292_p3)  ;;  %v371_v17 = vld [vmem:[%s1301_s2 + $0x50] sm:$0xff] (!%p292_p3)  ;;  %v372_v18 = vld [vmem:[%s1301_s2 + $0x58] sm:$0xff] (!%p292_p3) }
   0xa   : > { %1029 = vmatprep.subr.bf16.mxu0 (!%p292_p3), %v1117_v3  ;;  %v1039_v16 = vpack.c.bf16 (!%p292_p3), %v370_v15, %v369_v14  ;;  %v1042_v19 = vpack.c.bf16 (!%p292_p3), %v372_v18, %v371_v17  ;;  %v373_v20 = vld [vmem:[%s1301_s2 + $0x60] sm:$0xff] (!%p292_p3)  ;;  %v374_v21 = vld [vmem:[%s1301_s2 + $0x68] sm:$0xff] (!%p292_p3)  ;;  %v375_v23 = vld [vmem:[%s1301_s2 + $0x70] sm:$0xff] (!%p292_p3)  ;;  %v553_v58 = vsub.s32 (!%p292_p3), 0, %v552_v55 }
   0xb   : > { %v1045_v22 = vpack.c.bf16 (!%p292_p3), %v374_v21, %v373_v20  ;;  %v376_v24 = vld [vmem:[%s1301_s2 + $0x78] sm:$0xff] (!%p292_p3)  ;;  %v454_v27 = vld [vmem:[%s1303_s4] sm:$0xf] (!%p292_p3)  ;;  %v1078_v39 = vld [vmem:[%s1305_s6 + $0x8] sm:$0xff] (!%p292_p3)  }
   0xc   : > { %v1048_v25 = vpack.c.bf16 (!%p292_p3), %v376_v24, %v375_v23  ;;  %v377_v28 = vld [vmem:[%s1302_s3] sm:$0x1] (!%p292_p3)  ;;  %v1079_v40 = vld [vmem:[%s1305_s6 + $0x10] sm:$0xff] (!%p292_p3)   ;;  %v1080_v41 = vld [vmem:[%s1305_s6 + $0x18] sm:$0xff] (!%p292_p3)  }
   0xd   : > { %1031 = vmatpush3.bf16.msra.mxu0 (!%p292_p3), %v1030_v7  ;;  %v1077_v38 = vld [vmem:[%s1305_s6] sm:$0xff] (!%p292_p3)   ;;  %v1082_v43 = vld [vmem:[%s1305_s6 + $0x28] sm:$0xff] (!%p292_p3)   ;;  %v1083_v44 = vld [vmem:[%s1305_s6 + $0x30] sm:$0xff] (!%p292_p3)  }
   0xe   : > { %1032 = vmatprep.subr.bf16.mxu0 %v1117_v3  ;;  %s1313_s27 = smov (!%p337_p4, %s1107_s27), 1  ;;  %1002 = vmatprep.subr.bf16.mxu1 %v1077_v38  ;;  %v1081_v42 = vld [vmem:[%s1305_s6 + $0x20] sm:$0xff]   ;;  %v1084_v45 = vld [vmem:[%s1305_s6 + $0x38] sm:$0xff]  }
   0xf   : > { %s348_s25 = scalar_lea.vmem %s1300_s1, %s1313_s27  ;;  %1003 = vmatpush3.bf16.msra.mxu1 %v1077_v38  ;;  %v455_v46 = vld [vmem:[%s1304_s5] sm:$0x1]  ;;  %s898_s12 = sshll.u32 %s1313_s27, 5 }
  0x10   : > { %v360_v26 = vld [vmem:[%s348_s25] sm:$0x1]  ;;  %1004 = vmatprep.subr.bf16.mxu1 %v1078_v39  ;;  %s344_s15 = scalar_lea.vmem %s1299_s0, %s898_s12  ;;  %s357_s20 = scalar_lea.vmem %s1307_s8, %s898_s12 }
  0x11   : > { %1034 = vmatpush3.bf16.msra.mxu0 %v1033_v12  ;;  %v539_v61 = vld [vmem:[%s344_s15] sm:$0xf]  ;;  %v540_v62 = vld [vmem:[%s344_s15 + $0x4] sm:$0xf]  ;;  %v541_v63 = vld [vmem:[%s344_s15 + $0x8] sm:$0xf] }
  0x12   : > { %1035 = vmatprep.subr.bf16.mxu0 %v1117_v3  ;;  %v542_v0 = vld [vmem:[%s344_s15 + $0xc] sm:$0xf]  ;;  %v543_v1 = vld [vmem:[%s344_s15 + $0x10] sm:$0xf]  ;;  %v545_v4 = vld [vmem:[%s344_s15 + $0x18] sm:$0xf] }
  0x13   : > { %1005 = vmatpush3.bf16.msra.mxu1 %v1078_v39  ;;  %v546_v5 = vld [vmem:[%s344_s15 + $0x1c] sm:$0xf] }
  0x14   : > { %1006 = vmatprep.subr.bf16.mxu1 %v1079_v40 }
  0x15   : > { %1037 = vmatpush3.bf16.msra.mxu0 %v1036_v13 }
  0x16   : > { %1038 = vmatprep.subr.bf16.mxu0 %v1117_v3 }
  0x17   : > { %1007 = vmatpush3.bf16.msra.mxu1 %v1079_v40 }
  0x18   : > { %1008 = vmatprep.subr.bf16.mxu1 %v1080_v41 }
  0x19   : > { %1040 = vmatpush3.bf16.msra.mxu0 %v1039_v16 }
  0x1a   : > { %1041 = vmatprep.subr.bf16.mxu0 %v1117_v3 }
  0x1b   : > { %1009 = vmatpush3.bf16.msra.mxu1 %v1080_v41 }
  0x1c   : > { %1010 = vmatprep.subr.bf16.mxu1 %v1081_v42 }
  0x1d   : > { %1043 = vmatpush3.bf16.msra.mxu0 %v1042_v19  ;;  %v875_v19 = vld [vmem:[%s1306_s7] ss:$0 sm:$0xff] }
  0x1e   : > { %1044 = vmatprep.subr.bf16.mxu0 %v1117_v3 }
  0x1f   : > { %1011 = vmatpush3.bf16.msra.mxu1 %v1081_v42 }
  0x20   : > { %1012 = vmatprep.subr.bf16.mxu1 %v1082_v43 }
  0x21   : > { %1046 = vmatpush3.bf16.msra.mxu0 %v1045_v22 }
  0x22   : > { %1047 = vmatprep.subr.bf16.mxu0 %v1117_v3  ;;  %v544_v3 = vld [vmem:[%s344_s15 + $0x14] sm:$0xf] }
  0x23   : > { %1013 = vmatpush3.bf16.msra.mxu1 %v1082_v43 }
  0x24   : > { %1014 = vmatprep.subr.bf16.mxu1 %v1083_v44 }
  0x25   : > { %1049 = vmatpush3.bf16.msra.mxu0 %v1048_v25 }
  0x26   : > { %997 = vmatprep.subr.mxu0 %v1119_v6 }
  0x27   : > { %1015 = vmatpush3.bf16.msra.mxu1 %v1083_v44 }
  0x28   : > { %995 = vmatmul.mubr.f32.vlgmr.msra.gmra.mrb[0].mxu0 %v360_v26  ;;  %1016 = vmatprep.subr.bf16.mxu1 %v1084_v45 }
  0x29   : > { %999 = vmatprep.mubr.msk.f32.mxu0 %vm1118_vm0, %v1119_v6  ;;  %998 = vmatpush3.msk.msra.mxu0 %vm460_vm1, %v454_v27 }
  0x2b   : > { %1017 = vmatpush3.bf16.msra.mxu1 %v1084_v45 }
  0xfb   : > { %v444_v29 = vpop.f32.mrb[0].mxu0 }
  0xfc   : > { %v445_v30 = vadd.f32 %v444_v29, %v377_v28  ;;  %v996_v31 = vpop.f32.mrb[1].mxu0 }
  0xfe   : > { %v448_v32 = vsub.f32 0.0, %v445_v30 }
 0x100   : > { %v449_v33 = vmul.f32 1.442695, %v448_v32 }
 0x102   : > { %1085 = vpow2.f32 %v449_v33 }
 0x10c   : > { %v1086_v34 = vpop.eup %1085 }
 0x10d   : > { %v451_v35 = vadd.f32 1.0, %v1086_v34 }
 0x10f   : > { %1087 = vrcp.f32 %v451_v35 }
 0x119   : > { %v1088_v36 = vpop.eup %1087 }
 0x11a   : > { %v453_v37 = vmul.f32 %v1088_v36, %v445_v30 }
 0x11c   : > { %1000 = vmatmul.mubr.msk.f32.vlgmr.msra.gmra.mrb[2].mxu0 %vm456_vm2, %v453_v37 }
 0x1ef   : > { %v530_v47 = vpop.f32.mrb[2].mxu0 }
 0x1f0   : > { %v531_v48 = vadd.f32 %v530_v47, %v455_v46  ;;  %v1001_v49 = vpop.f32.mrb[3].mxu0 }
 0x1f2   : > { %v534_v50 = vsub.f32 0.0, %v531_v48 }
 0x1f4   : > { %v535_v51 = vmul.f32 1.442695, %v534_v50 }
 0x1f6   : > { %1089 = vpow2.f32 %v535_v51 }
 0x200   : > { %v1090_v52 = vpop.eup %1089 }
 0x201   : > { %v537_v53 = vadd.f32 1.0, %v1090_v52 }
 0x203   : > { %1091 = vrcp.f32 %v537_v53 }
 0x20d   : > { %v1092_v56 = vpop.eup %1091 }
 0x20e   : > { %v547_v57 = vpack.c.bf16 %v1092_v56, %v1092_v56 }
 0x210   : > { %v549_v59 = vpack.i.b16 %v547_v57, %v547_v57 }
 0x212   : > { %v554_v60 = vrot.slane %v549_v59, %v553_v58 }
 0x214   : > { %v874_v2 = vcombine.low %v554_v60, %v554_v60 }
 0x216   : > { %v559_v6 = vmul.bf16 %v874_v2, %v539_v61  ;;  %v560_v7 = vmul.bf16 %v874_v2, %v540_v62  ;;  %v561_v8 = vmul.bf16 %v874_v2, %v541_v63  ;;  %v562_v9 = vmul.bf16 %v874_v2, %v542_v0 }
 0x217   : > { %v563_v10 = vmul.bf16 %v874_v2, %v543_v1  ;;  %v564_v11 = vmul.bf16 %v874_v2, %v544_v3  ;;  %v565_v12 = vmul.bf16 %v874_v2, %v545_v4  ;;  %v566_v13 = vmul.bf16 %v874_v2, %v546_v5 }
 0x218   : > { %v876_v14 = vcombine.low %v559_v6, %v560_v7  ;;  %v877_v15 = vcombine.low %v561_v8, %v562_v9 }
 0x219   : > { %v878_v16 = vcombine.low %v563_v10, %v564_v11  ;;  %v879_v17 = vcombine.low %v565_v12, %v566_v13 }
 0x21a   : > { %1018 = vmatprep.mubr.bf16.mxu1 %v876_v14 }
 0x21b   : > { %1019 = vmatmul.mubr.bf16.vlgmr.msra.gmra.mrb[0].mxu1 %v877_v15 }
 0x21c   : > { %1022 = vmatprep.mubr.bf16.mxu1 %v878_v16 }
 0x223   : > { %1023 = vmatmul.mubr.bf16.gmra.mrb[4].mxu1 %v879_v17 }
 0x2ee   : > { %v1020_v18 = vpop.f32.mrb[0].mxu1 }
 0x2ef   : > { %v696_v20 = vpop.f32.mrb[1].mxu1  ;;  %v705_v22 = vadd.f32 %v1020_v18, %v875_v19 }
 0x2f0   : > { %v1021_v21 = vpop.f32.mrb[2].mxu1  ;;  %v697_v25 = vadd.f32 %v875_v19, %v696_v20 }
 0x2f1   : > { %v708_v23 = vadd.f32 %v1021_v21, %v875_v19  ;;  %v699_v24 = vpop.f32.mrb[3].mxu1 }
 0x2f2   : > { %v700_v26 = vadd.f32 %v875_v19, %v699_v24 }
 0x2f3   : > { %v916_v27 = vpack.c.bf16 %v708_v23, %v705_v22 }
 0x2f4   : > { %v911_v28 = vpack.c.bf16 %v700_v26, %v697_v25 }
 0x2f5   : > { %928 = vst [vmem:[%s357_s20 + $0x8] sm:$0xff] %v916_v27  }
 0x2f6   : > { %912 = vst [vmem:[%s357_s20] sm:$0xff] %v911_v28   ;;  %v1024_v29 = vpop.f32.mrb[4].mxu1 }
 0x2f7   : > { %v712_v30 = vpop.f32.mrb[5].mxu1  ;;  %v721_v32 = vadd.f32 %v1024_v29, %v875_v19 }
 0x2f8   : > { %v1025_v31 = vpop.f32.mrb[6].mxu1  ;;  %v713_v35 = vadd.f32 %v875_v19, %v712_v30 }
 0x2f9   : > { %v724_v33 = vadd.f32 %v1025_v31, %v875_v19  ;;  %v715_v34 = vpop.f32.mrb[7].mxu1 }
 0x2fa   : > { %v716_v36 = vadd.f32 %v875_v19, %v715_v34 }
 0x2fb   : > { %v926_v37 = vpack.c.bf16 %v724_v33, %v721_v32 }
 0x2fc   : > { %v921_v38 = vpack.c.bf16 %v716_v36, %v713_v35 }
 0x2fd   : > { %930 = vst [vmem:[%s357_s20 + $0x18] sm:$0xff] %v926_v37  }
 0x2fe   : > { %929 = vst [vmem:[%s357_s20 + $0x10] sm:$0xff] %v921_v38  }
 0x2ff PF: > { %s18_s29 = sadd.s32 1, %s1115_s29   ;;  %s1308_s27 = smov %s1111_s28 }
 0x300   : > { %p15_p5 = scmp.ge.s32.totalorder %s18_s29, 4   ;;  %s1309_s28 = smov %s1311_s30 }
 0x302   :  { %17 = sbr.rel (!%p15_p5) target bundleno = 2 (0x2), region = 85 }

// kernel: efficientb5_forward.14
= control target key start
LH: loop header
LB: loop body
LE: loop exit
PB: predicated region body
PF: predicated region fallthrough
CT: control target
= control target key end

     0   :  { %s1230_s15 = smov 0   ;;  %s1232_s16 = smov 0   ;;  %s1553_s0 = inlined_call_operand.vmem [shape: bf16[8,9,9,128], index: 0, kind: input, shape index: {}]   ;;  %s1554_s1 = inlined_call_operand.vmem [shape: f32[9,128], index: 1, kind: input, shape index: {}]   ;;  %s1555_s2 = inlined_call_operand.vmem [shape: f32[1,128], index: 2, kind: input, shape index: {}]   ;;  %s1556_s3 = inlined_call_operand.vmem [shape: bf16[2,8,8,128], index: 3, kind: output, shape index: {0}]   ;;  %s1557_s4 = inlined_call_operand.vmem [shape: f32[2,1,128], index: 4, kind: output, shape index: {1}]  }
   0x1   :  { %s1234_s17 = smov 0  }
   0x2 LB: > { %s27_s18 = sadd.s32 1, %s1199_s16  ;;  %p1027_p0 = scmp.ge.s32.totalorder %s1203_s17, 1  ;;  %s1203_s17 = sphi %s1234_s17, %s15_s17   ;;  %s1199_s16 = sphi %s1232_s16, %s1559_s16   ;;  %s1195_s15 = sphi %s1230_s15, %s1558_s15  }
   0x3   : > { %p29_p1 = scmp.ge.s32.totalorder %s27_s18, 2  ;;  %p205_p2 = scmp.lt.s32.totalorder %s1203_s17, 3 }
   0x5   : > { %s1561_s18 = smov (%p29_p1, %s27_s18), 0  ;;  %p206_p3 = pnand %p1027_p0, %p205_p2 }
   0x6   : > { %s1028_s19 = sshll.u32 (!%p206_p3), %s1195_s15, 2  ;;  %v1032_v0 = vld [vmem:[%s1554_s1] ss:$0 sm:$0xff] (!%p206_p3)  ;;  %v1041_v25 = vld [vmem:[%s1554_s1 + $0x1] ss:$0 sm:$0xff] (!%p206_p3)  ;;  %vm402_vm0 = vcmask (!%p206_p3), 1046528  }
   0x7   : > { %209 = sbr.rel (%p206_p3) target bundleno = 156 (0x9c), region = 32  ;;  %p252_p4 = scmp.lt.s32.totalorder (!%p206_p3), %s1028_s19, 7  ;;  %v1042_v58 = vld [vmem:[%s1554_s1 + $0x2] ss:$0 sm:$0xff] (!%p206_p3) }
   0x8   : > { %p268_p5 = scmp.lt.s32.totalorder (!%p206_p3), %s1195_s15, 1 }
   0xe   : > { %s1563_s19 = smov (!%p252_p4, %s1028_s19), 7  ;;  %s1565_s15 = smov (!%p268_p5, %s1195_s15), 1 }
   0xf   : > { %s1124_s20 = smul.u32 72, %s1563_s19  ;;  %s1100_s22 = sshll.u32 %s1565_s15, 5 }
  0x10   : > { %s275_s25 = scalar_lea.vmem %s1556_s3, %s1100_s22  ;;  %s281_s28 = scalar_lea.vmem %s1557_s4, %s1565_s15 }
  0x11   : > { %s1254_s23 = scalar_lea.vmem %s1553_s0, %s1124_s20 }
  0x12   : > { %v1260_v1 = vld [vmem:[%s1254_s23] ss:$8 sps:$4 sm:$0xff]   ;;  %v1263_v2 = vld [vmem:[%s1254_s23 + $0x10] ss:$8 sps:$4 sm:$0xff]   ;;  %v349_v38 = vld [vmem:[%s1254_s23 + $0x4] sm:$0x1] }
  0x13   : > { %v1266_v3 = vld [vmem:[%s1254_s23 + $0x20] ss:$8 sps:$4 sm:$0xff]   ;;  %v1269_v4 = vld [vmem:[%s1254_s23 + $0x30] ss:$8 sps:$4 sm:$0xff]   ;;  %v291_v5 = vunpack.c.l.bf16 %v1260_v1  ;;  %v292_v6 = vunpack.c.h.bf16 %v1260_v1  ;;  %v293_v7 = vunpack.c.l.bf16 %v1263_v2  ;;  %v294_v8 = vunpack.c.h.bf16 %v1263_v2  ;;  %v350_v39 = vld [vmem:[%s1254_s23 + $0xc] sm:$0x1] }
  0x14   : > { %v295_v9 = vunpack.c.l.bf16 %v1266_v3  ;;  %v296_v10 = vunpack.c.h.bf16 %v1266_v3  ;;  %v297_v11 = vunpack.c.l.bf16 %v1269_v4  ;;  %v298_v12 = vunpack.c.h.bf16 %v1269_v4  ;;  %v1033_v13 = vld [vmem:[%s1254_s23 + $0x48] ss:$8 sps:$4 sm:$0xff]   ;;  %v1035_v14 = vld [vmem:[%s1254_s23 + $0x58] ss:$8 sps:$4 sm:$0xff]   ;;  %v351_v44 = vld [vmem:[%s1254_s23 + $0x14] sm:$0x1] }
  0x15   : > { %v303_v15 = vmul.f32 %v1032_v0, %v291_v5  ;;  %v304_v16 = vmul.f32 %v1032_v0, %v292_v6  ;;  %v305_v17 = vmul.f32 %v1032_v0, %v293_v7  ;;  %v306_v18 = vmul.f32 %v1032_v0, %v294_v8  ;;  %v1037_v19 = vld [vmem:[%s1254_s23 + $0x68] ss:$8 sps:$4 sm:$0xff]   ;;  %v1039_v20 = vld [vmem:[%s1254_s23 + $0x78] ss:$8 sps:$4 sm:$0xff]   ;;  %v352_v45 = vld [vmem:[%s1254_s23 + $0x1c] sm:$0x1] }
  0x16   : > { %v307_v21 = vmul.f32 %v1032_v0, %v295_v9  ;;  %v308_v22 = vmul.f32 %v1032_v0, %v296_v10  ;;  %v309_v23 = vmul.f32 %v1032_v0, %v297_v11  ;;  %v310_v24 = vmul.f32 %v1032_v0, %v298_v12  ;;  %v353_v46 = vld [vmem:[%s1254_s23 + $0x24] sm:$0x1]  ;;  %v354_v51 = vld [vmem:[%s1254_s23 + $0x2c] sm:$0x1]  ;;  %v355_v52 = vld [vmem:[%s1254_s23 + $0x34] sm:$0x1] }
  0x17   : > { %v321_v26 = vunpack.c.l.bf16 %v1033_v13  ;;  %v322_v27 = vunpack.c.h.bf16 %v1033_v13  ;;  %v323_v28 = vunpack.c.l.bf16 %v1035_v14  ;;  %v324_v29 = vunpack.c.h.bf16 %v1035_v14  ;;  %v356_v53 = vld [vmem:[%s1254_s23 + $0x3c] sm:$0x1] }
  0x18   : > { %v325_v30 = vunpack.c.l.bf16 %v1037_v19  ;;  %v326_v31 = vunpack.c.h.bf16 %v1037_v19  ;;  %v327_v32 = vunpack.c.l.bf16 %v1039_v20  ;;  %v328_v33 = vunpack.c.h.bf16 %v1039_v20 }
  0x19   : > { %v333_v34 = vmul.f32 %v1041_v25, %v321_v26  ;;  %v334_v35 = vmul.f32 %v1041_v25, %v322_v27  ;;  %v335_v36 = vmul.f32 %v1041_v25, %v323_v28  ;;  %v336_v37 = vmul.f32 %v1041_v25, %v324_v29 }
  0x1a   : > { %v337_v40 = vmul.f32 %v1041_v25, %v325_v30  ;;  %v338_v41 = vmul.f32 %v1041_v25, %v326_v31  ;;  %v339_v42 = vmul.f32 %v1041_v25, %v327_v32  ;;  %v340_v43 = vmul.f32 %v1041_v25, %v328_v33 }
  0x1b   : > { %v341_v47 = vadd.f32 %v333_v34, %v303_v15  ;;  %v342_v48 = vadd.f32 %v334_v35, %v304_v16  ;;  %v343_v49 = vadd.f32 %v335_v36, %v305_v17  ;;  %v344_v50 = vadd.f32 %v336_v37, %v306_v18 }
  0x1c   : > { %v345_v54 = vadd.f32 %v337_v40, %v307_v21  ;;  %v346_v55 = vadd.f32 %v338_v41, %v308_v22  ;;  %v347_v56 = vadd.f32 %v339_v42, %v309_v23  ;;  %v1310_v57 = vadd.f32 %v340_v43, %v310_v24 }
  0x1d   : > { %v358_v59 = vunpack.c.l.bf16 %v349_v38  ;;  %v359_v60 = vunpack.c.l.bf16 %v350_v39  ;;  %v360_v61 = vunpack.c.l.bf16 %v351_v44  ;;  %v361_v62 = vunpack.c.l.bf16 %v352_v45  ;;  %v1337_v39 = vld [vmem:[%s1254_s23 + $0x90] ss:$8 sps:$4 sm:$0xff]   ;;  %v1341_v44 = vld [vmem:[%s1254_s23 + $0xa0] ss:$8 sps:$4 sm:$0xff]  }
  0x1e   : > { %v362_v63 = vunpack.c.l.bf16 %v353_v46  ;;  %v363_v0 = vunpack.c.l.bf16 %v354_v51  ;;  %v364_v13 = vunpack.c.l.bf16 %v355_v52  ;;  %v365_v14 = vunpack.c.l.bf16 %v356_v53  ;;  %v1345_v53 = vld [vmem:[%s1254_s23 + $0xb0] ss:$8 sps:$4 sm:$0xff]  }
  0x1f   : > { %v370_v15 = vmul.f32 %v1042_v58, %v291_v5  ;;  %v371_v16 = vmul.f32 %v1042_v58, %v358_v59  ;;  %v372_v17 = vmul.f32 %v1042_v58, %v292_v6  ;;  %v373_v18 = vmul.f32 %v1042_v58, %v359_v60 }
  0x20   : > { %v374_v19 = vmul.f32 %v1042_v58, %v293_v7  ;;  %v375_v20 = vmul.f32 %v1042_v58, %v360_v61  ;;  %v376_v21 = vmul.f32 %v1042_v58, %v294_v8  ;;  %v377_v22 = vmul.f32 %v1042_v58, %v361_v62 }
  0x21   : > { %v378_v23 = vmul.f32 %v1042_v58, %v295_v9  ;;  %v379_v24 = vmul.f32 %v1042_v58, %v362_v63  ;;  %v380_v5 = vmul.f32 %v1042_v58, %v296_v10  ;;  %v381_v25 = vmul.f32 %v1042_v58, %v363_v0 }
  0x22   : > { %v382_v1 = vmul.f32 %v1042_v58, %v297_v11  ;;  %v383_v6 = vmul.f32 %v1042_v58, %v364_v13  ;;  %v384_v7 = vmul.f32 %v1042_v58, %v298_v12  ;;  %v385_v26 = vmul.f32 %v1042_v58, %v365_v14  ;;  %v1348_v58 = vld [vmem:[%s1254_s23 + $0xc0] ss:$8 sps:$4 sm:$0xff]  }
  0x23   : > { %v403_v27 = vrot.slane %v370_v15, 1  ;;  %v404_v2 = vrot.slane %v371_v16, 1  ;;  %v406_v8 = vrot.slane %v372_v17, 1  ;;  %v407_v28 = vrot.slane %v373_v18, 1 }
  0x24   : > { %v409_v29 = vrot.slane %v374_v19, 1  ;;  %v410_v9 = vrot.slane %v375_v20, 1  ;;  %v412_v30 = vrot.slane %v376_v21, 1  ;;  %v413_v31 = vrot.slane %v377_v22, 1  ;;  %v1052_v20 = vld [vmem:[%s1254_s23 + $0xd8] ss:$8 sps:$4 sm:$0xff]  }
  0x25   : > { %v405_v3 = vsel %vm402_vm0, %v403_v27, %v404_v2  ;;  %v408_v10 = vsel %vm402_vm0, %v406_v8, %v407_v28  ;;  %v415_v11 = vrot.slane %v378_v23, 1  ;;  %v416_v32 = vrot.slane %v379_v24, 1  ;;  %v1054_v21 = vld [vmem:[%s1254_s23 + $0xe8] ss:$8 sps:$4 sm:$0xff]   ;;  %v1060_v2 = vld [vmem:[%s1554_s1 + $0x4] ss:$0 sm:$0xff] }
  0x26   : > { %v411_v4 = vsel %vm402_vm0, %v409_v29, %v410_v9  ;;  %v414_v12 = vsel %vm402_vm0, %v412_v30, %v413_v31  ;;  %v418_v33 = vrot.slane %v380_v5, 1  ;;  %v419_v34 = vrot.slane %v381_v25, 1  ;;  %v1056_v25 = vld [vmem:[%s1254_s23 + $0xf8] ss:$8 sps:$4 sm:$0xff]  }
  0x27   : > { %v417_v35 = vsel %vm402_vm0, %v415_v11, %v416_v32  ;;  %v421_v36 = vrot.slane %v382_v1, 1  ;;  %v422_v37 = vrot.slane %v383_v6, 1  ;;  %v424_v38 = vrot.slane %v384_v7, 1  ;;  %v1058_v1 = vld [vmem:[%s1254_s23 + $0x108] ss:$8 sps:$4 sm:$0xff]  }
  0x28   : > { %v420_v40 = vsel %vm402_vm0, %v418_v33, %v419_v34  ;;  %v425_v41 = vrot.slane %v385_v26, 1  ;;  %v435_v42 = vadd.f32 %v405_v3, %v341_v47  ;;  %v436_v43 = vadd.f32 %v408_v10, %v342_v48  ;;  %v1051_v47 = vld [vmem:[%s1554_s1 + $0x3] ss:$0 sm:$0xff]  ;;  %v1061_v33 = vld [vmem:[%s1254_s23 + $0x94] sm:$0x1] }
  0x29   : > { %v423_v45 = vsel %vm402_vm0, %v421_v36, %v422_v37  ;;  %v437_v46 = vadd.f32 %v411_v4, %v343_v49  ;;  %v438_v51 = vadd.f32 %v414_v12, %v344_v50  ;;  %v439_v52 = vadd.f32 %v417_v35, %v345_v54  ;;  %v1062_v34 = vld [vmem:[%s1254_s23 + $0x9c] sm:$0x1] }
  0x2a   : > { %v426_v59 = vsel %vm402_vm0, %v424_v38, %v425_v41  ;;  %v440_v60 = vadd.f32 %v420_v40, %v346_v55  ;;  %v441_v61 = vadd.f32 %v423_v45, %v347_v56  ;;  %v453_v48 = vunpack.c.l.bf16 %v1337_v39  ;;  %v1063_v40 = vld [vmem:[%s1254_s23 + $0xa4] sm:$0x1]  ;;  %v1064_v41 = vld [vmem:[%s1254_s23 + $0xac] sm:$0x1] }
  0x2b   : > { %v442_v62 = vadd.f32 %v426_v59, %v1310_v57  ;;  %v454_v49 = vunpack.c.h.bf16 %v1337_v39  ;;  %v455_v50 = vunpack.c.l.bf16 %v1341_v44  ;;  %v456_v54 = vunpack.c.h.bf16 %v1341_v44  ;;  %v1067_v59 = vld [vmem:[%s1254_s23 + $0xc4] sm:$0x1] }
  0x2c   : > { %v457_v63 = vunpack.c.l.bf16 %v1345_v53  ;;  %v458_v55 = vunpack.c.h.bf16 %v1345_v53  ;;  %v459_v56 = vunpack.c.l.bf16 %v1348_v58  ;;  %v460_v0 = vunpack.c.h.bf16 %v1348_v58 }
  0x2d   : > { %v465_v57 = vmul.f32 %v1051_v47, %v453_v48  ;;  %v466_v13 = vmul.f32 %v1051_v47, %v454_v49  ;;  %v467_v14 = vmul.f32 %v1051_v47, %v455_v50  ;;  %v468_v15 = vmul.f32 %v1051_v47, %v456_v54 }
  0x2e   : > { %v469_v16 = vmul.f32 %v1051_v47, %v457_v63  ;;  %v470_v17 = vmul.f32 %v1051_v47, %v458_v55  ;;  %v471_v18 = vmul.f32 %v1051_v47, %v459_v56  ;;  %v472_v19 = vmul.f32 %v1051_v47, %v460_v0 }
  0x2f   : > { %v473_v22 = vadd.f32 %v465_v57, %v435_v42  ;;  %v474_v23 = vadd.f32 %v466_v13, %v436_v43  ;;  %v475_v24 = vadd.f32 %v467_v14, %v437_v46  ;;  %v476_v5 = vadd.f32 %v468_v15, %v438_v51  ;;  %v1065_v42 = vld [vmem:[%s1254_s23 + $0xb4] sm:$0x1]  ;;  %v1069_v13 = vld [vmem:[%s1554_s1 + $0x5] ss:$0 sm:$0xff] }
  0x30   : > { %v477_v6 = vadd.f32 %v469_v16, %v439_v52  ;;  %v478_v7 = vadd.f32 %v470_v17, %v440_v60  ;;  %v479_v26 = vadd.f32 %v471_v18, %v441_v61  ;;  %v480_v27 = vadd.f32 %v472_v19, %v442_v62  ;;  %v1066_v52 = vld [vmem:[%s1254_s23 + $0xbc] sm:$0x1]  ;;  %v1068_v60 = vld [vmem:[%s1254_s23 + $0xcc] sm:$0x1] }
  0x31   : > { %v491_v8 = vunpack.c.l.bf16 %v1052_v20  ;;  %v492_v28 = vunpack.c.h.bf16 %v1052_v20  ;;  %v493_v29 = vunpack.c.l.bf16 %v1054_v21  ;;  %v494_v9 = vunpack.c.h.bf16 %v1054_v21 }
  0x32   : > { %v495_v30 = vunpack.c.l.bf16 %v1056_v25  ;;  %v496_v31 = vunpack.c.h.bf16 %v1056_v25  ;;  %v497_v3 = vunpack.c.l.bf16 %v1058_v1  ;;  %v498_v10 = vunpack.c.h.bf16 %v1058_v1 }
  0x33   : > { %v503_v11 = vmul.f32 %v1060_v2, %v491_v8  ;;  %v504_v32 = vmul.f32 %v1060_v2, %v492_v28  ;;  %v505_v4 = vmul.f32 %v1060_v2, %v493_v29  ;;  %v506_v12 = vmul.f32 %v1060_v2, %v494_v9 }
  0x34   : > { %v507_v35 = vmul.f32 %v1060_v2, %v495_v30  ;;  %v508_v36 = vmul.f32 %v1060_v2, %v496_v31  ;;  %v509_v37 = vmul.f32 %v1060_v2, %v497_v3  ;;  %v510_v38 = vmul.f32 %v1060_v2, %v498_v10 }
  0x35   : > { %v511_v43 = vadd.f32 %v503_v11, %v473_v22  ;;  %v512_v45 = vadd.f32 %v504_v32, %v474_v23  ;;  %v513_v46 = vadd.f32 %v505_v4, %v475_v24  ;;  %v514_v51 = vadd.f32 %v506_v12, %v476_v5 }
  0x36   : > { %v515_v61 = vadd.f32 %v507_v35, %v477_v6  ;;  %v516_v47 = vadd.f32 %v508_v36, %v478_v7  ;;  %v517_v62 = vadd.f32 %v509_v37, %v479_v26  ;;  %v1394_v57 = vadd.f32 %v510_v38, %v480_v27 }
  0x37   : > { %v528_v14 = vunpack.c.l.bf16 %v1061_v33  ;;  %v529_v15 = vunpack.c.l.bf16 %v1062_v34  ;;  %v530_v16 = vunpack.c.l.bf16 %v1063_v40  ;;  %v531_v17 = vunpack.c.l.bf16 %v1064_v41  ;;  %v1421_v34 = vld [vmem:[%s1254_s23 + $0x8] ss:$8 sps:$4 sm:$0xff]   ;;  %v1425_v40 = vld [vmem:[%s1254_s23 + $0x18] ss:$8 sps:$4 sm:$0xff]  }
  0x38   : > { %v532_v18 = vunpack.c.l.bf16 %v1065_v42  ;;  %v533_v19 = vunpack.c.l.bf16 %v1066_v52  ;;  %v534_v20 = vunpack.c.l.bf16 %v1067_v59  ;;  %v535_v21 = vunpack.c.l.bf16 %v1068_v60  ;;  %v1429_v60 = vld [vmem:[%s1254_s23 + $0x28] ss:$8 sps:$4 sm:$0xff]  }
  0x39   : > { %v540_v22 = vmul.f32 %v1069_v13, %v453_v48  ;;  %v541_v23 = vmul.f32 %v1069_v13, %v528_v14  ;;  %v542_v24 = vmul.f32 %v1069_v13, %v454_v49  ;;  %v543_v5 = vmul.f32 %v1069_v13, %v529_v15 }
  0x3a   : > { %v544_v25 = vmul.f32 %v1069_v13, %v455_v50  ;;  %v545_v1 = vmul.f32 %v1069_v13, %v530_v16  ;;  %v546_v6 = vmul.f32 %v1069_v13, %v456_v54  ;;  %v547_v7 = vmul.f32 %v1069_v13, %v531_v17 }
  0x3b   : > { %v548_v26 = vmul.f32 %v1069_v13, %v457_v63  ;;  %v549_v27 = vmul.f32 %v1069_v13, %v532_v18  ;;  %v550_v48 = vmul.f32 %v1069_v13, %v458_v55  ;;  %v551_v2 = vmul.f32 %v1069_v13, %v533_v19 }
  0x3c   : > { %v552_v39 = vmul.f32 %v1069_v13, %v459_v56  ;;  %v553_v49 = vmul.f32 %v1069_v13, %v534_v20  ;;  %v554_v50 = vmul.f32 %v1069_v13, %v460_v0  ;;  %v555_v8 = vmul.f32 %v1069_v13, %v535_v21  ;;  %v1432_v13 = vld [vmem:[%s1254_s23 + $0x38] ss:$8 sps:$4 sm:$0xff]  }
  0x3d   : > { %v572_v28 = vrot.slane %v540_v22, 1  ;;  %v573_v44 = vrot.slane %v541_v23, 1  ;;  %v575_v54 = vrot.slane %v542_v24, 1  ;;  %v576_v29 = vrot.slane %v543_v5, 1 }
  0x3e   : > { %v578_v9 = vrot.slane %v544_v25, 1  ;;  %v579_v63 = vrot.slane %v545_v1, 1  ;;  %v581_v30 = vrot.slane %v546_v6, 1  ;;  %v582_v31 = vrot.slane %v547_v7, 1  ;;  %v1079_v1 = vld [vmem:[%s1254_s23 + $0x50] ss:$8 sps:$4 sm:$0xff]  }
  0x3f   : > { %v574_v53 = vsel %vm402_vm0, %v572_v28, %v573_v44  ;;  %v577_v55 = vsel %vm402_vm0, %v575_v54, %v576_v29  ;;  %v584_v56 = vrot.slane %v548_v26, 1  ;;  %v585_v3 = vrot.slane %v549_v27, 1  ;;  %v1081_v6 = vld [vmem:[%s1254_s23 + $0x60] ss:$8 sps:$4 sm:$0xff]   ;;  %v1087_v44 = vld [vmem:[%s1554_s1 + $0x7] ss:$0 sm:$0xff] }
  0x40   : > { %v580_v58 = vsel %vm402_vm0, %v578_v9, %v579_v63  ;;  %v583_v0 = vsel %vm402_vm0, %v581_v30, %v582_v31  ;;  %v587_v10 = vrot.slane %v550_v48, 1  ;;  %v588_v11 = vrot.slane %v551_v2, 1  ;;  %v1083_v2 = vld [vmem:[%s1254_s23 + $0x70] ss:$8 sps:$4 sm:$0xff]  }
  0x41   : > { %v586_v32 = vsel %vm402_vm0, %v584_v56, %v585_v3  ;;  %v590_v4 = vrot.slane %v552_v39, 1  ;;  %v591_v12 = vrot.slane %v553_v49, 1  ;;  %v593_v33 = vrot.slane %v554_v50, 1  ;;  %v1085_v39 = vld [vmem:[%s1254_s23 + $0x80] ss:$8 sps:$4 sm:$0xff]  }
  0x42   : > { %v589_v35 = vsel %vm402_vm0, %v587_v10, %v588_v11  ;;  %v594_v36 = vrot.slane %v555_v8, 1  ;;  %v604_v37 = vadd.f32 %v574_v53, %v511_v43  ;;  %v605_v38 = vadd.f32 %v577_v55, %v512_v45  ;;  %v1078_v43 = vld [vmem:[%s1554_s1 + $0x6] ss:$0 sm:$0xff]  ;;  %v1088_v10 = vld [vmem:[%s1254_s23 + $0xc] sm:$0x1] }
  0x43   : > { %v592_v41 = vsel %vm402_vm0, %v590_v4, %v591_v12  ;;  %v606_v42 = vadd.f32 %v580_v58, %v513_v46  ;;  %v607_v52 = vadd.f32 %v583_v0, %v514_v51  ;;  %v608_v59 = vadd.f32 %v586_v32, %v515_v61  ;;  %v1089_v11 = vld [vmem:[%s1254_s23 + $0x14] sm:$0x1] }
  0x44   : > { %v595_v14 = vsel %vm402_vm0, %v593_v33, %v594_v36  ;;  %v609_v15 = vadd.f32 %v589_v35, %v516_v47  ;;  %v610_v16 = vadd.f32 %v592_v41, %v517_v62  ;;  %v622_v45 = vunpack.c.l.bf16 %v1421_v34  ;;  %v1090_v35 = vld [vmem:[%s1254_s23 + $0x1c] sm:$0x1]  ;;  %v1091_v36 = vld [vmem:[%s1254_s23 + $0x24] sm:$0x1] }
  0x45   : > { %v611_v17 = vadd.f32 %v595_v14, %v1394_v57  ;;  %v623_v46 = vunpack.c.h.bf16 %v1421_v34  ;;  %v624_v51 = vunpack.c.l.bf16 %v1425_v40  ;;  %v625_v61 = vunpack.c.h.bf16 %v1425_v40  ;;  %v1094_v14 = vld [vmem:[%s1254_s23 + $0x3c] sm:$0x1] }
  0x46   : > { %v626_v18 = vunpack.c.l.bf16 %v1429_v60  ;;  %v627_v47 = vunpack.c.h.bf16 %v1429_v60  ;;  %v628_v62 = vunpack.c.l.bf16 %v1432_v13  ;;  %v629_v19 = vunpack.c.h.bf16 %v1432_v13 }
  0x47   : > { %v634_v57 = vmul.f32 %v1078_v43, %v622_v45  ;;  %v635_v20 = vmul.f32 %v1078_v43, %v623_v46  ;;  %v636_v21 = vmul.f32 %v1078_v43, %v624_v51  ;;  %v637_v22 = vmul.f32 %v1078_v43, %v625_v61 }
  0x48   : > { %v638_v23 = vmul.f32 %v1078_v43, %v626_v18  ;;  %v639_v24 = vmul.f32 %v1078_v43, %v627_v47  ;;  %v640_v5 = vmul.f32 %v1078_v43, %v628_v62  ;;  %v641_v25 = vmul.f32 %v1078_v43, %v629_v19 }
  0x49   : > { %v642_v7 = vadd.f32 %v634_v57, %v604_v37  ;;  %v643_v26 = vadd.f32 %v635_v20, %v605_v38  ;;  %v644_v27 = vadd.f32 %v636_v21, %v606_v42  ;;  %v645_v48 = vadd.f32 %v637_v22, %v607_v52  ;;  %v1092_v37 = vld [vmem:[%s1254_s23 + $0x2c] sm:$0x1]  ;;  %v1096_v20 = vld [vmem:[%s1554_s1 + $0x8] ss:$0 sm:$0xff] }
  0x4a   : > { %v646_v49 = vadd.f32 %v638_v23, %v608_v59  ;;  %v647_v50 = vadd.f32 %v639_v24, %v609_v15  ;;  %v648_v8 = vadd.f32 %v640_v5, %v610_v16  ;;  %v649_v28 = vadd.f32 %v641_v25, %v611_v17  ;;  %v1093_v59 = vld [vmem:[%s1254_s23 + $0x34] sm:$0x1]  ;;  %v1095_v15 = vld [vmem:[%s1254_s23 + $0x44] sm:$0x1] }
  0x4b   : > { %v660_v54 = vunpack.c.l.bf16 %v1079_v1  ;;  %v661_v29 = vunpack.c.h.bf16 %v1079_v1  ;;  %v662_v9 = vunpack.c.l.bf16 %v1081_v6  ;;  %v663_v63 = vunpack.c.h.bf16 %v1081_v6 }
  0x4c   : > { %v664_v30 = vunpack.c.l.bf16 %v1083_v2  ;;  %v665_v31 = vunpack.c.h.bf16 %v1083_v2  ;;  %v666_v53 = vunpack.c.l.bf16 %v1085_v39  ;;  %v667_v55 = vunpack.c.h.bf16 %v1085_v39 }
  0x4d   : > { %v672_v56 = vmul.f32 %v1087_v44, %v660_v54  ;;  %v673_v3 = vmul.f32 %v1087_v44, %v661_v29  ;;  %v674_v58 = vmul.f32 %v1087_v44, %v662_v9  ;;  %v675_v0 = vmul.f32 %v1087_v44, %v663_v63 }
  0x4e   : > { %v676_v32 = vmul.f32 %v1087_v44, %v664_v30  ;;  %v677_v4 = vmul.f32 %v1087_v44, %v665_v31  ;;  %v678_v12 = vmul.f32 %v1087_v44, %v666_v53  ;;  %v679_v33 = vmul.f32 %v1087_v44, %v667_v55 }
  0x4f   : > { %v680_v38 = vadd.f32 %v672_v56, %v642_v7  ;;  %v681_v41 = vadd.f32 %v673_v3, %v643_v26  ;;  %v682_v42 = vadd.f32 %v674_v58, %v644_v27  ;;  %v683_v52 = vadd.f32 %v675_v0, %v645_v48 }
  0x50   : > { %v684_v16 = vadd.f32 %v676_v32, %v646_v49  ;;  %v685_v43 = vadd.f32 %v677_v4, %v647_v50  ;;  %v686_v17 = vadd.f32 %v678_v12, %v648_v8  ;;  %v687_v57 = vadd.f32 %v679_v33, %v649_v28 }
  0x51   : > { %v697_v21 = vunpack.c.l.bf16 %v1088_v10  ;;  %v698_v22 = vunpack.c.l.bf16 %v1089_v11  ;;  %v699_v23 = vunpack.c.l.bf16 %v1090_v35  ;;  %v700_v24 = vunpack.c.l.bf16 %v1091_v36  ;;  %v1097_v11 = vld [vmem:[%s1555_s2] ss:$0 sm:$0xff] }
  0x52   : > { %v701_v5 = vunpack.c.l.bf16 %v1092_v37  ;;  %v702_v25 = vunpack.c.l.bf16 %v1093_v59  ;;  %v703_v1 = vunpack.c.l.bf16 %v1094_v14  ;;  %v704_v6 = vunpack.c.l.bf16 %v1095_v15 }
  0x53   : > { %v709_v7 = vmul.f32 %v1096_v20, %v622_v45  ;;  %v710_v26 = vmul.f32 %v1096_v20, %v697_v21  ;;  %v711_v27 = vmul.f32 %v1096_v20, %v623_v46  ;;  %v712_v48 = vmul.f32 %v1096_v20, %v698_v22 }
  0x54   : > { %v713_v2 = vmul.f32 %v1096_v20, %v624_v51  ;;  %v714_v39 = vmul.f32 %v1096_v20, %v699_v23  ;;  %v715_v49 = vmul.f32 %v1096_v20, %v625_v61  ;;  %v716_v50 = vmul.f32 %v1096_v20, %v700_v24 }
  0x55   : > { %v717_v8 = vmul.f32 %v1096_v20, %v626_v18  ;;  %v718_v28 = vmul.f32 %v1096_v20, %v701_v5  ;;  %v719_v45 = vmul.f32 %v1096_v20, %v627_v47  ;;  %v720_v44 = vmul.f32 %v1096_v20, %v702_v25 }
  0x56   : > { %v721_v34 = vmul.f32 %v1096_v20, %v628_v62  ;;  %v722_v46 = vmul.f32 %v1096_v20, %v703_v1  ;;  %v723_v51 = vmul.f32 %v1096_v20, %v629_v19  ;;  %v724_v54 = vmul.f32 %v1096_v20, %v704_v6 }
  0x57   : > { %v741_v29 = vrot.slane %v709_v7, 1  ;;  %v742_v40 = vrot.slane %v710_v26, 1  ;;  %v744_v61 = vrot.slane %v711_v27, 1  ;;  %v745_v9 = vrot.slane %v712_v48, 1 }
  0x58   : > { %v747_v63 = vrot.slane %v713_v2, 1  ;;  %v748_v30 = vrot.slane %v714_v39, 1  ;;  %v750_v18 = vrot.slane %v715_v49, 1  ;;  %v751_v31 = vrot.slane %v716_v50, 1 }
  0x59   : > { %v743_v60 = vsel %vm402_vm0, %v741_v29, %v742_v40  ;;  %v746_v47 = vsel %vm402_vm0, %v744_v61, %v745_v9  ;;  %v753_v53 = vrot.slane %v717_v8, 1  ;;  %v754_v55 = vrot.slane %v718_v28, 1 }
  0x5a   : > { %v749_v62 = vsel %vm402_vm0, %v747_v63, %v748_v30  ;;  %v752_v13 = vsel %vm402_vm0, %v750_v18, %v751_v31  ;;  %v756_v19 = vrot.slane %v719_v45, 1  ;;  %v757_v56 = vrot.slane %v720_v44, 1 }
  0x5b   : > { %v755_v3 = vsel %vm402_vm0, %v753_v53, %v754_v55  ;;  %v759_v58 = vrot.slane %v721_v34, 1  ;;  %v760_v0 = vrot.slane %v722_v46, 1  ;;  %v762_v10 = vrot.slane %v723_v51, 1 }
  0x5c   : > { %v758_v32 = vsel %vm402_vm0, %v756_v19, %v757_v56  ;;  %v763_v4 = vrot.slane %v724_v54, 1  ;;  %v773_v12 = vadd.f32 %v743_v60, %v680_v38  ;;  %v774_v33 = vadd.f32 %v746_v47, %v681_v41 }
  0x5d   : > { %v761_v35 = vsel %vm402_vm0, %v759_v58, %v760_v0  ;;  %v775_v36 = vadd.f32 %v749_v62, %v682_v42  ;;  %v776_v37 = vadd.f32 %v752_v13, %v683_v52  ;;  %v777_v59 = vadd.f32 %v755_v3, %v684_v16 }
  0x5e   : > { %v764_v14 = vsel %vm402_vm0, %v762_v10, %v763_v4  ;;  %v778_v15 = vadd.f32 %v758_v32, %v685_v43  ;;  %v779_v20 = vadd.f32 %v761_v35, %v686_v17  ;;  %v788_v21 = vadd.f32 %v1097_v11, %v773_v12 }
  0x5f   : > { %v780_v22 = vadd.f32 %v764_v14, %v687_v57  ;;  %v789_v23 = vadd.f32 %v1097_v11, %v774_v33  ;;  %v1508_v24 = vadd.f32 %v1097_v11, %v775_v36  ;;  %v1510_v5 = vadd.f32 %v1097_v11, %v776_v37 }
  0x60   : > { %v1512_v25 = vadd.f32 %v1097_v11, %v777_v59  ;;  %v1514_v38 = vadd.f32 %v1097_v11, %v778_v15  ;;  %v1516_v41 = vadd.f32 %v1097_v11, %v779_v20  ;;  %v796_v42 = vsub.f32 0.0, %v788_v21 }
  0x61   : > { %v1518_v52 = vadd.f32 %v1097_v11, %v780_v22  ;;  %v797_v16 = vsub.f32 0.0, %v789_v23  ;;  %v798_v43 = vsub.f32 0.0, %v1508_v24  ;;  %v799_v17 = vsub.f32 0.0, %v1510_v5 }
  0x62   : > { %v800_v57 = vsub.f32 0.0, %v1512_v25  ;;  %v801_v1 = vsub.f32 0.0, %v1514_v38  ;;  %v802_v6 = vsub.f32 0.0, %v1516_v41  ;;  %v804_v7 = vmul.f32 1.442695, %v796_v42 }
  0x63   : > { %v803_v26 = vsub.f32 0.0, %v1518_v52  ;;  %v806_v27 = vmul.f32 1.442695, %v797_v16  ;;  %v808_v48 = vmul.f32 1.442695, %v798_v43 }
  0x64   : > { %1149 = vpow2.f32 %v804_v7  ;;  %v810_v2 = vmul.f32 1.442695, %v799_v17  ;;  %v812_v39 = vmul.f32 1.442695, %v800_v57  ;;  %v814_v49 = vmul.f32 1.442695, %v801_v1 }
  0x65   : > { %1151 = vpow2.f32 %v806_v27  ;;  %v816_v50 = vmul.f32 1.442695, %v802_v6  ;;  %v818_v8 = vmul.f32 1.442695, %v803_v26 }
  0x66   : > { %1153 = vpow2.f32 %v808_v48 }
  0x67   : > { %1155 = vpow2.f32 %v810_v2 }
  0x68   : > { %1157 = vpow2.f32 %v812_v39 }
  0x69   : > { %1159 = vpow2.f32 %v814_v49 }
  0x6a   : > { %1161 = vpow2.f32 %v816_v50 }
  0x6b   : > { %1163 = vpow2.f32 %v818_v8 }
  0x6e   : > { %v1150_v28 = vpop.eup %1149 }
  0x6f   : > { %v1152_v45 = vpop.eup %1151  ;;  %v820_v44 = vadd.f32 1.0, %v1150_v28 }
  0x70   : > { %v1154_v34 = vpop.eup %1153  ;;  %v821_v46 = vadd.f32 1.0, %v1152_v45 }
  0x71   : > { %v1156_v51 = vpop.eup %1155  ;;  %v822_v54 = vadd.f32 1.0, %v1154_v34  ;;  %1165 = vrcp.f32 %v820_v44 }
  0x72   : > { %v1158_v29 = vpop.eup %1157  ;;  %v823_v40 = vadd.f32 1.0, %v1156_v51  ;;  %1167 = vrcp.f32 %v821_v46 }
  0x73   : > { %v1160_v61 = vpop.eup %1159  ;;  %v824_v9 = vadd.f32 1.0, %v1158_v29  ;;  %1169 = vrcp.f32 %v822_v54 }
  0x74   : > { %v1162_v63 = vpop.eup %1161  ;;  %v825_v30 = vadd.f32 1.0, %v1160_v61  ;;  %1171 = vrcp.f32 %v823_v40 }
  0x75   : > { %v1164_v18 = vpop.eup %1163  ;;  %v826_v31 = vadd.f32 1.0, %v1162_v63  ;;  %1173 = vrcp.f32 %v824_v9 }
  0x76   : > { %v827_v60 = vadd.f32 1.0, %v1164_v18  ;;  %1175 = vrcp.f32 %v825_v30 }
  0x77   : > { %1177 = vrcp.f32 %v826_v31 }
  0x78   : > { %1179 = vrcp.f32 %v827_v60 }
  0x7b   : > { %v1166_v47 = vpop.eup %1165 }
  0x7c   : > { %v1168_v53 = vpop.eup %1167  ;;  %v836_v55 = vmul.f32 %v1166_v47, %v788_v21 }
  0x7d   : > { %v1170_v62 = vpop.eup %1169  ;;  %v837_v13 = vmul.f32 %v1168_v53, %v789_v23 }
  0x7e   : > { %v1172_v19 = vpop.eup %1171  ;;  %v838_v56 = vmul.f32 %v1170_v62, %v1508_v24 }
  0x7f   : > { %v1174_v3 = vpop.eup %1173  ;;  %v839_v58 = vmul.f32 %v1172_v19, %v1510_v5  ;;  %v1104_v0 = vpack.c.bf16 %v837_v13, %v836_v55  ;;  %v860_v10 = vadd.f32 %v837_v13, %v836_v55 }
  0x80   : > { %v1176_v11 = vpop.eup %1175  ;;  %v840_v4 = vmul.f32 %v1174_v3, %v1512_v25 }
  0x81   : > { %v1178_v32 = vpop.eup %1177  ;;  %v841_v12 = vmul.f32 %v1176_v11, %v1514_v38  ;;  %1105 = vst [vmem:[%s275_s25] sm:$0xff] %v1104_v0   ;;  %v1109_v33 = vpack.c.bf16 %v839_v58, %v838_v56  ;;  %v861_v35 = vadd.f32 %v860_v10, %v838_v56 }
  0x82   : > { %v1180_v36 = vpop.eup %1179  ;;  %v842_v37 = vmul.f32 %v1178_v32, %v1516_v41 }
  0x83   : > { %v843_v59 = vmul.f32 %v1180_v36, %v1518_v52  ;;  %1121 = vst [vmem:[%s275_s25 + $0x8] sm:$0xff] %v1109_v33   ;;  %v1114_v14 = vpack.c.bf16 %v841_v12, %v840_v4  ;;  %v862_v15 = vadd.f32 %v861_v35, %v839_v58 }
  0x85   : > { %1122 = vst [vmem:[%s275_s25 + $0x10] sm:$0xff] %v1114_v14   ;;  %v1119_v20 = vpack.c.bf16 %v843_v59, %v842_v37  ;;  %v863_v21 = vadd.f32 %v862_v15, %v840_v4 }
  0x87   : > { %1123 = vst [vmem:[%s275_s25 + $0x18] sm:$0xff] %v1119_v20   ;;  %v864_v22 = vadd.f32 %v863_v21, %v841_v12 }
  0x89   : > { %v865_v23 = vadd.f32 %v864_v22, %v842_v37 }
  0x8b   : > { %v866_v24 = vadd.f32 %v865_v23, %v843_v59 }
  0x8d   : > { %v867_v5 = vrot.slane %v866_v24, 4 }
  0x8f   : > { %v868_v25 = vadd.f32 %v867_v5, %v866_v24 }
  0x91   : > { %v869_v38 = vrot.slane %v868_v25, 2 }
  0x93   : > { %v870_v42 = vadd.f32 %v869_v38, %v868_v25 }
  0x95   : > { %v871_v16 = vrot.slane %v870_v42, 1 }
  0x97   : > { %v872_v43 = vadd.f32 %v871_v16, %v870_v42 }
  0x99   : > { %v873_v41 = vmul.f32 0.015625, %v872_v43 }
  0x9b   : > { %874 = vst [vmem:[%s281_s28] sm:$0x1] %v873_v41 }
  0x9c PF: > { %s15_s17 = sadd.s32 1, %s1203_s17   ;;  %s1558_s15 = smov %s1199_s16 }
  0x9d   : > { %p12_p6 = scmp.ge.s32.totalorder %s15_s17, 4   ;;  %s1559_s16 = smov %s1561_s18 }
  0x9f   :  { %14 = sbr.rel (!%p12_p6) target bundleno = 2 (0x2), region = 85 }

// kernel: efficientb5_forward.19
= control target key start
LH: loop header
LB: loop body
LE: loop exit
PB: predicated region body
PF: predicated region fallthrough
CT: control target
= control target key end

     0   :  { %10 = vsyncpa [#allocation3], 0  ;;  %s980_s0 = inlined_call_operand.vmem [shape: bf16[2,16,128], index: 0, kind: input, shape index: {}]   ;;  %s981_s1 = inlined_call_operand.vmem [shape: bf16[128,128], index: 1, kind: input, shape index: {}]   ;;  %s982_s2 = inlined_call_operand.vmem [shape: f32[1,128], index: 2, kind: input, shape index: {}]   ;;  %s983_s3 = inlined_call_operand.vmem [shape: f32[128,4], index: 3, kind: input, shape index: {}]   ;;  %s984_s4 = inlined_call_operand.vmem [shape: f32[1,4], index: 4, kind: input, shape index: {}]   ;;  %s985_s5 = inlined_call_operand.hbm [shape: f32[2,1,4], index: 5, kind: output, shape index: {}]  }
   0x1   :  { %12 = vsyncpa [#allocation3 + $0x1], 0  ;;  %s802_s18 = smov 0   ;;  %s804_s19 = smov 0  }
   0x2   :  { %s806_s20 = smov 0   ;;  %s808_s21 = smov 0  }
   0x3 LB: > { %s823_s22 = sadd.s32 4294967295, %s766_s21   ;;  %s520_s23 = sadd.s32 4294967294, %s766_s21   ;;  %s766_s21 = sphi %s808_s21, %s991_s21   ;;  %s762_s20 = sphi %s806_s20, %s990_s20   ;;  %s758_s19 = sphi %s804_s19, %s989_s19   ;;  %s754_s18 = sphi %s802_s18, %s988_s18  }
   0x4   : > { %s827_s24 = sadd.s32 1, %s766_s21   ;;  %s135_s25 = sadd.s32 1, %s762_s20 }
   0x5   : > { %s132_s26 = ssub.s32 %s766_s21, %s827_s24  ;;  %p145_p0 = scmp.ne.s32.totalorder %s762_s20, %s758_s19 }
   0x6   : > { %p133_p1 = scmp.eq.s32.totalorder %s132_s26, 0  ;;  %p146_p2 = scmp.eq.s32.totalorder %s823_s22, 1 }
   0x7   : > { %p151_p3 = scmp.ne.s32.totalorder %s758_s19, %s754_s18  ;;  %p152_p4 = scmp.eq.s32.totalorder %s520_s23, 1 }
   0x8   : > { %s838_s27 = scalar_select %p133_p1, %s762_s20, %s135_s25  }
   0x9   : > { %p840_p5 = por %p146_p2, %p145_p0  ;;  %p844_p6 = por %p152_p4, %p151_p3 }
   0xa   : > { %p523_p7 = scmp.ge.s32.totalorder %s766_s21, 1  ;;  %p190_p8 = scmp.lt.s32.totalorder %s766_s21, 3 }
   0xc   : > { %p191_p9 = pnand %p523_p7, %p190_p8 }
   0xd   : > { %v687_v0 = vld [vmem:[%s981_s1] sm:$0xff] (!%p191_p9)   ;;  %v768_v1 = vmov (!%p191_p9), 0.0   ;;  %v688_v2 = vld [vmem:[%s981_s1 + $0x8] sm:$0xff] (!%p191_p9)   ;;  %vm769_vm0 = vmmov (!%p191_p9), 0   ;;  %p217_p10 = scmp.lt.s32.totalorder (!%p191_p9), %s823_s22, 1  ;;  %v689_v3 = vld [vmem:[%s981_s1 + $0x10] sm:$0xff] (!%p191_p9)  }
   0xe   : > { %194 = sbr.rel (%p191_p9) target bundleno = 536 (0x218), region = 40  ;;  %566 = vmatprep.subr.bf16.mxu0 (!%p191_p9), %v768_v1  ;;  %582 = vmatprep.mubr.msk.bf16.mxu0 (!%p191_p9), %vm769_vm0, %v768_v1  ;;  %v690_v4 = vld [vmem:[%s981_s1 + $0x18] sm:$0xff] (!%p191_p9)   ;;  %v691_v5 = vld [vmem:[%s981_s1 + $0x20] sm:$0xff] (!%p191_p9)   ;;  %v692_v6 = vld [vmem:[%s981_s1 + $0x28] sm:$0xff] (!%p191_p9)   ;;  %v770_v13 = vmov (!%p191_p9), 0.0|0.0   ;;  %s536_s16 = sshll.u32 (!%p191_p9), %s823_s22, 4 }
   0xf   : > { %567 = vmatpush3.bf16.msra.mxu0 (!%p191_p9), %v687_v0  ;;  %618 = vmatprep.mubr.msk.f32.mxu1 (!%p191_p9), %vm769_vm0, %v768_v1  ;;  %v693_v7 = vld [vmem:[%s981_s1 + $0x30] sm:$0xff] (!%p191_p9)   ;;  %v694_v8 = vld [vmem:[%s981_s1 + $0x38] sm:$0xff] (!%p191_p9)   ;;  %v363_v10 = vld [vmem:[%s983_s3] sm:$0xff] (!%p191_p9)  ;;  %vm450_vm1 = vcmask (!%p191_p9), 24576   ;;  %s938_s26 = scalar_lea.hbm (!%p191_p9), %s985_s5, %s536_s16 }
  0x10   : > { %568 = vmatprep.subr.bf16.mxu0 (!%p191_p9), %v768_v1  ;;  %v364_v11 = vld [vmem:[%s983_s3 + $0x8] sm:$0xff] (!%p191_p9)  ;;  %621 = vmatprep.subr.bf16.mxu1 (!%p191_p9), %v770_v13  ;;  %v365_v14 = vld [vmem:[%s983_s3 + $0x10] sm:$0xff] (!%p191_p9)  ;;  %v366_v15 = vld [vmem:[%s983_s3 + $0x18] sm:$0xff] (!%p191_p9) }
  0x11   : > { %v622_v12 = vpack.c.bf16 (!%p191_p9), %v364_v11, %v363_v10  ;;  %v625_v16 = vpack.c.bf16 (!%p191_p9), %v366_v15, %v365_v14  ;;  %v367_v17 = vld [vmem:[%s983_s3 + $0x20] sm:$0xff] (!%p191_p9)  ;;  %v368_v18 = vld [vmem:[%s983_s3 + $0x28] sm:$0xff] (!%p191_p9)  ;;  %v369_v20 = vld [vmem:[%s983_s3 + $0x30] sm:$0xff] (!%p191_p9) }
  0x12   : > { %v628_v19 = vpack.c.bf16 (!%p191_p9), %v368_v18, %v367_v17  ;;  %v370_v21 = vld [vmem:[%s983_s3 + $0x38] sm:$0xff] (!%p191_p9)  ;;  %v371_v23 = vld [vmem:[%s983_s3 + $0x40] sm:$0xff] (!%p191_p9)  ;;  %v372_v24 = vld [vmem:[%s983_s3 + $0x48] sm:$0xff] (!%p191_p9) }
  0x13   : > { %569 = vmatpush3.bf16.msra.mxu0 (!%p191_p9), %v688_v2  ;;  %623 = vmatpush3.bf16.msra.mxu1 (!%p191_p9), %v622_v12  ;;  %v631_v22 = vpack.c.bf16 (!%p191_p9), %v370_v21, %v369_v20  ;;  %v634_v25 = vpack.c.bf16 (!%p191_p9), %v372_v24, %v371_v23  ;;  %v373_v26 = vld [vmem:[%s983_s3 + $0x50] sm:$0xff] (!%p191_p9)  ;;  %v374_v27 = vld [vmem:[%s983_s3 + $0x58] sm:$0xff] (!%p191_p9)  ;;  %v375_v29 = vld [vmem:[%s983_s3 + $0x60] sm:$0xff] (!%p191_p9) }
  0x14   : > { %570 = vmatprep.subr.bf16.mxu0 (!%p191_p9), %v768_v1  ;;  %624 = vmatprep.subr.bf16.mxu1 (!%p191_p9), %v770_v13  ;;  %v637_v28 = vpack.c.bf16 (!%p191_p9), %v374_v27, %v373_v26  ;;  %v376_v30 = vld [vmem:[%s983_s3 + $0x68] sm:$0xff] (!%p191_p9)  ;;  %v377_v32 = vld [vmem:[%s983_s3 + $0x70] sm:$0xff] (!%p191_p9)  ;;  %v378_v33 = vld [vmem:[%s983_s3 + $0x78] sm:$0xff] (!%p191_p9) }
  0x15   : > { %s218_s9 = scalar_select %p217_p10, %s823_s22, 1  ;;  %v640_v31 = vpack.c.bf16 %v376_v30, %v375_v29  ;;  %v643_v34 = vpack.c.bf16 %v378_v33, %v377_v32  ;;  %v526_v35 = vld [vmem:[%s982_s2] ss:$0 sm:$0xff] }
  0x16   : > { %v379_v62 = vld [vmem:[%s984_s4] sm:$0x1]  ;;  %s771_s22 = smov [#allocation2]  }
  0x17   : > { %s539_s12 = sshll.u32 %s218_s9, 3  ;;  %571 = vmatpush3.bf16.msra.mxu0 %v689_v3  ;;  %626 = vmatpush3.bf16.msra.mxu1 %v625_v16  ;;  %s708_s7 = sshll.u32 %s771_s22, 4  ;;  %s709_s7 = int_to_ptr.vmem [resolvable:$false] %s708_s7 }
  0x18   : > { %s221_s15 = scalar_lea.vmem %s980_s0, %s539_s12  ;;  %572 = vmatprep.subr.bf16.mxu0 %v768_v1  ;;  %627 = vmatprep.subr.bf16.mxu1 %v770_v13  ;;  %s215_s12 = sand.u32 1, %s758_s19  }
  0x19   : > { %v695_v9 = vld [vmem:[%s221_s15] sm:$0xff]   ;;  %s216_s15 = scalar_lea.vmem [#allocation2], %s215_s12  ;;  %s453_s30 = scalar_lea.sflag [#allocation3], %s215_s12 }
  0x1a   : > { %s465_s17 = sshll.u32 %s216_s15, 4  ;;  %s710_s8 = scalar_lea.vmem %s709_s7, 32  ;;  %s940_s17 = int_to_ptr.vmem [resolvable:$true] %s465_s17 }
  0x1b   : > { %573 = vmatpush3.bf16.msra.mxu0 %v690_v4  ;;  %629 = vmatpush3.bf16.msra.mxu1 %v628_v19  ;;  %s704_s6 = scalar_lea.vmem %s940_s17, 16  ;;  %p711_p0 = scmp.lt.s32.totalorder %s940_s17, %s709_s7 }
  0x1c   : > { %574 = vmatprep.subr.bf16.mxu0 %v768_v1  ;;  %630 = vmatprep.subr.bf16.mxu1 %v770_v13  ;;  %p705_p11 = scmp.ne.s32.totalorder %s940_s17, %s704_s6  ;;  %p712_p1 = scmp.lt.s32.totalorder %s710_s8, %s704_s6 }
  0x1e   : > { %p706_p12 = pnand %p705_p11, %p840_p5  ;;  %p713_p2 = por %p712_p1, %p711_p0 }
  0x1f   : > { %575 = vmatpush3.bf16.msra.mxu0 %v691_v5  ;;  %632 = vmatpush3.bf16.msra.mxu1 %v631_v22 }
  0x20   : > { %576 = vmatprep.subr.bf16.mxu0 %v768_v1  ;;  %633 = vmatprep.subr.bf16.mxu1 %v770_v13  ;;  %p707_p13 = pneg %p706_p12 }
  0x22   : > { %p714_p3 = pnand %p713_p2, %p707_p13 }
  0x23   : > { %577 = vmatpush3.bf16.msra.mxu0 %v692_v6  ;;  %635 = vmatpush3.bf16.msra.mxu1 %v634_v25 }
  0x24   : > { %578 = vmatprep.subr.bf16.mxu0 %v768_v1  ;;  %636 = vmatprep.subr.bf16.mxu1 %v770_v13 }
  0x27   : > { %579 = vmatpush3.bf16.msra.mxu0 %v693_v7  ;;  %638 = vmatpush3.bf16.msra.mxu1 %v637_v28 }
  0x28   : > { %580 = vmatprep.subr.bf16.mxu0 %v768_v1  ;;  %639 = vmatprep.subr.bf16.mxu1 %v770_v13 }
  0x2b   : > { %581 = vmatpush3.bf16.msra.mxu0 %v694_v8  ;;  %641 = vmatpush3.bf16.msra.mxu1 %v640_v31 }
  0x2c   : > { %642 = vmatprep.subr.bf16.mxu1 %v770_v13 }
  0x2e   : > { %583 = vmatmul.mubr.bf16.vlgmr.msra.gmra.mrb[0].mxu0 %v695_v9 }
  0x2f   : > { %644 = vmatpush3.bf16.msra.mxu1 %v643_v34 }
 0x101   : > { %v336_v36 = vpop.f32.mrb[0].mxu0 }
 0x102   : > { %v337_v37 = vadd.f32 %v526_v35, %v336_v36  ;;  %v584_v38 = vpop.f32.mrb[1].mxu0 }
 0x103   : > { %v339_v39 = vpop.f32.mrb[2].mxu0 }
 0x104   : > { %v343_v40 = vsub.f32 0.0, %v337_v37  ;;  %v340_v41 = vadd.f32 %v526_v35, %v339_v39  ;;  %v585_v42 = vpop.f32.mrb[3].mxu0 }
 0x106   : > { %v345_v43 = vmul.f32 1.442695, %v343_v40  ;;  %v344_v44 = vsub.f32 0.0, %v340_v41 }
 0x108   : > { %696 = vpow2.f32 %v345_v43  ;;  %v347_v45 = vmul.f32 1.442695, %v344_v44 }
 0x10a   : > { %698 = vpow2.f32 %v347_v45 }
 0x112   : > { %v697_v46 = vpop.eup %696 }
 0x113   : > { %v349_v47 = vadd.f32 1.0, %v697_v46 }
 0x114   : > { %v699_v48 = vpop.eup %698 }
 0x115   : > { %700 = vrcp.f32 %v349_v47  ;;  %v350_v49 = vadd.f32 1.0, %v699_v48 }
 0x117   : > { %702 = vrcp.f32 %v350_v49 }
 0x11f   : > { %v701_v50 = vpop.eup %700 }
 0x120   : > { %v353_v52 = vmul.f32 %v701_v50, %v337_v37 }
 0x121   : > { %v703_v51 = vpop.eup %702 }
 0x122   : > { %v354_v53 = vmul.f32 %v703_v51, %v340_v41 }
 0x124   : > { %v355_v54 = vadd.f32 %v354_v53, %v353_v52 }
 0x126   : > { %v356_v55 = vrot.slane %v355_v54, 4 }
 0x128   : > { %v357_v56 = vadd.f32 %v356_v55, %v355_v54 }
 0x12a   : > { %v358_v57 = vrot.slane %v357_v56, 2 }
 0x12c   : > { %v359_v58 = vadd.f32 %v358_v57, %v357_v56 }
 0x12e   : > { %v360_v59 = vrot.slane %v359_v58, 1 }
 0x130   : > { %v361_v60 = vadd.f32 %v360_v59, %v359_v58 }
 0x132   : > { %v362_v61 = vmul.f32 0.0625, %v361_v60 }
 0x134   : > { %619 = vmatmul.mubr.f32.vlgmr.msra.gmra.mrb[0].mxu1 %v362_v61 }
 0x207   : > { %v446_v63 = vpop.f32.mrb[0].mxu1 }
 0x208   : > { %v447_v0 = vadd.f32 %v446_v63, %v379_v62  ;;  %v620_v1 = vpop.f32.mrb[1].mxu1 }
 0x20a   : > { %451 = vst.msk [vmem:[%s216_s15] sm:$0x1] %vm450_vm1, %v447_v0 }
 0x20b   : > { %717 = shalt.err (!%p714_p3)
}
 0x20c   : > { %s718_s9 = scalar_lea.hbm %s938_s26, 16  ;;  %s722_s12 = scalar_lea.hbm %s985_s5, 32 }
 0x20d   : > { %p719_p4 = scmp.ne.s32.totalorder %s938_s26, %s718_s9  ;;  %p723_p9 = scmp.lt.u32.totalorder %s938_s26, %s985_s5 }
 0x20e   : > { %p724_p10 = scmp.lt.u32.totalorder %s722_s12, %s718_s9  ;;  %p726_p12 = scmp.lt.u32.totalorder %s718_s9, %s938_s26 }
 0x20f   : > { %p720_p7 = pnand %p719_p4, %p840_p5 }
 0x210   : > { %p725_p11 = por %p724_p10, %p723_p9 }
 0x211   : > { %p721_p8 = pneg %p720_p7 }
 0x212   : > { %p727_p13 = por %p726_p12, %p725_p11 }
 0x214   : > { %p728_p0 = pnand %p727_p13, %p721_p8 }
 0x216   : > { %731 = shalt.err (!%p728_p0)
}
 0x217   : > { %645 = dma.vmem_to_hbm [thread:$0]  (%p840_p5), %s940_s17, 16, %s938_s26, %s453_s30  }
 0x218 PF: > { %p651_p1 = scmp.ge.s32.totalorder %s766_s21, 2  ;;  %s477_s16 = sand.u32 1, %s754_s18  }
 0x219   : > { %s478_s15 = scalar_lea.sflag [#allocation3], %s477_s16 }
 0x21a   : > { %p648_p2 = pnand %p651_p1, %p844_p6 }
 0x21c   : > { %749 = dma.done.wait (!%p648_p2), %s478_s15, 16  }
 0x21d   : > { %751 = vsyncadd (!%p648_p2), %s478_s15, 4294967280  ;;  %p15_p3 = scmp.ge.s32.totalorder %s827_s24, 4   ;;  %s988_s18 = smov %s758_s19 }
 0x21e   : > { %s989_s19 = smov %s762_s20  ;;  %s990_s20 = smov %s838_s27 }
 0x21f   : > { %s991_s21 = smov %s827_s24  ;;  %17 = sbr.rel (!%p15_p3) target bundleno = 3 (0x3), region = 75 }
 0x226   :  { %482 = vsyncpa [#allocation3], 1 }
 0x227   :  { %484 = vsyncpa [#allocation3 + $0x1], 1 }

// kernel: efficientb5_forward.18
= control target key start
LH: loop header
LB: loop body
LE: loop exit
PB: predicated region body
PF: predicated region fallthrough
CT: control target
= control target key end

     0   :  { %s1175_s27 = smov 0   ;;  %s1177_s28 = smov 0   ;;  %s1389_s0 = inlined_call_operand.vmem [shape: bf16[2,16,256], index: 0, kind: input, shape index: {}]   ;;  %s1390_s1 = inlined_call_operand.vmem [shape: f32[2,1,256], index: 1, kind: input, shape index: {}]   ;;  %s1391_s2 = inlined_call_operand.vmem [shape: f32[256,6], index: 2, kind: input, shape index: {}]   ;;  %s1392_s3 = inlined_call_operand.vmem [shape: f32[1,6], index: 3, kind: input, shape index: {}]   ;;  %s1393_s4 = inlined_call_operand.vmem [shape: f32[6,256], index: 4, kind: input, shape index: {}]   ;;  %s1394_s5 = inlined_call_operand.vmem [shape: f32[1,256], index: 5, kind: input, shape index: {}]   ;;  %s1395_s6 = inlined_call_operand.vmem [shape: bf16[256,128], index: 6, kind: input, shape index: {}]   ;;  %s1396_s7 = inlined_call_operand.vmem [shape: f32[1,128], index: 7, kind: input, shape index: {}]   ;;  %s1397_s8 = inlined_call_operand.vmem [shape: bf16[2,16,128], index: 8, kind: output, shape index: {}]  }
   0x1   :  { %s1179_s29 = smov 0  }
   0x2 LB: > { %s30_s30 = sadd.s32 1, %s1123_s28  ;;  %p921_p0 = scmp.ge.s32.totalorder %s1127_s29, 1  ;;  %s1127_s29 = sphi %s1179_s29, %s18_s29   ;;  %s1123_s28 = sphi %s1177_s28, %s1399_s28   ;;  %s1119_s27 = sphi %s1175_s27, %s1398_s27  }
   0x3   : > { %p32_p1 = scmp.ge.s32.totalorder %s30_s30, 2  ;;  %p293_p2 = scmp.lt.s32.totalorder %s1127_s29, 3 }
   0x5   : > { %s1401_s30 = smov (%p32_p1, %s30_s30), 0  ;;  %p294_p3 = pnand %p921_p0, %p293_p2 }
   0x6   : > { %v383_v0 = vld [vmem:[%s1391_s2 + $0x80] sm:$0xff] (!%p294_p3)  ;;  %v384_v1 = vld [vmem:[%s1391_s2 + $0x88] sm:$0xff] (!%p294_p3)  ;;  %p341_p4 = scmp.lt.s32.totalorder (!%p294_p3), %s1119_s27, 1  ;;  %v401_v3 = vlaneseq (!%p294_p3)  ;;  %v385_v6 = vld [vmem:[%s1391_s2 + $0x90] sm:$0xff] (!%p294_p3)  ;;  %vm505_vm0 = vcmask (!%p294_p3), 1045504   ;;  %v1129_v57 = vmov (!%p294_p3), 0.0  }
   0x7   : > { %297 = sbr.rel (%p294_p3) target bundleno = 766 (0x2fe), region = 52  ;;  %v367_v2 = vld [vmem:[%s1391_s2] sm:$0xff] (!%p294_p3)  ;;  %v1020_v4 = vpack.c.bf16 (!%p294_p3), %v384_v1, %v383_v0  ;;  %v368_v5 = vld [vmem:[%s1391_s2 + $0x8] sm:$0xff] (!%p294_p3)  ;;  %v386_v7 = vld [vmem:[%s1391_s2 + $0x98] sm:$0xff] (!%p294_p3)  ;;  %vm501_vm1 = vcmask (!%p294_p3), 48128  }
   0x8   : > { %v1022_v8 = vpack.c.bf16 (!%p294_p3), %v368_v5, %v367_v2  ;;  %v1024_v9 = vpack.c.bf16 (!%p294_p3), %v386_v7, %v385_v6  ;;  %v369_v10 = vld [vmem:[%s1391_s2 + $0x10] sm:$0xff] (!%p294_p3)  ;;  %v370_v11 = vld [vmem:[%s1391_s2 + $0x18] sm:$0xff] (!%p294_p3)  ;;  %v387_v12 = vld [vmem:[%s1391_s2 + $0xa0] sm:$0xff] (!%p294_p3)  ;;  %v1225_v14 = vshrl.u32 (!%p294_p3), %v401_v3, 7 }
   0x9   : > { %1021 = vmatprep.subr.bf16.mxu0 (!%p294_p3), %v1020_v4  ;;  %v388_v13 = vld [vmem:[%s1391_s2 + $0xa8] sm:$0xff] (!%p294_p3)  ;;  %v1026_v15 = vpack.c.bf16 (!%p294_p3), %v370_v11, %v369_v10  ;;  %v371_v17 = vld [vmem:[%s1391_s2 + $0x20] sm:$0xff] (!%p294_p3)  ;;  %v389_v19 = vld [vmem:[%s1391_s2 + $0xb0] sm:$0xff] (!%p294_p3) }
   0xa   : > { %1023 = vmatpush3.bf16.msra.mxu0 (!%p294_p3), %v1022_v8  ;;  %v1028_v16 = vpack.c.bf16 (!%p294_p3), %v388_v13, %v387_v12  ;;  %v372_v18 = vld [vmem:[%s1391_s2 + $0x28] sm:$0xff] (!%p294_p3)  ;;  %v390_v20 = vld [vmem:[%s1391_s2 + $0xb8] sm:$0xff] (!%p294_p3)  ;;  %v407_v21 = vsub.s32 (!%p294_p3), 1, %v1225_v14  ;;  %v373_v24 = vld [vmem:[%s1391_s2 + $0x30] sm:$0xff] (!%p294_p3)  ;;  %v1301_v52 = vsub.s32 (!%p294_p3), 0, %v1225_v14 }
   0xb   : > { %1025 = vmatprep.subr.bf16.mxu0 (!%p294_p3), %v1024_v9  ;;  %v1030_v22 = vpack.c.bf16 (!%p294_p3), %v372_v18, %v371_v17  ;;  %v1032_v23 = vpack.c.bf16 (!%p294_p3), %v390_v20, %v389_v19  ;;  %v374_v25 = vld [vmem:[%s1391_s2 + $0x38] sm:$0xff] (!%p294_p3)  ;;  %v391_v26 = vld [vmem:[%s1391_s2 + $0xc0] sm:$0xff] (!%p294_p3)  ;;  %v392_v27 = vld [vmem:[%s1391_s2 + $0xc8] sm:$0xff] (!%p294_p3) }
   0xc   : > { %v375_v29 = vld [vmem:[%s1391_s2 + $0x40] sm:$0xff] (!%p294_p3)  ;;  %v376_v30 = vld [vmem:[%s1391_s2 + $0x48] sm:$0xff] (!%p294_p3)  ;;  %v1034_v32 = vpack.c.bf16 (!%p294_p3), %v374_v25, %v373_v24  ;;  %v393_v33 = vld [vmem:[%s1391_s2 + $0xd0] sm:$0xff] (!%p294_p3)  ;;  %v1036_v35 = vpack.c.bf16 (!%p294_p3), %v392_v27, %v391_v26 }
   0xd   : > { %v394_v34 = vld [vmem:[%s1391_s2 + $0xd8] sm:$0xff] (!%p294_p3)  ;;  %v377_v36 = vld [vmem:[%s1391_s2 + $0x50] sm:$0xff] (!%p294_p3)  ;;  %v1038_v38 = vpack.c.bf16 (!%p294_p3), %v376_v30, %v375_v29  ;;  %v395_v39 = vld [vmem:[%s1391_s2 + $0xe0] sm:$0xff] (!%p294_p3) }
   0xe   : > { %s1403_s27 = smov (!%p341_p4, %s1119_s27), 1  ;;  %1027 = vmatpush3.bf16.msra.mxu0 %v1026_v15  ;;  %v378_v37 = vld [vmem:[%s1391_s2 + $0x58] sm:$0xff]  ;;  %v396_v40 = vld [vmem:[%s1391_s2 + $0xe8] sm:$0xff]  ;;  %v1040_v41 = vpack.c.bf16 %v394_v34, %v393_v33  ;;  %v379_v42 = vld [vmem:[%s1391_s2 + $0x60] sm:$0xff] }
   0xf   : > { %s924_s11 = sshll.u32 %s1403_s27, 1  ;;  %1029 = vmatprep.subr.bf16.mxu0 %v1028_v16  ;;  %v1042_v43 = vpack.c.bf16 %v378_v37, %v377_v36  ;;  %v1044_v44 = vpack.c.bf16 %v396_v40, %v395_v39  ;;  %v380_v45 = vld [vmem:[%s1391_s2 + $0x68] sm:$0xff]  ;;  %v397_v46 = vld [vmem:[%s1391_s2 + $0xf0] sm:$0xff]  ;;  %v398_v47 = vld [vmem:[%s1391_s2 + $0xf8] sm:$0xff]  ;;  %s954_s9 = sshll.u32 %s1403_s27, 4 }
  0x10   : > { %s354_s22 = scalar_lea.vmem %s1390_s1, %s924_s11  ;;  %v1046_v48 = vpack.c.bf16 %v380_v45, %v379_v42  ;;  %v1048_v49 = vpack.c.bf16 %v398_v47, %v397_v46  ;;  %v381_v50 = vld [vmem:[%s1391_s2 + $0x70] sm:$0xff]  ;;  %v382_v51 = vld [vmem:[%s1391_s2 + $0x78] sm:$0xff]  ;;  %v488_v55 = vld [vmem:[%s1393_s4 + $0x8] sm:$0x3f]  ;;  %s349_s11 = scalar_lea.vmem %s1389_s0, %s954_s9 }
  0x11   : > { %v366_v28 = vld [vmem:[%s354_s22] sm:$0x3]  ;;  %v1050_v53 = vpack.c.bf16 %v382_v51, %v381_v50  ;;  %v1079_v7 = vld [vmem:[%s1395_s6 + $0x48] sm:$0xff]   ;;  %v1081_v9 = vld [vmem:[%s1395_s6 + $0x50] sm:$0xff]   ;;  %s955_s15 = sshll.u32 %s1403_s27, 3 }
  0x12   : > { %v408_v31 = vrot.slane %v366_v28, %v407_v21  ;;  %1031 = vmatpush3.bf16.msra.mxu0 %v1030_v22  ;;  %v404_v54 = vrot.slane %v366_v28, %v1301_v52  ;;  %v487_v56 = vld [vmem:[%s1393_s4] sm:$0x3f]  ;;  %v1080_v8 = vld [vmem:[%s1395_s6 + $0x8] sm:$0xff]   ;;  %v1082_v10 = vld [vmem:[%s1395_s6 + $0x10] sm:$0xff]   ;;  %s363_s18 = scalar_lea.vmem %s1397_s8, %s955_s15 }
  0x13   : > { %1033 = vmatprep.subr.bf16.mxu0 %v1032_v23  ;;  %v399_v59 = vld [vmem:[%s1392_s3] sm:$0x1]  ;;  %v1083_v11 = vld [vmem:[%s1395_s6 + $0x58] sm:$0xff]   ;;  %v1087_v16 = vld [vmem:[%s1395_s6 + $0x68] sm:$0xff]  }
  0x14   : > { %475 = vmatprep.mubr.f32.mxu0 %v408_v31  ;;  %v1077_v5 = vld [vmem:[%s1395_s6 + $0x40] sm:$0xff]   ;;  %v1084_v12 = vld [vmem:[%s1395_s6 + $0x18] sm:$0xff]   ;;  %v1088_v17 = vld [vmem:[%s1395_s6 + $0x28] sm:$0xff]  }
  0x15   : > { %v1078_v6 = vld [vmem:[%s1395_s6] sm:$0xff]   ;;  %998 = vmatprep.subr.bf16.mxu1 %v1077_v5  ;;  %v1089_v18 = vld [vmem:[%s1395_s6 + $0x70] sm:$0xff]   ;;  %v1091_v20 = vld [vmem:[%s1395_s6 + $0x78] sm:$0xff]  }
  0x16   : > { %1035 = vmatpush3.bf16.msra.mxu0 %v1034_v32  ;;  %999 = vmatpush3.bf16.msra.mxu1 %v1078_v6  ;;  %v1085_v13 = vld [vmem:[%s1395_s6 + $0x60] sm:$0xff]   ;;  %v1090_v19 = vld [vmem:[%s1395_s6 + $0x30] sm:$0xff]   ;;  %v1092_v22 = vld [vmem:[%s1395_s6 + $0x38] sm:$0xff]  }
  0x17   : > { %1037 = vmatprep.subr.bf16.mxu0 %v1036_v35  ;;  %1000 = vmatprep.subr.bf16.mxu1 %v1079_v7  ;;  %v1086_v15 = vld [vmem:[%s1395_s6 + $0x20] sm:$0xff]   ;;  %v594_v45 = vld [vmem:[%s349_s11 + $0x8] sm:$0xff] }
  0x18   : > { %v489_v23 = vld [vmem:[%s1394_s5] sm:$0x3] }
  0x19   : > { %v494_v24 = vrot.slane %v489_v23, %v1301_v52  ;;  %v498_v25 = vrot.slane %v489_v23, %v407_v21 }
  0x1a   : > { %1039 = vmatpush3.bf16.msra.mxu0 %v1038_v38  ;;  %1001 = vmatpush3.bf16.msra.mxu1 %v1080_v8 }
  0x1b   : > { %1041 = vmatprep.subr.bf16.mxu0 %v1040_v41  ;;  %1002 = vmatprep.subr.bf16.mxu1 %v1081_v9 }
  0x1e   : > { %1043 = vmatpush3.bf16.msra.mxu0 %v1042_v43  ;;  %1003 = vmatpush3.bf16.msra.mxu1 %v1082_v10 }
  0x1f   : > { %1045 = vmatprep.subr.bf16.mxu0 %v1044_v44  ;;  %1004 = vmatprep.subr.bf16.mxu1 %v1083_v11  ;;  %v593_v44 = vld [vmem:[%s349_s11] sm:$0xff] }
  0x22   : > { %1047 = vmatpush3.bf16.msra.mxu0 %v1046_v48  ;;  %1005 = vmatpush3.bf16.msra.mxu1 %v1084_v12 }
  0x23   : > { %1049 = vmatprep.subr.bf16.mxu0 %v1048_v49  ;;  %1006 = vmatprep.subr.bf16.mxu1 %v1085_v13 }
  0x26   : > { %1051 = vmatpush3.bf16.msra.mxu0 %v1050_v53  ;;  %1007 = vmatpush3.bf16.msra.mxu1 %v1086_v15 }
  0x27   : > { %927 = vmatprep.subr.msk.mxu0 %vm505_vm0, %v488_v55  ;;  %1008 = vmatprep.subr.bf16.mxu1 %v1087_v16 }
  0x29   : > { %476 = vmatmul.mubr.f32.vlgmr.msra.gmra.mrb[0].mxu0 %v404_v54 }
  0x2a   : > { %928 = vmatpush1.msk.msra.mxu0 %vm505_vm0, %v487_v56  ;;  %576 = vmatprep.mubr.f32.mxu0 %v1129_v57  ;;  %v931_v56 = vld [vmem:[%s1396_s7] ss:$0 sm:$0xff] }
  0x2b   : > { %1009 = vmatpush3.bf16.msra.mxu1 %v1088_v17 }
  0x2c   : > { %1010 = vmatprep.subr.bf16.mxu1 %v1089_v18 }
  0x2f   : > { %1011 = vmatpush3.bf16.msra.mxu1 %v1090_v19 }
  0x30   : > { %1012 = vmatprep.subr.bf16.mxu1 %v1091_v20 }
  0x33   : > { %1013 = vmatpush3.bf16.msra.mxu1 %v1092_v22 }
  0xfc   : > { %v995_v58 = vpop.f32.mrb[0].mxu0 }
  0xfd   : > { %v996_v60 = vpop.f32.mrb[1].mxu0 }
  0xfe   : > { %v997_v61 = vadd.f32 %v996_v60, %v995_v58 }
 0x100   : > { %v478_v62 = vadd.f32 %v997_v61, %v399_v59 }
 0x102   : > { %v481_v63 = vsub.f32 0.0, %v478_v62 }
 0x104   : > { %v482_v0 = vmul.f32 1.442695, %v481_v63 }
 0x106   : > { %1093 = vpow2.f32 %v482_v0 }
 0x110   : > { %v1094_v1 = vpop.eup %1093 }
 0x111   : > { %v484_v2 = vadd.f32 1.0, %v1094_v1 }
 0x113   : > { %1095 = vrcp.f32 %v484_v2 }
 0x11d   : > { %v1096_v3 = vpop.eup %1095 }
 0x11e   : > { %v486_v4 = vmul.f32 %v1096_v3, %v478_v62 }
 0x120   : > { %929 = vmatmul.mubr.msk.f32.vlgmr.msra.gmra.mrb[2].mxu0 %vm501_vm1, %v486_v4 }
 0x1f3   : > { %v578_v26 = vpop.f32.mrb[2].mxu0 }
 0x1f4   : > { %v579_v27 = vadd.f32 %v578_v26, %v494_v24  ;;  %v580_v28 = vpop.f32.mrb[3].mxu0 }
 0x1f5   : > { %v581_v29 = vadd.f32 %v580_v28, %v498_v25 }
 0x1f6   : > { %v583_v30 = vsub.f32 0.0, %v579_v27 }
 0x1f7   : > { %v584_v31 = vsub.f32 0.0, %v581_v29 }
 0x1f8   : > { %v585_v32 = vmul.f32 1.442695, %v583_v30 }
 0x1f9   : > { %v587_v33 = vmul.f32 1.442695, %v584_v31 }
 0x1fa   : > { %1097 = vpow2.f32 %v585_v32 }
 0x1fb   : > { %1099 = vpow2.f32 %v587_v33 }
 0x204   : > { %v1098_v34 = vpop.eup %1097 }
 0x205   : > { %v1100_v35 = vpop.eup %1099  ;;  %v589_v36 = vadd.f32 1.0, %v1098_v34 }
 0x206   : > { %v590_v37 = vadd.f32 1.0, %v1100_v35 }
 0x207   : > { %1101 = vrcp.f32 %v589_v36 }
 0x208   : > { %1103 = vrcp.f32 %v590_v37 }
 0x211   : > { %v1102_v38 = vpop.eup %1101 }
 0x212   : > { %v1104_v14 = vpop.eup %1103  ;;  %v595_v21 = vpack.c.bf16 %v1102_v38, %v1102_v38 }
 0x213   : > { %v596_v39 = vpack.c.bf16 %v1104_v14, %v1104_v14 }
 0x214   : > { %v598_v40 = vpack.i.b16 %v595_v21, %v595_v21 }
 0x215   : > { %v605_v41 = vpack.i.b16 %v596_v39, %v596_v39 }
 0x216   : > { %v603_v42 = vrot.slane %v598_v40, %v1301_v52 }
 0x217   : > { %v610_v43 = vrot.slane %v605_v41, %v1301_v52 }
 0x219   : > { %v930_v46 = vcombine.low %v603_v42, %v610_v43 }
 0x21b   : > { %v617_v47 = vmul.bf16 %v930_v46, %v593_v44  ;;  %v618_v48 = vmul.bf16 %v930_v46, %v594_v45 }
 0x21d   : > { %v933_v49 = vcombine.high %v617_v47, %v618_v48  ;;  %v932_v50 = vcombine.low %v617_v47, %v618_v48 }
 0x21f   : > { %796 = vmatprep.mubr.bf16.mxu1 %v933_v49 }
 0x220   : > { %797 = vmatmul.mubr.bf16.vlgmr.msra.gmra.mrb[0].mxu1 %v932_v50 }
 0x2f3   : > { %v1014_v51 = vpop.f32.mrb[0].mxu1 }
 0x2f4   : > { %v1015_v53 = vpop.f32.mrb[1].mxu1 }
 0x2f5   : > { %v1016_v54 = vadd.f32 %v1015_v53, %v1014_v51  ;;  %v1017_v55 = vpop.f32.mrb[2].mxu1 }
 0x2f6   : > { %v1018_v57 = vpop.f32.mrb[3].mxu1 }
 0x2f7   : > { %v1019_v52 = vadd.f32 %v1018_v57, %v1017_v55  ;;  %v799_v58 = vadd.f32 %v1016_v54, %v931_v56 }
 0x2f9   : > { %v802_v59 = vadd.f32 %v1019_v52, %v931_v56 }
 0x2fb   : > { %v961_v60 = vpack.c.bf16 %v802_v59, %v799_v58 }
 0x2fd   : > { %962 = vst [vmem:[%s363_s18] sm:$0xff] %v961_v60  }
 0x2fe PF: > { %s18_s29 = sadd.s32 1, %s1127_s29   ;;  %s1398_s27 = smov %s1123_s28 }
 0x2ff   : > { %p15_p5 = scmp.ge.s32.totalorder %s18_s29, 4   ;;  %s1399_s28 = smov %s1401_s30 }
 0x301   :  { %17 = sbr.rel (!%p15_p5) target bundleno = 2 (0x2), region = 85 }

// kernel: efficientb5_forward.17
= control target key start
LH: loop header
LB: loop body
LE: loop exit
PB: predicated region body
PF: predicated region fallthrough
CT: control target
= control target key end

     0   :  { %s1736_s15 = smov 0   ;;  %s1738_s16 = smov 0   ;;  %s2094_s0 = inlined_call_operand.vmem [shape: bf16[8,6,6,256], index: 0, kind: input, shape index: {}]   ;;  %s2095_s1 = inlined_call_operand.vmem [shape: f32[25,256], index: 1, kind: input, shape index: {}]   ;;  %s2096_s2 = inlined_call_operand.vmem [shape: f32[1,256], index: 2, kind: input, shape index: {}]   ;;  %s2097_s3 = inlined_call_operand.vmem [shape: bf16[2,4,4,256], index: 3, kind: output, shape index: {0}]   ;;  %s2098_s4 = inlined_call_operand.vmem [shape: f32[2,1,256], index: 4, kind: output, shape index: {1}]  }
   0x1   :  { %s1740_s17 = smov 0   ;;  %s1742_s18 = smov 0  }
   0x2   :  { %s1744_s19 = smov 0   ;;  %s1746_s20 = smov 0  }
   0x3   :  { %s1748_s21 = smov 0   ;;  %s1750_s22 = smov 0  }
   0x4   :  { %s1752_s23 = smov 0  }
   0x5 LB: > { %s1416_s24 = sadd.s32 4294967295, %s1709_s23   ;;  %s24_s25 = sadd.s32 1, %s1701_s21  ;;  %s1709_s23 = sphi %s1752_s23, %s15_s23   ;;  %s1705_s22 = sphi %s1750_s22, %s2109_s22   ;;  %s1701_s21 = sphi %s1748_s21, %s2108_s21   ;;  %s1697_s20 = sphi %s1746_s20, %s2107_s20   ;;  %s1693_s19 = sphi %s1744_s19, %s2106_s19   ;;  %s1689_s18 = sphi %s1742_s18, %s2105_s18   ;;  %s1685_s17 = sphi %s1740_s17, %s2104_s17   ;;  %s1681_s16 = sphi %s1738_s16, %s2103_s16   ;;  %s1677_s15 = sphi %s1736_s15, %s2102_s15  }
   0x6   : > { %p25_p0 = scmp.ge.s32.totalorder %s24_s25, 2  ;;  %s27_s26 = sadd.s32 1, %s1705_s22 }
   0x7   : > { %s36_s27 = sadd.s32 1, %s1689_s18  ;;  %p43_p1 = scmp.ne.s32.totalorder %s1689_s18, %s1685_s17 }
   0x8   : > { %s2111_s25 = smov (%p25_p0, %s24_s25), 0  ;;  %s2113_s26 = smov (!%p25_p0, %s27_s26), %s1705_s22 }
   0x9   : > { %s32_s28 = ssub.s32 %s1701_s21, %s2111_s25  ;;  %p44_p2 = scmp.eq.s32.totalorder %s1709_s23, 0 }
   0xa   : > { %p29_p3 = scmp.ge.s32.totalorder %s2113_s26, 2  ;;  %p60_p4 = scmp.eq.s32.totalorder %s32_s28, 0 }
   0xb   : > { %p1796_p5 = por %p44_p2, %p43_p1  ;;  %s62_s30 = sadd.s32 1, %s1681_s16 }
   0xc   : > { %s2115_s26 = smov (%p29_p3, %s2113_s26), 0  ;;  %p69_p6 = scmp.ne.s32.totalorder %s1681_s16, %s1677_s15 }
   0xd   : > { %s1804_s5 = scalar_select %p60_p4, %s1681_s16, %s62_s30  }
   0xe   : > { %s31_s6 = ssub.s32 %s1705_s22, %s2115_s26  ;;  %p127_p7 = scmp.eq.s32.totalorder %s1416_s24, 3 }
   0xf   : > { %s33_s7 = sor.u32 %s32_s28, %s31_s6  ;;  %p1810_p9 = por %p69_p6, %p44_p2 }
  0x10   : > { %p34_p8 = scmp.eq.s32.totalorder %s33_s7, 0  ;;  %p1817_p10 = por %p127_p7, %p43_p1 }
  0x11   : > { %p1419_p11 = scmp.ge.s32.totalorder %s1709_s23, 4 }
  0x12   : > { %s1822_s10 = scalar_select %p34_p8, %s1689_s18, %s36_s27  }
  0x13   : > { %177 = sbr.rel (%p1419_p11) target bundleno = 56 (0x38), region = 16 }
  0x1a   : > { %180 = sbr.rel (!%p1796_p5) target bundleno = 49 (0x31), region = 20  ;;  %s182_s11 = sand.u32 (%p1796_p5), 1, %s1689_s18  }
  0x1b   : > { %s1549_s12 = smul.u32 (%p1796_p5), 48, %s1705_s22 }
  0x1c   : > { %s1548_s13 = smul.u32 (%p1796_p5), 96, %s182_s11 }
  0x1d   : > { %s187_s14 = sadd.s32 (%p1796_p5), %s1701_s21, %s1549_s12 }
  0x1e   : > { %s1422_s24 = sshll.u32 (%p1796_p5), %s187_s14, 2  ;;  %s1838_s27 = scalar_lea.vmem (%p1796_p5), [#allocation2], %s1548_s13 }
  0x1f   : > { %s1833_s6 = scalar_lea.vmem (%p1796_p5), %s2094_s0, %s1422_s24 }
  0x20   : > { %v205_v0 = vld [vmem:[%s1833_s6] sm:$0xf] (%p1796_p5)  ;;  %v207_v1 = vld [vmem:[%s1833_s6 + $0x8] sm:$0xf] (%p1796_p5)  ;;  %v209_v2 = vld [vmem:[%s1833_s6 + $0x10] sm:$0xf] (%p1796_p5) }
  0x21   : > { %206 = vst [vmem:[%s1838_s27] sm:$0xf] %v205_v0  ;;  %208 = vst [vmem:[%s1838_s27 + $0x4] sm:$0xf] %v207_v1  ;;  %v211_v3 = vld [vmem:[%s1833_s6 + $0x18] sm:$0xf] }
  0x22   : > { %210 = vst [vmem:[%s1838_s27 + $0x8] sm:$0xf] %v209_v2  ;;  %v213_v4 = vld [vmem:[%s1833_s6 + $0x20] sm:$0xf]  ;;  %v215_v5 = vld [vmem:[%s1833_s6 + $0x28] sm:$0xf] }
  0x23   : > { %212 = vst [vmem:[%s1838_s27 + $0xc] sm:$0xf] %v211_v3  ;;  %214 = vst [vmem:[%s1838_s27 + $0x10] sm:$0xf] %v213_v4  ;;  %v217_v6 = vld [vmem:[%s1833_s6 + $0x30] sm:$0xf] }
  0x24   : > { %216 = vst [vmem:[%s1838_s27 + $0x14] sm:$0xf] %v215_v5  ;;  %v219_v7 = vld [vmem:[%s1833_s6 + $0x38] sm:$0xf]  ;;  %v221_v8 = vld [vmem:[%s1833_s6 + $0x40] sm:$0xf] }
  0x25   : > { %218 = vst [vmem:[%s1838_s27 + $0x18] sm:$0xf] %v217_v6  ;;  %220 = vst [vmem:[%s1838_s27 + $0x1c] sm:$0xf] %v219_v7  ;;  %v223_v9 = vld [vmem:[%s1833_s6 + $0x48] sm:$0xf] }
  0x26   : > { %222 = vst [vmem:[%s1838_s27 + $0x20] sm:$0xf] %v221_v8  ;;  %v225_v10 = vld [vmem:[%s1833_s6 + $0x50] sm:$0xf]  ;;  %v227_v11 = vld [vmem:[%s1833_s6 + $0x58] sm:$0xf] }
  0x27   : > { %224 = vst [vmem:[%s1838_s27 + $0x24] sm:$0xf] %v223_v9  ;;  %226 = vst [vmem:[%s1838_s27 + $0x28] sm:$0xf] %v225_v10  ;;  %v229_v12 = vld [vmem:[%s1833_s6 + $0x60] sm:$0xf] }
  0x28   : > { %228 = vst [vmem:[%s1838_s27 + $0x2c] sm:$0xf] %v227_v11  ;;  %v231_v13 = vld [vmem:[%s1833_s6 + $0x68] sm:$0xf]  ;;  %v233_v14 = vld [vmem:[%s1833_s6 + $0x70] sm:$0xf] }
  0x29   : > { %230 = vst [vmem:[%s1838_s27 + $0x30] sm:$0xf] %v229_v12  ;;  %232 = vst [vmem:[%s1838_s27 + $0x34] sm:$0xf] %v231_v13  ;;  %v235_v15 = vld [vmem:[%s1833_s6 + $0x78] sm:$0xf] }
  0x2a   : > { %234 = vst [vmem:[%s1838_s27 + $0x38] sm:$0xf] %v233_v14  ;;  %v237_v16 = vld [vmem:[%s1833_s6 + $0x80] sm:$0xf]  ;;  %v239_v17 = vld [vmem:[%s1833_s6 + $0x88] sm:$0xf] }
  0x2b   : > { %236 = vst [vmem:[%s1838_s27 + $0x3c] sm:$0xf] %v235_v15  ;;  %238 = vst [vmem:[%s1838_s27 + $0x40] sm:$0xf] %v237_v16  ;;  %v241_v18 = vld [vmem:[%s1833_s6 + $0x90] sm:$0xf] }
  0x2c   : > { %240 = vst [vmem:[%s1838_s27 + $0x44] sm:$0xf] %v239_v17  ;;  %v243_v19 = vld [vmem:[%s1833_s6 + $0x98] sm:$0xf]  ;;  %v245_v20 = vld [vmem:[%s1833_s6 + $0xa0] sm:$0xf] }
  0x2d   : > { %242 = vst [vmem:[%s1838_s27 + $0x48] sm:$0xf] %v241_v18  ;;  %244 = vst [vmem:[%s1838_s27 + $0x4c] sm:$0xf] %v243_v19  ;;  %v247_v21 = vld [vmem:[%s1833_s6 + $0xa8] sm:$0xf] }
  0x2e   : > { %246 = vst [vmem:[%s1838_s27 + $0x50] sm:$0xf] %v245_v20  ;;  %v249_v22 = vld [vmem:[%s1833_s6 + $0xb0] sm:$0xf]  ;;  %v251_v23 = vld [vmem:[%s1833_s6 + $0xb8] sm:$0xf] }
  0x2f   : > { %248 = vst [vmem:[%s1838_s27 + $0x54] sm:$0xf] %v247_v21  ;;  %250 = vst [vmem:[%s1838_s27 + $0x58] sm:$0xf] %v249_v22 }
  0x30   : > { %252 = vst [vmem:[%s1838_s27 + $0x5c] sm:$0xf] %v251_v23 }
  0x31 PF: > { %323 = sbr.rel (!%p1810_p9) target bundleno = 56 (0x38), region = 61  ;;  %s325_s29 = sand.u32 (%p1810_p9), 1, %s1681_s16  }
  0x32   : > { %s1424_s7 = sshll.u32 (%p1810_p9), %s1701_s21, 3  ;;  %s1423_s11 = sshll.u32 (%p1810_p9), %s325_s29, 5 }
  0x33   : > { %s329_s14 = scalar_lea.vmem (%p1810_p9), %s2095_s1, %s1424_s7  ;;  %s327_s24 = scalar_lea.vmem (%p1810_p9), [#allocation3], %s1423_s11 }
  0x34   : > { %v363_v24 = vld [vmem:[%s329_s14] sm:$0xff] (%p1810_p9)  ;;  %v365_v25 = vld [vmem:[%s329_s14 + $0x10] sm:$0xff] (%p1810_p9) }
  0x35   : > { %v367_v26 = vld [vmem:[%s329_s14 + $0x20] sm:$0xff] (%p1810_p9)  ;;  %364 = vst [vmem:[%s327_s24] sm:$0xff] (%p1810_p9), %v363_v24  ;;  %366 = vst [vmem:[%s327_s24 + $0x8] sm:$0xff] (%p1810_p9), %v365_v25  ;;  %v369_v27 = vld [vmem:[%s329_s14 + $0x30] sm:$0xff] (%p1810_p9) }
  0x36   : > { %368 = vst [vmem:[%s327_s24 + $0x10] sm:$0xff] (%p1810_p9), %v367_v26  ;;  %370 = vst [vmem:[%s327_s24 + $0x18] sm:$0xff] (%p1810_p9), %v369_v27 }
  0x38 PF: > { %p1425_p12 = scmp.ge.s32.totalorder %s1709_s23, 1  ;;  %p381_p13 = scmp.lt.s32.totalorder %s1709_s23, 5 }
  0x3a   : > { %p382_p0 = pnand %p1425_p12, %p381_p13 }
  0x3b   : > { %s388_s8 = sand.u32 (!%p382_p0), 1, %s1685_s17   ;;  %s395_s28 = sand.u32 (!%p382_p0), 1, %s1677_s15   ;;  %vm1197_vm0 = vcmask (!%p382_p0), 1043456  }
  0x3c   : > { %385 = sbr.rel (%p382_p0) target bundleno = 213 (0xd5), region = 103  ;;  %s1426_s6 = sshll.u32 (!%p382_p0), %s395_s28, 5 }
  0x3d   : > { %s1550_s30 = smul.u32 (!%p382_p0), 96, %s388_s8  ;;  %s1898_s27 = scalar_lea.vmem (!%p382_p0), [#allocation3], %s1426_s6 }
  0x3e   : > { %v1429_v28 = vld [vmem:[%s1898_s27] ss:$0 sm:$0xff] (!%p382_p0)  ;;  %v1434_v31 = vld [vmem:[%s1898_s27 + $0x1] ss:$0 sm:$0xff] (!%p382_p0)  ;;  %v1435_v57 = vld [vmem:[%s1898_s27 + $0x2] ss:$0 sm:$0xff] (!%p382_p0) }
  0x3f   : > { %s1901_s29 = scalar_lea.vmem (!%p382_p0), [#allocation2], %s1550_s30  ;;  %v1440_v8 = vld [vmem:[%s1898_s27 + $0x3] ss:$0 sm:$0xff] (!%p382_p0)  ;;  %p434_p1 = scmp.lt.s32.totalorder (!%p382_p0), %s1693_s19, 1 }
  0x40   : > { %v444_v29 = vld [vmem:[%s1901_s29] sm:$0x3] (!%p382_p0)  ;;  %v445_v30 = vld [vmem:[%s1901_s29 + $0x4] sm:$0x3] (!%p382_p0)  ;;  %v446_v32 = vld [vmem:[%s1901_s29 + $0x8] sm:$0x3] (!%p382_p0) }
  0x41   : > { %v447_v33 = vld [vmem:[%s1901_s29 + $0xc] sm:$0x3] (!%p382_p0)  ;;  %v449_v34 = vunpack.c.l.bf16 (!%p382_p0), %v444_v29  ;;  %v450_v35 = vunpack.c.l.bf16 (!%p382_p0), %v445_v30  ;;  %v1430_v36 = vld [vmem:[%s1901_s29 + $0x18] sm:$0x3] (!%p382_p0)  ;;  %v451_v37 = vunpack.c.l.bf16 (!%p382_p0), %v446_v32  ;;  %v1431_v39 = vld [vmem:[%s1901_s29 + $0x1c] sm:$0x3] (!%p382_p0) }
  0x42   : > { %v452_v38 = vunpack.c.l.bf16 (!%p382_p0), %v447_v33  ;;  %v1432_v40 = vld [vmem:[%s1901_s29 + $0x20] sm:$0x3] (!%p382_p0)  ;;  %v467_v41 = vunpack.c.l.bf16 (!%p382_p0), %v1430_v36  ;;  %v1433_v44 = vld [vmem:[%s1901_s29 + $0x24] sm:$0x3] (!%p382_p0)  ;;  %v468_v45 = vunpack.c.l.bf16 (!%p382_p0), %v1431_v39  ;;  %v485_v53 = vld [vmem:[%s1901_s29 + $0x8] sm:$0x7] (!%p382_p0) }
  0x43   : > { %v457_v42 = vmul.f32 %v1429_v28, %v449_v34  ;;  %v458_v43 = vmul.f32 %v1429_v28, %v450_v35  ;;  %v469_v46 = vunpack.c.l.bf16 %v1432_v40  ;;  %v483_v47 = vld [vmem:[%s1901_s29] sm:$0x7]  ;;  %v459_v48 = vmul.f32 %v1429_v28, %v451_v37  ;;  %v484_v52 = vld [vmem:[%s1901_s29 + $0x4] sm:$0x7]  ;;  %v486_v54 = vld [vmem:[%s1901_s29 + $0xc] sm:$0x7] }
  0x44   : > { %v460_v49 = vmul.f32 %v1429_v28, %v452_v38  ;;  %v470_v50 = vunpack.c.l.bf16 %v1433_v44  ;;  %v475_v51 = vmul.f32 %v1434_v31, %v467_v41  ;;  %v476_v55 = vmul.f32 %v1434_v31, %v468_v45  ;;  %v1436_v60 = vld [vmem:[%s1901_s29 + $0x18] sm:$0x7]  ;;  %v1437_v1 = vld [vmem:[%s1901_s29 + $0x1c] sm:$0x7]  ;;  %v1438_v2 = vld [vmem:[%s1901_s29 + $0x20] sm:$0x7] }
  0x45   : > { %v477_v56 = vmul.f32 %v1434_v31, %v469_v46  ;;  %v488_v58 = vunpack.c.l.bf16 %v483_v47  ;;  %v489_v59 = vunpack.c.l.bf16 %v484_v52  ;;  %v490_v63 = vunpack.c.l.bf16 %v485_v53  ;;  %v1439_v7 = vld [vmem:[%s1901_s29 + $0x24] sm:$0x7]  ;;  %v549_v21 = vld [vmem:[%s1901_s29] sm:$0x6]  ;;  %v551_v27 = vld [vmem:[%s1901_s29 + $0x8] sm:$0x6] }
  0x46   : > { %v478_v61 = vmul.f32 %v1434_v31, %v470_v50  ;;  %v479_v62 = vadd.f32 %v475_v51, %v457_v42  ;;  %v491_v0 = vunpack.c.l.bf16 %v486_v54  ;;  %v480_v3 = vadd.f32 %v476_v55, %v458_v43  ;;  %v550_v22 = vld [vmem:[%s1901_s29 + $0x4] sm:$0x6]  ;;  %v552_v28 = vld [vmem:[%s1901_s29 + $0xc] sm:$0x6]  ;;  %v1441_v33 = vld [vmem:[%s1898_s27 + $0x4] ss:$0 sm:$0xff] }
  0x47   : > { %v481_v4 = vadd.f32 %v477_v56, %v459_v48  ;;  %v496_v5 = vmul.f32 %v1435_v57, %v488_v58  ;;  %v497_v6 = vmul.f32 %v1435_v57, %v489_v59  ;;  %v498_v10 = vmul.f32 %v1435_v57, %v490_v63  ;;  %v1442_v38 = vld [vmem:[%s1901_s29 + $0x30] sm:$0x3]  ;;  %v1443_v43 = vld [vmem:[%s1901_s29 + $0x34] sm:$0x3]  ;;  %v1444_v44 = vld [vmem:[%s1901_s29 + $0x38] sm:$0x3] }
  0x48   : > { %v482_v9 = vadd.f32 %v478_v61, %v460_v49  ;;  %v499_v11 = vmul.f32 %v1435_v57, %v491_v0  ;;  %v521_v12 = vunpack.c.l.bf16 %v1436_v60  ;;  %v522_v15 = vunpack.c.l.bf16 %v1437_v1  ;;  %v1445_v49 = vld [vmem:[%s1901_s29 + $0x3c] sm:$0x3]  ;;  %v1446_v50 = vld [vmem:[%s1898_s27 + $0x5] ss:$0 sm:$0xff]  ;;  %v1447_v59 = vld [vmem:[%s1901_s29 + $0x48] sm:$0x3] }
  0x49   : > { %v504_v13 = vrot.slane %v496_v5, 1  ;;  %v505_v14 = vrot.slane %v497_v6, 1  ;;  %v523_v16 = vunpack.c.l.bf16 %v1438_v2  ;;  %v506_v17 = vrot.slane %v498_v10, 1  ;;  %v1448_v0 = vld [vmem:[%s1901_s29 + $0x4c] sm:$0x3]  ;;  %s2028_s15 = scalar_select %p434_p1, %s1693_s19, 1 }
  0x4a   : > { %v507_v18 = vrot.slane %v499_v11, 1  ;;  %v524_v19 = vunpack.c.l.bf16 %v1439_v7  ;;  %v529_v20 = vmul.f32 %v1440_v8, %v521_v12  ;;  %v530_v25 = vmul.f32 %v1440_v8, %v522_v15  ;;  %v1449_v1 = vld [vmem:[%s1901_s29 + $0x50] sm:$0x3]  ;;  %v1450_v6 = vld [vmem:[%s1901_s29 + $0x54] sm:$0x3]  ;;  %s1427_s13 = sshll.u32 %s388_s8, 3 }
  0x4b   : > { %v512_v23 = vadd.f32 %v504_v13, %v479_v62  ;;  %v513_v24 = vadd.f32 %v505_v14, %v480_v3  ;;  %v531_v26 = vmul.f32 %v1440_v8, %v523_v16  ;;  %v514_v29 = vadd.f32 %v506_v17, %v481_v4  ;;  %v1451_v7 = vld [vmem:[%s1898_s27 + $0x6] ss:$0 sm:$0xff]  ;;  %v1452_v12 = vld [vmem:[%s1901_s29 + $0x30] sm:$0x7]  ;;  %v1453_v13 = vld [vmem:[%s1901_s29 + $0x34] sm:$0x7]  ;;  %s436_s12 = scalar_lea.vmem %s2096_s2, %s2028_s15 }
  0x4c   : > { %v515_v30 = vadd.f32 %v507_v18, %v482_v9  ;;  %v532_v31 = vmul.f32 %v1440_v8, %v524_v19  ;;  %v537_v32 = vrot.slane %v529_v20, 1  ;;  %v538_v34 = vrot.slane %v530_v25, 1  ;;  %v1454_v18 = vld [vmem:[%s1901_s29 + $0x38] sm:$0x7]  ;;  %v1455_v19 = vld [vmem:[%s1901_s29 + $0x3c] sm:$0x7] }
  0x4d   : > { %v539_v35 = vrot.slane %v531_v26, 1  ;;  %v554_v36 = vunpack.c.l.bf16 %v549_v21  ;;  %v555_v37 = vunpack.c.l.bf16 %v550_v22  ;;  %v556_v41 = vunpack.c.l.bf16 %v551_v27  ;;  %s2041_s17 = scalar_lea.vmem [#allocation4], %s1427_s13  ;;  %p437_p2 = scmp.lt.s32.totalorder %s1697_s20, 1 }
  0x4e   : > { %v540_v39 = vrot.slane %v532_v31, 1  ;;  %v545_v40 = vadd.f32 %v537_v32, %v512_v23  ;;  %v557_v42 = vunpack.c.l.bf16 %v552_v28  ;;  %v546_v45 = vadd.f32 %v538_v34, %v513_v24  ;;  %v1456_v24 = vld [vmem:[%s1898_s27 + $0x7] ss:$0 sm:$0xff]  ;;  %v1458_v34 = vld [vmem:[%s1901_s29 + $0x4c] sm:$0x7] }
  0x4f   : > { %v547_v46 = vadd.f32 %v539_v35, %v514_v29  ;;  %v562_v47 = vmul.f32 %v1441_v33, %v554_v36  ;;  %v563_v48 = vmul.f32 %v1441_v33, %v555_v37  ;;  %v564_v52 = vmul.f32 %v1441_v33, %v556_v41  ;;  %v1457_v29 = vld [vmem:[%s1901_s29 + $0x48] sm:$0x7]  ;;  %v1459_v35 = vld [vmem:[%s1901_s29 + $0x50] sm:$0x7]  ;;  %s438_s14 = scalar_select %p437_p2, %s1697_s20, 1 }
  0x50   : > { %v548_v51 = vadd.f32 %v540_v39, %v515_v30  ;;  %v565_v53 = vmul.f32 %v1441_v33, %v557_v42  ;;  %v588_v54 = vunpack.c.l.bf16 %v1442_v38  ;;  %v589_v57 = vunpack.c.l.bf16 %v1443_v43  ;;  %v1461_v41 = vld [vmem:[%s1898_s27 + $0x8] ss:$0 sm:$0xff] }
  0x51   : > { %v570_v55 = vrot.slane %v562_v47, 2  ;;  %v571_v56 = vrot.slane %v563_v48, 2  ;;  %v590_v58 = vunpack.c.l.bf16 %v1444_v44  ;;  %v572_v60 = vrot.slane %v564_v52, 2  ;;  %s1428_s24 = sshll.u32 %s438_s14, 1 }
  0x52   : > { %v573_v61 = vrot.slane %v565_v53, 2  ;;  %v591_v62 = vunpack.c.l.bf16 %v1445_v49  ;;  %v596_v63 = vmul.f32 %v1446_v50, %v588_v54  ;;  %v597_v4 = vmul.f32 %v1446_v50, %v589_v57  ;;  %v1462_v54 = vld [vmem:[%s1901_s29 + $0x30] sm:$0x6]  ;;  %s442_s8 = sadd.s32 %s1428_s24, %s2028_s15 }
  0x53   : > { %v578_v2 = vadd.f32 %v570_v55, %v545_v40  ;;  %v579_v3 = vadd.f32 %v571_v56, %v546_v45  ;;  %v598_v5 = vmul.f32 %v1446_v50, %v590_v58  ;;  %v580_v8 = vadd.f32 %v572_v60, %v547_v46  ;;  %v1460_v40 = vld [vmem:[%s1901_s29 + $0x54] sm:$0x7]  ;;  %v1464_v60 = vld [vmem:[%s1901_s29 + $0x38] sm:$0x6]  ;;  %s443_s6 = scalar_lea.vmem %s2098_s4, %s442_s8 }
  0x54   : > { %v581_v9 = vadd.f32 %v573_v61, %v548_v51  ;;  %v599_v10 = vmul.f32 %v1446_v50, %v591_v62  ;;  %v610_v11 = vunpack.c.l.bf16 %v1447_v59  ;;  %v611_v16 = vunpack.c.l.bf16 %v1448_v0  ;;  %v1463_v55 = vld [vmem:[%s1901_s29 + $0x34] sm:$0x6]  ;;  %v1465_v61 = vld [vmem:[%s1901_s29 + $0x3c] sm:$0x6] }
  0x55   : > { %v600_v14 = vadd.f32 %v596_v63, %v578_v2  ;;  %v601_v15 = vadd.f32 %v597_v4, %v579_v3  ;;  %v612_v17 = vunpack.c.l.bf16 %v1449_v1  ;;  %v602_v20 = vadd.f32 %v598_v5, %v580_v8  ;;  %v1466_v2 = vld [vmem:[%s1898_s27 + $0x9] ss:$0 sm:$0xff] }
  0x56   : > { %v603_v21 = vadd.f32 %v599_v10, %v581_v9  ;;  %v613_v22 = vunpack.c.l.bf16 %v1450_v6  ;;  %v618_v23 = vmul.f32 %v1451_v7, %v610_v11  ;;  %v619_v25 = vmul.f32 %v1451_v7, %v611_v16 }
  0x57   : > { %v620_v26 = vmul.f32 %v1451_v7, %v612_v17  ;;  %v631_v27 = vunpack.c.l.bf16 %v1452_v12  ;;  %v632_v28 = vunpack.c.l.bf16 %v1453_v13  ;;  %v633_v32 = vunpack.c.l.bf16 %v1454_v18  ;;  %v1468_v12 = vld [vmem:[%s1901_s29 + $0x8] sm:$0x3]  ;;  %v1469_v13 = vld [vmem:[%s1901_s29 + $0xc] sm:$0x3]  ;;  %v1470_v18 = vld [vmem:[%s1901_s29 + $0x10] sm:$0x3] }
  0x58   : > { %v621_v30 = vmul.f32 %v1451_v7, %v613_v22  ;;  %v622_v31 = vadd.f32 %v618_v23, %v600_v14  ;;  %v634_v33 = vunpack.c.l.bf16 %v1455_v19  ;;  %v623_v36 = vadd.f32 %v619_v25, %v601_v15  ;;  %v1467_v7 = vld [vmem:[%s1901_s29 + $0x4] sm:$0x3]  ;;  %v1471_v19 = vld [vmem:[%s1898_s27 + $0xa] ss:$0 sm:$0xff] }
  0x59   : > { %v624_v37 = vadd.f32 %v620_v26, %v602_v20  ;;  %v639_v38 = vmul.f32 %v1456_v24, %v631_v27  ;;  %v640_v39 = vmul.f32 %v1456_v24, %v632_v28  ;;  %v641_v43 = vmul.f32 %v1456_v24, %v633_v32  ;;  %v1472_v28 = vld [vmem:[%s1901_s29 + $0x1c] sm:$0x3] }
  0x5a   : > { %v625_v42 = vadd.f32 %v621_v30, %v603_v21  ;;  %v642_v44 = vmul.f32 %v1456_v24, %v634_v33  ;;  %v664_v45 = vunpack.c.l.bf16 %v1457_v29  ;;  %v665_v48 = vunpack.c.l.bf16 %v1458_v34  ;;  %v1473_v33 = vld [vmem:[%s1901_s29 + $0x20] sm:$0x3]  ;;  %v1474_v34 = vld [vmem:[%s1901_s29 + $0x24] sm:$0x3] }
  0x5b   : > { %v647_v46 = vrot.slane %v639_v38, 1  ;;  %v648_v47 = vrot.slane %v640_v39, 1  ;;  %v666_v49 = vunpack.c.l.bf16 %v1459_v35  ;;  %v649_v50 = vrot.slane %v641_v43, 1  ;;  %v1475_v39 = vld [vmem:[%s1901_s29 + $0x28] sm:$0x3] }
  0x5c   : > { %v650_v51 = vrot.slane %v642_v44, 1  ;;  %v667_v52 = vunpack.c.l.bf16 %v1460_v40  ;;  %v672_v53 = vmul.f32 %v1461_v41, %v664_v45  ;;  %v673_v58 = vmul.f32 %v1461_v41, %v665_v48  ;;  %v1476_v40 = vld [vmem:[%s1898_s27 + $0xb] ss:$0 sm:$0xff]  ;;  %v1477_v45 = vld [vmem:[%s1901_s29 + $0x4] sm:$0x7] }
  0x5d   : > { %v655_v56 = vadd.f32 %v647_v46, %v622_v31  ;;  %v656_v57 = vadd.f32 %v648_v47, %v623_v36  ;;  %v674_v59 = vmul.f32 %v1461_v41, %v666_v49  ;;  %v657_v62 = vadd.f32 %v649_v50, %v624_v37  ;;  %v1478_v46 = vld [vmem:[%s1901_s29 + $0x8] sm:$0x7] }
  0x5e   : > { %v658_v63 = vadd.f32 %v650_v51, %v625_v42  ;;  %v675_v0 = vmul.f32 %v1461_v41, %v667_v52  ;;  %v680_v1 = vrot.slane %v672_v53, 1  ;;  %v681_v3 = vrot.slane %v673_v58, 1  ;;  %v1479_v51 = vld [vmem:[%s1901_s29 + $0xc] sm:$0x7]  ;;  %v1480_v52 = vld [vmem:[%s1901_s29 + $0x10] sm:$0x7] }
  0x5f   : > { %v682_v4 = vrot.slane %v674_v59, 1  ;;  %v697_v5 = vunpack.c.l.bf16 %v1462_v54  ;;  %v698_v6 = vunpack.c.l.bf16 %v1463_v55  ;;  %v699_v10 = vunpack.c.l.bf16 %v1464_v60 }
  0x60   : > { %v683_v8 = vrot.slane %v675_v0, 1  ;;  %v688_v9 = vadd.f32 %v680_v1, %v655_v56  ;;  %v700_v11 = vunpack.c.l.bf16 %v1465_v61  ;;  %v689_v14 = vadd.f32 %v681_v3, %v656_v57  ;;  %v1481_v57 = vld [vmem:[%s1898_s27 + $0xc] ss:$0 sm:$0xff]  ;;  %v1483_v3 = vld [vmem:[%s1901_s29 + $0x20] sm:$0x7] }
  0x61   : > { %v690_v15 = vadd.f32 %v682_v4, %v657_v62  ;;  %v705_v16 = vmul.f32 %v1466_v2, %v697_v5  ;;  %v706_v17 = vmul.f32 %v1466_v2, %v698_v6  ;;  %v707_v21 = vmul.f32 %v1466_v2, %v699_v10  ;;  %v1482_v62 = vld [vmem:[%s1901_s29 + $0x1c] sm:$0x7]  ;;  %v1484_v4 = vld [vmem:[%s1901_s29 + $0x24] sm:$0x7]  ;;  %v1486_v10 = vld [vmem:[%s1898_s27 + $0xd] ss:$0 sm:$0xff] }
  0x62   : > { %v691_v20 = vadd.f32 %v683_v8, %v658_v63  ;;  %v708_v22 = vmul.f32 %v1466_v2, %v700_v11  ;;  %v731_v23 = vunpack.c.l.bf16 %v1467_v7  ;;  %v732_v26 = vunpack.c.l.bf16 %v1468_v12 }
  0x63   : > { %v713_v24 = vrot.slane %v705_v16, 2  ;;  %v714_v25 = vrot.slane %v706_v17, 2  ;;  %v733_v27 = vunpack.c.l.bf16 %v1469_v13  ;;  %v715_v29 = vrot.slane %v707_v21, 2 }
  0x64   : > { %v716_v30 = vrot.slane %v708_v22, 2  ;;  %v734_v31 = vunpack.c.l.bf16 %v1470_v18  ;;  %v739_v32 = vmul.f32 %v1471_v19, %v731_v23  ;;  %v740_v37 = vmul.f32 %v1471_v19, %v732_v26  ;;  %v1487_v23 = vld [vmem:[%s1901_s29 + $0x4] sm:$0x6] }
  0x65   : > { %v721_v35 = vadd.f32 %v713_v24, %v688_v9  ;;  %v722_v36 = vadd.f32 %v714_v25, %v689_v14  ;;  %v741_v38 = vmul.f32 %v1471_v19, %v733_v27  ;;  %v723_v41 = vadd.f32 %v715_v29, %v690_v15  ;;  %v1485_v9 = vld [vmem:[%s1901_s29 + $0x28] sm:$0x7]  ;;  %v1489_v29 = vld [vmem:[%s1901_s29 + $0xc] sm:$0x6] }
  0x66   : > { %v724_v42 = vadd.f32 %v716_v30, %v691_v20  ;;  %v742_v43 = vmul.f32 %v1471_v19, %v734_v31  ;;  %v753_v44 = vunpack.c.l.bf16 %v1472_v28  ;;  %v754_v49 = vunpack.c.l.bf16 %v1473_v33  ;;  %v1488_v24 = vld [vmem:[%s1901_s29 + $0x8] sm:$0x6]  ;;  %v1490_v30 = vld [vmem:[%s1901_s29 + $0x10] sm:$0x6] }
  0x67   : > { %v743_v47 = vadd.f32 %v739_v32, %v721_v35  ;;  %v744_v48 = vadd.f32 %v740_v37, %v722_v36  ;;  %v755_v50 = vunpack.c.l.bf16 %v1474_v34  ;;  %v745_v53 = vadd.f32 %v741_v38, %v723_v41  ;;  %v1491_v35 = vld [vmem:[%s1898_s27 + $0xe] ss:$0 sm:$0xff] }
  0x68   : > { %v746_v54 = vadd.f32 %v742_v43, %v724_v42  ;;  %v756_v55 = vunpack.c.l.bf16 %v1475_v39  ;;  %v761_v56 = vmul.f32 %v1476_v40, %v753_v44  ;;  %v762_v58 = vmul.f32 %v1476_v40, %v754_v49 }
  0x69   : > { %v763_v59 = vmul.f32 %v1476_v40, %v755_v50  ;;  %v774_v60 = vunpack.c.l.bf16 %v1477_v45  ;;  %v775_v61 = vunpack.c.l.bf16 %v1478_v46  ;;  %v776_v1 = vunpack.c.l.bf16 %v1479_v51  ;;  %v1493_v45 = vld [vmem:[%s1901_s29 + $0x38] sm:$0x3]  ;;  %v1494_v46 = vld [vmem:[%s1901_s29 + $0x3c] sm:$0x3]  ;;  %v1495_v51 = vld [vmem:[%s1901_s29 + $0x40] sm:$0x3] }
  0x6a   : > { %v764_v63 = vmul.f32 %v1476_v40, %v756_v55  ;;  %v765_v0 = vadd.f32 %v761_v56, %v743_v47  ;;  %v777_v2 = vunpack.c.l.bf16 %v1480_v52  ;;  %v766_v5 = vadd.f32 %v762_v58, %v744_v48  ;;  %v1492_v40 = vld [vmem:[%s1901_s29 + $0x34] sm:$0x3]  ;;  %v1496_v52 = vld [vmem:[%s1898_s27 + $0xf] ss:$0 sm:$0xff] }
  0x6b   : > { %v767_v6 = vadd.f32 %v763_v59, %v745_v53  ;;  %v782_v7 = vmul.f32 %v1481_v57, %v774_v60  ;;  %v783_v8 = vmul.f32 %v1481_v57, %v775_v61  ;;  %v784_v12 = vmul.f32 %v1481_v57, %v776_v1  ;;  %v1497_v61 = vld [vmem:[%s1901_s29 + $0x4c] sm:$0x3] }
  0x6c   : > { %v768_v11 = vadd.f32 %v764_v63, %v746_v54  ;;  %v785_v13 = vmul.f32 %v1481_v57, %v777_v2  ;;  %v807_v14 = vunpack.c.l.bf16 %v1482_v62  ;;  %v808_v17 = vunpack.c.l.bf16 %v1483_v3  ;;  %v1498_v2 = vld [vmem:[%s1901_s29 + $0x50] sm:$0x3]  ;;  %v1499_v3 = vld [vmem:[%s1901_s29 + $0x54] sm:$0x3] }
  0x6d   : > { %v790_v15 = vrot.slane %v782_v7, 1  ;;  %v791_v16 = vrot.slane %v783_v8, 1  ;;  %v809_v18 = vunpack.c.l.bf16 %v1484_v4  ;;  %v792_v19 = vrot.slane %v784_v12, 1  ;;  %v1500_v8 = vld [vmem:[%s1901_s29 + $0x58] sm:$0x3] }
  0x6e   : > { %v793_v20 = vrot.slane %v785_v13, 1  ;;  %v810_v21 = vunpack.c.l.bf16 %v1485_v9  ;;  %v815_v22 = vmul.f32 %v1486_v10, %v807_v14  ;;  %v816_v27 = vmul.f32 %v1486_v10, %v808_v17  ;;  %v1501_v9 = vld [vmem:[%s1898_s27 + $0x10] ss:$0 sm:$0xff]  ;;  %v1502_v14 = vld [vmem:[%s1901_s29 + $0x34] sm:$0x7] }
  0x6f   : > { %v798_v25 = vadd.f32 %v790_v15, %v765_v0  ;;  %v799_v26 = vadd.f32 %v791_v16, %v766_v5  ;;  %v817_v28 = vmul.f32 %v1486_v10, %v809_v18  ;;  %v800_v31 = vadd.f32 %v792_v19, %v767_v6  ;;  %v1503_v15 = vld [vmem:[%s1901_s29 + $0x38] sm:$0x7] }
  0x70   : > { %v801_v32 = vadd.f32 %v793_v20, %v768_v11  ;;  %v818_v33 = vmul.f32 %v1486_v10, %v810_v21  ;;  %v823_v34 = vrot.slane %v815_v22, 1  ;;  %v824_v36 = vrot.slane %v816_v27, 1  ;;  %v1504_v20 = vld [vmem:[%s1901_s29 + $0x3c] sm:$0x7]  ;;  %v1505_v21 = vld [vmem:[%s1901_s29 + $0x40] sm:$0x7] }
  0x71   : > { %v825_v37 = vrot.slane %v817_v28, 1  ;;  %v840_v38 = vunpack.c.l.bf16 %v1487_v23  ;;  %v841_v39 = vunpack.c.l.bf16 %v1488_v24  ;;  %v842_v43 = vunpack.c.l.bf16 %v1489_v29 }
  0x72   : > { %v826_v41 = vrot.slane %v818_v33, 1  ;;  %v831_v42 = vadd.f32 %v823_v34, %v798_v25  ;;  %v843_v44 = vunpack.c.l.bf16 %v1490_v30  ;;  %v832_v47 = vadd.f32 %v824_v36, %v799_v26  ;;  %v1506_v26 = vld [vmem:[%s1898_s27 + $0x11] ss:$0 sm:$0xff] }
  0x73   : > { %v833_v48 = vadd.f32 %v825_v37, %v800_v31  ;;  %v848_v49 = vmul.f32 %v1491_v35, %v840_v38  ;;  %v849_v50 = vmul.f32 %v1491_v35, %v841_v39  ;;  %v850_v54 = vmul.f32 %v1491_v35, %v842_v43  ;;  %v1507_v31 = vld [vmem:[%s1901_s29 + $0x4c] sm:$0x7]  ;;  %v1508_v36 = vld [vmem:[%s1901_s29 + $0x50] sm:$0x7]  ;;  %v1509_v37 = vld [vmem:[%s1901_s29 + $0x54] sm:$0x7] }
  0x74   : > { %v834_v53 = vadd.f32 %v826_v41, %v801_v32  ;;  %v851_v55 = vmul.f32 %v1491_v35, %v843_v44  ;;  %v874_v56 = vunpack.c.l.bf16 %v1492_v40  ;;  %v875_v59 = vunpack.c.l.bf16 %v1493_v45  ;;  %v1511_v43 = vld [vmem:[%s1898_s27 + $0x12] ss:$0 sm:$0xff] }
  0x75   : > { %v856_v57 = vrot.slane %v848_v49, 2  ;;  %v857_v58 = vrot.slane %v849_v50, 2  ;;  %v876_v60 = vunpack.c.l.bf16 %v1494_v46  ;;  %v858_v62 = vrot.slane %v850_v54, 2 }
  0x76   : > { %v859_v63 = vrot.slane %v851_v55, 2  ;;  %v877_v0 = vunpack.c.l.bf16 %v1495_v51  ;;  %v882_v1 = vmul.f32 %v1496_v52, %v874_v56  ;;  %v883_v6 = vmul.f32 %v1496_v52, %v875_v59  ;;  %v1512_v56 = vld [vmem:[%s1901_s29 + $0x34] sm:$0x6] }
  0x77   : > { %v864_v4 = vadd.f32 %v856_v57, %v831_v42  ;;  %v865_v5 = vadd.f32 %v857_v58, %v832_v47  ;;  %v884_v7 = vmul.f32 %v1496_v52, %v876_v60  ;;  %v866_v10 = vadd.f32 %v858_v62, %v833_v48  ;;  %v1510_v42 = vld [vmem:[%s1901_s29 + $0x58] sm:$0x7]  ;;  %v1514_v62 = vld [vmem:[%s1901_s29 + $0x3c] sm:$0x6] }
  0x78   : > { %v867_v11 = vadd.f32 %v859_v63, %v834_v53  ;;  %v885_v12 = vmul.f32 %v1496_v52, %v877_v0  ;;  %v896_v13 = vunpack.c.l.bf16 %v1497_v61  ;;  %v897_v18 = vunpack.c.l.bf16 %v1498_v2  ;;  %v1513_v57 = vld [vmem:[%s1901_s29 + $0x38] sm:$0x6]  ;;  %v1515_v63 = vld [vmem:[%s1901_s29 + $0x40] sm:$0x6] }
  0x79   : > { %v886_v16 = vadd.f32 %v882_v1, %v864_v4  ;;  %v887_v17 = vadd.f32 %v883_v6, %v865_v5  ;;  %v898_v19 = vunpack.c.l.bf16 %v1499_v3  ;;  %v888_v22 = vadd.f32 %v884_v7, %v866_v10  ;;  %v1516_v4 = vld [vmem:[%s1898_s27 + $0x13] ss:$0 sm:$0xff] }
  0x7a   : > { %v889_v23 = vadd.f32 %v885_v12, %v867_v11  ;;  %v899_v24 = vunpack.c.l.bf16 %v1500_v8  ;;  %v904_v25 = vmul.f32 %v1501_v9, %v896_v13  ;;  %v905_v27 = vmul.f32 %v1501_v9, %v897_v18 }
  0x7b   : > { %v906_v28 = vmul.f32 %v1501_v9, %v898_v19  ;;  %v917_v29 = vunpack.c.l.bf16 %v1502_v14  ;;  %v918_v30 = vunpack.c.l.bf16 %v1503_v15  ;;  %v919_v34 = vunpack.c.l.bf16 %v1504_v20  ;;  %v1518_v14 = vld [vmem:[%s1901_s29 + $0xc] sm:$0x3]  ;;  %v1519_v15 = vld [vmem:[%s1901_s29 + $0x10] sm:$0x3]  ;;  %v1520_v20 = vld [vmem:[%s1901_s29 + $0x14] sm:$0x3] }
  0x7c   : > { %v907_v32 = vmul.f32 %v1501_v9, %v899_v24  ;;  %v908_v33 = vadd.f32 %v904_v25, %v886_v16  ;;  %v920_v35 = vunpack.c.l.bf16 %v1505_v21  ;;  %v909_v38 = vadd.f32 %v905_v27, %v887_v17  ;;  %v1517_v9 = vld [vmem:[%s1901_s29 + $0x8] sm:$0x3]  ;;  %v1521_v21 = vld [vmem:[%s1898_s27 + $0x14] ss:$0 sm:$0xff] }
  0x7d   : > { %v910_v39 = vadd.f32 %v906_v28, %v888_v22  ;;  %v925_v40 = vmul.f32 %v1506_v26, %v917_v29  ;;  %v926_v41 = vmul.f32 %v1506_v26, %v918_v30  ;;  %v927_v45 = vmul.f32 %v1506_v26, %v919_v34  ;;  %v1522_v30 = vld [vmem:[%s1901_s29 + $0x20] sm:$0x3] }
  0x7e   : > { %v911_v44 = vadd.f32 %v907_v32, %v889_v23  ;;  %v928_v46 = vmul.f32 %v1506_v26, %v920_v35  ;;  %v950_v47 = vunpack.c.l.bf16 %v1507_v31  ;;  %v951_v50 = vunpack.c.l.bf16 %v1508_v36  ;;  %v1523_v35 = vld [vmem:[%s1901_s29 + $0x24] sm:$0x3]  ;;  %v1524_v36 = vld [vmem:[%s1901_s29 + $0x28] sm:$0x3] }
  0x7f   : > { %v933_v48 = vrot.slane %v925_v40, 1  ;;  %v934_v49 = vrot.slane %v926_v41, 1  ;;  %v952_v51 = vunpack.c.l.bf16 %v1509_v37  ;;  %v935_v52 = vrot.slane %v927_v45, 1  ;;  %v1525_v41 = vld [vmem:[%s1901_s29 + $0x2c] sm:$0x3] }
  0x80   : > { %v936_v53 = vrot.slane %v928_v46, 1  ;;  %v953_v54 = vunpack.c.l.bf16 %v1510_v42  ;;  %v958_v55 = vmul.f32 %v1511_v43, %v950_v47  ;;  %v959_v60 = vmul.f32 %v1511_v43, %v951_v50  ;;  %v1526_v42 = vld [vmem:[%s1898_s27 + $0x15] ss:$0 sm:$0xff]  ;;  %v1527_v47 = vld [vmem:[%s1901_s29 + $0x8] sm:$0x7] }
  0x81   : > { %v941_v58 = vadd.f32 %v933_v48, %v908_v33  ;;  %v942_v59 = vadd.f32 %v934_v49, %v909_v38  ;;  %v960_v61 = vmul.f32 %v1511_v43, %v952_v51  ;;  %v943_v0 = vadd.f32 %v935_v52, %v910_v39  ;;  %v1528_v48 = vld [vmem:[%s1901_s29 + $0xc] sm:$0x7] }
  0x82   : > { %v944_v1 = vadd.f32 %v936_v53, %v911_v44  ;;  %v961_v2 = vmul.f32 %v1511_v43, %v953_v54  ;;  %v966_v3 = vrot.slane %v958_v55, 1  ;;  %v967_v5 = vrot.slane %v959_v60, 1  ;;  %v1529_v53 = vld [vmem:[%s1901_s29 + $0x10] sm:$0x7]  ;;  %v1530_v54 = vld [vmem:[%s1901_s29 + $0x14] sm:$0x7] }
  0x83   : > { %v968_v6 = vrot.slane %v960_v61, 1  ;;  %v983_v7 = vunpack.c.l.bf16 %v1512_v56  ;;  %v984_v8 = vunpack.c.l.bf16 %v1513_v57  ;;  %v985_v12 = vunpack.c.l.bf16 %v1514_v62 }
  0x84   : > { %v969_v10 = vrot.slane %v961_v2, 1  ;;  %v974_v11 = vadd.f32 %v966_v3, %v941_v58  ;;  %v986_v13 = vunpack.c.l.bf16 %v1515_v63  ;;  %v975_v16 = vadd.f32 %v967_v5, %v942_v59  ;;  %v1531_v59 = vld [vmem:[%s1898_s27 + $0x16] ss:$0 sm:$0xff]  ;;  %v1533_v5 = vld [vmem:[%s1901_s29 + $0x24] sm:$0x7] }
  0x85   : > { %v976_v17 = vadd.f32 %v968_v6, %v943_v0  ;;  %v991_v18 = vmul.f32 %v1516_v4, %v983_v7  ;;  %v992_v19 = vmul.f32 %v1516_v4, %v984_v8  ;;  %v993_v23 = vmul.f32 %v1516_v4, %v985_v12  ;;  %v1532_v0 = vld [vmem:[%s1901_s29 + $0x20] sm:$0x7]  ;;  %v1534_v6 = vld [vmem:[%s1901_s29 + $0x28] sm:$0x7]  ;;  %v1536_v12 = vld [vmem:[%s1898_s27 + $0x17] ss:$0 sm:$0xff] }
  0x86   : > { %v977_v22 = vadd.f32 %v969_v10, %v944_v1  ;;  %v994_v24 = vmul.f32 %v1516_v4, %v986_v13  ;;  %v1017_v25 = vunpack.c.l.bf16 %v1517_v9  ;;  %v1018_v28 = vunpack.c.l.bf16 %v1518_v14 }
  0x87   : > { %v999_v26 = vrot.slane %v991_v18, 2  ;;  %v1000_v27 = vrot.slane %v992_v19, 2  ;;  %v1019_v29 = vunpack.c.l.bf16 %v1519_v15  ;;  %v1001_v31 = vrot.slane %v993_v23, 2 }
  0x88   : > { %v1002_v32 = vrot.slane %v994_v24, 2  ;;  %v1020_v33 = vunpack.c.l.bf16 %v1520_v20  ;;  %v1025_v34 = vmul.f32 %v1521_v21, %v1017_v25  ;;  %v1026_v39 = vmul.f32 %v1521_v21, %v1018_v28  ;;  %v1537_v25 = vld [vmem:[%s1901_s29 + $0x8] sm:$0x6] }
  0x89   : > { %v1007_v37 = vadd.f32 %v999_v26, %v974_v11  ;;  %v1008_v38 = vadd.f32 %v1000_v27, %v975_v16  ;;  %v1027_v40 = vmul.f32 %v1521_v21, %v1019_v29  ;;  %v1009_v43 = vadd.f32 %v1001_v31, %v976_v17  ;;  %v1535_v11 = vld [vmem:[%s1901_s29 + $0x2c] sm:$0x7]  ;;  %v1539_v31 = vld [vmem:[%s1901_s29 + $0x10] sm:$0x6] }
  0x8a   : > { %v1010_v44 = vadd.f32 %v1002_v32, %v977_v22  ;;  %v1028_v45 = vmul.f32 %v1521_v21, %v1020_v33  ;;  %v1039_v46 = vunpack.c.l.bf16 %v1522_v30  ;;  %v1040_v51 = vunpack.c.l.bf16 %v1523_v35  ;;  %v1538_v26 = vld [vmem:[%s1901_s29 + $0xc] sm:$0x6]  ;;  %v1540_v32 = vld [vmem:[%s1901_s29 + $0x14] sm:$0x6] }
  0x8b   : > { %v1029_v49 = vadd.f32 %v1025_v34, %v1007_v37  ;;  %v1030_v50 = vadd.f32 %v1026_v39, %v1008_v38  ;;  %v1041_v52 = vunpack.c.l.bf16 %v1524_v36  ;;  %v1031_v55 = vadd.f32 %v1027_v40, %v1009_v43  ;;  %v1541_v37 = vld [vmem:[%s1898_s27 + $0x18] ss:$0 sm:$0xff]  ;;  %s1544_s27 = sshll.u32 (%p1817_p10), %s1697_s20, 3 }
  0x8c   : > { %v1032_v56 = vadd.f32 %v1028_v45, %v1010_v44  ;;  %v1042_v57 = vunpack.c.l.bf16 %v1525_v41  ;;  %v1047_v58 = vmul.f32 %v1526_v42, %v1039_v46  ;;  %v1048_v60 = vmul.f32 %v1526_v42, %v1040_v51  ;;  %s1229_s29 = sadd.s32 (%p1817_p10), %s1693_s19, %s1544_s27 }
  0x8d   : > { %v1049_v61 = vmul.f32 %v1526_v42, %v1041_v52  ;;  %v1060_v62 = vunpack.c.l.bf16 %v1527_v47  ;;  %v1061_v63 = vunpack.c.l.bf16 %v1528_v48  ;;  %v1062_v3 = vunpack.c.l.bf16 %v1529_v53  ;;  %s1545_s15 = sshll.u32 (%p1817_p10), %s1229_s29, 1 }
  0x8e   : > { %v1050_v1 = vmul.f32 %v1526_v42, %v1042_v57  ;;  %v1051_v2 = vadd.f32 %v1047_v58, %v1029_v49  ;;  %v1063_v4 = vunpack.c.l.bf16 %v1530_v54  ;;  %v1052_v7 = vadd.f32 %v1048_v60, %v1030_v50  ;;  %v1542_v57 = vld [vmem:[%s436_s12] ss:$0 sm:$0xff]  ;;  %s1231_s12 = scalar_lea.vmem (%p1817_p10), %s2097_s3, %s1545_s15 }
  0x8f   : > { %v1053_v8 = vadd.f32 %v1049_v61, %v1031_v55  ;;  %v1068_v9 = vmul.f32 %v1531_v59, %v1060_v62  ;;  %v1069_v10 = vmul.f32 %v1531_v59, %v1061_v63  ;;  %v1070_v14 = vmul.f32 %v1531_v59, %v1062_v3 }
  0x90   : > { %v1054_v13 = vadd.f32 %v1050_v1, %v1032_v56  ;;  %v1071_v15 = vmul.f32 %v1531_v59, %v1063_v4  ;;  %v1093_v16 = vunpack.c.l.bf16 %v1532_v0  ;;  %v1094_v19 = vunpack.c.l.bf16 %v1533_v5 }
  0x91   : > { %v1076_v17 = vrot.slane %v1068_v9, 1  ;;  %v1077_v18 = vrot.slane %v1069_v10, 1  ;;  %v1095_v20 = vunpack.c.l.bf16 %v1534_v6  ;;  %v1078_v21 = vrot.slane %v1070_v14, 1 }
  0x92   : > { %v1079_v22 = vrot.slane %v1071_v15, 1  ;;  %v1096_v23 = vunpack.c.l.bf16 %v1535_v11  ;;  %v1101_v24 = vmul.f32 %v1536_v12, %v1093_v16  ;;  %v1102_v29 = vmul.f32 %v1536_v12, %v1094_v19 }
  0x93   : > { %v1084_v27 = vadd.f32 %v1076_v17, %v1051_v2  ;;  %v1085_v28 = vadd.f32 %v1077_v18, %v1052_v7  ;;  %v1103_v30 = vmul.f32 %v1536_v12, %v1095_v20  ;;  %v1086_v33 = vadd.f32 %v1078_v21, %v1053_v8 }
  0x94   : > { %v1087_v34 = vadd.f32 %v1079_v22, %v1054_v13  ;;  %v1104_v35 = vmul.f32 %v1536_v12, %v1096_v23  ;;  %v1109_v36 = vrot.slane %v1101_v24, 1  ;;  %v1110_v38 = vrot.slane %v1102_v29, 1 }
  0x95   : > { %v1111_v39 = vrot.slane %v1103_v30, 1  ;;  %v1126_v40 = vunpack.c.l.bf16 %v1537_v25  ;;  %v1127_v41 = vunpack.c.l.bf16 %v1538_v26  ;;  %v1128_v43 = vunpack.c.l.bf16 %v1539_v31 }
  0x96   : > { %v1112_v42 = vrot.slane %v1104_v35, 1  ;;  %v1129_v44 = vunpack.c.l.bf16 %v1540_v32  ;;  %v1117_v45 = vadd.f32 %v1109_v36, %v1084_v27  ;;  %v1118_v46 = vadd.f32 %v1110_v38, %v1085_v28 }
  0x97   : > { %v1134_v47 = vmul.f32 %v1541_v37, %v1126_v40  ;;  %v1135_v48 = vmul.f32 %v1541_v37, %v1127_v41  ;;  %v1119_v49 = vadd.f32 %v1111_v39, %v1086_v33  ;;  %v1136_v51 = vmul.f32 %v1541_v37, %v1128_v43 }
  0x98   : > { %v1120_v50 = vadd.f32 %v1112_v42, %v1087_v34  ;;  %v1137_v52 = vmul.f32 %v1541_v37, %v1129_v44 }
  0x99   : > { %v1142_v53 = vrot.slane %v1134_v47, 2  ;;  %v1143_v54 = vrot.slane %v1135_v48, 2  ;;  %v1144_v55 = vrot.slane %v1136_v51, 2 }
  0x9a   : > { %v1145_v56 = vrot.slane %v1137_v52, 2 }
  0x9b   : > { %v1150_v58 = vadd.f32 %v1142_v53, %v1117_v45  ;;  %v1151_v59 = vadd.f32 %v1143_v54, %v1118_v46  ;;  %v1152_v60 = vadd.f32 %v1144_v55, %v1119_v49 }
  0x9c   : > { %v1153_v61 = vadd.f32 %v1145_v56, %v1120_v50 }
  0x9d   : > { %v1161_v62 = vadd.f32 %v1542_v57, %v1150_v58  ;;  %v1162_v63 = vadd.f32 %v1542_v57, %v1151_v59  ;;  %v1163_v0 = vadd.f32 %v1542_v57, %v1152_v60 }
  0x9e   : > { %v1164_v1 = vadd.f32 %v1542_v57, %v1153_v61 }
  0x9f   : > { %v1165_v2 = vsub.f32 0.0, %v1161_v62  ;;  %v1166_v3 = vsub.f32 0.0, %v1162_v63  ;;  %v1167_v4 = vsub.f32 0.0, %v1163_v0 }
  0xa0   : > { %v1168_v5 = vsub.f32 0.0, %v1164_v1 }
  0xa1   : > { %v1169_v6 = vmul.f32 1.442695, %v1165_v2  ;;  %v1171_v7 = vmul.f32 1.442695, %v1166_v3  ;;  %v1173_v8 = vmul.f32 1.442695, %v1167_v4 }
  0xa2   : > { %v1175_v9 = vmul.f32 1.442695, %v1168_v5 }
  0xa3   : > { %1623 = vpow2.f32 %v1169_v6 }
  0xa4   : > { %1625 = vpow2.f32 %v1171_v7 }
  0xa5   : > { %1627 = vpow2.f32 %v1173_v8 }
  0xa6   : > { %1629 = vpow2.f32 %v1175_v9 }
  0xad   : > { %v1624_v10 = vpop.eup %1623 }
  0xae   : > { %v1626_v11 = vpop.eup %1625  ;;  %v1177_v12 = vadd.f32 1.0, %v1624_v10 }
  0xaf   : > { %v1628_v13 = vpop.eup %1627  ;;  %v1178_v14 = vadd.f32 1.0, %v1626_v11 }
  0xb0   : > { %v1630_v15 = vpop.eup %1629  ;;  %v1179_v16 = vadd.f32 1.0, %v1628_v13  ;;  %1631 = vrcp.f32 %v1177_v12 }
  0xb1   : > { %v1180_v17 = vadd.f32 1.0, %v1630_v15  ;;  %1633 = vrcp.f32 %v1178_v14 }
  0xb2   : > { %1635 = vrcp.f32 %v1179_v16 }
  0xb3   : > { %1637 = vrcp.f32 %v1180_v17 }
  0xba   : > { %v1632_v18 = vpop.eup %1631 }
  0xbb   : > { %v1634_v19 = vpop.eup %1633  ;;  %v1185_v20 = vmul.f32 %v1632_v18, %v1161_v62 }
  0xbc   : > { %v1636_v21 = vpop.eup %1635  ;;  %v1186_v22 = vmul.f32 %v1634_v19, %v1162_v63 }
  0xbd   : > { %v1638_v23 = vpop.eup %1637  ;;  %v1187_v24 = vmul.f32 %v1636_v21, %v1163_v0  ;;  %v1189_v25 = vpack.c.bf16 %v1185_v20, %v1185_v20  ;;  %v1198_v26 = vsel %vm1197_vm0, %v1185_v20, 0.0 }
  0xbe   : > { %v1188_v27 = vmul.f32 %v1638_v23, %v1164_v1  ;;  %v1190_v28 = vpack.c.bf16 %v1186_v22, %v1186_v22  ;;  %v1199_v29 = vsel %vm1197_vm0, %v1186_v22, 0.0 }
  0xbf   : > { %v1191_v30 = vpack.c.bf16 %v1187_v24, %v1187_v24  ;;  %1193 = vst [vmem:[%s2041_s17] sm:$0x3] %v1189_v25  ;;  %v1200_v31 = vadd.f32 %v1199_v29, %v1198_v26  ;;  %v1201_v32 = vsel %vm1197_vm0, %v1187_v24, 0.0 }
  0xc0   : > { %v1192_v33 = vpack.c.bf16 %v1188_v27, %v1188_v27  ;;  %1194 = vst [vmem:[%s2041_s17 + $0x2] sm:$0x3] %v1190_v28  ;;  %v1203_v34 = vsel %vm1197_vm0, %v1188_v27, 0.0 }
  0xc1   : > { %1195 = vst [vmem:[%s2041_s17 + $0x4] sm:$0x3] %v1191_v30  ;;  %v1202_v35 = vadd.f32 %v1201_v32, %v1200_v31 }
  0xc2   : > { %1196 = vst [vmem:[%s2041_s17 + $0x6] sm:$0x3] %v1192_v33 }
  0xc3   : > { %v1204_v36 = vadd.f32 %v1203_v34, %v1202_v35 }
  0xc5   : > { %v1205_v37 = vsel %vm1197_vm0, %v1204_v36, 0.0 }
  0xc6   : > { %v1206_v38 = vrot.slane %v1205_v37, 4  ;;  %v1247_v45 = vld [vmem:[%s2041_s17] sm:$0x3] (%p1817_p10) }
  0xc7   : > { %v1249_v46 = vld [vmem:[%s2041_s17 + $0x2] sm:$0x3] (%p1817_p10)  ;;  %1248 = vst [vmem:[%s1231_s12] sm:$0x3] (%p1817_p10), %v1247_v45 }
  0xc8   : > { %v1207_v39 = vadd.f32 %v1206_v38, %v1205_v37  ;;  %v1251_v47 = vld [vmem:[%s2041_s17 + $0x4] sm:$0x3] (%p1817_p10)  ;;  %1250 = vst [vmem:[%s1231_s12 + $0x4] sm:$0x3] (%p1817_p10), %v1249_v46 }
  0xc9   : > { %v1253_v48 = vld [vmem:[%s2041_s17 + $0x6] sm:$0x3] (%p1817_p10)  ;;  %1252 = vst [vmem:[%s1231_s12 + $0x8] sm:$0x3] (%p1817_p10), %v1251_v47 }
  0xca   : > { %v1208_v40 = vrot.slane %v1207_v39, 2  ;;  %1254 = vst [vmem:[%s1231_s12 + $0xc] sm:$0x3] (%p1817_p10), %v1253_v48 }
  0xcc   : > { %v1209_v41 = vadd.f32 %v1208_v40, %v1207_v39 }
  0xce   : > { %v1210_v42 = vrot.slane %v1209_v41, 1  ;;  %1227 = sbr.rel (!%p1817_p10) target bundleno = 213 (0xd5), region = 115 }
  0xd0   : > { %v1211_v43 = vadd.f32 %v1210_v42, %v1209_v41 }
  0xd2   : > { %v1212_v44 = vmul.f32 0.0625, %v1211_v43 }
  0xd4   : > { %1213 = vst [vmem:[%s443_s6] sm:$0x1] %v1212_v44 }
  0xd5 PF: > { %s15_s23 = sadd.s32 1, %s1709_s23   ;;  %s2102_s15 = smov %s1681_s16 }
  0xd6   : > { %p12_p3 = scmp.ge.s32.totalorder %s15_s23, 6   ;;  %s2103_s16 = smov %s1804_s5 }
  0xd7   : > { %s2104_s17 = smov %s1689_s18  ;;  %s2105_s18 = smov %s1822_s10 }
  0xd8   : > { %s2106_s19 = smov %s1701_s21  ;;  %s2107_s20 = smov %s1705_s22 }
  0xd9   : > { %s2108_s21 = smov %s2111_s25  ;;  %s2109_s22 = smov %s2115_s26 }
  0xda   :  { %14 = sbr.rel (!%p12_p3) target bundleno = 5 (0x5), region = 219 }

</bundles_post_ra>
